<compile_context>
chip_gen: v7x
topology: tpu7x:2x2x1
jax: 0.10.0
libtpu: 0.0.40
codegen_flags: <defaults>
</compile_context>

<pallas_src>
import functools

import jax
import jax.numpy as jnp
from jax.experimental import pallas as pl
from jax.experimental.pallas import tpu as pltpu


_MATMUL_DTYPE = jnp.bfloat16     # MXU operand dtype (f32 accumulation everywhere)
_ROW_TILE = 512                  # target token rows per transformer grid step


def _cparams(grid_rank):
    return pltpu.CompilerParams(
        dimension_semantics=("parallel",) * grid_rank,
        vmem_limit_bytes=32 * 1024 * 1024,
    )


def _const_spec(shape, grid_rank):
    """BlockSpec for a whole (small) weight/bias array, constant across the grid."""
    zeros = (0,) * len(shape)
    if grid_rank == 1:
        return pl.BlockSpec(shape, lambda i: zeros)
    return pl.BlockSpec(shape, lambda i, j: zeros)


def _gelu(x):
    # NOTE: tanh-approx GELU; PyTorch nn.GELU() default is exact erf (tiny numeric delta).
    return jax.nn.gelu(x, approximate=True)


# =============================================================================
# MBConv: fused 1x1 expand + GELU -> depthwise 3x3 + GELU -> SE -> 1x1 project + residual
# =============================================================================

def _mbconv_kernel(x_ref, ew_ref, eb_ref, dw_ref, db_ref, sw1_ref, sb1_ref,
                   sw2_ref, sb2_ref, pw_ref, pb_ref, o_ref):
    x = x_ref[...]                                        # (H, W, C), f32
    H, W, C = x.shape
    hid = ew_ref.shape[1]

    # ---- 1x1 expand (eval-mode BatchNorm folded into the weights) + GELU (bf16 MXU, f32 acc)
    h = jnp.dot(x.reshape(H * W, C).astype(ew_ref.dtype), ew_ref[...],
                preferred_element_type=jnp.float32) + eb_ref[0, :]
    h = _gelu(h).reshape(H, W, hid)                       # f32

    # ---- depthwise 3x3, stride 1, zero padding: shift-and-mask
    #      (H-axis shift: 1-row concat; W-axis shift: pltpu.roll on the sublane axis + mask)
    w = dw_ref[...]                                       # (9, hid) f32
    zrow = jnp.zeros((1, W, hid), jnp.float32)
    rows = (jnp.concatenate([zrow, h[:-1]], axis=0),      # h[y-1]
            h,                                            # h[y]
            jnp.concatenate([h[1:], zrow], axis=0))       # h[y+1]
    col = jax.lax.broadcasted_iota(jnp.int32, (1, W, 1), 1)

    def wshift(a, sx):                                    # a'[.., x, :] = a[.., x+sx, :], 0 outside
        if sx == 0:
            return a
        r = pltpu.roll(a, (-sx) % W, axis=1)
        if sx > 0:
            return r * (col < W - sx).astype(jnp.float32)
        return r * (col >= -sx).astype(jnp.float32)

    acc = jnp.zeros((H, W, hid), jnp.float32)
    for dy in range(3):
        for dx in range(3):
            acc = acc + wshift(rows[dy], dx - 1) * w[dy * 3 + dx]
    acc = _gelu(acc + db_ref[0, :]).reshape(H * W, hid)

    # ---- Squeeze-Excite: global average pool -> fc -> GELU -> fc -> sigmoid -> channel scale
    pooled = jnp.mean(acc, axis=0, keepdims=True)                               # (1, hid)
    se = _gelu(jnp.dot(pooled.astype(sw1_ref.dtype), sw1_ref[...],
                       preferred_element_type=jnp.float32) + sb1_ref[0, :])
    se = jax.nn.sigmoid(jnp.dot(se.astype(sw2_ref.dtype), sw2_ref[...],
                                preferred_element_type=jnp.float32) + sb2_ref[0, :])

    # ---- 1x1 projection + residual
    y = jnp.dot((acc * se).astype(pw_ref.dtype), pw_ref[...],
                preferred_element_type=jnp.float32) + pb_ref[0, :]
    o_ref[...] = (x.astype(jnp.float32) + y.reshape(H, W, C)).astype(o_ref.dtype)


def mbconv_pallas(x_nhwc, p):
    B, H, W, C = x_nhwc.shape
    hid = p["expand_w"].shape[1]
    se_dim = p["se_w1"].shape[1]
    cs = lambda shape: _const_spec(shape, 1)
    # TODO(synk): row-strip tile H (with 1-row halo + 2-pass SE) for large H*W*hid under
    # v7x's 64 MiB VMEM; whole-image blocks are fine at the sizes used here.
    return pl.pallas_call(
        _mbconv_kernel,
        out_shape=jax.ShapeDtypeStruct((B, H, W, C), x_nhwc.dtype),
        grid=(B,),
        in_specs=[
            pl.BlockSpec((None, H, W, C), lambda b: (b, 0, 0, 0)),
            cs((C, hid)), cs((1, hid)),          # expand
            cs((9, hid)), cs((1, hid)),          # depthwise 3x3
            cs((hid, se_dim)), cs((1, se_dim)),  # SE fc1
            cs((se_dim, hid)), cs((1, hid)),     # SE fc2
            cs((hid, C)), cs((1, C)),            # project
        ],
        out_specs=pl.BlockSpec((None, H, W, C), lambda b: (b, 0, 0, 0)),
        compiler_params=_cparams(1),
    )(x_nhwc, p["expand_w"], p["expand_b"], p["dw_w"], p["dw_b"],
      p["se_w1"], p["se_b1"], p["se_w2"], p["se_b2"], p["proj_w"], p["proj_b"])


# =============================================================================
# Transformer: fused LN1 -> rel-pos MHSA -> +res -> LN2 -> MLP -> +res
# =============================================================================

def _transformer_core(xg, relb, ln1g, ln1b, wqkv, bqkv, wp, bp,
                      ln2g, ln2b, w1, b1, w2, b2, n_head):
    """xg: (nw, N, C) f32, windows-major. Returns same shape (f32)."""
    nw, N, C = xg.shape
    dh = C // n_head
    scale = dh ** -0.5
    cdt = _MATMUL_DTYPE

    # LN1 (f32)
    mu = jnp.mean(xg, axis=-1, keepdims=True)
    var = jnp.mean((xg - mu) ** 2, axis=-1, keepdims=True)
    xn = ((xg - mu) * jax.lax.rsqrt(var + 1e-5)) * ln1g + ln1b

    # fused QKV projection: one K=C, N=3C matmul (MXU-dense)
    qkv = jnp.dot(xn.reshape(nw * N, C).astype(cdt), wqkv,
                  preferred_element_type=jnp.float32) + bqkv
    qkv = qkv.reshape(nw, N, 3 * C)

    # per-head scores / softmax / PV (batched over the window dim)
    outs = []
    for h in range(n_head):
        q = qkv[:, :, h * dh:(h + 1) * dh] * scale
        k = qkv[:, :, C + h * dh:C + (h + 1) * dh]
        v = qkv[:, :, 2 * C + h * dh:2 * C + (h + 1) * dh]
        s = jnp.einsum("bnd,bmd->bnm", q.astype(cdt), k.astype(cdt),
                       preferred_element_type=jnp.float32)
        s = jax.nn.softmax(s + relb[h], axis=-1)
        outs.append(jnp.einsum("bnm,bmd->bnd", s.astype(cdt), v.astype(cdt),
                               preferred_element_type=jnp.float32))
    attn = jnp.concatenate(outs, axis=-1).reshape(nw * N, C)

    # single fused output projection (K=C) + residual
    y = jnp.dot(attn.astype(cdt), wp, preferred_element_type=jnp.float32) + bp
    x1 = xg.reshape(nw * N, C) + y

    # LN2 + MLP + residual
    mu2 = jnp.mean(x1, axis=-1, keepdims=True)
    var2 = jnp.mean((x1 - mu2) ** 2, axis=-1, keepdims=True)
    xn2 = (((x1 - mu2) * jax.lax.rsqrt(var2 + 1e-5)) * ln2g + ln2b).astype(cdt)
    hmid = jnp.dot(xn2, w1, preferred_element_type=jnp.float32) + b1
    hmid = _gelu(hmid).astype(cdt)
    y2 = jnp.dot(hmid, w2, preferred_element_type=jnp.float32) + b2
    return (x1 + y2).reshape(nw, N, C)


def _transformer_kernel(x_ref, relb_ref, ln1g_ref, ln1b_ref, wqkv_ref, bqkv_ref,
                        wp_ref, bp_ref, ln2g_ref, ln2b_ref, w1_ref, b1_ref,
                        w2_ref, b2_ref, o_ref, *, n_head):
    # x block is either (nw, wh, ww, C) [window mode, direct view] or (nw, N, C) [grid mode];
    # in both cases the leading dim indexes independent windows.
    x = x_ref[...]
    C = x.shape[-1]
    xg = x.astype(jnp.float32).reshape(x.shape[0], -1, C)
    y = _transformer_core(xg, relb_ref[...], ln1g_ref[0, :], ln1b_ref[0, :],
                          wqkv_ref[...], bqkv_ref[0, :], wp_ref[...], bp_ref[0, :],
                          ln2g_ref[0, :], ln2b_ref[0, :], w1_ref[...], b1_ref[0, :],
                          w2_ref[...], b2_ref[0, :], n_head)
    o_ref[...] = y.reshape(x.shape).astype(o_ref.dtype)


def _weight_specs(p, C, N, n_head, grid_rank):
    mlp_hid = p["mlp_w1"].shape[1]
    cs = lambda shape: _const_spec(shape, grid_rank)
    return [
        cs((n_head, N, N)),                  # precomputed rel-pos bias
        cs((1, C)), cs((1, C)),              # LN1
        cs((C, 3 * C)), cs((1, 3 * C)),      # fused QKV
        cs((C, C)), cs((1, C)),              # output proj
        cs((1, C)), cs((1, C)),              # LN2
        cs((C, mlp_hid)), cs((1, mlp_hid)),  # MLP fc1
        cs((mlp_hid, C)), cs((1, C)),        # MLP fc2
    ]


def _weight_args(p):
    return (p["rel_bias"], p["ln1_g"], p["ln1_b"], p["wqkv"], p["bqkv"], p["wp"], p["bp"],
            p["ln2_g"], p["ln2_b"], p["mlp_w1"], p["mlp_b1"], p["mlp_w2"], p["mlp_b2"])


def win_transformer_pallas(x_nhwc, p, wh, ww, n_head):
    """Window attention: partition read/written directly via BlockSpec on a 6-D view."""
    B, H, W, C = x_nhwc.shape
    assert H % wh == 0 and W % ww == 0
    Hb, Wb = H // wh, W // ww
    N = wh * ww
    x6 = x_nhwc.reshape(B, Hb, wh, Wb, ww, C)             # stride-only view
    out = pl.pallas_call(
        functools.partial(_transformer_kernel, n_head=n_head),
        out_shape=jax.ShapeDtypeStruct((B, Hb, wh, Wb, ww, C), x_nhwc.dtype),
        grid=(B, Wb),
        in_specs=[pl.BlockSpec((None, Hb, wh, None, ww, C),
                               lambda b, w: (b, 0, 0, w, 0, 0))]
                 + _weight_specs(p, C, N, n_head, 2),
        out_specs=pl.BlockSpec((None, Hb, wh, None, ww, C),
                               lambda b, w: (b, 0, 0, w, 0, 0)),
        compiler_params=_cparams(2),
    )(x6, *_weight_args(p))
    return out.reshape(B, H, W, C)


def grid_transformer_pallas(x_nhwc, p, wh, ww, n_head):
    """Grid attention on the strided partition (windows-major layout)."""
    B, H, W, C = x_nhwc.shape
    assert H % wh == 0 and W % ww == 0
    Hb, Wb = H // wh, W // ww
    N = wh * ww
    nW = B * Hb * Wb
    # TODO(synk): express the grid partition via a BlockSpec index_map (needs an in-kernel
    # cross-sublane regroup); one XLA transpose round trip remains for this mode.
    xw = x_nhwc.reshape(B, wh, Hb, ww, Wb, C).transpose(0, 2, 4, 1, 3, 5).reshape(nW, N, C)
    wb = max(1, min(_ROW_TILE // N, pl.cdiv(nW, 4)))      # >=4 grid steps when possible
    out = pl.pallas_call(
        functools.partial(_transformer_kernel, n_head=n_head),
        out_shape=jax.ShapeDtypeStruct((nW, N, C), x_nhwc.dtype),
        grid=(pl.cdiv(nW, wb),),
        in_specs=[pl.BlockSpec((wb, N, C), lambda i: (i, 0, 0))]
                 + _weight_specs(p, C, N, n_head, 1),
        out_specs=pl.BlockSpec((wb, N, C), lambda i: (i, 0, 0)),
        compiler_params=_cparams(1),
    )(xw, *_weight_args(p))
    return out.reshape(B, Hb, Wb, wh, ww, C).transpose(0, 3, 1, 4, 2, 5).reshape(B, H, W, C)


# =============================================================================
# Module glue
# =============================================================================

def compute_relative_position_index(wh, ww):
    coords = jnp.stack(jnp.meshgrid(jnp.arange(wh), jnp.arange(ww), indexing="ij"), axis=0)
    coords = coords.reshape(2, -1)                                   # (2, N)
    rel = coords[:, :, None] - coords[:, None, :]                    # (2, N, N)
    rel = rel.transpose(1, 2, 0) + jnp.array([wh - 1, ww - 1])
    return (rel[..., 0] * (2 * ww - 1) + rel[..., 1]).astype(jnp.int32)


def init_maxvit_blocks_params(key, *, emb_dim, expansion_rate, shrink_rate, n_head,
                              wh, ww, num_block):
    C = emb_dim
    hid = C * expansion_rate
    se_dim = max(1, int(hid * shrink_rate))
    mlp_hid = C * expansion_rate
    rel_index = compute_relative_position_index(wh, ww)
    wdt = _MATMUL_DTYPE

    def dense(k, shape, scale=0.02):
        return (scale * jax.random.normal(k, shape)).astype(jnp.float32)

    params = []
    for _ in range(num_block):
        key, *ks = jax.random.split(key, 48)
        ks = iter(ks)

        # --- MBConv (fold eval-mode BatchNorm, running stats 0/1, into the expand 1x1 conv) ---
        bn_gamma = 1.0 + 0.1 * jax.random.normal(next(ks), (C,))
        bn_beta = 0.1 * jax.random.normal(next(ks), (C,))
        s = bn_gamma / jnp.sqrt(1.0 + 1e-5)
        expand_w = dense(next(ks), (C, hid))
        expand_b = dense(next(ks), (hid,))
        mb = dict(
            expand_w=(s[:, None] * expand_w).astype(wdt),
            expand_b=(bn_beta @ expand_w + expand_b).astype(jnp.float32).reshape(1, hid),
            dw_w=dense(next(ks), (3, 3, hid)).reshape(9, hid),
            dw_b=dense(next(ks), (hid,)).reshape(1, hid),
            se_w1=dense(next(ks), (hid, se_dim)).astype(wdt),
            se_b1=dense(next(ks), (se_dim,)).reshape(1, se_dim),
            se_w2=dense(next(ks), (se_dim, hid)).astype(wdt),
            se_b2=dense(next(ks), (hid,)).reshape(1, hid),
            proj_w=dense(next(ks), (hid, C)).astype(wdt),
            proj_b=dense(next(ks), (C,)).reshape(1, C),
        )

        def attn_block(ks):
            qkv_w = dense(next(ks), (C, 3 * C))            # fused qkv, as in the PyTorch module
            qkv_b = dense(next(ks), (3 * C,))
            proj_w = dense(next(ks), (C, C))
            proj_b = dense(next(ks), (C,))
            rel_table = dense(next(ks), ((2 * wh - 1) * (2 * ww - 1), n_head))
            rel_bias = rel_table[rel_index].transpose(2, 0, 1)       # (nh, N, N), precomputed
            return dict(
                ln1_g=jnp.ones((1, C), jnp.float32), ln1_b=jnp.zeros((1, C), jnp.float32),
                wqkv=qkv_w.astype(wdt), bqkv=qkv_b.reshape(1, 3 * C),
                wp=proj_w.astype(wdt), bp=proj_b.reshape(1, C),
                rel_bias=rel_bias.astype(jnp.float32),
                ln2_g=jnp.ones((1, C), jnp.float32), ln2_b=jnp.zeros((1, C), jnp.float32),
                mlp_w1=dense(next(ks), (C, mlp_hid)).astype(wdt),
                mlp_b1=dense(next(ks), (mlp_hid,)).reshape(1, mlp_hid),
                mlp_w2=dense(next(ks), (mlp_hid, C)).astype(wdt),
                mlp_b2=dense(next(ks), (C,)).reshape(1, C),
            )

        params.append(dict(mbconv=mb, block_attn=attn_block(ks), grid_attn=attn_block(ks)))
    return params


def maxvit_blocks_forward(x_nchw, params, *, n_head, wh, ww, use_downsample=False):
    assert not use_downsample  # TODO(synk): downsample path not implemented
    x = jnp.transpose(x_nchw, (0, 2, 3, 1))          # NCHW -> NHWC
    for p in params:
        x = mbconv_pallas(x, p["mbconv"])
        x = win_transformer_pallas(x, p["block_attn"], wh, ww, n_head)
        x = grid_transformer_pallas(x, p["grid_attn"], wh, ww, n_head)
    return jnp.transpose(x, (0, 3, 1, 2))            # NHWC -> NCHW


# ----------------------------------------------------------------------------- demo

if __name__ == "__main__":
    B, C, H, W = 2, 16, 16, 16
    n_head, wh, ww = 2, 4, 4
    expansion_rate, shrink_rate = 2, 0.25
    num_block = 2

    key = jax.random.PRNGKey(0)
    kx, kp = jax.random.split(key)
    x = jax.random.normal(kx, (B, C, H, W), jnp.float32)

    params = init_maxvit_blocks_params(
        kp, emb_dim=C, expansion_rate=expansion_rate, shrink_rate=shrink_rate,
        n_head=n_head, wh=wh, ww=ww, num_block=num_block)

    fwd = jax.jit(functools.partial(maxvit_blocks_forward, n_head=n_head, wh=wh, ww=ww))
    y = fwd(x, params)
    jax.block_until_ready(y)

    assert y.shape == (B, C, H, W) and y.dtype == jnp.float32
    assert bool(jnp.all(jnp.isfinite(y)))
    print("KERNEL_OK")
</pallas_src>

<mosaic_0001>
module attributes {stable_mosaic.version = 11 : i64} {
  func.func @_mbconv_kernel(%arg0: i32, %arg1: memref<1x16x16x16xf32, #tpu.memory_space<vmem>>, %arg2: memref<16x32xbf16, #tpu.memory_space<vmem>>, %arg3: memref<1x32xf32, #tpu.memory_space<vmem>>, %arg4: memref<9x32xf32, #tpu.memory_space<vmem>>, %arg5: memref<1x32xf32, #tpu.memory_space<vmem>>, %arg6: memref<32x8xbf16, #tpu.memory_space<vmem>>, %arg7: memref<1x8xf32, #tpu.memory_space<vmem>>, %arg8: memref<8x32xbf16, #tpu.memory_space<vmem>>, %arg9: memref<1x32xf32, #tpu.memory_space<vmem>>, %arg10: memref<32x16xbf16, #tpu.memory_space<vmem>>, %arg11: memref<1x16xf32, #tpu.memory_space<vmem>>, %arg12: memref<1x16x16x16xf32, #tpu.memory_space<vmem>>) attributes {dimension_semantics = [#tpu.dimension_semantics<parallel>], iteration_bounds = array<i64: 2>, scalar_prefetch = 0 : i64, scratch_operands = 0 : i64, tpu.core_type = #tpu.core_type<tc>, window_params = [{transform_indices = @transform_0, window_bounds = array<i64: 1, 16, 16, 16>}, {pipeline_mode = #tpu.pipeline_mode<synchronous>, transform_indices = @transform_1, window_bounds = array<i64: 16, 32>}, {pipeline_mode = #tpu.pipeline_mode<synchronous>, transform_indices = @transform_2, window_bounds = array<i64: 1, 32>}, {pipeline_mode = #tpu.pipeline_mode<synchronous>, transform_indices = @transform_3, window_bounds = array<i64: 9, 32>}, {pipeline_mode = #tpu.pipeline_mode<synchronous>, transform_indices = @transform_4, window_bounds = array<i64: 1, 32>}, {pipeline_mode = #tpu.pipeline_mode<synchronous>, transform_indices = @transform_5, window_bounds = array<i64: 32, 8>}, {pipeline_mode = #tpu.pipeline_mode<synchronous>, transform_indices = @transform_6, window_bounds = array<i64: 1, 8>}, {pipeline_mode = #tpu.pipeline_mode<synchronous>, transform_indices = @transform_7, window_bounds = array<i64: 8, 32>}, {pipeline_mode = #tpu.pipeline_mode<synchronous>, transform_indices = @transform_8, window_bounds = array<i64: 1, 32>}, {pipeline_mode = #tpu.pipeline_mode<synchronous>, transform_indices = @transform_9, window_bounds = array<i64: 32, 16>}, {pipeline_mode = #tpu.pipeline_mode<synchronous>, transform_indices = @transform_10, window_bounds = array<i64: 1, 16>}, {transform_indices = @transform_11, window_bounds = array<i64: 1, 16, 16, 16>}]} {
    %c0 = arith.constant 0 : index
    %c0_0 = arith.constant 0 : index
    %c0_1 = arith.constant 0 : index
    %c0_2 = arith.constant 0 : index
    %0 = vector.load %arg1[%c0, %c0_0, %c0_1, %c0_2] : memref<1x16x16x16xf32, #tpu.memory_space<vmem>>, vector<1x16x16x16xf32>
    %1 = vector.shape_cast %0 : vector<1x16x16x16xf32> to vector<16x16x16xf32>
    %2 = vector.shape_cast %1 : vector<16x16x16xf32> to vector<256x16xf32>
    %3 = arith.truncf %2 : vector<256x16xf32> to vector<256x16xbf16>
    %c0_3 = arith.constant 0 : index
    %c0_4 = arith.constant 0 : index
    %4 = vector.load %arg2[%c0_3, %c0_4] : memref<16x32xbf16, #tpu.memory_space<vmem>>, vector<16x32xbf16>
    %cst = arith.constant dense<0.000000e+00> : vector<256x32xf32>
    %5 = tpu.matmul %3, %4, %cst {dimension_numbers = #tpu.dot_dimension_numbers<[1], [0], [0], [1], [0, 0, 1, 1], [], []>} : vector<256x16xbf16>, vector<16x32xbf16>, vector<256x32xf32> -> vector<256x32xf32>
    %c0_5 = arith.constant 0 : index
    %c0_6 = arith.constant 0 : index
    %6 = vector.load %arg3[%c0_5, %c0_6] : memref<1x32xf32, #tpu.memory_space<vmem>>, vector<1x32xf32>
    %7 = vector.shape_cast %6 : vector<1x32xf32> to vector<32xf32>
    %8 = vector.shape_cast %7 : vector<32xf32> to vector<1x32xf32>
    %9 = vector.broadcast %8 : vector<1x32xf32> to vector<256x32xf32>
    %10 = arith.addf %5, %9 : vector<256x32xf32>
    %11 = arith.mulf %10, %10 : vector<256x32xf32>
    %12 = arith.mulf %10, %11 : vector<256x32xf32>
    %cst_7 = arith.constant 4.471500e-02 : f32
    %13 = vector.broadcast %cst_7 : f32 to vector<256x32xf32>
    %14 = arith.mulf %13, %12 : vector<256x32xf32>
    %15 = arith.addf %10, %14 : vector<256x32xf32>
    %cst_8 = arith.constant 0.797884583 : f32
    %16 = vector.broadcast %cst_8 : f32 to vector<256x32xf32>
    %17 = arith.mulf %16, %15 : vector<256x32xf32>
    %18 = math.tanh %17 : vector<256x32xf32>
    %cst_9 = arith.constant 1.000000e+00 : f32
    %19 = vector.broadcast %cst_9 : f32 to vector<256x32xf32>
    %20 = arith.addf %19, %18 : vector<256x32xf32>
    %cst_10 = arith.constant 5.000000e-01 : f32
    %21 = vector.broadcast %cst_10 : f32 to vector<256x32xf32>
    %22 = arith.mulf %21, %20 : vector<256x32xf32>
    %23 = arith.mulf %10, %22 : vector<256x32xf32>
    %24 = vector.shape_cast %23 : vector<256x32xf32> to vector<16x16x32xf32>
    %c0_11 = arith.constant 0 : index
    %c0_12 = arith.constant 0 : index
    %25 = vector.load %arg4[%c0_11, %c0_12] : memref<9x32xf32, #tpu.memory_space<vmem>>, vector<9x32xf32>
    %cst_13 = arith.constant 0.000000e+00 : f32
    %26 = vector.broadcast %cst_13 : f32 to vector<1x16x32xf32>
    %27 = vector.extract_strided_slice %24 {offsets = [0, 0, 0], sizes = [15, 16, 32], strides = [1, 1, 1]} : vector<16x16x32xf32> to vector<15x16x32xf32>
    %28 = tpu.concatenate %26, %27 in 0 : vector<1x16x32xf32>, vector<15x16x32xf32> -> vector<16x16x32xf32>
    %29 = vector.extract_strided_slice %24 {offsets = [1, 0, 0], sizes = [15, 16, 32], strides = [1, 1, 1]} : vector<16x16x32xf32> to vector<15x16x32xf32>
    %30 = tpu.concatenate %29, %26 in 0 : vector<15x16x32xf32>, vector<1x16x32xf32> -> vector<16x16x32xf32>
    %31 = tpu.iota {dimensions = array<i32: 1>} : vector<1x16x1xi32>
    %cst_14 = arith.constant 0.000000e+00 : f32
    %32 = vector.broadcast %cst_14 : f32 to vector<16x16x32xf32>
    %c1_i32 = arith.constant 1 : i32
    %33 = tpu.dynamic_rotate %28 by %c1_i32 dim 1 : vector<16x16x32xf32>, i32 -> vector<16x16x32xf32>
    %c1_i32_15 = arith.constant 1 : i32
    %34 = vector.broadcast %c1_i32_15 : i32 to vector<1x16x1xi32>
    %35 = arith.cmpi sge, %31, %34 : vector<1x16x1xi32>
    %36 = arith.extui %35 : vector<1x16x1xi1> to vector<1x16x1xi32>
    %37 = arith.sitofp %36 : vector<1x16x1xi32> to vector<1x16x1xf32>
    %38 = vector.broadcast %37 : vector<1x16x1xf32> to vector<16x16x32xf32>
    %39 = arith.mulf %33, %38 : vector<16x16x32xf32>
    %40 = vector.extract_strided_slice %25 {offsets = [0, 0], sizes = [1, 32], strides = [1, 1]} : vector<9x32xf32> to vector<1x32xf32>
    %41 = vector.shape_cast %40 : vector<1x32xf32> to vector<32xf32>
    %42 = vector.shape_cast %41 : vector<32xf32> to vector<1x1x32xf32>
    %43 = vector.broadcast %42 : vector<1x1x32xf32> to vector<16x16x32xf32>
    %44 = arith.mulf %39, %43 : vector<16x16x32xf32>
    %45 = arith.addf %32, %44 : vector<16x16x32xf32>
    %46 = vector.extract_strided_slice %25 {offsets = [1, 0], sizes = [1, 32], strides = [1, 1]} : vector<9x32xf32> to vector<1x32xf32>
    %47 = vector.shape_cast %46 : vector<1x32xf32> to vector<32xf32>
    %48 = vector.shape_cast %47 : vector<32xf32> to vector<1x1x32xf32>
    %49 = vector.broadcast %48 : vector<1x1x32xf32> to vector<16x16x32xf32>
    %50 = arith.mulf %28, %49 : vector<16x16x32xf32>
    %51 = arith.addf %45, %50 : vector<16x16x32xf32>
    %c15_i32 = arith.constant 15 : i32
    %52 = tpu.dynamic_rotate %28 by %c15_i32 dim 1 : vector<16x16x32xf32>, i32 -> vector<16x16x32xf32>
    %c15_i32_16 = arith.constant 15 : i32
    %53 = vector.broadcast %c15_i32_16 : i32 to vector<1x16x1xi32>
    %54 = arith.cmpi slt, %31, %53 : vector<1x16x1xi32>
    %55 = arith.extui %54 : vector<1x16x1xi1> to vector<1x16x1xi32>
    %56 = arith.sitofp %55 : vector<1x16x1xi32> to vector<1x16x1xf32>
    %57 = vector.broadcast %56 : vector<1x16x1xf32> to vector<16x16x32xf32>
    %58 = arith.mulf %52, %57 : vector<16x16x32xf32>
    %59 = vector.extract_strided_slice %25 {offsets = [2, 0], sizes = [1, 32], strides = [1, 1]} : vector<9x32xf32> to vector<1x32xf32>
    %60 = vector.shape_cast %59 : vector<1x32xf32> to vector<32xf32>
    %61 = vector.shape_cast %60 : vector<32xf32> to vector<1x1x32xf32>
    %62 = vector.broadcast %61 : vector<1x1x32xf32> to vector<16x16x32xf32>
    %63 = arith.mulf %58, %62 : vector<16x16x32xf32>
    %64 = arith.addf %51, %63 : vector<16x16x32xf32>
    %c1_i32_17 = arith.constant 1 : i32
    %65 = tpu.dynamic_rotate %24 by %c1_i32_17 dim 1 : vector<16x16x32xf32>, i32 -> vector<16x16x32xf32>
    %c1_i32_18 = arith.constant 1 : i32
    %66 = vector.broadcast %c1_i32_18 : i32 to vector<1x16x1xi32>
    %67 = arith.cmpi sge, %31, %66 : vector<1x16x1xi32>
    %68 = arith.extui %67 : vector<1x16x1xi1> to vector<1x16x1xi32>
    %69 = arith.sitofp %68 : vector<1x16x1xi32> to vector<1x16x1xf32>
    %70 = vector.broadcast %69 : vector<1x16x1xf32> to vector<16x16x32xf32>
    %71 = arith.mulf %65, %70 : vector<16x16x32xf32>
    %72 = vector.extract_strided_slice %25 {offsets = [3, 0], sizes = [1, 32], strides = [1, 1]} : vector<9x32xf32> to vector<1x32xf32>
    %73 = vector.shape_cast %72 : vector<1x32xf32> to vector<32xf32>
    %74 = vector.shape_cast %73 : vector<32xf32> to vector<1x1x32xf32>
    %75 = vector.broadcast %74 : vector<1x1x32xf32> to vector<16x16x32xf32>
    %76 = arith.mulf %71, %75 : vector<16x16x32xf32>
    %77 = arith.addf %64, %76 : vector<16x16x32xf32>
    %78 = vector.extract_strided_slice %25 {offsets = [4, 0], sizes = [1, 32], strides = [1, 1]} : vector<9x32xf32> to vector<1x32xf32>
    %79 = vector.shape_cast %78 : vector<1x32xf32> to vector<32xf32>
    %80 = vector.shape_cast %79 : vector<32xf32> to vector<1x1x32xf32>
    %81 = vector.broadcast %80 : vector<1x1x32xf32> to vector<16x16x32xf32>
    %82 = arith.mulf %24, %81 : vector<16x16x32xf32>
    %83 = arith.addf %77, %82 : vector<16x16x32xf32>
    %c15_i32_19 = arith.constant 15 : i32
    %84 = tpu.dynamic_rotate %24 by %c15_i32_19 dim 1 : vector<16x16x32xf32>, i32 -> vector<16x16x32xf32>
    %c15_i32_20 = arith.constant 15 : i32
    %85 = vector.broadcast %c15_i32_20 : i32 to vector<1x16x1xi32>
    %86 = arith.cmpi slt, %31, %85 : vector<1x16x1xi32>
    %87 = arith.extui %86 : vector<1x16x1xi1> to vector<1x16x1xi32>
    %88 = arith.sitofp %87 : vector<1x16x1xi32> to vector<1x16x1xf32>
    %89 = vector.broadcast %88 : vector<1x16x1xf32> to vector<16x16x32xf32>
    %90 = arith.mulf %84, %89 : vector<16x16x32xf32>
    %91 = vector.extract_strided_slice %25 {offsets = [5, 0], sizes = [1, 32], strides = [1, 1]} : vector<9x32xf32> to vector<1x32xf32>
    %92 = vector.shape_cast %91 : vector<1x32xf32> to vector<32xf32>
    %93 = vector.shape_cast %92 : vector<32xf32> to vector<1x1x32xf32>
    %94 = vector.broadcast %93 : vector<1x1x32xf32> to vector<16x16x32xf32>
    %95 = arith.mulf %90, %94 : vector<16x16x32xf32>
    %96 = arith.addf %83, %95 : vector<16x16x32xf32>
    %c1_i32_21 = arith.constant 1 : i32
    %97 = tpu.dynamic_rotate %30 by %c1_i32_21 dim 1 : vector<16x16x32xf32>, i32 -> vector<16x16x32xf32>
    %c1_i32_22 = arith.constant 1 : i32
    %98 = vector.broadcast %c1_i32_22 : i32 to vector<1x16x1xi32>
    %99 = arith.cmpi sge, %31, %98 : vector<1x16x1xi32>
    %100 = arith.extui %99 : vector<1x16x1xi1> to vector<1x16x1xi32>
    %101 = arith.sitofp %100 : vector<1x16x1xi32> to vector<1x16x1xf32>
    %102 = vector.broadcast %101 : vector<1x16x1xf32> to vector<16x16x32xf32>
    %103 = arith.mulf %97, %102 : vector<16x16x32xf32>
    %104 = vector.extract_strided_slice %25 {offsets = [6, 0], sizes = [1, 32], strides = [1, 1]} : vector<9x32xf32> to vector<1x32xf32>
    %105 = vector.shape_cast %104 : vector<1x32xf32> to vector<32xf32>
    %106 = vector.shape_cast %105 : vector<32xf32> to vector<1x1x32xf32>
    %107 = vector.broadcast %106 : vector<1x1x32xf32> to vector<16x16x32xf32>
    %108 = arith.mulf %103, %107 : vector<16x16x32xf32>
    %109 = arith.addf %96, %108 : vector<16x16x32xf32>
    %110 = vector.extract_strided_slice %25 {offsets = [7, 0], sizes = [1, 32], strides = [1, 1]} : vector<9x32xf32> to vector<1x32xf32>
    %111 = vector.shape_cast %110 : vector<1x32xf32> to vector<32xf32>
    %112 = vector.shape_cast %111 : vector<32xf32> to vector<1x1x32xf32>
    %113 = vector.broadcast %112 : vector<1x1x32xf32> to vector<16x16x32xf32>
    %114 = arith.mulf %30, %113 : vector<16x16x32xf32>
    %115 = arith.addf %109, %114 : vector<16x16x32xf32>
    %c15_i32_23 = arith.constant 15 : i32
    %116 = tpu.dynamic_rotate %30 by %c15_i32_23 dim 1 : vector<16x16x32xf32>, i32 -> vector<16x16x32xf32>
    %c15_i32_24 = arith.constant 15 : i32
    %117 = vector.broadcast %c15_i32_24 : i32 to vector<1x16x1xi32>
    %118 = arith.cmpi slt, %31, %117 : vector<1x16x1xi32>
    %119 = arith.extui %118 : vector<1x16x1xi1> to vector<1x16x1xi32>
    %120 = arith.sitofp %119 : vector<1x16x1xi32> to vector<1x16x1xf32>
    %121 = vector.broadcast %120 : vector<1x16x1xf32> to vector<16x16x32xf32>
    %122 = arith.mulf %116, %121 : vector<16x16x32xf32>
    %123 = vector.extract_strided_slice %25 {offsets = [8, 0], sizes = [1, 32], strides = [1, 1]} : vector<9x32xf32> to vector<1x32xf32>
    %124 = vector.shape_cast %123 : vector<1x32xf32> to vector<32xf32>
    %125 = vector.shape_cast %124 : vector<32xf32> to vector<1x1x32xf32>
    %126 = vector.broadcast %125 : vector<1x1x32xf32> to vector<16x16x32xf32>
    %127 = arith.mulf %122, %126 : vector<16x16x32xf32>
    %128 = arith.addf %115, %127 : vector<16x16x32xf32>
    %c0_25 = arith.constant 0 : index
    %c0_26 = arith.constant 0 : index
    %129 = vector.load %arg5[%c0_25, %c0_26] : memref<1x32xf32, #tpu.memory_space<vmem>>, vector<1x32xf32>
    %130 = vector.shape_cast %129 : vector<1x32xf32> to vector<32xf32>
    %131 = vector.shape_cast %130 : vector<32xf32> to vector<1x1x32xf32>
    %132 = vector.broadcast %131 : vector<1x1x32xf32> to vector<16x16x32xf32>
    %133 = arith.addf %128, %132 : vector<16x16x32xf32>
    %134 = arith.mulf %133, %133 : vector<16x16x32xf32>
    %135 = arith.mulf %133, %134 : vector<16x16x32xf32>
    %cst_27 = arith.constant 4.471500e-02 : f32
    %136 = vector.broadcast %cst_27 : f32 to vector<16x16x32xf32>
    %137 = arith.mulf %136, %135 : vector<16x16x32xf32>
    %138 = arith.addf %133, %137 : vector<16x16x32xf32>
    %cst_28 = arith.constant 0.797884583 : f32
    %139 = vector.broadcast %cst_28 : f32 to vector<16x16x32xf32>
    %140 = arith.mulf %139, %138 : vector<16x16x32xf32>
    %141 = math.tanh %140 : vector<16x16x32xf32>
    %cst_29 = arith.constant 1.000000e+00 : f32
    %142 = vector.broadcast %cst_29 : f32 to vector<16x16x32xf32>
    %143 = arith.addf %142, %141 : vector<16x16x32xf32>
    %cst_30 = arith.constant 5.000000e-01 : f32
    %144 = vector.broadcast %cst_30 : f32 to vector<16x16x32xf32>
    %145 = arith.mulf %144, %143 : vector<16x16x32xf32>
    %146 = arith.mulf %133, %145 : vector<16x16x32xf32>
    %147 = vector.shape_cast %146 : vector<16x16x32xf32> to vector<256x32xf32>
    %cst_31 = arith.constant dense<0.000000e+00> : vector<32xf32>
    %148 = vector.multi_reduction <add>, %147, %cst_31 [0] : vector<256x32xf32> to vector<32xf32>
    %149 = vector.shape_cast %148 : vector<32xf32> to vector<1x32xf32>
    %cst_32 = arith.constant 2.560000e+02 : f32
    %150 = vector.broadcast %cst_32 : f32 to vector<1x32xf32>
    %151 = arith.divf %149, %150 : vector<1x32xf32>
    %152 = arith.truncf %151 : vector<1x32xf32> to vector<1x32xbf16>
    %c0_33 = arith.constant 0 : index
    %c0_34 = arith.constant 0 : index
    %153 = vector.load %arg6[%c0_33, %c0_34] : memref<32x8xbf16, #tpu.memory_space<vmem>>, vector<32x8xbf16>
    %cst_35 = arith.constant dense<0.000000e+00> : vector<1x8xf32>
    %154 = tpu.matmul %152, %153, %cst_35 {dimension_numbers = #tpu.dot_dimension_numbers<[1], [0], [0], [1], [0, 0, 1, 1], [], []>} : vector<1x32xbf16>, vector<32x8xbf16>, vector<1x8xf32> -> vector<1x8xf32>
    %c0_36 = arith.constant 0 : index
    %c0_37 = arith.constant 0 : index
    %155 = vector.load %arg7[%c0_36, %c0_37] : memref<1x8xf32, #tpu.memory_space<vmem>>, vector<1x8xf32>
    %156 = vector.shape_cast %155 : vector<1x8xf32> to vector<8xf32>
    %157 = vector.shape_cast %156 : vector<8xf32> to vector<1x8xf32>
    %158 = arith.addf %154, %157 : vector<1x8xf32>
    %159 = arith.mulf %158, %158 : vector<1x8xf32>
    %160 = arith.mulf %158, %159 : vector<1x8xf32>
    %cst_38 = arith.constant 4.471500e-02 : f32
    %161 = vector.broadcast %cst_38 : f32 to vector<1x8xf32>
    %162 = arith.mulf %161, %160 : vector<1x8xf32>
    %163 = arith.addf %158, %162 : vector<1x8xf32>
    %cst_39 = arith.constant 0.797884583 : f32
    %164 = vector.broadcast %cst_39 : f32 to vector<1x8xf32>
    %165 = arith.mulf %164, %163 : vector<1x8xf32>
    %166 = math.tanh %165 : vector<1x8xf32>
    %cst_40 = arith.constant 1.000000e+00 : f32
    %167 = vector.broadcast %cst_40 : f32 to vector<1x8xf32>
    %168 = arith.addf %167, %166 : vector<1x8xf32>
    %cst_41 = arith.constant 5.000000e-01 : f32
    %169 = vector.broadcast %cst_41 : f32 to vector<1x8xf32>
    %170 = arith.mulf %169, %168 : vector<1x8xf32>
    %171 = arith.mulf %158, %170 : vector<1x8xf32>
    %172 = arith.truncf %171 : vector<1x8xf32> to vector<1x8xbf16>
    %c0_42 = arith.constant 0 : index
    %c0_43 = arith.constant 0 : index
    %173 = vector.load %arg8[%c0_42, %c0_43] : memref<8x32xbf16, #tpu.memory_space<vmem>>, vector<8x32xbf16>
    %cst_44 = arith.constant dense<0.000000e+00> : vector<1x32xf32>
    %174 = tpu.matmul %172, %173, %cst_44 {dimension_numbers = #tpu.dot_dimension_numbers<[1], [0], [0], [1], [0, 0, 1, 1], [], []>} : vector<1x8xbf16>, vector<8x32xbf16>, vector<1x32xf32> -> vector<1x32xf32>
    %c0_45 = arith.constant 0 : index
    %c0_46 = arith.constant 0 : index
    %175 = vector.load %arg9[%c0_45, %c0_46] : memref<1x32xf32, #tpu.memory_space<vmem>>, vector<1x32xf32>
    %176 = vector.shape_cast %175 : vector<1x32xf32> to vector<32xf32>
    %177 = vector.shape_cast %176 : vector<32xf32> to vector<1x32xf32>
    %178 = arith.addf %174, %177 : vector<1x32xf32>
    %179 = arith.negf %178 : vector<1x32xf32>
    %180 = math.exp %179 : vector<1x32xf32>
    %cst_47 = arith.constant 1.000000e+00 : f32
    %181 = vector.broadcast %cst_47 : f32 to vector<1x32xf32>
    %182 = arith.addf %181, %180 : vector<1x32xf32>
    %183 = arith.divf %181, %182 : vector<1x32xf32>
    %184 = vector.broadcast %183 : vector<1x32xf32> to vector<256x32xf32>
    %185 = arith.mulf %147, %184 : vector<256x32xf32>
    %186 = arith.truncf %185 : vector<256x32xf32> to vector<256x32xbf16>
    %c0_48 = arith.constant 0 : index
    %c0_49 = arith.constant 0 : index
    %187 = vector.load %arg10[%c0_48, %c0_49] : memref<32x16xbf16, #tpu.memory_space<vmem>>, vector<32x16xbf16>
    %cst_50 = arith.constant dense<0.000000e+00> : vector<256x16xf32>
    %188 = tpu.matmul %186, %187, %cst_50 {dimension_numbers = #tpu.dot_dimension_numbers<[1], [0], [0], [1], [0, 0, 1, 1], [], []>} : vector<256x32xbf16>, vector<32x16xbf16>, vector<256x16xf32> -> vector<256x16xf32>
    %c0_51 = arith.constant 0 : index
    %c0_52 = arith.constant 0 : index
    %189 = vector.load %arg11[%c0_51, %c0_52] : memref<1x16xf32, #tpu.memory_space<vmem>>, vector<1x16xf32>
    %190 = vector.shape_cast %189 : vector<1x16xf32> to vector<16xf32>
    %191 = vector.shape_cast %190 : vector<16xf32> to vector<1x16xf32>
    %192 = vector.broadcast %191 : vector<1x16xf32> to vector<256x16xf32>
    %193 = arith.addf %188, %192 : vector<256x16xf32>
    %194 = vector.shape_cast %193 : vector<256x16xf32> to vector<16x16x16xf32>
    %195 = arith.addf %1, %194 : vector<16x16x16xf32>
    %c0_53 = arith.constant 0 : index
    %c0_54 = arith.constant 0 : index
    %c0_55 = arith.constant 0 : index
    %c0_56 = arith.constant 0 : index
    %196 = vector.load %arg12[%c0_53, %c0_54, %c0_55, %c0_56] : memref<1x16x16x16xf32, #tpu.memory_space<vmem>>, vector<1x16x16x16xf32>
    %197 = vector.shape_cast %196 : vector<1x16x16x16xf32> to vector<16x16x16xf32>
    %198 = vector.shape_cast %195 : vector<16x16x16xf32> to vector<1x16x16x16xf32>
    tpu.vector_store %arg12[%c0_53, %c0_54, %c0_55, %c0_56], %198 {strides = array<i32>} : memref<1x16x16x16xf32, #tpu.memory_space<vmem>>, vector<1x16x16x16xf32>,
    return
  }
  func.func @transform_0(%arg0: i32) -> (i32, i32, i32, i32) {
    %c0_i32 = arith.constant 0 : i32
    %c0_i32_0 = arith.constant 0 : i32
    %c0_i32_1 = arith.constant 0 : i32
    %c0_i32_2 = arith.constant 0 : i32
    return %arg0, %c0_i32, %c0_i32_0, %c0_i32_1 : i32, i32, i32, i32
  }
  func.func @transform_1(%arg0: i32) -> (i32, i32) {
    %c0_i32 = arith.constant 0 : i32
    %c0_i32_0 = arith.constant 0 : i32
    %c0_i32_1 = arith.constant 0 : i32
    return %c0_i32, %c0_i32_0 : i32, i32
  }
  func.func @transform_2(%arg0: i32) -> (i32, i32) {
    %c0_i32 = arith.constant 0 : i32
    %c0_i32_0 = arith.constant 0 : i32
    %c0_i32_1 = arith.constant 0 : i32
    return %c0_i32, %c0_i32_0 : i32, i32
  }
  func.func @transform_3(%arg0: i32) -> (i32, i32) {
    %c0_i32 = arith.constant 0 : i32
    %c0_i32_0 = arith.constant 0 : i32
    %c0_i32_1 = arith.constant 0 : i32
    return %c0_i32, %c0_i32_0 : i32, i32
  }
  func.func @transform_4(%arg0: i32) -> (i32, i32) {
    %c0_i32 = arith.constant 0 : i32
    %c0_i32_0 = arith.constant 0 : i32
    %c0_i32_1 = arith.constant 0 : i32
    return %c0_i32, %c0_i32_0 : i32, i32
  }
  func.func @transform_5(%arg0: i32) -> (i32, i32) {
    %c0_i32 = arith.constant 0 : i32
    %c0_i32_0 = arith.constant 0 : i32
    %c0_i32_1 = arith.constant 0 : i32
    return %c0_i32, %c0_i32_0 : i32, i32
  }
  func.func @transform_6(%arg0: i32) -> (i32, i32) {
    %c0_i32 = arith.constant 0 : i32
    %c0_i32_0 = arith.constant 0 : i32
    %c0_i32_1 = arith.constant 0 : i32
    return %c0_i32, %c0_i32_0 : i32, i32
  }
  func.func @transform_7(%arg0: i32) -> (i32, i32) {
    %c0_i32 = arith.constant 0 : i32
    %c0_i32_0 = arith.constant 0 : i32
    %c0_i32_1 = arith.constant 0 : i32
    return %c0_i32, %c0_i32_0 : i32, i32
  }
  func.func @transform_8(%arg0: i32) -> (i32, i32) {
    %c0_i32 = arith.constant 0 : i32
    %c0_i32_0 = arith.constant 0 : i32
    %c0_i32_1 = arith.constant 0 : i32
    return %c0_i32, %c0_i32_0 : i32, i32
  }
  func.func @transform_9(%arg0: i32) -> (i32, i32) {
    %c0_i32 = arith.constant 0 : i32
    %c0_i32_0 = arith.constant 0 : i32
    %c0_i32_1 = arith.constant 0 : i32
    return %c0_i32, %c0_i32_0 : i32, i32
  }
  func.func @transform_10(%arg0: i32) -> (i32, i32) {
    %c0_i32 = arith.constant 0 : i32
    %c0_i32_0 = arith.constant 0 : i32
    %c0_i32_1 = arith.constant 0 : i32
    return %c0_i32, %c0_i32_0 : i32, i32
  }
  func.func @transform_11(%arg0: i32) -> (i32, i32, i32, i32) {
    %c0_i32 = arith.constant 0 : i32
    %c0_i32_0 = arith.constant 0 : i32
    %c0_i32_1 = arith.constant 0 : i32
    %c0_i32_2 = arith.constant 0 : i32
    return %arg0, %c0_i32, %c0_i32_0, %c0_i32_1 : i32, i32, i32, i32
  }
}

module attributes {stable_mosaic.version = 11 : i64} {
  func.func @_transformer_kernel(%arg0: i32, %arg1: i32, %arg2: memref<1x4x4x1x4x16xf32, #tpu.memory_space<vmem>>, %arg3: memref<2x16x16xf32, #tpu.memory_space<vmem>>, %arg4: memref<1x16xf32, #tpu.memory_space<vmem>>, %arg5: memref<1x16xf32, #tpu.memory_space<vmem>>, %arg6: memref<16x48xbf16, #tpu.memory_space<vmem>>, %arg7: memref<1x48xf32, #tpu.memory_space<vmem>>, %arg8: memref<16x16xbf16, #tpu.memory_space<vmem>>, %arg9: memref<1x16xf32, #tpu.memory_space<vmem>>, %arg10: memref<1x16xf32, #tpu.memory_space<vmem>>, %arg11: memref<1x16xf32, #tpu.memory_space<vmem>>, %arg12: memref<16x32xbf16, #tpu.memory_space<vmem>>, %arg13: memref<1x32xf32, #tpu.memory_space<vmem>>, %arg14: memref<32x16xbf16, #tpu.memory_space<vmem>>, %arg15: memref<1x16xf32, #tpu.memory_space<vmem>>, %arg16: memref<1x4x4x1x4x16xf32, #tpu.memory_space<vmem>>) attributes {dimension_semantics = [#tpu.dimension_semantics<parallel>, #tpu.dimension_semantics<parallel>], iteration_bounds = array<i64: 2, 4>, scalar_prefetch = 0 : i64, scratch_operands = 0 : i64, tpu.core_type = #tpu.core_type<tc>, window_params = [{transform_indices = @transform_0, window_bounds = array<i64: 1, 4, 4, 1, 4, 16>}, {pipeline_mode = #tpu.pipeline_mode<synchronous>, transform_indices = @transform_1, window_bounds = array<i64: 2, 16, 16>}, {pipeline_mode = #tpu.pipeline_mode<synchronous>, transform_indices = @transform_2, window_bounds = array<i64: 1, 16>}, {pipeline_mode = #tpu.pipeline_mode<synchronous>, transform_indices = @transform_3, window_bounds = array<i64: 1, 16>}, {pipeline_mode = #tpu.pipeline_mode<synchronous>, transform_indices = @transform_4, window_bounds = array<i64: 16, 48>}, {pipeline_mode = #tpu.pipeline_mode<synchronous>, transform_indices = @transform_5, window_bounds = array<i64: 1, 48>}, {pipeline_mode = #tpu.pipeline_mode<synchronous>, transform_indices = @transform_6, window_bounds = array<i64: 16, 16>}, {pipeline_mode = #tpu.pipeline_mode<synchronous>, transform_indices = @transform_7, window_bounds = array<i64: 1, 16>}, {pipeline_mode = #tpu.pipeline_mode<synchronous>, transform_indices = @transform_8, window_bounds = array<i64: 1, 16>}, {pipeline_mode = #tpu.pipeline_mode<synchronous>, transform_indices = @transform_9, window_bounds = array<i64: 1, 16>}, {pipeline_mode = #tpu.pipeline_mode<synchronous>, transform_indices = @transform_10, window_bounds = array<i64: 16, 32>}, {pipeline_mode = #tpu.pipeline_mode<synchronous>, transform_indices = @transform_11, window_bounds = array<i64: 1, 32>}, {pipeline_mode = #tpu.pipeline_mode<synchronous>, transform_indices = @transform_12, window_bounds = array<i64: 32, 16>}, {pipeline_mode = #tpu.pipeline_mode<synchronous>, transform_indices = @transform_13, window_bounds = array<i64: 1, 16>}, {transform_indices = @transform_14, window_bounds = array<i64: 1, 4, 4, 1, 4, 16>}]} {
    %c0 = arith.constant 0 : index
    %c0_0 = arith.constant 0 : index
    %c0_1 = arith.constant 0 : index
    %c0_2 = arith.constant 0 : index
    %c0_3 = arith.constant 0 : index
    %c0_4 = arith.constant 0 : index
    %0 = vector.load %arg2[%c0, %c0_0, %c0_1, %c0_2, %c0_3, %c0_4] : memref<1x4x4x1x4x16xf32, #tpu.memory_space<vmem>>, vector<1x4x4x1x4x16xf32>
    %1 = vector.shape_cast %0 : vector<1x4x4x1x4x16xf32> to vector<4x4x4x16xf32>
    %2 = vector.shape_cast %1 : vector<4x4x4x16xf32> to vector<4x16x16xf32>
    %c0_5 = arith.constant 0 : index
    %c0_6 = arith.constant 0 : index
    %c0_7 = arith.constant 0 : index
    %3 = vector.load %arg3[%c0_5, %c0_6, %c0_7] : memref<2x16x16xf32, #tpu.memory_space<vmem>>, vector<2x16x16xf32>
    %c0_8 = arith.constant 0 : index
    %c0_9 = arith.constant 0 : index
    %4 = vector.load %arg4[%c0_8, %c0_9] : memref<1x16xf32, #tpu.memory_space<vmem>>, vector<1x16xf32>
    %5 = vector.shape_cast %4 : vector<1x16xf32> to vector<16xf32>
    %c0_10 = arith.constant 0 : index
    %c0_11 = arith.constant 0 : index
    %6 = vector.load %arg5[%c0_10, %c0_11] : memref<1x16xf32, #tpu.memory_space<vmem>>, vector<1x16xf32>
    %7 = vector.shape_cast %6 : vector<1x16xf32> to vector<16xf32>
    %c0_12 = arith.constant 0 : index
    %c0_13 = arith.constant 0 : index
    %8 = vector.load %arg6[%c0_12, %c0_13] : memref<16x48xbf16, #tpu.memory_space<vmem>>, vector<16x48xbf16>
    %c0_14 = arith.constant 0 : index
    %c0_15 = arith.constant 0 : index
    %9 = vector.load %arg7[%c0_14, %c0_15] : memref<1x48xf32, #tpu.memory_space<vmem>>, vector<1x48xf32>
    %10 = vector.shape_cast %9 : vector<1x48xf32> to vector<48xf32>
    %c0_16 = arith.constant 0 : index
    %c0_17 = arith.constant 0 : index
    %11 = vector.load %arg8[%c0_16, %c0_17] : memref<16x16xbf16, #tpu.memory_space<vmem>>, vector<16x16xbf16>
    %c0_18 = arith.constant 0 : index
    %c0_19 = arith.constant 0 : index
    %12 = vector.load %arg9[%c0_18, %c0_19] : memref<1x16xf32, #tpu.memory_space<vmem>>, vector<1x16xf32>
    %13 = vector.shape_cast %12 : vector<1x16xf32> to vector<16xf32>
    %c0_20 = arith.constant 0 : index
    %c0_21 = arith.constant 0 : index
    %14 = vector.load %arg10[%c0_20, %c0_21] : memref<1x16xf32, #tpu.memory_space<vmem>>, vector<1x16xf32>
    %15 = vector.shape_cast %14 : vector<1x16xf32> to vector<16xf32>
    %c0_22 = arith.constant 0 : index
    %c0_23 = arith.constant 0 : index
    %16 = vector.load %arg11[%c0_22, %c0_23] : memref<1x16xf32, #tpu.memory_space<vmem>>, vector<1x16xf32>
    %17 = vector.shape_cast %16 : vector<1x16xf32> to vector<16xf32>
    %c0_24 = arith.constant 0 : index
    %c0_25 = arith.constant 0 : index
    %18 = vector.load %arg12[%c0_24, %c0_25] : memref<16x32xbf16, #tpu.memory_space<vmem>>, vector<16x32xbf16>
    %c0_26 = arith.constant 0 : index
    %c0_27 = arith.constant 0 : index
    %19 = vector.load %arg13[%c0_26, %c0_27] : memref<1x32xf32, #tpu.memory_space<vmem>>, vector<1x32xf32>
    %20 = vector.shape_cast %19 : vector<1x32xf32> to vector<32xf32>
    %c0_28 = arith.constant 0 : index
    %c0_29 = arith.constant 0 : index
    %21 = vector.load %arg14[%c0_28, %c0_29] : memref<32x16xbf16, #tpu.memory_space<vmem>>, vector<32x16xbf16>
    %c0_30 = arith.constant 0 : index
    %c0_31 = arith.constant 0 : index
    %22 = vector.load %arg15[%c0_30, %c0_31] : memref<1x16xf32, #tpu.memory_space<vmem>>, vector<1x16xf32>
    %23 = vector.shape_cast %22 : vector<1x16xf32> to vector<16xf32>
    %cst = arith.constant dense<0.000000e+00> : vector<4x16xf32>
    %24 = vector.multi_reduction <add>, %2, %cst [2] : vector<4x16x16xf32> to vector<4x16xf32>
    %25 = vector.shape_cast %24 : vector<4x16xf32> to vector<4x16x1xf32>
    %cst_32 = arith.constant 1.600000e+01 : f32
    %26 = vector.broadcast %cst_32 : f32 to vector<4x16x1xf32>
    %27 = arith.divf %25, %26 : vector<4x16x1xf32>
    %28 = vector.broadcast %27 : vector<4x16x1xf32> to vector<4x16x16xf32>
    %29 = arith.subf %2, %28 : vector<4x16x16xf32>
    %30 = arith.mulf %29, %29 : vector<4x16x16xf32>
    %cst_33 = arith.constant dense<0.000000e+00> : vector<4x16xf32>
    %31 = vector.multi_reduction <add>, %30, %cst_33 [2] : vector<4x16x16xf32> to vector<4x16xf32>
    %32 = vector.shape_cast %31 : vector<4x16xf32> to vector<4x16x1xf32>
    %cst_34 = arith.constant 1.600000e+01 : f32
    %33 = vector.broadcast %cst_34 : f32 to vector<4x16x1xf32>
    %34 = arith.divf %32, %33 : vector<4x16x1xf32>
    %35 = vector.broadcast %27 : vector<4x16x1xf32> to vector<4x16x16xf32>
    %36 = arith.subf %2, %35 : vector<4x16x16xf32>
    %cst_35 = arith.constant 9.99999974E-6 : f32
    %37 = vector.broadcast %cst_35 : f32 to vector<4x16x1xf32>
    %38 = arith.addf %34, %37 : vector<4x16x1xf32>
    %39 = math.rsqrt %38 : vector<4x16x1xf32>
    %40 = vector.broadcast %39 : vector<4x16x1xf32> to vector<4x16x16xf32>
    %41 = arith.mulf %36, %40 : vector<4x16x16xf32>
    %42 = vector.shape_cast %5 : vector<16xf32> to vector<1x1x16xf32>
    %43 = vector.broadcast %42 : vector<1x1x16xf32> to vector<4x16x16xf32>
    %44 = arith.mulf %41, %43 : vector<4x16x16xf32>
    %45 = vector.shape_cast %7 : vector<16xf32> to vector<1x1x16xf32>
    %46 = vector.broadcast %45 : vector<1x1x16xf32> to vector<4x16x16xf32>
    %47 = arith.addf %44, %46 : vector<4x16x16xf32>
    %48 = vector.shape_cast %47 : vector<4x16x16xf32> to vector<64x16xf32>
    %49 = arith.truncf %48 : vector<64x16xf32> to vector<64x16xbf16>
    %cst_36 = arith.constant dense<0.000000e+00> : vector<64x48xf32>
    %50 = tpu.matmul %49, %8, %cst_36 {dimension_numbers = #tpu.dot_dimension_numbers<[1], [0], [0], [1], [0, 0, 1, 1], [], []>} : vector<64x16xbf16>, vector<16x48xbf16>, vector<64x48xf32> -> vector<64x48xf32>
    %51 = vector.shape_cast %10 : vector<48xf32> to vector<1x48xf32>
    %52 = vector.broadcast %51 : vector<1x48xf32> to vector<64x48xf32>
    %53 = arith.addf %50, %52 : vector<64x48xf32>
    %54 = vector.shape_cast %53 : vector<64x48xf32> to vector<4x16x48xf32>
    %55 = vector.extract_strided_slice %54 {offsets = [0, 0, 0], sizes = [4, 16, 8], strides = [1, 1, 1]} : vector<4x16x48xf32> to vector<4x16x8xf32>
    %cst_37 = arith.constant 0.353553385 : f32
    %56 = vector.broadcast %cst_37 : f32 to vector<4x16x8xf32>
    %57 = arith.mulf %55, %56 : vector<4x16x8xf32>
    %58 = vector.extract_strided_slice %54 {offsets = [0, 0, 16], sizes = [4, 16, 8], strides = [1, 1, 1]} : vector<4x16x48xf32> to vector<4x16x8xf32>
    %59 = vector.extract_strided_slice %54 {offsets = [0, 0, 32], sizes = [4, 16, 8], strides = [1, 1, 1]} : vector<4x16x48xf32> to vector<4x16x8xf32>
    %60 = arith.truncf %57 : vector<4x16x8xf32> to vector<4x16x8xbf16>
    %61 = arith.truncf %58 : vector<4x16x8xf32> to vector<4x16x8xbf16>
    "tpu.trace_start"() <{level = 10 : i32, message = "bnd,bmd->bnm"}> : () -> ()
    %cst_38 = arith.constant dense<0.000000e+00> : vector<4x16x16xf32>
    %62 = tpu.matmul %60, %61, %cst_38 {dimension_numbers = #tpu.dot_dimension_numbers<[2], [2], [1], [1], [0, 0, 0, 1, 1, 1], [0], [0]>} : vector<4x16x8xbf16>, vector<4x16x8xbf16>, vector<4x16x16xf32> -> vector<4x16x16xf32>
    "tpu.trace_stop"() : () -> ()
    %63 = vector.extract_strided_slice %3 {offsets = [0, 0, 0], sizes = [1, 16, 16], strides = [1, 1, 1]} : vector<2x16x16xf32> to vector<1x16x16xf32>
    %64 = vector.shape_cast %63 : vector<1x16x16xf32> to vector<16x16xf32>
    %65 = vector.shape_cast %64 : vector<16x16xf32> to vector<1x16x16xf32>
    %66 = vector.broadcast %65 : vector<1x16x16xf32> to vector<4x16x16xf32>
    %67 = arith.addf %62, %66 : vector<4x16x16xf32>
    %cst_39 = arith.constant dense<0xFF800000> : vector<4x16xf32>
    %68 = vector.multi_reduction <maximumf>, %67, %cst_39 [2] : vector<4x16x16xf32> to vector<4x16xf32>
    %cst_40 = arith.constant 0xFF800000 : f32
    %69 = vector.broadcast %cst_40 : f32 to vector<4x16xf32>
    %70 = arith.maximumf %69, %68 : vector<4x16xf32>
    %71 = vector.shape_cast %70 : vector<4x16xf32> to vector<4x16x1xf32>
    %72 = vector.broadcast %71 : vector<4x16x1xf32> to vector<4x16x16xf32>
    %73 = arith.subf %67, %72 : vector<4x16x16xf32>
    %74 = math.exp %73 : vector<4x16x16xf32>
    %cst_41 = arith.constant dense<0.000000e+00> : vector<4x16xf32>
    %75 = vector.multi_reduction <add>, %74, %cst_41 [2] : vector<4x16x16xf32> to vector<4x16xf32>
    %76 = vector.shape_cast %75 : vector<4x16xf32> to vector<4x16x1xf32>
    %77 = vector.broadcast %76 : vector<4x16x1xf32> to vector<4x16x16xf32>
    %78 = arith.divf %74, %77 : vector<4x16x16xf32>
    %79 = arith.truncf %78 : vector<4x16x16xf32> to vector<4x16x16xbf16>
    %80 = arith.truncf %59 : vector<4x16x8xf32> to vector<4x16x8xbf16>
    "tpu.trace_start"() <{level = 10 : i32, message = "bnm,bmd->bnd"}> : () -> ()
    %cst_42 = arith.constant dense<0.000000e+00> : vector<4x16x8xf32>
    %81 = tpu.matmul %79, %80, %cst_42 {dimension_numbers = #tpu.dot_dimension_numbers<[2], [1], [1], [2], [0, 0, 0, 1, 1, 2], [0], [0]>} : vector<4x16x16xbf16>, vector<4x16x8xbf16>, vector<4x16x8xf32> -> vector<4x16x8xf32>
    "tpu.trace_stop"() : () -> ()
    %82 = vector.extract_strided_slice %54 {offsets = [0, 0, 8], sizes = [4, 16, 8], strides = [1, 1, 1]} : vector<4x16x48xf32> to vector<4x16x8xf32>
    %cst_43 = arith.constant 0.353553385 : f32
    %83 = vector.broadcast %cst_43 : f32 to vector<4x16x8xf32>
    %84 = arith.mulf %82, %83 : vector<4x16x8xf32>
    %85 = vector.extract_strided_slice %54 {offsets = [0, 0, 24], sizes = [4, 16, 8], strides = [1, 1, 1]} : vector<4x16x48xf32> to vector<4x16x8xf32>
    %86 = vector.extract_strided_slice %54 {offsets = [0, 0, 40], sizes = [4, 16, 8], strides = [1, 1, 1]} : vector<4x16x48xf32> to vector<4x16x8xf32>
    %87 = arith.truncf %84 : vector<4x16x8xf32> to vector<4x16x8xbf16>
    %88 = arith.truncf %85 : vector<4x16x8xf32> to vector<4x16x8xbf16>
    "tpu.trace_start"() <{level = 10 : i32, message = "bnd,bmd->bnm"}> : () -> ()
    %cst_44 = arith.constant dense<0.000000e+00> : vector<4x16x16xf32>
    %89 = tpu.matmul %87, %88, %cst_44 {dimension_numbers = #tpu.dot_dimension_numbers<[2], [2], [1], [1], [0, 0, 0, 1, 1, 1], [0], [0]>} : vector<4x16x8xbf16>, vector<4x16x8xbf16>, vector<4x16x16xf32> -> vector<4x16x16xf32>
    "tpu.trace_stop"() : () -> ()
    %90 = vector.extract_strided_slice %3 {offsets = [1, 0, 0], sizes = [1, 16, 16], strides = [1, 1, 1]} : vector<2x16x16xf32> to vector<1x16x16xf32>
    %91 = vector.shape_cast %90 : vector<1x16x16xf32> to vector<16x16xf32>
    %92 = vector.shape_cast %91 : vector<16x16xf32> to vector<1x16x16xf32>
    %93 = vector.broadcast %92 : vector<1x16x16xf32> to vector<4x16x16xf32>
    %94 = arith.addf %89, %93 : vector<4x16x16xf32>
    %cst_45 = arith.constant dense<0xFF800000> : vector<4x16xf32>
    %95 = vector.multi_reduction <maximumf>, %94, %cst_45 [2] : vector<4x16x16xf32> to vector<4x16xf32>
    %cst_46 = arith.constant 0xFF800000 : f32
    %96 = vector.broadcast %cst_46 : f32 to vector<4x16xf32>
    %97 = arith.maximumf %96, %95 : vector<4x16xf32>
    %98 = vector.shape_cast %97 : vector<4x16xf32> to vector<4x16x1xf32>
    %99 = vector.broadcast %98 : vector<4x16x1xf32> to vector<4x16x16xf32>
    %100 = arith.subf %94, %99 : vector<4x16x16xf32>
    %101 = math.exp %100 : vector<4x16x16xf32>
    %cst_47 = arith.constant dense<0.000000e+00> : vector<4x16xf32>
    %102 = vector.multi_reduction <add>, %101, %cst_47 [2] : vector<4x16x16xf32> to vector<4x16xf32>
    %103 = vector.shape_cast %102 : vector<4x16xf32> to vector<4x16x1xf32>
    %104 = vector.broadcast %103 : vector<4x16x1xf32> to vector<4x16x16xf32>
    %105 = arith.divf %101, %104 : vector<4x16x16xf32>
    %106 = arith.truncf %105 : vector<4x16x16xf32> to vector<4x16x16xbf16>
    %107 = arith.truncf %86 : vector<4x16x8xf32> to vector<4x16x8xbf16>
    "tpu.trace_start"() <{level = 10 : i32, message = "bnm,bmd->bnd"}> : () -> ()
    %cst_48 = arith.constant dense<0.000000e+00> : vector<4x16x8xf32>
    %108 = tpu.matmul %106, %107, %cst_48 {dimension_numbers = #tpu.dot_dimension_numbers<[2], [1], [1], [2], [0, 0, 0, 1, 1, 2], [0], [0]>} : vector<4x16x16xbf16>, vector<4x16x8xbf16>, vector<4x16x8xf32> -> vector<4x16x8xf32>
    "tpu.trace_stop"() : () -> ()
    %109 = tpu.concatenate %81, %108 in 2 : vector<4x16x8xf32>, vector<4x16x8xf32> -> vector<4x16x16xf32>
    %110 = vector.shape_cast %109 : vector<4x16x16xf32> to vector<64x16xf32>
    %111 = arith.truncf %110 : vector<64x16xf32> to vector<64x16xbf16>
    %cst_49 = arith.constant dense<0.000000e+00> : vector<64x16xf32>
    %112 = tpu.matmul %111, %11, %cst_49 {dimension_numbers = #tpu.dot_dimension_numbers<[1], [0], [0], [1], [0, 0, 1, 1], [], []>} : vector<64x16xbf16>, vector<16x16xbf16>, vector<64x16xf32> -> vector<64x16xf32>
    %113 = vector.shape_cast %13 : vector<16xf32> to vector<1x16xf32>
    %114 = vector.broadcast %113 : vector<1x16xf32> to vector<64x16xf32>
    %115 = arith.addf %112, %114 : vector<64x16xf32>
    %116 = vector.shape_cast %2 : vector<4x16x16xf32> to vector<64x16xf32>
    %117 = arith.addf %116, %115 : vector<64x16xf32>
    %cst_50 = arith.constant dense<0.000000e+00> : vector<64xf32>
    %118 = vector.multi_reduction <add>, %117, %cst_50 [1] : vector<64x16xf32> to vector<64xf32>
    %119 = vector.shape_cast %118 : vector<64xf32> to vector<64x1xf32>
    %cst_51 = arith.constant 1.600000e+01 : f32
    %120 = vector.broadcast %cst_51 : f32 to vector<64x1xf32>
    %121 = arith.divf %119, %120 : vector<64x1xf32>
    %122 = vector.broadcast %121 : vector<64x1xf32> to vector<64x16xf32>
    %123 = arith.subf %117, %122 : vector<64x16xf32>
    %124 = arith.mulf %123, %123 : vector<64x16xf32>
    %cst_52 = arith.constant dense<0.000000e+00> : vector<64xf32>
    %125 = vector.multi_reduction <add>, %124, %cst_52 [1] : vector<64x16xf32> to vector<64xf32>
    %126 = vector.shape_cast %125 : vector<64xf32> to vector<64x1xf32>
    %cst_53 = arith.constant 1.600000e+01 : f32
    %127 = vector.broadcast %cst_53 : f32 to vector<64x1xf32>
    %128 = arith.divf %126, %127 : vector<64x1xf32>
    %129 = vector.broadcast %121 : vector<64x1xf32> to vector<64x16xf32>
    %130 = arith.subf %117, %129 : vector<64x16xf32>
    %cst_54 = arith.constant 9.99999974E-6 : f32
    %131 = vector.broadcast %cst_54 : f32 to vector<64x1xf32>
    %132 = arith.addf %128, %131 : vector<64x1xf32>
    %133 = math.rsqrt %132 : vector<64x1xf32>
    %134 = vector.broadcast %133 : vector<64x1xf32> to vector<64x16xf32>
    %135 = arith.mulf %130, %134 : vector<64x16xf32>
    %136 = vector.shape_cast %15 : vector<16xf32> to vector<1x16xf32>
    %137 = vector.broadcast %136 : vector<1x16xf32> to vector<64x16xf32>
    %138 = arith.mulf %135, %137 : vector<64x16xf32>
    %139 = vector.shape_cast %17 : vector<16xf32> to vector<1x16xf32>
    %140 = vector.broadcast %139 : vector<1x16xf32> to vector<64x16xf32>
    %141 = arith.addf %138, %140 : vector<64x16xf32>
    %142 = arith.truncf %141 : vector<64x16xf32> to vector<64x16xbf16>
    %cst_55 = arith.constant dense<0.000000e+00> : vector<64x32xf32>
    %143 = tpu.matmul %142, %18, %cst_55 {dimension_numbers = #tpu.dot_dimension_numbers<[1], [0], [0], [1], [0, 0, 1, 1], [], []>} : vector<64x16xbf16>, vector<16x32xbf16>, vector<64x32xf32> -> vector<64x32xf32>
    %144 = vector.shape_cast %20 : vector<32xf32> to vector<1x32xf32>
    %145 = vector.broadcast %144 : vector<1x32xf32> to vector<64x32xf32>
    %146 = arith.addf %143, %145 : vector<64x32xf32>
    %147 = arith.mulf %146, %146 : vector<64x32xf32>
    %148 = arith.mulf %146, %147 : vector<64x32xf32>
    %cst_56 = arith.constant 4.471500e-02 : f32
    %149 = vector.broadcast %cst_56 : f32 to vector<64x32xf32>
    %150 = arith.mulf %149, %148 : vector<64x32xf32>
    %151 = arith.addf %146, %150 : vector<64x32xf32>
    %cst_57 = arith.constant 0.797884583 : f32
    %152 = vector.broadcast %cst_57 : f32 to vector<64x32xf32>
    %153 = arith.mulf %152, %151 : vector<64x32xf32>
    %154 = math.tanh %153 : vector<64x32xf32>
    %cst_58 = arith.constant 1.000000e+00 : f32
    %155 = vector.broadcast %cst_58 : f32 to vector<64x32xf32>
    %156 = arith.addf %155, %154 : vector<64x32xf32>
    %cst_59 = arith.constant 5.000000e-01 : f32
    %157 = vector.broadcast %cst_59 : f32 to vector<64x32xf32>
    %158 = arith.mulf %157, %156 : vector<64x32xf32>
    %159 = arith.mulf %146, %158 : vector<64x32xf32>
    %160 = arith.truncf %159 : vector<64x32xf32> to vector<64x32xbf16>
    %cst_60 = arith.constant dense<0.000000e+00> : vector<64x16xf32>
    %161 = tpu.matmul %160, %21, %cst_60 {dimension_numbers = #tpu.dot_dimension_numbers<[1], [0], [0], [1], [0, 0, 1, 1], [], []>} : vector<64x32xbf16>, vector<32x16xbf16>, vector<64x16xf32> -> vector<64x16xf32>
    %162 = vector.shape_cast %23 : vector<16xf32> to vector<1x16xf32>
    %163 = vector.broadcast %162 : vector<1x16xf32> to vector<64x16xf32>
    %164 = arith.addf %161, %163 : vector<64x16xf32>
    %165 = arith.addf %117, %164 : vector<64x16xf32>
    %166 = vector.shape_cast %165 : vector<64x16xf32> to vector<4x16x16xf32>
    %167 = vector.shape_cast %166 : vector<4x16x16xf32> to vector<4x4x4x16xf32>
    %c0_61 = arith.constant 0 : index
    %c0_62 = arith.constant 0 : index
    %c0_63 = arith.constant 0 : index
    %c0_64 = arith.constant 0 : index
    %c0_65 = arith.constant 0 : index
    %c0_66 = arith.constant 0 : index
    %168 = vector.load %arg16[%c0_61, %c0_62, %c0_63, %c0_64, %c0_65, %c0_66] : memref<1x4x4x1x4x16xf32, #tpu.memory_space<vmem>>, vector<1x4x4x1x4x16xf32>
    %169 = vector.shape_cast %168 : vector<1x4x4x1x4x16xf32> to vector<4x4x4x16xf32>
    %170 = vector.shape_cast %167 : vector<4x4x4x16xf32> to vector<1x4x4x1x4x16xf32>
    tpu.vector_store %arg16[%c0_61, %c0_62, %c0_63, %c0_64, %c0_65, %c0_66], %170 {strides = array<i32>} : memref<1x4x4x1x4x16xf32, #tpu.memory_space<vmem>>, vector<1x4x4x1x4x16xf32>,
    return
  }
  func.func @transform_0(%arg0: i32, %arg1: i32) -> (i32, i32, i32, i32, i32, i32) {
    %c0_i32 = arith.constant 0 : i32
    %c0_i32_0 = arith.constant 0 : i32
    %c0_i32_1 = arith.constant 0 : i32
    %c0_i32_2 = arith.constant 0 : i32
    %c0_i32_3 = arith.constant 0 : i32
    return %arg0, %c0_i32, %c0_i32_0, %arg1, %c0_i32_1, %c0_i32_2 : i32, i32, i32, i32, i32, i32
  }
  func.func @transform_1(%arg0: i32, %arg1: i32) -> (i32, i32, i32) {
    %c0_i32 = arith.constant 0 : i32
    %c0_i32_0 = arith.constant 0 : i32
    %c0_i32_1 = arith.constant 0 : i32
    %c0_i32_2 = arith.constant 0 : i32
    return %c0_i32, %c0_i32_0, %c0_i32_1 : i32, i32, i32
  }
  func.func @transform_2(%arg0: i32, %arg1: i32) -> (i32, i32) {
    %c0_i32 = arith.constant 0 : i32
    %c0_i32_0 = arith.constant 0 : i32
    %c0_i32_1 = arith.constant 0 : i32
    return %c0_i32, %c0_i32_0 : i32, i32
  }
  func.func @transform_3(%arg0: i32, %arg1: i32) -> (i32, i32) {
    %c0_i32 = arith.constant 0 : i32
    %c0_i32_0 = arith.constant 0 : i32
    %c0_i32_1 = arith.constant 0 : i32
    return %c0_i32, %c0_i32_0 : i32, i32
  }
  func.func @transform_4(%arg0: i32, %arg1: i32) -> (i32, i32) {
    %c0_i32 = arith.constant 0 : i32
    %c0_i32_0 = arith.constant 0 : i32
    %c0_i32_1 = arith.constant 0 : i32
    return %c0_i32, %c0_i32_0 : i32, i32
  }
  func.func @transform_5(%arg0: i32, %arg1: i32) -> (i32, i32) {
    %c0_i32 = arith.constant 0 : i32
    %c0_i32_0 = arith.constant 0 : i32
    %c0_i32_1 = arith.constant 0 : i32
    return %c0_i32, %c0_i32_0 : i32, i32
  }
  func.func @transform_6(%arg0: i32, %arg1: i32) -> (i32, i32) {
    %c0_i32 = arith.constant 0 : i32
    %c0_i32_0 = arith.constant 0 : i32
    %c0_i32_1 = arith.constant 0 : i32
    return %c0_i32, %c0_i32_0 : i32, i32
  }
  func.func @transform_7(%arg0: i32, %arg1: i32) -> (i32, i32) {
    %c0_i32 = arith.constant 0 : i32
    %c0_i32_0 = arith.constant 0 : i32
    %c0_i32_1 = arith.constant 0 : i32
    return %c0_i32, %c0_i32_0 : i32, i32
  }
  func.func @transform_8(%arg0: i32, %arg1: i32) -> (i32, i32) {
    %c0_i32 = arith.constant 0 : i32
    %c0_i32_0 = arith.constant 0 : i32
    %c0_i32_1 = arith.constant 0 : i32
    return %c0_i32, %c0_i32_0 : i32, i32
  }
  func.func @transform_9(%arg0: i32, %arg1: i32) -> (i32, i32) {
    %c0_i32 = arith.constant 0 : i32
    %c0_i32_0 = arith.constant 0 : i32
    %c0_i32_1 = arith.constant 0 : i32
    return %c0_i32, %c0_i32_0 : i32, i32
  }
  func.func @transform_10(%arg0: i32, %arg1: i32) -> (i32, i32) {
    %c0_i32 = arith.constant 0 : i32
    %c0_i32_0 = arith.constant 0 : i32
    %c0_i32_1 = arith.constant 0 : i32
    return %c0_i32, %c0_i32_0 : i32, i32
  }
  func.func @transform_11(%arg0: i32, %arg1: i32) -> (i32, i32) {
    %c0_i32 = arith.constant 0 : i32
    %c0_i32_0 = arith.constant 0 : i32
    %c0_i32_1 = arith.constant 0 : i32
    return %c0_i32, %c0_i32_0 : i32, i32
  }
  func.func @transform_12(%arg0: i32, %arg1: i32) -> (i32, i32) {
    %c0_i32 = arith.constant 0 : i32
    %c0_i32_0 = arith.constant 0 : i32
    %c0_i32_1 = arith.constant 0 : i32
    return %c0_i32, %c0_i32_0 : i32, i32
  }
  func.func @transform_13(%arg0: i32, %arg1: i32) -> (i32, i32) {
    %c0_i32 = arith.constant 0 : i32
    %c0_i32_0 = arith.constant 0 : i32
    %c0_i32_1 = arith.constant 0 : i32
    return %c0_i32, %c0_i32_0 : i32, i32
  }
  func.func @transform_14(%arg0: i32, %arg1: i32) -> (i32, i32, i32, i32, i32, i32) {
    %c0_i32 = arith.constant 0 : i32
    %c0_i32_0 = arith.constant 0 : i32
    %c0_i32_1 = arith.constant 0 : i32
    %c0_i32_2 = arith.constant 0 : i32
    %c0_i32_3 = arith.constant 0 : i32
    return %arg0, %c0_i32, %c0_i32_0, %arg1, %c0_i32_1, %c0_i32_2 : i32, i32, i32, i32, i32, i32
  }
}

module attributes {stable_mosaic.version = 11 : i64} {
  func.func @_transformer_kernel(%arg0: i32, %arg1: memref<8x16x16xf32, #tpu.memory_space<vmem>>, %arg2: memref<2x16x16xf32, #tpu.memory_space<vmem>>, %arg3: memref<1x16xf32, #tpu.memory_space<vmem>>, %arg4: memref<1x16xf32, #tpu.memory_space<vmem>>, %arg5: memref<16x48xbf16, #tpu.memory_space<vmem>>, %arg6: memref<1x48xf32, #tpu.memory_space<vmem>>, %arg7: memref<16x16xbf16, #tpu.memory_space<vmem>>, %arg8: memref<1x16xf32, #tpu.memory_space<vmem>>, %arg9: memref<1x16xf32, #tpu.memory_space<vmem>>, %arg10: memref<1x16xf32, #tpu.memory_space<vmem>>, %arg11: memref<16x32xbf16, #tpu.memory_space<vmem>>, %arg12: memref<1x32xf32, #tpu.memory_space<vmem>>, %arg13: memref<32x16xbf16, #tpu.memory_space<vmem>>, %arg14: memref<1x16xf32, #tpu.memory_space<vmem>>, %arg15: memref<8x16x16xf32, #tpu.memory_space<vmem>>) attributes {dimension_semantics = [#tpu.dimension_semantics<parallel>], iteration_bounds = array<i64: 4>, scalar_prefetch = 0 : i64, scratch_operands = 0 : i64, tpu.core_type = #tpu.core_type<tc>, window_params = [{transform_indices = @transform_0, window_bounds = array<i64: 8, 16, 16>}, {pipeline_mode = #tpu.pipeline_mode<synchronous>, transform_indices = @transform_1, window_bounds = array<i64: 2, 16, 16>}, {pipeline_mode = #tpu.pipeline_mode<synchronous>, transform_indices = @transform_2, window_bounds = array<i64: 1, 16>}, {pipeline_mode = #tpu.pipeline_mode<synchronous>, transform_indices = @transform_3, window_bounds = array<i64: 1, 16>}, {pipeline_mode = #tpu.pipeline_mode<synchronous>, transform_indices = @transform_4, window_bounds = array<i64: 16, 48>}, {pipeline_mode = #tpu.pipeline_mode<synchronous>, transform_indices = @transform_5, window_bounds = array<i64: 1, 48>}, {pipeline_mode = #tpu.pipeline_mode<synchronous>, transform_indices = @transform_6, window_bounds = array<i64: 16, 16>}, {pipeline_mode = #tpu.pipeline_mode<synchronous>, transform_indices = @transform_7, window_bounds = array<i64: 1, 16>}, {pipeline_mode = #tpu.pipeline_mode<synchronous>, transform_indices = @transform_8, window_bounds = array<i64: 1, 16>}, {pipeline_mode = #tpu.pipeline_mode<synchronous>, transform_indices = @transform_9, window_bounds = array<i64: 1, 16>}, {pipeline_mode = #tpu.pipeline_mode<synchronous>, transform_indices = @transform_10, window_bounds = array<i64: 16, 32>}, {pipeline_mode = #tpu.pipeline_mode<synchronous>, transform_indices = @transform_11, window_bounds = array<i64: 1, 32>}, {pipeline_mode = #tpu.pipeline_mode<synchronous>, transform_indices = @transform_12, window_bounds = array<i64: 32, 16>}, {pipeline_mode = #tpu.pipeline_mode<synchronous>, transform_indices = @transform_13, window_bounds = array<i64: 1, 16>}, {transform_indices = @transform_14, window_bounds = array<i64: 8, 16, 16>}]} {
    %c0 = arith.constant 0 : index
    %c0_0 = arith.constant 0 : index
    %c0_1 = arith.constant 0 : index
    %0 = vector.load %arg1[%c0, %c0_0, %c0_1] : memref<8x16x16xf32, #tpu.memory_space<vmem>>, vector<8x16x16xf32>
    %c0_2 = arith.constant 0 : index
    %c0_3 = arith.constant 0 : index
    %c0_4 = arith.constant 0 : index
    %1 = vector.load %arg2[%c0_2, %c0_3, %c0_4] : memref<2x16x16xf32, #tpu.memory_space<vmem>>, vector<2x16x16xf32>
    %c0_5 = arith.constant 0 : index
    %c0_6 = arith.constant 0 : index
    %2 = vector.load %arg3[%c0_5, %c0_6] : memref<1x16xf32, #tpu.memory_space<vmem>>, vector<1x16xf32>
    %3 = vector.shape_cast %2 : vector<1x16xf32> to vector<16xf32>
    %c0_7 = arith.constant 0 : index
    %c0_8 = arith.constant 0 : index
    %4 = vector.load %arg4[%c0_7, %c0_8] : memref<1x16xf32, #tpu.memory_space<vmem>>, vector<1x16xf32>
    %5 = vector.shape_cast %4 : vector<1x16xf32> to vector<16xf32>
    %c0_9 = arith.constant 0 : index
    %c0_10 = arith.constant 0 : index
    %6 = vector.load %arg5[%c0_9, %c0_10] : memref<16x48xbf16, #tpu.memory_space<vmem>>, vector<16x48xbf16>
    %c0_11 = arith.constant 0 : index
    %c0_12 = arith.constant 0 : index
    %7 = vector.load %arg6[%c0_11, %c0_12] : memref<1x48xf32, #tpu.memory_space<vmem>>, vector<1x48xf32>
    %8 = vector.shape_cast %7 : vector<1x48xf32> to vector<48xf32>
    %c0_13 = arith.constant 0 : index
    %c0_14 = arith.constant 0 : index
    %9 = vector.load %arg7[%c0_13, %c0_14] : memref<16x16xbf16, #tpu.memory_space<vmem>>, vector<16x16xbf16>
    %c0_15 = arith.constant 0 : index
    %c0_16 = arith.constant 0 : index
    %10 = vector.load %arg8[%c0_15, %c0_16] : memref<1x16xf32, #tpu.memory_space<vmem>>, vector<1x16xf32>
    %11 = vector.shape_cast %10 : vector<1x16xf32> to vector<16xf32>
    %c0_17 = arith.constant 0 : index
    %c0_18 = arith.constant 0 : index
    %12 = vector.load %arg9[%c0_17, %c0_18] : memref<1x16xf32, #tpu.memory_space<vmem>>, vector<1x16xf32>
    %13 = vector.shape_cast %12 : vector<1x16xf32> to vector<16xf32>
    %c0_19 = arith.constant 0 : index
    %c0_20 = arith.constant 0 : index
    %14 = vector.load %arg10[%c0_19, %c0_20] : memref<1x16xf32, #tpu.memory_space<vmem>>, vector<1x16xf32>
    %15 = vector.shape_cast %14 : vector<1x16xf32> to vector<16xf32>
    %c0_21 = arith.constant 0 : index
    %c0_22 = arith.constant 0 : index
    %16 = vector.load %arg11[%c0_21, %c0_22] : memref<16x32xbf16, #tpu.memory_space<vmem>>, vector<16x32xbf16>
    %c0_23 = arith.constant 0 : index
    %c0_24 = arith.constant 0 : index
    %17 = vector.load %arg12[%c0_23, %c0_24] : memref<1x32xf32, #tpu.memory_space<vmem>>, vector<1x32xf32>
    %18 = vector.shape_cast %17 : vector<1x32xf32> to vector<32xf32>
    %c0_25 = arith.constant 0 : index
    %c0_26 = arith.constant 0 : index
    %19 = vector.load %arg13[%c0_25, %c0_26] : memref<32x16xbf16, #tpu.memory_space<vmem>>, vector<32x16xbf16>
    %c0_27 = arith.constant 0 : index
    %c0_28 = arith.constant 0 : index
    %20 = vector.load %arg14[%c0_27, %c0_28] : memref<1x16xf32, #tpu.memory_space<vmem>>, vector<1x16xf32>
    %21 = vector.shape_cast %20 : vector<1x16xf32> to vector<16xf32>
    %cst = arith.constant dense<0.000000e+00> : vector<8x16xf32>
    %22 = vector.multi_reduction <add>, %0, %cst [2] : vector<8x16x16xf32> to vector<8x16xf32>
    %23 = vector.shape_cast %22 : vector<8x16xf32> to vector<8x16x1xf32>
    %cst_29 = arith.constant 1.600000e+01 : f32
    %24 = vector.broadcast %cst_29 : f32 to vector<8x16x1xf32>
    %25 = arith.divf %23, %24 : vector<8x16x1xf32>
    %26 = vector.broadcast %25 : vector<8x16x1xf32> to vector<8x16x16xf32>
    %27 = arith.subf %0, %26 : vector<8x16x16xf32>
    %28 = arith.mulf %27, %27 : vector<8x16x16xf32>
    %cst_30 = arith.constant dense<0.000000e+00> : vector<8x16xf32>
    %29 = vector.multi_reduction <add>, %28, %cst_30 [2] : vector<8x16x16xf32> to vector<8x16xf32>
    %30 = vector.shape_cast %29 : vector<8x16xf32> to vector<8x16x1xf32>
    %cst_31 = arith.constant 1.600000e+01 : f32
    %31 = vector.broadcast %cst_31 : f32 to vector<8x16x1xf32>
    %32 = arith.divf %30, %31 : vector<8x16x1xf32>
    %33 = vector.broadcast %25 : vector<8x16x1xf32> to vector<8x16x16xf32>
    %34 = arith.subf %0, %33 : vector<8x16x16xf32>
    %cst_32 = arith.constant 9.99999974E-6 : f32
    %35 = vector.broadcast %cst_32 : f32 to vector<8x16x1xf32>
    %36 = arith.addf %32, %35 : vector<8x16x1xf32>
    %37 = math.rsqrt %36 : vector<8x16x1xf32>
    %38 = vector.broadcast %37 : vector<8x16x1xf32> to vector<8x16x16xf32>
    %39 = arith.mulf %34, %38 : vector<8x16x16xf32>
    %40 = vector.shape_cast %3 : vector<16xf32> to vector<1x1x16xf32>
    %41 = vector.broadcast %40 : vector<1x1x16xf32> to vector<8x16x16xf32>
    %42 = arith.mulf %39, %41 : vector<8x16x16xf32>
    %43 = vector.shape_cast %5 : vector<16xf32> to vector<1x1x16xf32>
    %44 = vector.broadcast %43 : vector<1x1x16xf32> to vector<8x16x16xf32>
    %45 = arith.addf %42, %44 : vector<8x16x16xf32>
    %46 = vector.shape_cast %45 : vector<8x16x16xf32> to vector<128x16xf32>
    %47 = arith.truncf %46 : vector<128x16xf32> to vector<128x16xbf16>
    %cst_33 = arith.constant dense<0.000000e+00> : vector<128x48xf32>
    %48 = tpu.matmul %47, %6, %cst_33 {dimension_numbers = #tpu.dot_dimension_numbers<[1], [0], [0], [1], [0, 0, 1, 1], [], []>} : vector<128x16xbf16>, vector<16x48xbf16>, vector<128x48xf32> -> vector<128x48xf32>
    %49 = vector.shape_cast %8 : vector<48xf32> to vector<1x48xf32>
    %50 = vector.broadcast %49 : vector<1x48xf32> to vector<128x48xf32>
    %51 = arith.addf %48, %50 : vector<128x48xf32>
    %52 = vector.shape_cast %51 : vector<128x48xf32> to vector<8x16x48xf32>
    %53 = vector.extract_strided_slice %52 {offsets = [0, 0, 0], sizes = [8, 16, 8], strides = [1, 1, 1]} : vector<8x16x48xf32> to vector<8x16x8xf32>
    %cst_34 = arith.constant 0.353553385 : f32
    %54 = vector.broadcast %cst_34 : f32 to vector<8x16x8xf32>
    %55 = arith.mulf %53, %54 : vector<8x16x8xf32>
    %56 = vector.extract_strided_slice %52 {offsets = [0, 0, 16], sizes = [8, 16, 8], strides = [1, 1, 1]} : vector<8x16x48xf32> to vector<8x16x8xf32>
    %57 = vector.extract_strided_slice %52 {offsets = [0, 0, 32], sizes = [8, 16, 8], strides = [1, 1, 1]} : vector<8x16x48xf32> to vector<8x16x8xf32>
    %58 = arith.truncf %55 : vector<8x16x8xf32> to vector<8x16x8xbf16>
    %59 = arith.truncf %56 : vector<8x16x8xf32> to vector<8x16x8xbf16>
    "tpu.trace_start"() <{level = 10 : i32, message = "bnd,bmd->bnm"}> : () -> ()
    %cst_35 = arith.constant dense<0.000000e+00> : vector<8x16x16xf32>
    %60 = tpu.matmul %58, %59, %cst_35 {dimension_numbers = #tpu.dot_dimension_numbers<[2], [2], [1], [1], [0, 0, 0, 1, 1, 1], [0], [0]>} : vector<8x16x8xbf16>, vector<8x16x8xbf16>, vector<8x16x16xf32> -> vector<8x16x16xf32>
    "tpu.trace_stop"() : () -> ()
    %61 = vector.extract_strided_slice %1 {offsets = [0, 0, 0], sizes = [1, 16, 16], strides = [1, 1, 1]} : vector<2x16x16xf32> to vector<1x16x16xf32>
    %62 = vector.shape_cast %61 : vector<1x16x16xf32> to vector<16x16xf32>
    %63 = vector.shape_cast %62 : vector<16x16xf32> to vector<1x16x16xf32>
    %64 = vector.broadcast %63 : vector<1x16x16xf32> to vector<8x16x16xf32>
    %65 = arith.addf %60, %64 : vector<8x16x16xf32>
    %cst_36 = arith.constant dense<0xFF800000> : vector<8x16xf32>
    %66 = vector.multi_reduction <maximumf>, %65, %cst_36 [2] : vector<8x16x16xf32> to vector<8x16xf32>
    %cst_37 = arith.constant 0xFF800000 : f32
    %67 = vector.broadcast %cst_37 : f32 to vector<8x16xf32>
    %68 = arith.maximumf %67, %66 : vector<8x16xf32>
    %69 = vector.shape_cast %68 : vector<8x16xf32> to vector<8x16x1xf32>
    %70 = vector.broadcast %69 : vector<8x16x1xf32> to vector<8x16x16xf32>
    %71 = arith.subf %65, %70 : vector<8x16x16xf32>
    %72 = math.exp %71 : vector<8x16x16xf32>
    %cst_38 = arith.constant dense<0.000000e+00> : vector<8x16xf32>
    %73 = vector.multi_reduction <add>, %72, %cst_38 [2] : vector<8x16x16xf32> to vector<8x16xf32>
    %74 = vector.shape_cast %73 : vector<8x16xf32> to vector<8x16x1xf32>
    %75 = vector.broadcast %74 : vector<8x16x1xf32> to vector<8x16x16xf32>
    %76 = arith.divf %72, %75 : vector<8x16x16xf32>
    %77 = arith.truncf %76 : vector<8x16x16xf32> to vector<8x16x16xbf16>
    %78 = arith.truncf %57 : vector<8x16x8xf32> to vector<8x16x8xbf16>
    "tpu.trace_start"() <{level = 10 : i32, message = "bnm,bmd->bnd"}> : () -> ()
    %cst_39 = arith.constant dense<0.000000e+00> : vector<8x16x8xf32>
    %79 = tpu.matmul %77, %78, %cst_39 {dimension_numbers = #tpu.dot_dimension_numbers<[2], [1], [1], [2], [0, 0, 0, 1, 1, 2], [0], [0]>} : vector<8x16x16xbf16>, vector<8x16x8xbf16>, vector<8x16x8xf32> -> vector<8x16x8xf32>
    "tpu.trace_stop"() : () -> ()
    %80 = vector.extract_strided_slice %52 {offsets = [0, 0, 8], sizes = [8, 16, 8], strides = [1, 1, 1]} : vector<8x16x48xf32> to vector<8x16x8xf32>
    %cst_40 = arith.constant 0.353553385 : f32
    %81 = vector.broadcast %cst_40 : f32 to vector<8x16x8xf32>
    %82 = arith.mulf %80, %81 : vector<8x16x8xf32>
    %83 = vector.extract_strided_slice %52 {offsets = [0, 0, 24], sizes = [8, 16, 8], strides = [1, 1, 1]} : vector<8x16x48xf32> to vector<8x16x8xf32>
    %84 = vector.extract_strided_slice %52 {offsets = [0, 0, 40], sizes = [8, 16, 8], strides = [1, 1, 1]} : vector<8x16x48xf32> to vector<8x16x8xf32>
    %85 = arith.truncf %82 : vector<8x16x8xf32> to vector<8x16x8xbf16>
    %86 = arith.truncf %83 : vector<8x16x8xf32> to vector<8x16x8xbf16>
    "tpu.trace_start"() <{level = 10 : i32, message = "bnd,bmd->bnm"}> : () -> ()
    %cst_41 = arith.constant dense<0.000000e+00> : vector<8x16x16xf32>
    %87 = tpu.matmul %85, %86, %cst_41 {dimension_numbers = #tpu.dot_dimension_numbers<[2], [2], [1], [1], [0, 0, 0, 1, 1, 1], [0], [0]>} : vector<8x16x8xbf16>, vector<8x16x8xbf16>, vector<8x16x16xf32> -> vector<8x16x16xf32>
    "tpu.trace_stop"() : () -> ()
    %88 = vector.extract_strided_slice %1 {offsets = [1, 0, 0], sizes = [1, 16, 16], strides = [1, 1, 1]} : vector<2x16x16xf32> to vector<1x16x16xf32>
    %89 = vector.shape_cast %88 : vector<1x16x16xf32> to vector<16x16xf32>
    %90 = vector.shape_cast %89 : vector<16x16xf32> to vector<1x16x16xf32>
    %91 = vector.broadcast %90 : vector<1x16x16xf32> to vector<8x16x16xf32>
    %92 = arith.addf %87, %91 : vector<8x16x16xf32>
    %cst_42 = arith.constant dense<0xFF800000> : vector<8x16xf32>
    %93 = vector.multi_reduction <maximumf>, %92, %cst_42 [2] : vector<8x16x16xf32> to vector<8x16xf32>
    %cst_43 = arith.constant 0xFF800000 : f32
    %94 = vector.broadcast %cst_43 : f32 to vector<8x16xf32>
    %95 = arith.maximumf %94, %93 : vector<8x16xf32>
    %96 = vector.shape_cast %95 : vector<8x16xf32> to vector<8x16x1xf32>
    %97 = vector.broadcast %96 : vector<8x16x1xf32> to vector<8x16x16xf32>
    %98 = arith.subf %92, %97 : vector<8x16x16xf32>
    %99 = math.exp %98 : vector<8x16x16xf32>
    %cst_44 = arith.constant dense<0.000000e+00> : vector<8x16xf32>
    %100 = vector.multi_reduction <add>, %99, %cst_44 [2] : vector<8x16x16xf32> to vector<8x16xf32>
    %101 = vector.shape_cast %100 : vector<8x16xf32> to vector<8x16x1xf32>
    %102 = vector.broadcast %101 : vector<8x16x1xf32> to vector<8x16x16xf32>
    %103 = arith.divf %99, %102 : vector<8x16x16xf32>
    %104 = arith.truncf %103 : vector<8x16x16xf32> to vector<8x16x16xbf16>
    %105 = arith.truncf %84 : vector<8x16x8xf32> to vector<8x16x8xbf16>
    "tpu.trace_start"() <{level = 10 : i32, message = "bnm,bmd->bnd"}> : () -> ()
    %cst_45 = arith.constant dense<0.000000e+00> : vector<8x16x8xf32>
    %106 = tpu.matmul %104, %105, %cst_45 {dimension_numbers = #tpu.dot_dimension_numbers<[2], [1], [1], [2], [0, 0, 0, 1, 1, 2], [0], [0]>} : vector<8x16x16xbf16>, vector<8x16x8xbf16>, vector<8x16x8xf32> -> vector<8x16x8xf32>
    "tpu.trace_stop"() : () -> ()
    %107 = tpu.concatenate %79, %106 in 2 : vector<8x16x8xf32>, vector<8x16x8xf32> -> vector<8x16x16xf32>
    %108 = vector.shape_cast %107 : vector<8x16x16xf32> to vector<128x16xf32>
    %109 = arith.truncf %108 : vector<128x16xf32> to vector<128x16xbf16>
    %cst_46 = arith.constant dense<0.000000e+00> : vector<128x16xf32>
    %110 = tpu.matmul %109, %9, %cst_46 {dimension_numbers = #tpu.dot_dimension_numbers<[1], [0], [0], [1], [0, 0, 1, 1], [], []>} : vector<128x16xbf16>, vector<16x16xbf16>, vector<128x16xf32> -> vector<128x16xf32>
    %111 = vector.shape_cast %11 : vector<16xf32> to vector<1x16xf32>
    %112 = vector.broadcast %111 : vector<1x16xf32> to vector<128x16xf32>
    %113 = arith.addf %110, %112 : vector<128x16xf32>
    %114 = vector.shape_cast %0 : vector<8x16x16xf32> to vector<128x16xf32>
    %115 = arith.addf %114, %113 : vector<128x16xf32>
    %cst_47 = arith.constant dense<0.000000e+00> : vector<128xf32>
    %116 = vector.multi_reduction <add>, %115, %cst_47 [1] : vector<128x16xf32> to vector<128xf32>
    %117 = vector.shape_cast %116 : vector<128xf32> to vector<128x1xf32>
    %cst_48 = arith.constant 1.600000e+01 : f32
    %118 = vector.broadcast %cst_48 : f32 to vector<128x1xf32>
    %119 = arith.divf %117, %118 : vector<128x1xf32>
    %120 = vector.broadcast %119 : vector<128x1xf32> to vector<128x16xf32>
    %121 = arith.subf %115, %120 : vector<128x16xf32>
    %122 = arith.mulf %121, %121 : vector<128x16xf32>
    %cst_49 = arith.constant dense<0.000000e+00> : vector<128xf32>
    %123 = vector.multi_reduction <add>, %122, %cst_49 [1] : vector<128x16xf32> to vector<128xf32>
    %124 = vector.shape_cast %123 : vector<128xf32> to vector<128x1xf32>
    %cst_50 = arith.constant 1.600000e+01 : f32
    %125 = vector.broadcast %cst_50 : f32 to vector<128x1xf32>
    %126 = arith.divf %124, %125 : vector<128x1xf32>
    %127 = vector.broadcast %119 : vector<128x1xf32> to vector<128x16xf32>
    %128 = arith.subf %115, %127 : vector<128x16xf32>
    %cst_51 = arith.constant 9.99999974E-6 : f32
    %129 = vector.broadcast %cst_51 : f32 to vector<128x1xf32>
    %130 = arith.addf %126, %129 : vector<128x1xf32>
    %131 = math.rsqrt %130 : vector<128x1xf32>
    %132 = vector.broadcast %131 : vector<128x1xf32> to vector<128x16xf32>
    %133 = arith.mulf %128, %132 : vector<128x16xf32>
    %134 = vector.shape_cast %13 : vector<16xf32> to vector<1x16xf32>
    %135 = vector.broadcast %134 : vector<1x16xf32> to vector<128x16xf32>
    %136 = arith.mulf %133, %135 : vector<128x16xf32>
    %137 = vector.shape_cast %15 : vector<16xf32> to vector<1x16xf32>
    %138 = vector.broadcast %137 : vector<1x16xf32> to vector<128x16xf32>
    %139 = arith.addf %136, %138 : vector<128x16xf32>
    %140 = arith.truncf %139 : vector<128x16xf32> to vector<128x16xbf16>
    %cst_52 = arith.constant dense<0.000000e+00> : vector<128x32xf32>
    %141 = tpu.matmul %140, %16, %cst_52 {dimension_numbers = #tpu.dot_dimension_numbers<[1], [0], [0], [1], [0, 0, 1, 1], [], []>} : vector<128x16xbf16>, vector<16x32xbf16>, vector<128x32xf32> -> vector<128x32xf32>
    %142 = vector.shape_cast %18 : vector<32xf32> to vector<1x32xf32>
    %143 = vector.broadcast %142 : vector<1x32xf32> to vector<128x32xf32>
    %144 = arith.addf %141, %143 : vector<128x32xf32>
    %145 = arith.mulf %144, %144 : vector<128x32xf32>
    %146 = arith.mulf %144, %145 : vector<128x32xf32>
    %cst_53 = arith.constant 4.471500e-02 : f32
    %147 = vector.broadcast %cst_53 : f32 to vector<128x32xf32>
    %148 = arith.mulf %147, %146 : vector<128x32xf32>
    %149 = arith.addf %144, %148 : vector<128x32xf32>
    %cst_54 = arith.constant 0.797884583 : f32
    %150 = vector.broadcast %cst_54 : f32 to vector<128x32xf32>
    %151 = arith.mulf %150, %149 : vector<128x32xf32>
    %152 = math.tanh %151 : vector<128x32xf32>
    %cst_55 = arith.constant 1.000000e+00 : f32
    %153 = vector.broadcast %cst_55 : f32 to vector<128x32xf32>
    %154 = arith.addf %153, %152 : vector<128x32xf32>
    %cst_56 = arith.constant 5.000000e-01 : f32
    %155 = vector.broadcast %cst_56 : f32 to vector<128x32xf32>
    %156 = arith.mulf %155, %154 : vector<128x32xf32>
    %157 = arith.mulf %144, %156 : vector<128x32xf32>
    %158 = arith.truncf %157 : vector<128x32xf32> to vector<128x32xbf16>
    %cst_57 = arith.constant dense<0.000000e+00> : vector<128x16xf32>
    %159 = tpu.matmul %158, %19, %cst_57 {dimension_numbers = #tpu.dot_dimension_numbers<[1], [0], [0], [1], [0, 0, 1, 1], [], []>} : vector<128x32xbf16>, vector<32x16xbf16>, vector<128x16xf32> -> vector<128x16xf32>
    %160 = vector.shape_cast %21 : vector<16xf32> to vector<1x16xf32>
    %161 = vector.broadcast %160 : vector<1x16xf32> to vector<128x16xf32>
    %162 = arith.addf %159, %161 : vector<128x16xf32>
    %163 = arith.addf %115, %162 : vector<128x16xf32>
    %164 = vector.shape_cast %163 : vector<128x16xf32> to vector<8x16x16xf32>
    %c0_58 = arith.constant 0 : index
    %c0_59 = arith.constant 0 : index
    %c0_60 = arith.constant 0 : index
    %165 = vector.load %arg15[%c0_58, %c0_59, %c0_60] : memref<8x16x16xf32, #tpu.memory_space<vmem>>, vector<8x16x16xf32>
    tpu.vector_store %arg15[%c0_58, %c0_59, %c0_60], %164 {strides = array<i32>} : memref<8x16x16xf32, #tpu.memory_space<vmem>>, vector<8x16x16xf32>,
    return
  }
  func.func @transform_0(%arg0: i32) -> (i32, i32, i32) {
    %c0_i32 = arith.constant 0 : i32
    %c0_i32_0 = arith.constant 0 : i32
    %c0_i32_1 = arith.constant 0 : i32
    return %arg0, %c0_i32, %c0_i32_0 : i32, i32, i32
  }
  func.func @transform_1(%arg0: i32) -> (i32, i32, i32) {
    %c0_i32 = arith.constant 0 : i32
    %c0_i32_0 = arith.constant 0 : i32
    %c0_i32_1 = arith.constant 0 : i32
    %c0_i32_2 = arith.constant 0 : i32
    return %c0_i32, %c0_i32_0, %c0_i32_1 : i32, i32, i32
  }
  func.func @transform_2(%arg0: i32) -> (i32, i32) {
    %c0_i32 = arith.constant 0 : i32
    %c0_i32_0 = arith.constant 0 : i32
    %c0_i32_1 = arith.constant 0 : i32
    return %c0_i32, %c0_i32_0 : i32, i32
  }
  func.func @transform_3(%arg0: i32) -> (i32, i32) {
    %c0_i32 = arith.constant 0 : i32
    %c0_i32_0 = arith.constant 0 : i32
    %c0_i32_1 = arith.constant 0 : i32
    return %c0_i32, %c0_i32_0 : i32, i32
  }
  func.func @transform_4(%arg0: i32) -> (i32, i32) {
    %c0_i32 = arith.constant 0 : i32
    %c0_i32_0 = arith.constant 0 : i32
    %c0_i32_1 = arith.constant 0 : i32
    return %c0_i32, %c0_i32_0 : i32, i32
  }
  func.func @transform_5(%arg0: i32) -> (i32, i32) {
    %c0_i32 = arith.constant 0 : i32
    %c0_i32_0 = arith.constant 0 : i32
    %c0_i32_1 = arith.constant 0 : i32
    return %c0_i32, %c0_i32_0 : i32, i32
  }
  func.func @transform_6(%arg0: i32) -> (i32, i32) {
    %c0_i32 = arith.constant 0 : i32
    %c0_i32_0 = arith.constant 0 : i32
    %c0_i32_1 = arith.constant 0 : i32
    return %c0_i32, %c0_i32_0 : i32, i32
  }
  func.func @transform_7(%arg0: i32) -> (i32, i32) {
    %c0_i32 = arith.constant 0 : i32
    %c0_i32_0 = arith.constant 0 : i32
    %c0_i32_1 = arith.constant 0 : i32
    return %c0_i32, %c0_i32_0 : i32, i32
  }
  func.func @transform_8(%arg0: i32) -> (i32, i32) {
    %c0_i32 = arith.constant 0 : i32
    %c0_i32_0 = arith.constant 0 : i32
    %c0_i32_1 = arith.constant 0 : i32
    return %c0_i32, %c0_i32_0 : i32, i32
  }
  func.func @transform_9(%arg0: i32) -> (i32, i32) {
    %c0_i32 = arith.constant 0 : i32
    %c0_i32_0 = arith.constant 0 : i32
    %c0_i32_1 = arith.constant 0 : i32
    return %c0_i32, %c0_i32_0 : i32, i32
  }
  func.func @transform_10(%arg0: i32) -> (i32, i32) {
    %c0_i32 = arith.constant 0 : i32
    %c0_i32_0 = arith.constant 0 : i32
    %c0_i32_1 = arith.constant 0 : i32
    return %c0_i32, %c0_i32_0 : i32, i32
  }
  func.func @transform_11(%arg0: i32) -> (i32, i32) {
    %c0_i32 = arith.constant 0 : i32
    %c0_i32_0 = arith.constant 0 : i32
    %c0_i32_1 = arith.constant 0 : i32
    return %c0_i32, %c0_i32_0 : i32, i32
  }
  func.func @transform_12(%arg0: i32) -> (i32, i32) {
    %c0_i32 = arith.constant 0 : i32
    %c0_i32_0 = arith.constant 0 : i32
    %c0_i32_1 = arith.constant 0 : i32
    return %c0_i32, %c0_i32_0 : i32, i32
  }
  func.func @transform_13(%arg0: i32) -> (i32, i32) {
    %c0_i32 = arith.constant 0 : i32
    %c0_i32_0 = arith.constant 0 : i32
    %c0_i32_1 = arith.constant 0 : i32
    return %c0_i32, %c0_i32_0 : i32, i32
  }
  func.func @transform_14(%arg0: i32) -> (i32, i32, i32) {
    %c0_i32 = arith.constant 0 : i32
    %c0_i32_0 = arith.constant 0 : i32
    %c0_i32_1 = arith.constant 0 : i32
    return %arg0, %c0_i32, %c0_i32_0 : i32, i32, i32
  }
}

</mosaic_0001>

<bundles_post_ra>
// kernel: maxvit_blocks_forward.6
= control target key start
LH: loop header
LB: loop body
LE: loop exit
PB: predicated region body
PF: predicated region fallthrough
CT: control target
= control target key end

     0   :  { %s3139_s17 = smov 0   ;;  %s5527_s0 = inlined_call_operand.vmem [shape: f32[2,16,16,16], index: 0, kind: input, shape index: {}]   ;;  %s5528_s1 = inlined_call_operand.vmem [shape: bf16[16,32], index: 1, kind: input, shape index: {}]   ;;  %s5529_s2 = inlined_call_operand.vmem [shape: f32[1,32], index: 2, kind: input, shape index: {}]   ;;  %s5530_s3 = inlined_call_operand.vmem [shape: f32[9,32], index: 3, kind: input, shape index: {}]   ;;  %s5531_s4 = inlined_call_operand.vmem [shape: f32[1,32], index: 4, kind: input, shape index: {}]   ;;  %s5532_s5 = inlined_call_operand.vmem [shape: bf16[32,8], index: 5, kind: input, shape index: {}]   ;;  %s5533_s6 = inlined_call_operand.vmem [shape: f32[1,8], index: 6, kind: input, shape index: {}]   ;;  %s5534_s7 = inlined_call_operand.vmem [shape: bf16[8,32], index: 7, kind: input, shape index: {}]   ;;  %s5535_s8 = inlined_call_operand.vmem [shape: f32[1,32], index: 8, kind: input, shape index: {}]   ;;  %s5536_s9 = inlined_call_operand.vmem [shape: bf16[32,16], index: 9, kind: input, shape index: {}]   ;;  %s5537_s10 = inlined_call_operand.vmem [shape: f32[1,16], index: 10, kind: input, shape index: {}]   ;;  %s5538_s11 = inlined_call_operand.vmem [shape: f32[2,16,16,16], index: 11, kind: output, shape index: {}]  }
   0x1 LB: > { %s2703_s18 = sadd.s32 4294967295, %s3075_s17   ;;  %p2707_p0 = scmp.ge.s32.totalorder %s3075_s17, 1  ;;  %s3075_s17 = sphi %s3139_s17, %s21_s17  }
   0x2   : > { %p337_p1 = scmp.lt.s32.totalorder %s3075_s17, 3 }
   0x4   : > { %p338_p2 = pnand %p2707_p0, %p337_p1 }
   0x6   : > { %341 = sbr.rel (%p338_p2) target bundleno = 1402 (0x57a), region = 64 }
   0xd   : > { %v2896_v0 = vld [vmem:[%s5528_s1] sm:$0xff]   ;;  %p377_p3 = scmp.lt.s32.totalorder %s2703_s18, 1  ;;  %vm451_vm0 = vcmask 130048   ;;  %v5540_v49 = vmov 0.0   ;;  %v951_v50 = vlaneseq  ;;  %vm3078_vm5 = vmmov 0  }
   0xe   : > { %2802 = vmatprep.subr.bf16.mxu0 %v2896_v0  ;;  %2844 = vmatprep.subr.bf16.mxu1 %v5540_v49  ;;  %v3213_v51 = vld [vmem:[%s5529_s2] ss:$0 sm:$0xff]  ;;  %vm2101_vm6 = vcmask 261120   ;;  %vm2250_vm7 = vcmask 1043456   ;;  %vm2246_vm8 = vcmask 64512  }
   0xf   : > { %s6129_s18 = smov (!%p377_p3, %s2703_s18), 1  ;;  %2803 = vmatpush3.bf16.msra.mxu0 %v2896_v0  ;;  %v3215_v52 = vshrl.u32 %v951_v50, 7  ;;  %v3229_v60 = vld [vmem:[%s5530_s3] sm:$0xff] }
  0x10   : > { %s2760_s21 = sshll.u32 %s6129_s18, 8  ;;  %2836 = vmatprep.subr.bf16.mxu0 %v5540_v49 }
  0x11   : > { %s3158_s24 = scalar_lea.vmem %s5527_s0, %s2760_s21  ;;  %5629 = vst [vmem:[#allocation2_spill] sm:$0xff] %v3215_v52  ;;  %v1123_v56 = vsub.s32 1, %v3215_v52  ;;  %v1431_v61 = vsub.s32 4, %v3215_v52  ;;  %v1641_v62 = vsub.s32 7, %v3215_v52  ;;  %vm1015_vm1 = vcmp.ge.s32.totalorder %v3215_v52, 1  ;;  %s5395_s25 = scalar_lea.vmem %s5538_s11, %s2760_s21 }
  0x12   : > { %v388_v1 = vld [vmem:[%s3158_s24] sm:$0xff]  ;;  %v389_v2 = vld [vmem:[%s3158_s24 + $0x8] sm:$0xff]  ;;  %v390_v3 = vld [vmem:[%s3158_s24 + $0x10] sm:$0xff]  ;;  %v1573_v50 = vsub.s32 6, %v3215_v52  ;;  %vm984_vm2 = vcmp.lt.s32.totalorder %v3215_v52, 1  ;;  %vm1218_vm3 = vcmp.lt.s32.totalorder %v3215_v52, 7 }
  0x13   : > { %v420_v4 = vpack.c.bf16 %v389_v2, %v388_v1  ;;  %v391_v5 = vld [vmem:[%s3158_s24 + $0x18] sm:$0xff]  ;;  %v392_v6 = vld [vmem:[%s3158_s24 + $0x20] sm:$0xff]  ;;  %v393_v7 = vld [vmem:[%s3158_s24 + $0x28] sm:$0xff]  ;;  %v5539_v2 = vsub.s32 0, %v3215_v52 }
  0x14   : > { %v421_v8 = vpack.c.bf16 %v391_v5, %v390_v3  ;;  %v422_v9 = vpack.c.bf16 %v393_v7, %v392_v6  ;;  %v394_v10 = vld [vmem:[%s3158_s24 + $0x30] sm:$0xff]  ;;  %v395_v11 = vld [vmem:[%s3158_s24 + $0x38] sm:$0xff]  ;;  %v396_v12 = vld [vmem:[%s3158_s24 + $0x40] sm:$0xff]  ;;  %v3246_v6 = vrot.slane %v3229_v60, %v1123_v56 }
  0x15   : > { %2804 = vmatprep.mubr.msk.bf16.mxu0 %vm451_vm0, %v420_v4  ;;  %v397_v13 = vld [vmem:[%s3158_s24 + $0x48] sm:$0xff]  ;;  %v423_v14 = vpack.c.bf16 %v395_v11, %v394_v10  ;;  %v398_v16 = vld [vmem:[%s3158_s24 + $0x50] sm:$0xff]  ;;  %v399_v17 = vld [vmem:[%s3158_s24 + $0x58] sm:$0xff]  ;;  %v3252_v10 = vrot.slane %v3229_v60, %v1431_v61  ;;  %v3255_v11 = vrot.slane %v3229_v60, %v1641_v62 }
  0x16   : > { %2805 = vmatmul.mubr.msk.bf16.vlgmr.msra.gmra.mrb[0].mxu0 %vm451_vm0, %v421_v8  ;;  %v424_v15 = vpack.c.bf16 %v397_v13, %v396_v12  ;;  %v400_v18 = vld [vmem:[%s3158_s24 + $0x60] sm:$0xff]  ;;  %v401_v19 = vld [vmem:[%s3158_s24 + $0x68] sm:$0xff]  ;;  %v425_v20 = vpack.c.bf16 %v399_v17, %v398_v16  ;;  %v402_v22 = vld [vmem:[%s3158_s24 + $0x70] sm:$0xff] }
  0x17   : > { %2808 = vmatprep.mubr.msk.bf16.mxu0 %vm451_vm0, %v422_v9  ;;  %v426_v21 = vpack.c.bf16 %v401_v19, %v400_v18  ;;  %v403_v23 = vld [vmem:[%s3158_s24 + $0x78] sm:$0xff]  ;;  %v404_v24 = vld [vmem:[%s3158_s24 + $0x80] sm:$0xff]  ;;  %v405_v25 = vld [vmem:[%s3158_s24 + $0x88] sm:$0xff]  ;;  %5630 = vst [vmem:[#allocation3_spill] sm:$0xff] %v3255_v11 }
  0x18   : > { %v427_v26 = vpack.c.bf16 %v403_v23, %v402_v22  ;;  %v428_v27 = vpack.c.bf16 %v405_v25, %v404_v24  ;;  %v406_v28 = vld [vmem:[%s3158_s24 + $0x90] sm:$0xff]  ;;  %v407_v29 = vld [vmem:[%s3158_s24 + $0x98] sm:$0xff]  ;;  %v408_v30 = vld [vmem:[%s3158_s24 + $0xa0] sm:$0xff] }
  0x19   : > { %v409_v31 = vld [vmem:[%s3158_s24 + $0xa8] sm:$0xff]  ;;  %v429_v32 = vpack.c.bf16 %v407_v29, %v406_v28  ;;  %v410_v34 = vld [vmem:[%s3158_s24 + $0xb0] sm:$0xff]  ;;  %v411_v35 = vld [vmem:[%s3158_s24 + $0xb8] sm:$0xff] }
  0x1a   : > { %v430_v33 = vpack.c.bf16 %v409_v31, %v408_v30  ;;  %v412_v36 = vld [vmem:[%s3158_s24 + $0xc0] sm:$0xff]  ;;  %v413_v37 = vld [vmem:[%s3158_s24 + $0xc8] sm:$0xff]  ;;  %v431_v38 = vpack.c.bf16 %v411_v35, %v410_v34  ;;  %v414_v40 = vld [vmem:[%s3158_s24 + $0xd0] sm:$0xff] }
  0x1b   : > { %v432_v39 = vpack.c.bf16 %v413_v37, %v412_v36  ;;  %v415_v41 = vld [vmem:[%s3158_s24 + $0xd8] sm:$0xff]  ;;  %v416_v42 = vld [vmem:[%s3158_s24 + $0xe0] sm:$0xff]  ;;  %v417_v43 = vld [vmem:[%s3158_s24 + $0xe8] sm:$0xff] }
  0x1c   : > { %v433_v44 = vpack.c.bf16 %v415_v41, %v414_v40  ;;  %v434_v45 = vpack.c.bf16 %v417_v43, %v416_v42  ;;  %v418_v46 = vld [vmem:[%s3158_s24 + $0xf0] sm:$0xff]  ;;  %v419_v47 = vld [vmem:[%s3158_s24 + $0xf8] sm:$0xff] }
  0x1d   : > { %v435_v48 = vpack.c.bf16 %v419_v47, %v418_v46 }
  0x1e   : > { %2809 = vmatmul.mubr.msk.bf16.gmra.mrb[4].mxu0 %vm451_vm0, %v423_v14  ;;  %v3261_v14 = vrot.slane %v3229_v60, %v5539_v2 }
  0x1f   : > { %2812 = vmatprep.mubr.msk.bf16.mxu0 %vm451_vm0, %v424_v15  ;;  %v1289_v15 = vsub.s32 2, %v3215_v52 }
  0x26   : > { %2813 = vmatmul.mubr.msk.bf16.gmra.mrb[8].mxu0 %vm451_vm0, %v425_v20  ;;  %v1363_v20 = vsub.s32 3, %v3215_v52 }
  0x27   : > { %2816 = vmatprep.mubr.msk.bf16.mxu0 %vm451_vm0, %v426_v21 }
  0x2e   : > { %2817 = vmatmul.mubr.msk.bf16.gmra.mrb[12].mxu0 %vm451_vm0, %v427_v26 }
  0x2f   : > { %2820 = vmatprep.mubr.msk.bf16.mxu0 %vm451_vm0, %v428_v27 }
  0x36   : > { %2821 = vmatmul.mubr.msk.bf16.gmra.mrb[16].mxu0 %vm451_vm0, %v429_v32 }
  0x37   : > { %2824 = vmatprep.mubr.msk.bf16.mxu0 %vm451_vm0, %v430_v33 }
  0x3e   : > { %2825 = vmatmul.mubr.msk.bf16.gmra.mrb[20].mxu0 %vm451_vm0, %v431_v38 }
  0x3f   : > { %2828 = vmatprep.mubr.msk.bf16.mxu0 %vm451_vm0, %v432_v39 }
  0x46   : > { %2829 = vmatmul.mubr.msk.bf16.gmra.mrb[24].mxu0 %vm451_vm0, %v433_v44  ;;  %v3297_v44 = vsel %vm1015_vm1, 1.0, %v5540_v49 }
  0x47   : > { %2832 = vmatprep.mubr.msk.bf16.mxu0 %vm451_vm0, %v434_v45  ;;  %v1505_v45 = vsub.s32 5, %v3215_v52 }
  0x4e   : > { %2833 = vmatmul.mubr.msk.bf16.gmra.mrb[28].mxu0 %vm451_vm0, %v435_v48 }
  0xe9   : > { %v2806_v53 = vpop.f32.mrb[0].mxu0 }
  0xea   : > { %v3218_v54 = vadd.f32 %v2806_v53, %v3213_v51  ;;  %v534_v55 = vpop.f32.mrb[1].mxu0 }
  0xeb   : > { %v3222_v57 = vadd.f32 %v3213_v51, %v534_v55  ;;  %v2807_v58 = vpop.f32.mrb[2].mxu0 }
  0xec   : > { %v663_v59 = vmul.f32 %v3218_v54, %v3218_v54  ;;  %v3234_v63 = vadd.f32 %v2807_v58, %v3213_v51  ;;  %v537_v0 = vpop.f32.mrb[3].mxu0 }
  0xed   : > { %v661_v1 = vmul.f32 %v3222_v57, %v3222_v57  ;;  %v3240_v3 = vadd.f32 %v3213_v51, %v537_v0 }
  0xee   : > { %v695_v4 = vmul.f32 %v663_v59, %v3218_v54  ;;  %v664_v5 = vmul.f32 %v3234_v63, %v3234_v63 }
  0xef   : > { %v693_v7 = vmul.f32 %v661_v1, %v3222_v57  ;;  %v662_v8 = vmul.f32 %v3240_v3, %v3240_v3  ;;  %v3311_v1 = vmul.f32 0.0, %v3297_v44 }
  0xf0   : > { %v727_v9 = vmul.f32 0.044715, %v695_v4  ;;  %v696_v12 = vmul.f32 %v664_v5, %v3234_v63 }
  0xf1   : > { %v725_v13 = vmul.f32 0.044715, %v693_v7  ;;  %v694_v16 = vmul.f32 %v662_v8, %v3240_v3  ;;  %v2810_v17 = vpop.f32.mrb[4].mxu0  ;;  %5631 = vst [vmem:[#allocation4_spill] sm:$0xff] %v3311_v1 }
  0xf2   : > { %v759_v18 = vadd.f32 %v727_v9, %v3218_v54  ;;  %v728_v19 = vmul.f32 0.044715, %v696_v12  ;;  %v3268_v21 = vadd.f32 %v2810_v17, %v3213_v51  ;;  %v550_v22 = vpop.f32.mrb[5].mxu0 }
  0xf3   : > { %v757_v23 = vadd.f32 %v725_v13, %v3222_v57  ;;  %v726_v24 = vmul.f32 0.044715, %v694_v16  ;;  %v3272_v25 = vadd.f32 %v3213_v51, %v550_v22  ;;  %v2811_v26 = vpop.f32.mrb[6].mxu0 }
  0xf4   : > { %v791_v27 = vmul.f32 0.7978846, %v759_v18  ;;  %v760_v28 = vadd.f32 %v728_v19, %v3234_v63  ;;  %v667_v29 = vmul.f32 %v3268_v21, %v3268_v21  ;;  %v3279_v30 = vadd.f32 %v2811_v26, %v3213_v51  ;;  %v553_v31 = vpop.f32.mrb[7].mxu0 }
  0xf5   : > { %v789_v32 = vmul.f32 0.7978846, %v757_v23  ;;  %v758_v33 = vadd.f32 %v726_v24, %v3240_v3  ;;  %v665_v34 = vmul.f32 %v3272_v25, %v3272_v25  ;;  %v3285_v35 = vadd.f32 %v3213_v51, %v553_v31 }
  0xf6   : > { %2901 = vtanh.f32 %v791_v27  ;;  %v792_v36 = vmul.f32 0.7978846, %v760_v28  ;;  %v699_v37 = vmul.f32 %v667_v29, %v3268_v21  ;;  %v668_v38 = vmul.f32 %v3279_v30, %v3279_v30 }
  0xf7   : > { %2903 = vtanh.f32 %v789_v32  ;;  %v790_v39 = vmul.f32 0.7978846, %v758_v33  ;;  %v697_v40 = vmul.f32 %v665_v34, %v3272_v25  ;;  %v666_v41 = vmul.f32 %v3285_v35, %v3285_v35 }
  0xf8   : > { %2905 = vtanh.f32 %v792_v36  ;;  %v731_v42 = vmul.f32 0.044715, %v699_v37  ;;  %v700_v43 = vmul.f32 %v668_v38, %v3279_v30  ;;  %v3326_v18 = vrot.slane %v3229_v60, %v1289_v15 }
  0xf9   : > { %2907 = vtanh.f32 %v790_v39  ;;  %v729_v46 = vmul.f32 0.044715, %v697_v40  ;;  %v698_v47 = vmul.f32 %v666_v41, %v3285_v35  ;;  %v2814_v48 = vpop.f32.mrb[8].mxu0  ;;  %v1058_v23 = vmul.f32 0.0, %v3261_v14 }
  0xfa   : > { %v763_v53 = vadd.f32 %v731_v42, %v3268_v21  ;;  %v732_v55 = vmul.f32 0.044715, %v700_v43  ;;  %v3304_v56 = vadd.f32 %v2814_v48, %v3213_v51  ;;  %v566_v58 = vpop.f32.mrb[9].mxu0  ;;  %v1057_v27 = vmul.f32 %v3261_v14, %v3311_v1  ;;  %v3452_v1 = vld [vmem:[%s5530_s3 + $0x8] ss:$0 sm:$0xff] }
  0xfb   : > { %v761_v59 = vadd.f32 %v729_v46, %v3272_v25  ;;  %v730_v61 = vmul.f32 0.044715, %v698_v47  ;;  %v3308_v62 = vadd.f32 %v3213_v51, %v566_v58  ;;  %v2815_v0 = vpop.f32.mrb[10].mxu0  ;;  %v1125_v46 = vmul.f32 0.0, %v3246_v6 }
  0xfc   : > { %v795_v4 = vmul.f32 0.7978846, %v763_v53  ;;  %v764_v5 = vadd.f32 %v732_v55, %v3279_v30  ;;  %v671_v7 = vmul.f32 %v3304_v56, %v3304_v56  ;;  %v3317_v8 = vadd.f32 %v2815_v0, %v3213_v51  ;;  %v569_v9 = vpop.f32.mrb[11].mxu0 }
  0xfd   : > { %v793_v12 = vmul.f32 0.7978846, %v761_v59  ;;  %v762_v13 = vadd.f32 %v730_v61, %v3285_v35  ;;  %v669_v16 = vmul.f32 %v3308_v62, %v3308_v62  ;;  %v3323_v17 = vadd.f32 %v3213_v51, %v569_v9 }
  0xfe   : > { %v703_v19 = vmul.f32 %v671_v7, %v3304_v56  ;;  %v672_v22 = vmul.f32 %v3317_v8, %v3317_v8  ;;  %2909 = vtanh.f32 %v795_v4  ;;  %v796_v15 = vmul.f32 0.7978846, %v764_v5 }
  0xff   : > { %v701_v24 = vmul.f32 %v669_v16, %v3308_v62  ;;  %v670_v26 = vmul.f32 %v3323_v17, %v3323_v17  ;;  %2911 = vtanh.f32 %v793_v12  ;;  %v794_v34 = vmul.f32 0.7978846, %v762_v13 }
 0x100   : > { %v2902_v28 = vpop.eup %2901  ;;  %v735_v29 = vmul.f32 0.044715, %v703_v19  ;;  %v704_v31 = vmul.f32 %v672_v22, %v3317_v8  ;;  %2913 = vtanh.f32 %v796_v15  ;;  %v3355_v13 = vrot.slane %v3229_v60, %v1363_v20 }
 0x101   : > { %v2904_v32 = vpop.eup %2903  ;;  %v855_v33 = vadd.f32 1.0, %v2902_v28  ;;  %v733_v36 = vmul.f32 0.044715, %v701_v24  ;;  %v702_v37 = vmul.f32 %v670_v26, %v3323_v17  ;;  %v2818_v38 = vpop.f32.mrb[12].mxu0  ;;  %2915 = vtanh.f32 %v794_v34 }
 0x102   : > { %v2906_v39 = vpop.eup %2905  ;;  %v853_v40 = vadd.f32 1.0, %v2904_v32  ;;  %v767_v41 = vadd.f32 %v735_v29, %v3304_v56  ;;  %v736_v42 = vmul.f32 0.044715, %v704_v31  ;;  %v3342_v43 = vpop.f32.mrb[13].mxu0  ;;  %v3361_v24 = vrot.slane %v3229_v60, %v1505_v45 }
 0x103   : > { %v2908_v47 = vpop.eup %2907  ;;  %v887_v48 = vmul.f32 0.5, %v855_v33  ;;  %v856_v53 = vadd.f32 1.0, %v2906_v39  ;;  %v765_v55 = vadd.f32 %v733_v36, %v3308_v62  ;;  %v734_v58 = vmul.f32 0.044715, %v702_v37  ;;  %v3346_v59 = vpop.f32.mrb[14].mxu0 }
 0x104   : > { %v885_v61 = vmul.f32 0.5, %v853_v40  ;;  %v854_v0 = vadd.f32 1.0, %v2908_v47  ;;  %v799_v4 = vmul.f32 0.7978846, %v767_v41  ;;  %v3348_v5 = vpop.f32.mrb[15].mxu0  ;;  %v768_v12 = vadd.f32 %v736_v42, %v3317_v8  ;;  %5632 = vst [vmem:[#allocation5_spill] sm:$0xff] %v3361_v24 }
 0x105   : > { %v919_v7 = vmul.f32 %v887_v48, %v3218_v54  ;;  %v888_v9 = vmul.f32 0.5, %v856_v53  ;;  %v797_v19 = vmul.f32 0.7978846, %v765_v55  ;;  %v3366_v54 = vrot.slane %v3229_v60, %v1573_v50 }
 0x106   : > { %v886_v16 = vmul.f32 0.5, %v854_v0  ;;  %2917 = vtanh.f32 %v799_v4  ;;  %v917_v22 = vmul.f32 %v885_v61, %v3222_v57  ;;  %v3369_v26 = vadd.s32 8, %v3215_v52 }
 0x107   : > { %5633 = vst [vmem:[#allocation6_spill] sm:$0xff] %v3366_v54  ;;  %v766_v20 = vadd.f32 %v734_v58, %v3323_v17  ;;  %v3373_v28 = vadd.f32 %v2818_v38, %v3213_v51  ;;  %v3375_v15 = vadd.f32 %v1125_v46, %v1057_v27  ;;  %v3377_v57 = vadd.f32 %v1125_v46, %v1058_v23 }
 0x108   : > { %v2910_v29 = vpop.eup %2909  ;;  %v955_v45 = vrot.slane %v919_v7, 7  ;;  %v920_v31 = vmul.f32 %v888_v9, %v3234_v63  ;;  %v3381_v32 = vmul.f32 %v886_v16, %v3240_v3  ;;  %v800_v60 = vmul.f32 0.7978846, %v768_v12 }
 0x109   : > { %5634 = vst [vmem:[#allocation7_spill] sm:$0xff] %v3375_v15  ;;  %5635 = vst [vmem:[#allocation8_spill] sm:$0xff] %v3377_v57  ;;  %v3383_v50 = vpop.f32.mrb[16].mxu0  ;;  %v2912_v33 = vpop.eup %2911  ;;  %v3386_v34 = vmul.f32 %v3246_v6, %v919_v7  ;;  %v1189_v36 = vrot.slane %v919_v7, 1  ;;  %v3389_v27 = vmul.f32 %v3252_v10, %v919_v7  ;;  %2919 = vtanh.f32 %v797_v19 }
 0x10a   : > { %v3391_v23 = vpop.f32.mrb[17].mxu0  ;;  %v3394_v37 = vmul.f32 %v3255_v11, %v919_v7  ;;  %v954_v63 = vrot.slane %v917_v22, 7  ;;  %v970_v3 = vrot.slane %v920_v31, 7  ;;  %v1204_v38 = vrot.slane %v920_v31, 1  ;;  %v2914_v61 = vpop.eup %2913 }
 0x10b   : > { %5636 = vst [vmem:[#allocation9_spill] sm:$0xff] %v3389_v27  ;;  %v3396_v39 = vpop.f32.mrb[18].mxu0  ;;  %v3399_v40 = vmul.f32 %v3246_v6, %v917_v22  ;;  %v1188_v41 = vrot.slane %v917_v22, 1  ;;  %v969_v42 = vrot.slane %v3381_v32, 7  ;;  %v1203_v46 = vrot.slane %v3381_v32, 1  ;;  %v2916_v12 = vpop.eup %2915 }
 0x10c   : > { %5637 = vst [vmem:[#allocation10_spill] sm:$0xff] %v3394_v37  ;;  %v3403_v47 = vpop.f32.mrb[19].mxu0  ;;  %v986_v48 = vsel %vm984_vm2, %v955_v45, %v970_v3  ;;  %v3409_v53 = vsel %vm984_vm2, %v970_v3, %v955_v45  ;;  %v1220_v55 = vsel %vm1218_vm3, %v1189_v36, %v1204_v38  ;;  %v3415_v58 = vsel %vm1218_vm3, %v1204_v38, %v1189_v36 }
 0x10d   : > { %5638 = vst [vmem:[#allocation11_spill] sm:$0xff] %v3415_v58  ;;  %v1062_v0 = vmul.f32 %v3261_v14, %v986_v48  ;;  %v1129_v4 = vmul.f32 %v3246_v6, %v920_v31  ;;  %v859_v7 = vadd.f32 1.0, %v2910_v29  ;;  %v857_v9 = vadd.f32 1.0, %v2912_v33 }
 0x10e   : > { %v985_v16 = vsel %vm984_vm2, %v954_v63, %v969_v42  ;;  %v3423_v19 = vsel %vm984_vm2, %v969_v42, %v954_v63  ;;  %v1127_v45 = vmul.f32 %v3246_v6, %v3381_v32  ;;  %v675_v36 = vmul.f32 %v3373_v28, %v3373_v28 }
 0x10f   : > { %v3429_v38 = vadd.f32 %v1129_v4, %v1062_v0  ;;  %v1060_v29 = vmul.f32 %v3261_v14, %v985_v16  ;;  %v1219_v33 = vsel %vm1218_vm3, %v1188_v41, %v1203_v46  ;;  %v3436_v2 = vsel %vm1218_vm3, %v1203_v46, %v1188_v41 }
 0x110   : > { %v2918_v3 = vpop.eup %2917  ;;  %v3439_v63 = vmul.f32 %v3252_v10, %v917_v22  ;;  %v3442_v42 = vmul.f32 %v3252_v10, %v920_v31  ;;  %v3445_v49 = vmul.f32 %v3255_v11, %v920_v31  ;;  %v798_v0 = vmul.f32 0.7978846, %v766_v20 }
 0x111   : > { %5639 = vst [vmem:[#allocation12_spill] sm:$0xff] %v3429_v38  ;;  %v3447_v4 = vpop.f32.mrb[20].mxu0  ;;  %v3454_v37 = vadd.f32 %v1127_v45, %v1060_v29  ;;  %v891_v41 = vmul.f32 0.5, %v859_v7  ;;  %v889_v46 = vmul.f32 0.5, %v857_v9  ;;  %v860_v22 = vadd.f32 1.0, %v2914_v61 }
 0x112   : > { %5640 = vst [vmem:[#allocation13_spill] sm:$0xff] %v3439_v63  ;;  %5641 = vst [vmem:[#allocation14_spill] sm:$0xff] %v3442_v42  ;;  %v3456_v27 = vpop.f32.mrb[21].mxu0  ;;  %v3459_v42 = vmul.f32 %v3326_v18, %v1220_v55  ;;  %v3462_v31 = vmul.f32 %v3355_v13, %v986_v48  ;;  %v858_v20 = vadd.f32 1.0, %v2916_v12  ;;  %v3467_v58 = vmul.f32 %v3361_v24, %v1220_v55 }
 0x113   : > { %5642 = vst [vmem:[#allocation15_spill] sm:$0xff] %v3445_v49  ;;  %5643 = vst [vmem:[#allocation16_spill] sm:$0xff] %v3454_v37  ;;  %v863_v49 = vadd.f32 1.0, %v2918_v3  ;;  %v3464_v38 = vpop.f32.mrb[22].mxu0  ;;  %v2920_v63 = vpop.eup %2919  ;;  %v923_v7 = vmul.f32 %v891_v41, %v3268_v21  ;;  %v892_v9 = vmul.f32 0.5, %v860_v22  ;;  %v707_v61 = vmul.f32 %v675_v36, %v3373_v28 }
 0x114   : > { %5644 = vst [vmem:[#allocation17_spill] sm:$0xff] %v3459_v42  ;;  %5645 = vst [vmem:[#allocation18_spill] sm:$0xff] %v3462_v31  ;;  %v3471_v45 = vpop.f32.mrb[23].mxu0  ;;  %v3474_v29 = vmul.f32 %v3366_v54, %v986_v48  ;;  %v3477_v42 = vmul.f32 %v3452_v1, %v1220_v55  ;;  %v890_v12 = vmul.f32 0.5, %v858_v20  ;;  %2921 = vtanh.f32 %v800_v60 }
 0x115   : > { %5646 = vst [vmem:[#allocation19_spill] sm:$0xff] %v3467_v58  ;;  %v3480_v3 = vmul.f32 %v3326_v18, %v1219_v33  ;;  %v3483_v58 = vmul.f32 %v3355_v13, %v985_v16  ;;  %v921_v21 = vmul.f32 %v889_v46, %v3272_v25  ;;  %2923 = vtanh.f32 %v798_v0 }
 0x116   : > { %5647 = vst [vmem:[#allocation20_spill] sm:$0xff] %v3474_v29  ;;  %5648 = vst [vmem:[#allocation21_spill] sm:$0xff] %v3477_v42  ;;  %v3488_v36 = vmul.f32 %v3252_v10, %v3381_v32  ;;  %v3491_v48 = vmul.f32 %v3361_v24, %v1219_v33  ;;  %v895_v55 = vmul.f32 0.5, %v863_v49  ;;  %v861_v41 = vadd.f32 1.0, %v2920_v63 }
 0x117   : > { %5649 = vst [vmem:[#allocation22_spill] sm:$0xff] %v3483_v58  ;;  %v957_v22 = vrot.slane %v923_v7, 7  ;;  %v924_v60 = vmul.f32 %v892_v9, %v3279_v30  ;;  %v3495_v20 = vmul.f32 %v890_v12, %v3285_v35  ;;  %v739_v16 = vmul.f32 0.044715, %v707_v61 }
 0x118   : > { %5650 = vst [vmem:[#allocation23_spill] sm:$0xff] %v3488_v36  ;;  %5651 = vst [vmem:[#allocation24_spill] sm:$0xff] %v3491_v48  ;;  %v3498_v42 = vmul.f32 %v3246_v6, %v923_v7  ;;  %v1191_v25 = vrot.slane %v923_v7, 1  ;;  %v3501_v0 = vmul.f32 %v3252_v10, %v923_v7  ;;  %v3504_v32 = vmul.f32 %v3255_v11, %v923_v7 }
 0x119   : > { %v3506_v33 = vpop.f32.mrb[24].mxu0  ;;  %v956_v49 = vrot.slane %v921_v21, 7  ;;  %v3509_v63 = vmul.f32 %v3246_v6, %v921_v21  ;;  %v972_v30 = vrot.slane %v924_v60, 7  ;;  %v1206_v35 = vrot.slane %v924_v60, 1 }
 0x11a   : > { %5652 = vst [vmem:[#allocation25_spill] sm:$0xff] %v3498_v42  ;;  %5653 = vst [vmem:[#allocation26_spill] sm:$0xff] %v3501_v0  ;;  %v3511_v46 = vpop.f32.mrb[25].mxu0  ;;  %v1190_v9 = vrot.slane %v921_v21, 1  ;;  %v3514_v61 = vmul.f32 %v3252_v10, %v921_v21  ;;  %v971_v12 = vrot.slane %v3495_v20, 7  ;;  %v1205_v29 = vrot.slane %v3495_v20, 1 }
 0x11b   : > { %5654 = vst [vmem:[#allocation27_spill] sm:$0xff] %v3504_v32  ;;  %5655 = vst [vmem:[#allocation28_spill] sm:$0xff] %v3509_v63  ;;  %v3518_v7 = vpop.f32.mrb[26].mxu0  ;;  %v988_v32 = vsel %vm984_vm2, %v957_v22, %v972_v30  ;;  %v3524_v48 = vsel %vm984_vm2, %v972_v30, %v957_v22  ;;  %v1222_v0 = vsel %vm1218_vm3, %v1191_v25, %v1206_v35  ;;  %v2897_v63 = vld [vmem:[%s5532_s5] sm:$0xff]   ;;  %v893_v58 = vmul.f32 0.5, %v861_v41 }
 0x11c   : > { %5656 = vst [vmem:[#allocation29_spill] sm:$0xff] %v3514_v61  ;;  %5657 = vst [vmem:[#allocation30_spill] sm:$0xff] %v3524_v48  ;;  %v3530_v42 = vsel %vm1218_vm3, %v1206_v35, %v1191_v25  ;;  %v3532_v61 = vpop.f32.mrb[27].mxu0  ;;  %v3538_v36 = vmul.f32 %v3255_v11, %v921_v21  ;;  %v1066_v31 = vmul.f32 %v3261_v14, %v988_v32  ;;  %2837 = vmatpush3.bf16.msra.mxu0 %v2897_v63  ;;  %v2898_v21 = vld [vmem:[%s5532_s5 + $0x8] sm:$0xff]  }
 0x11d   : > { %5658 = vst [vmem:[#allocation31_spill] sm:$0xff] %v3530_v42  ;;  %v1133_v22 = vmul.f32 %v3246_v6, %v924_v60  ;;  %v3543_v30 = vmul.f32 %v895_v55, %v3304_v56  ;;  %v987_v25 = vsel %vm984_vm2, %v956_v49, %v971_v12  ;;  %v3549_v35 = vsel %vm984_vm2, %v971_v12, %v956_v49 }
 0x11e   : > { %5659 = vst [vmem:[#allocation32_spill] sm:$0xff] %v3538_v36  ;;  %v1131_v42 = vmul.f32 %v3246_v6, %v3495_v20  ;;  %v2922_v36 = vpop.eup %2921  ;;  %v1064_v56 = vmul.f32 %v3261_v14, %v987_v25  ;;  %v1221_v55 = vsel %vm1218_vm3, %v1190_v9, %v1205_v29  ;;  %v3563_v49 = vsel %vm1218_vm3, %v1205_v29, %v1190_v9 }
 0x11f   : > { %v3556_v37 = vadd.f32 %v1133_v22, %v1066_v31  ;;  %5661 = vst [vmem:[#allocation34_spill] sm:$0xff] %v3563_v49  ;;  %v5662_v12 = vmov 0.0   ;;  %v2924_v41 = vpop.eup %2923  ;;  %v3567_v63 = vmul.f32 %v3252_v10, %v924_v60  ;;  %v3570_v57 = vmul.f32 %v3255_v11, %v924_v60 }
 0x120   : > { %2838 = vmatprep.subr.bf16.mxu0 %v5662_v12  ;;  %v771_v31 = vadd.f32 %v739_v16, %v3373_v28  ;;  %v3575_v22 = vadd.f32 %v3213_v51, %v3342_v43  ;;  %v3581_v29 = vmul.f32 %v3355_v13, %v988_v32  ;;  %v3584_v9 = vmul.f32 %v3361_v24, %v1222_v0 }
 0x121   : > { %5660 = vst [vmem:[#allocation33_spill] sm:$0xff] %v3556_v37  ;;  %5663 = vst [vmem:[#allocation35_spill] sm:$0xff] %v3567_v63  ;;  %v3578_v37 = vmul.f32 %v3326_v18, %v1222_v0  ;;  %v3586_v49 = vadd.f32 %v1131_v42, %v1064_v56  ;;  %v3588_v63 = vpop.f32.mrb[28].mxu0  ;;  %v3591_v60 = vmul.f32 %v3366_v54, %v988_v32  ;;  %2839 = vmatpush3.bf16.msra.mxu0 %v2898_v21 }
 0x122   : > { %5664 = vst [vmem:[#allocation36_spill] sm:$0xff] %v3570_v57  ;;  %5666 = vst [vmem:[#allocation38_spill] sm:$0xff] %v3581_v29  ;;  %v3594_v16 = vmul.f32 %v3452_v1, %v1222_v0  ;;  %v3597_v43 = vmul.f32 %v3326_v18, %v1221_v55  ;;  %v3600_v57 = vmul.f32 %v3355_v13, %v987_v25  ;;  %v3602_v29 = vpop.f32.mrb[29].mxu0  ;;  %v864_v32 = vadd.f32 1.0, %v2922_v36 }
 0x123   : > { %5665 = vst [vmem:[#allocation37_spill] sm:$0xff] %v3578_v37  ;;  %5667 = vst [vmem:[#allocation39_spill] sm:$0xff] %v3584_v9  ;;  %v3606_v42 = vmul.f32 %v3252_v10, %v3495_v20  ;;  %v3609_v56 = vmul.f32 %v3361_v24, %v1221_v55  ;;  %v3611_v0 = vpop.f32.mrb[30].mxu0  ;;  %v925_v9 = vmul.f32 %v893_v58, %v3308_v62  ;;  %v959_v58 = vrot.slane %v3543_v30, 7 }
 0x124   : > { %5668 = vst [vmem:[#allocation40_spill] sm:$0xff] %v3586_v49  ;;  %5669 = vst [vmem:[#allocation41_spill] sm:$0xff] %v3591_v60  ;;  %v862_v60 = vadd.f32 1.0, %v2924_v41  ;;  %v673_v21 = vmul.f32 %v3575_v22, %v3575_v22  ;;  %v3619_v37 = vpop.f32.mrb[31].mxu0  ;;  %v3626_v36 = vmul.f32 %v3452_v1, %v1221_v55  ;;  %v3630_v41 = vadd.f32 %v3346_v59, %v3213_v51 }
 0x125   : > { %5670 = vst [vmem:[#allocation42_spill] sm:$0xff] %v3594_v16  ;;  %5671 = vst [vmem:[#allocation43_spill] sm:$0xff] %v3597_v43  ;;  %v3614_v16 = vmul.f32 %v3366_v54, %v987_v25  ;;  %v3634_v62 = vadd.f32 %v3213_v51, %v3348_v5  ;;  %v3639_v25 = vmul.f32 %v3246_v6, %v3543_v30  ;;  %vm1250_vm4 = vcmp.lt.s32.totalorder %v3369_v26, 15 }
 0x126   : > { %5672 = vst [vmem:[#allocation44_spill] sm:$0xff] %v3600_v57  ;;  %5673 = vst [vmem:[#allocation45_spill] sm:$0xff] %v3606_v42  ;;  %v803_v57 = vmul.f32 0.7978846, %v771_v31  ;;  %v3623_v42 = vmul.f32 %v3255_v11, %v3495_v20  ;;  %v896_v31 = vmul.f32 0.5, %v864_v32  ;;  %v894_v20 = vmul.f32 0.5, %v862_v60  ;;  %2840 = vmatprep.mubr.msk.bf16.mxu0 %vm3078_vm5, %v5662_v12  ;;  %2846 = vmatprep.mubr.msk.bf16.mxu1 %vm3078_vm5, %v5662_v12 }
 0x127   : > { %5674 = vst [vmem:[#allocation46_spill] sm:$0xff] %v3609_v56  ;;  %5675 = vst [vmem:[#allocation47_spill] sm:$0xff] %v3614_v16  ;;  %v3644_v55 = vmul.f32 %v3252_v10, %v3543_v30  ;;  %v705_v59 = vmul.f32 %v673_v21, %v3575_v22  ;;  %v3649_v5 = vmul.f32 %v3255_v11, %v3543_v30  ;;  %v1192_v32 = vrot.slane %v925_v9, 1 }
 0x128   : > { %5676 = vst [vmem:[#allocation48_spill] sm:$0xff] %v3623_v42  ;;  %5677 = vst [vmem:[#allocation49_spill] sm:$0xff] %v3626_v36  ;;  %v1193_v42 = vrot.slane %v3543_v30, 1  ;;  %2925 = vtanh.f32 %v803_v57  ;;  %v958_v36 = vrot.slane %v925_v9, 7  ;;  %v928_v16 = vmul.f32 %v896_v31, %v3317_v8 }
 0x129   : > { %5678 = vst [vmem:[#allocation50_spill] sm:$0xff] %v3639_v25  ;;  %5679 = vst [vmem:[#allocation51_spill] sm:$0xff] %v3644_v55  ;;  %v3653_v56 = vmul.f32 %v894_v20, %v3323_v17  ;;  %v3656_v60 = vmul.f32 %v3246_v6, %v925_v9  ;;  %v676_v55 = vmul.f32 %v3630_v41, %v3630_v41  ;;  %v737_v20 = vmul.f32 0.044715, %v705_v59 }
 0x12a   : > { %5680 = vst [vmem:[#allocation52_spill] sm:$0xff] %v3649_v5  ;;  %v674_v57 = vmul.f32 %v3634_v62, %v3634_v62  ;;  %v974_v21 = vrot.slane %v928_v16, 7  ;;  %v1208_v49 = vrot.slane %v928_v16, 1  ;;  %v3664_v30 = vadd.f32 %v3383_v50, %v3213_v51 }
 0x12b   : > { %5681 = vst [vmem:[#allocation53_spill] sm:$0xff] %v3656_v60  ;;  %v3668_v8 = vadd.f32 %v3213_v51, %v3391_v23  ;;  %v973_v17 = vrot.slane %v3653_v56, 7  ;;  %v1207_v31 = vrot.slane %v3653_v56, 1  ;;  %v3674_v5 = vadd.f32 %v3396_v39, %v3213_v51 }
 0x12c   : > { %v990_v43 = vsel %vm984_vm2, %v959_v58, %v974_v21  ;;  %v3680_v50 = vsel %vm984_vm2, %v974_v21, %v959_v58  ;;  %v1224_v23 = vsel %vm1218_vm3, %v1193_v42, %v1208_v49  ;;  %v3686_v25 = vsel %vm1218_vm3, %v1208_v49, %v1193_v42 }
 0x12d   : > { %5682 = vst [vmem:[#allocation54_spill] sm:$0xff] %v3680_v50  ;;  %5683 = vst [vmem:[#allocation55_spill] sm:$0xff] %v3686_v25  ;;  %v1070_v59 = vmul.f32 %v3261_v14, %v990_v43  ;;  %v1137_v60 = vmul.f32 %v3246_v6, %v928_v16  ;;  %v708_v39 = vmul.f32 %v676_v55, %v3630_v41 }
 0x12e   : > { %v706_v48 = vmul.f32 %v674_v57, %v3634_v62  ;;  %v989_v15 = vsel %vm984_vm2, %v958_v36, %v973_v17  ;;  %v3696_v58 = vsel %vm984_vm2, %v973_v17, %v958_v36  ;;  %v1135_v21 = vmul.f32 %v3246_v6, %v3653_v56 }
 0x12f   : > { %5684 = vst [vmem:[#allocation56_spill] sm:$0xff] %v3696_v58  ;;  %v679_v49 = vmul.f32 %v3664_v30, %v3664_v30  ;;  %v3702_v42 = vadd.f32 %v1137_v60, %v1070_v59  ;;  %v1068_v25 = vmul.f32 %v3261_v14, %v989_v15  ;;  %v3707_v55 = vsel %vm1218_vm3, %v1192_v32, %v1207_v31 }
 0x130   : > { %v3711_v57 = vsel %vm1218_vm3, %v1207_v31, %v1192_v32  ;;  %v3714_v36 = vmul.f32 %v3252_v10, %v925_v9  ;;  %v3717_v17 = vmul.f32 %v3255_v11, %v925_v9  ;;  %v3720_v50 = vmul.f32 %v3252_v10, %v928_v16 }
 0x131   : > { %5685 = vst [vmem:[#allocation57_spill] sm:$0xff] %v3702_v42  ;;  %5686 = vst [vmem:[#allocation58_spill] sm:$0xff] %v3711_v57  ;;  %v3723_v60 = vmul.f32 %v3255_v11, %v928_v16  ;;  %v3726_v42 = vmul.f32 %v3326_v18, %v1224_v23  ;;  %v3729_v58 = vmul.f32 %v3355_v13, %v990_v43  ;;  %v738_v16 = vmul.f32 0.044715, %v706_v48 }
 0x132   : > { %5687 = vst [vmem:[#allocation59_spill] sm:$0xff] %v3714_v36  ;;  %5688 = vst [vmem:[#allocation60_spill] sm:$0xff] %v3717_v17  ;;  %v2926_v59 = vpop.eup %2925  ;;  %v3732_v32 = vmul.f32 %v3361_v24, %v1224_v23  ;;  %v3734_v31 = vadd.f32 %v1135_v21, %v1068_v25  ;;  %v3737_v9 = vmul.f32 %v3366_v54, %v990_v43 }
 0x133   : > { %5689 = vst [vmem:[#allocation61_spill] sm:$0xff] %v3720_v50  ;;  %5690 = vst [vmem:[#allocation62_spill] sm:$0xff] %v3723_v60  ;;  %v769_v17 = vadd.f32 %v737_v20, %v3575_v22  ;;  %v740_v50 = vmul.f32 0.044715, %v708_v39  ;;  %v711_v60 = vmul.f32 %v679_v49, %v3664_v30  ;;  %v677_v36 = vmul.f32 %v3668_v8, %v3668_v8 }
 0x134   : > { %5691 = vst [vmem:[#allocation63_spill] sm:$0xff] %v3726_v42  ;;  %5692 = vst [vmem:[#allocation64_spill] sm:$0xff] %v3729_v58  ;;  %v680_v58 = vmul.f32 %v3674_v5, %v3674_v5  ;;  %v867_v25 = vadd.f32 1.0, %v2926_v59  ;;  %v770_v20 = vadd.f32 %v738_v16, %v3634_v62  ;;  %v3756_v42 = vmul.f32 %v3452_v1, %v1224_v23 }
 0x135   : > { %5693 = vst [vmem:[#allocation65_spill] sm:$0xff] %v3732_v32  ;;  %5694 = vst [vmem:[#allocation66_spill] sm:$0xff] %v3734_v31  ;;  %v3747_v32 = vadd.f32 %v3213_v51, %v3403_v47  ;;  %v801_v21 = vmul.f32 0.7978846, %v769_v17  ;;  %v772_v43 = vadd.f32 %v740_v50, %v3630_v41  ;;  %v743_v39 = vmul.f32 0.044715, %v711_v60 }
 0x136   : > { %5695 = vst [vmem:[#allocation67_spill] sm:$0xff] %v3737_v9  ;;  %v709_v48 = vmul.f32 %v677_v36, %v3668_v8  ;;  %v712_v49 = vmul.f32 %v680_v58, %v3674_v5  ;;  %5696 = vst [vmem:[#allocation68_spill] sm:$0xff] %v3756_v42  ;;  %v802_v31 = vmul.f32 0.7978846, %v770_v20  ;;  %v3762_v36 = vmul.f32 %v3326_v18, %v3707_v55 }
 0x137   : > { %v678_v9 = vmul.f32 %v3747_v32, %v3747_v32  ;;  %2927 = vtanh.f32 %v801_v21  ;;  %v804_v47 = vmul.f32 0.7978846, %v772_v43  ;;  %v775_v17 = vadd.f32 %v743_v39, %v3664_v30 }
 0x138   : > { %v741_v59 = vmul.f32 0.044715, %v709_v48  ;;  %v744_v50 = vmul.f32 0.044715, %v712_v49  ;;  %5697 = vst [vmem:[#allocation69_spill] sm:$0xff] %v3762_v36  ;;  %v3765_v58 = vmul.f32 %v3355_v13, %v989_v15  ;;  %v3769_v23 = vmul.f32 %v3252_v10, %v3653_v56 }
 0x139   : > { %v710_v16 = vmul.f32 %v678_v9, %v3747_v32  ;;  %v3773_v60 = vmul.f32 %v3361_v24, %v3707_v55  ;;  %v899_v21 = vmul.f32 0.5, %v867_v25  ;;  %2929 = vtanh.f32 %v804_v47 }
 0x13a   : > { %5698 = vst [vmem:[#allocation70_spill] sm:$0xff] %v3765_v58  ;;  %5699 = vst [vmem:[#allocation71_spill] sm:$0xff] %v3769_v23  ;;  %v807_v43 = vmul.f32 0.7978846, %v775_v17  ;;  %v773_v9 = vadd.f32 %v741_v59, %v3668_v8  ;;  %2931 = vtanh.f32 %v802_v31  ;;  %v776_v20 = vadd.f32 %v744_v50, %v3674_v5 }
 0x13b   : > { %5700 = vst [vmem:[#allocation72_spill] sm:$0xff] %v3773_v60  ;;  %v742_v39 = vmul.f32 0.044715, %v710_v16  ;;  %v3779_v48 = vadd.f32 %v3447_v4, %v3213_v51  ;;  %v3783_v42 = vadd.f32 %v3213_v51, %v3456_v27  ;;  %v3787_v25 = vadd.f32 %v3464_v38, %v3213_v51 }
 0x13c   : > { %2933 = vtanh.f32 %v807_v43  ;;  %v805_v49 = vmul.f32 0.7978846, %v773_v9  ;;  %v3790_v47 = vmul.f32 %v3366_v54, %v989_v15  ;;  %v3794_v31 = vmul.f32 %v3255_v11, %v3653_v56 }
 0x13d   : > { %v683_v4 = vmul.f32 %v3779_v48, %v3779_v48  ;;  %v3800_v17 = vadd.f32 %v3213_v51, %v3471_v45  ;;  %v808_v27 = vmul.f32 0.7978846, %v776_v20  ;;  %v681_v59 = vmul.f32 %v3783_v42, %v3783_v42 }
 0x13e   : > { %5701 = vst [vmem:[#allocation73_spill] sm:$0xff] %v3790_v47  ;;  %5702 = vst [vmem:[#allocation74_spill] sm:$0xff] %v3794_v31  ;;  %v684_v38 = vmul.f32 %v3787_v25, %v3787_v25  ;;  %v3808_v15 = vadd.f32 %v3506_v33, %v3213_v51  ;;  %v3811_v56 = vmul.f32 %v899_v21, %v3373_v28  ;;  %2935 = vtanh.f32 %v805_v49 }
 0x13f   : > { %v715_v50 = vmul.f32 %v683_v4, %v3779_v48  ;;  %v682_v45 = vmul.f32 %v3800_v17, %v3800_v17  ;;  %v3818_v16 = vmul.f32 %v3452_v1, %v3707_v55  ;;  %v774_v43 = vadd.f32 %v742_v39, %v3747_v32 }
 0x140   : > { %v713_v9 = vmul.f32 %v681_v59, %v3783_v42  ;;  %v716_v33 = vmul.f32 %v684_v38, %v3787_v25  ;;  %v687_v21 = vmul.f32 %v3808_v15, %v3808_v15  ;;  %v3828_v49 = vadd.f32 %v3213_v51, %v3511_v46 }
 0x141   : > { %5703 = vst [vmem:[#allocation75_spill] sm:$0xff] %v3818_v16  ;;  %v2928_v20 = vpop.eup %2927  ;;  %v747_v31 = vmul.f32 0.044715, %v715_v50  ;;  %v714_v28 = vmul.f32 %v682_v45, %v3800_v17  ;;  %2937 = vtanh.f32 %v808_v27  ;;  %v961_v39 = vrot.slane %v3811_v56, 7 }
 0x142   : > { %v865_v4 = vadd.f32 1.0, %v2928_v20  ;;  %v745_v55 = vmul.f32 0.044715, %v713_v9  ;;  %v748_v16 = vmul.f32 0.044715, %v716_v33  ;;  %v3833_v59 = vmul.f32 %v3246_v6, %v3811_v56 }
 0x143   : > { %v779_v38 = vadd.f32 %v747_v31, %v3779_v48  ;;  %v746_v50 = vmul.f32 0.044715, %v714_v28  ;;  %v2930_v45 = vpop.eup %2929  ;;  %v806_v60 = vmul.f32 0.7978846, %v774_v43  ;;  %v3839_v46 = vadd.f32 %v3518_v7, %v3213_v51 }
 0x144   : > { %5704 = vst [vmem:[#allocation76_spill] sm:$0xff] %v3833_v59  ;;  %v897_v47 = vmul.f32 0.5, %v865_v4  ;;  %v777_v23 = vadd.f32 %v745_v55, %v3783_v42  ;;  %v2932_v27 = vpop.eup %2931  ;;  %v868_v9 = vadd.f32 1.0, %v2930_v45  ;;  %v719_v20 = vmul.f32 %v687_v21, %v3808_v15 }
 0x145   : > { %v811_v33 = vmul.f32 0.7978846, %v779_v38  ;;  %v685_v58 = vmul.f32 %v3828_v49, %v3828_v49  ;;  %v866_v31 = vadd.f32 1.0, %v2932_v27  ;;  %v780_v4 = vadd.f32 %v748_v16, %v3787_v25 }
 0x146   : > { %v2934_v36 = vpop.eup %2933  ;;  %v809_v28 = vmul.f32 0.7978846, %v777_v23  ;;  %v778_v43 = vadd.f32 %v746_v50, %v3800_v17  ;;  %v1195_v55 = vrot.slane %v3811_v56, 1  ;;  %v3849_v51 = vmul.f32 %v3252_v10, %v3811_v56 }
 0x147   : > { %v929_v7 = vmul.f32 %v897_v47, %v3575_v22  ;;  %v900_v38 = vmul.f32 0.5, %v868_v9  ;;  %v3854_v21 = vmul.f32 %v3255_v11, %v3811_v56  ;;  %v871_v45 = vadd.f32 1.0, %v2934_v36 }
 0x148   : > { %5705 = vst [vmem:[#allocation77_spill] sm:$0xff] %v3849_v51  ;;  %2939 = vtanh.f32 %v806_v60  ;;  %v3858_v23 = vmul.f32 %v3839_v46, %v3839_v46  ;;  %v2936_v16 = vpop.eup %2935  ;;  %v898_v27 = vmul.f32 0.5, %v866_v31  ;;  %v751_v57 = vmul.f32 0.044715, %v719_v20 }
 0x149   : > { %5706 = vst [vmem:[#allocation78_spill] sm:$0xff] %v3854_v21  ;;  %v932_v50 = vmul.f32 %v900_v38, %v3630_v41  ;;  %2941 = vtanh.f32 %v811_v33  ;;  %v812_v51 = vmul.f32 0.7978846, %v780_v4  ;;  %v3861_v22 = vmul.f32 0.7978846, %v778_v43 }
 0x14a   : > { %2943 = vtanh.f32 %v809_v28  ;;  %v3864_v47 = vmul.f32 %v685_v58, %v3828_v49  ;;  %v960_v56 = vrot.slane %v929_v7, 7  ;;  %v3867_v36 = vmul.f32 %v3246_v6, %v929_v7 }
 0x14b   : > { %v976_v60 = vrot.slane %v932_v50, 7  ;;  %v1210_v9 = vrot.slane %v932_v50, 1  ;;  %v2938_v21 = vpop.eup %2937  ;;  %v1194_v59 = vrot.slane %v929_v7, 1  ;;  %v930_v41 = vmul.f32 %v898_v27, %v3634_v62 }
 0x14c   : > { %5707 = vst [vmem:[#allocation79_spill] sm:$0xff] %v3867_v36  ;;  %v903_v31 = vmul.f32 0.5, %v871_v45  ;;  %v869_v33 = vadd.f32 1.0, %v2936_v16  ;;  %v3883_v43 = vmul.f32 %v3252_v10, %v929_v7  ;;  %v3886_v62 = vmul.f32 %v3255_v11, %v929_v7 }
 0x14d   : > { %v992_v20 = vsel %vm984_vm2, %v961_v39, %v976_v60  ;;  %v3874_v28 = vsel %vm984_vm2, %v976_v60, %v961_v39  ;;  %v1226_v58 = vsel %vm1218_vm3, %v1195_v55, %v1210_v9  ;;  %v3880_v4 = vsel %vm1218_vm3, %v1210_v9, %v1195_v55 }
 0x14e   : > { %5708 = vst [vmem:[#allocation80_spill] sm:$0xff] %v3880_v4  ;;  %5709 = vst [vmem:[#allocation81_spill] sm:$0xff] %v3883_v43  ;;  %v1074_v38 = vmul.f32 %v3261_v14, %v992_v20  ;;  %v1141_v45 = vmul.f32 %v3246_v6, %v932_v50  ;;  %v3891_v39 = vmul.f32 %v3252_v10, %v932_v50  ;;  %v975_v16 = vrot.slane %v930_v41, 7 }
 0x14f   : > { %5710 = vst [vmem:[#allocation82_spill] sm:$0xff] %v3886_v62  ;;  %v872_v27 = vadd.f32 1.0, %v2938_v21  ;;  %v783_v60 = vadd.f32 %v751_v57, %v3808_v15  ;;  %v3897_v55 = vmul.f32 %v3255_v11, %v932_v50  ;;  %v1209_v9 = vrot.slane %v930_v41, 1 }
 0x150   : > { %5711 = vst [vmem:[#allocation83_spill] sm:$0xff] %v3891_v39  ;;  %v3894_v36 = vadd.f32 %v1141_v45, %v1074_v38  ;;  %v935_v7 = vmul.f32 %v903_v31, %v3664_v30  ;;  %v3901_v62 = vmul.f32 %v3326_v18, %v1226_v58  ;;  %v991_v43 = vsel %vm984_vm2, %v960_v56, %v975_v16 }
 0x151   : > { %5713 = vst [vmem:[#allocation85_spill] sm:$0xff] %v3897_v55  ;;  %v3907_v39 = vsel %vm984_vm2, %v975_v16, %v960_v56  ;;  %v901_v21 = vmul.f32 0.5, %v869_v33  ;;  %v1072_v38 = vmul.f32 %v3261_v14, %v991_v43  ;;  %v1139_v50 = vmul.f32 %v3246_v6, %v930_v41 }
 0x152   : > { %5712 = vst [vmem:[#allocation84_spill] sm:$0xff] %v3894_v36  ;;  %5714 = vst [vmem:[#allocation86_spill] sm:$0xff] %v3901_v62  ;;  %v2940_v57 = vpop.eup %2939  ;;  %v1225_v45 = vsel %vm1218_vm3, %v1194_v59, %v1209_v9  ;;  %v3915_v30 = vsel %vm1218_vm3, %v1209_v9, %v1194_v59  ;;  %v3918_v55 = vmul.f32 %v3355_v13, %v992_v20  ;;  %v963_v9 = vrot.slane %v935_v7, 7 }
 0x153   : > { %5715 = vst [vmem:[#allocation87_spill] sm:$0xff] %v3915_v30  ;;  %v2942_v31 = vpop.eup %2941  ;;  %v3921_v56 = vmul.f32 %v3361_v24, %v1226_v58  ;;  %v3924_v33 = vmul.f32 %v3366_v54, %v992_v20  ;;  %v3927_v16 = vmul.f32 %v3452_v1, %v1226_v58  ;;  %v3929_v62 = vadd.f32 %v1139_v50, %v1072_v38 }
 0x154   : > { %5716 = vst [vmem:[#allocation88_spill] sm:$0xff] %v3918_v55  ;;  %v2944_v36 = vpop.eup %2943  ;;  %v3932_v4 = vmul.f32 %v3252_v10, %v930_v41  ;;  %v3935_v59 = vmul.f32 %v3255_v11, %v930_v41  ;;  %v3938_v55 = vmul.f32 %v3355_v13, %v991_v43  ;;  %v904_v20 = vmul.f32 0.5, %v872_v27 }
 0x155   : > { %5717 = vst [vmem:[#allocation89_spill] sm:$0xff] %v3921_v56  ;;  %5718 = vst [vmem:[#allocation90_spill] sm:$0xff] %v3924_v33  ;;  %v3941_v56 = vmul.f32 %v3246_v6, %v935_v7  ;;  %v870_v33 = vadd.f32 1.0, %v2940_v57  ;;  %v3944_v58 = vmul.f32 %v3326_v18, %v1225_v45  ;;  %v3947_v38 = vmul.f32 %v3361_v24, %v1225_v45 }
 0x156   : > { %5719 = vst [vmem:[#allocation91_spill] sm:$0xff] %v3927_v16  ;;  %5720 = vst [vmem:[#allocation92_spill] sm:$0xff] %v3929_v62  ;;  %v3950_v50 = vmul.f32 %v3366_v54, %v991_v43  ;;  %v933_v41 = vmul.f32 %v901_v21, %v3668_v8  ;;  %v3954_v16 = vmul.f32 %v3452_v1, %v1225_v45  ;;  %2945 = vtanh.f32 %v812_v51 }
 0x157   : > { %5721 = vst [vmem:[#allocation93_spill] sm:$0xff] %v3932_v4  ;;  %5722 = vst [vmem:[#allocation94_spill] sm:$0xff] %v3935_v59  ;;  %v1197_v59 = vrot.slane %v935_v7, 1  ;;  %v875_v4 = vadd.f32 1.0, %v2942_v31  ;;  %v3957_v27 = vmul.f32 %v3252_v10, %v935_v7  ;;  %v936_v57 = vmul.f32 %v904_v20, %v3674_v5 }
 0x158   : > { %5723 = vst [vmem:[#allocation95_spill] sm:$0xff] %v3938_v55  ;;  %5724 = vst [vmem:[#allocation96_spill] sm:$0xff] %v3944_v58  ;;  %v873_v55 = vadd.f32 1.0, %v2944_v36  ;;  %v902_v62 = vmul.f32 0.5, %v870_v33  ;;  %2947 = vtanh.f32 %v3861_v22  ;;  %v815_v43 = vmul.f32 0.7978846, %v783_v60 }
 0x159   : > { %5725 = vst [vmem:[#allocation97_spill] sm:$0xff] %v3947_v38  ;;  %5726 = vst [vmem:[#allocation98_spill] sm:$0xff] %v3950_v50  ;;  %v3961_v38 = vmul.f32 %v3255_v11, %v935_v7  ;;  %v749_v8 = vmul.f32 0.044715, %v3864_v47  ;;  %v962_v21 = vrot.slane %v933_v41, 7  ;;  %v3966_v45 = vmul.f32 %v3246_v6, %v933_v41 }
 0x15a   : > { %5727 = vst [vmem:[#allocation99_spill] sm:$0xff] %v3954_v16  ;;  %5728 = vst [vmem:[#allocation100_spill] sm:$0xff] %v3957_v27  ;;  %v978_v36 = vrot.slane %v936_v57, 7  ;;  %v1212_v31 = vrot.slane %v936_v57, 1  ;;  %v1196_v16 = vrot.slane %v933_v41, 1  ;;  %v934_v50 = vmul.f32 %v902_v62, %v3747_v32 }
 0x15b   : > { %5729 = vst [vmem:[#allocation101_spill] sm:$0xff] %v3961_v38  ;;  %v907_v5 = vmul.f32 0.5, %v875_v4  ;;  %v905_v33 = vmul.f32 0.5, %v873_v55  ;;  %v3982_v7 = vmul.f32 %v3252_v10, %v933_v41  ;;  %v3985_v32 = vmul.f32 %v3255_v11, %v933_v41 }
 0x15c   : > { %v994_v51 = vsel %vm984_vm2, %v963_v9, %v978_v36  ;;  %v3973_v22 = vsel %vm984_vm2, %v978_v36, %v963_v9  ;;  %v1228_v47 = vsel %vm1218_vm3, %v1197_v59, %v1212_v31  ;;  %v3979_v60 = vsel %vm1218_vm3, %v1212_v31, %v1197_v59 }
 0x15d   : > { %5730 = vst [vmem:[#allocation102_spill] sm:$0xff] %v3979_v60  ;;  %5731 = vst [vmem:[#allocation103_spill] sm:$0xff] %v3982_v7  ;;  %v1078_v4 = vmul.f32 %v3261_v14, %v994_v51  ;;  %v1145_v62 = vmul.f32 %v3246_v6, %v936_v57  ;;  %v3990_v55 = vmul.f32 %v3252_v10, %v936_v57  ;;  %v977_v9 = vrot.slane %v934_v50, 7 }
 0x15e   : > { %5732 = vst [vmem:[#allocation104_spill] sm:$0xff] %v3985_v32  ;;  %v781_v20 = vadd.f32 %v749_v8, %v3828_v49  ;;  %v720_v59 = vmul.f32 %v3858_v23, %v3839_v46  ;;  %v3998_v31 = vmul.f32 %v3255_v11, %v936_v57  ;;  %v1211_v41 = vrot.slane %v934_v50, 1 }
 0x15f   : > { %5733 = vst [vmem:[#allocation105_spill] sm:$0xff] %v3990_v55  ;;  %v3995_v36 = vadd.f32 %v1145_v62, %v1078_v4  ;;  %v939_v38 = vmul.f32 %v907_v5, %v3779_v48  ;;  %v4002_v32 = vmul.f32 %v3326_v18, %v1228_v47  ;;  %v993_v55 = vsel %vm984_vm2, %v962_v21, %v977_v9 }
 0x160   : > { %5735 = vst [vmem:[#allocation107_spill] sm:$0xff] %v3998_v31  ;;  %v4008_v8 = vsel %vm984_vm2, %v977_v9, %v962_v21  ;;  %v4011_v23 = vmul.f32 %v905_v33, %v3783_v42  ;;  %v1076_v4 = vmul.f32 %v3261_v14, %v993_v55  ;;  %v1143_v57 = vmul.f32 %v3246_v6, %v934_v50  ;;  %v2946_v62 = vpop.eup %2945 }
 0x161   : > { %5734 = vst [vmem:[#allocation106_spill] sm:$0xff] %v3995_v36  ;;  %5736 = vst [vmem:[#allocation108_spill] sm:$0xff] %v4002_v32  ;;  %v1227_v48 = vsel %vm1218_vm3, %v1196_v16, %v1211_v41  ;;  %v4019_v5 = vsel %vm1218_vm3, %v1211_v41, %v1196_v16  ;;  %v4022_v31 = vmul.f32 %v3355_v13, %v994_v51  ;;  %v965_v41 = vrot.slane %v939_v38, 7 }
 0x162   : > { %5737 = vst [vmem:[#allocation109_spill] sm:$0xff] %v4019_v5  ;;  %v4025_v21 = vmul.f32 %v3361_v24, %v1228_v47  ;;  %v4028_v42 = vmul.f32 %v3366_v54, %v994_v51  ;;  %v4031_v33 = vmul.f32 %v3452_v1, %v1228_v47  ;;  %v2948_v9 = vpop.eup %2947  ;;  %v4033_v27 = vadd.f32 %v1143_v57, %v1076_v4 }
 0x163   : > { %5738 = vst [vmem:[#allocation110_spill] sm:$0xff] %v4022_v31  ;;  %v4036_v7 = vmul.f32 %v3252_v10, %v934_v50  ;;  %v4039_v16 = vmul.f32 %v3255_v11, %v934_v50  ;;  %v4042_v31 = vmul.f32 %v3326_v18, %v1227_v48  ;;  %v4048_v51 = vmul.f32 %v3361_v24, %v1227_v48 }
 0x164   : > { %5739 = vst [vmem:[#allocation111_spill] sm:$0xff] %v4025_v21  ;;  %5740 = vst [vmem:[#allocation112_spill] sm:$0xff] %v4028_v42  ;;  %v4045_v21 = vmul.f32 %v3355_v13, %v993_v55  ;;  %v4051_v47 = vmul.f32 %v3246_v6, %v939_v38  ;;  %v4054_v4 = vmul.f32 %v3366_v54, %v993_v55  ;;  %v876_v57 = vadd.f32 1.0, %v2946_v62  ;;  %v3035_v42 = vld [vmem:[%s5529_s2] ss:$0 sm:$0xff] }
 0x165   : > { %5741 = vst [vmem:[#allocation113_spill] sm:$0xff] %v4031_v33  ;;  %5742 = vst [vmem:[#allocation114_spill] sm:$0xff] %v4033_v27  ;;  %v874_v33 = vadd.f32 1.0, %v2948_v9  ;;  %2949 = vtanh.f32 %v815_v43  ;;  %v813_v50 = vmul.f32 0.7978846, %v781_v20  ;;  %v4069_v62 = vadd.f32 %v3035_v42, %v3602_v29 }
 0x166   : > { %5743 = vst [vmem:[#allocation115_spill] sm:$0xff] %v4036_v7  ;;  %5744 = vst [vmem:[#allocation116_spill] sm:$0xff] %v4039_v16  ;;  %v752_v16 = vmul.f32 0.044715, %v720_v59  ;;  %v4060_v7 = vadd.f32 %v3035_v42, %v3532_v61  ;;  %v908_v55 = vmul.f32 0.5, %v876_v57  ;;  %v1199_v43 = vrot.slane %v939_v38, 1 }
 0x167   : > { %5745 = vst [vmem:[#allocation117_spill] sm:$0xff] %v4042_v31  ;;  %5746 = vst [vmem:[#allocation118_spill] sm:$0xff] %v4045_v21  ;;  %v4066_v21 = vmul.f32 %v3452_v1, %v1227_v48  ;;  %2951 = vtanh.f32 %v813_v50  ;;  %v4073_v59 = vadd.f32 %v3035_v42, %v3611_v0  ;;  %v4076_v61 = vmul.f32 %v3252_v10, %v939_v38 }
 0x168   : > { %5747 = vst [vmem:[#allocation119_spill] sm:$0xff] %v4048_v51  ;;  %5748 = vst [vmem:[#allocation120_spill] sm:$0xff] %v4054_v4  ;;  %v4063_v51 = vadd.f32 %v3035_v42, %v3588_v63  ;;  %v906_v4 = vmul.f32 0.5, %v874_v33  ;;  %v784_v20 = vadd.f32 %v752_v16, %v3839_v46  ;;  %v4079_v63 = vmul.f32 %v3255_v11, %v939_v38 }
 0x169   : > { %5749 = vst [vmem:[#allocation121_spill] sm:$0xff] %v4066_v21  ;;  %5750 = vst [vmem:[#allocation122_spill] sm:$0xff] %v4076_v61  ;;  %v940_v48 = vmul.f32 %v908_v55, %v3787_v25  ;;  %v964_v29 = vrot.slane %v4011_v23, 7  ;;  %v4088_v9 = vmul.f32 %v3246_v6, %v4011_v23  ;;  %v686_v0 = vmul.f32 %v4060_v7, %v4060_v7 }
 0x16a   : > { %5751 = vst [vmem:[#allocation123_spill] sm:$0xff] %v4079_v63  ;;  %v4083_v33 = vmul.f32 %v906_v4, %v3800_v17  ;;  %v691_v16 = vmul.f32 %v4063_v51, %v4063_v51  ;;  %v1198_v38 = vrot.slane %v4011_v23, 1  ;;  %v689_v25 = vmul.f32 %v4069_v62, %v4069_v62 }
 0x16b   : > { %v980_v57 = vrot.slane %v940_v48, 7  ;;  %v1214_v50 = vrot.slane %v940_v48, 1  ;;  %v816_v55 = vmul.f32 0.7978846, %v784_v20  ;;  %v692_v21 = vmul.f32 %v4073_v59, %v4073_v59 }
 0x16c   : > { %v979_v17 = vrot.slane %v4083_v33, 7  ;;  %v1213_v4 = vrot.slane %v4083_v33, 1  ;;  %v1149_v20 = vmul.f32 %v3246_v6, %v940_v48  ;;  %v718_v31 = vmul.f32 %v686_v0, %v4060_v7 }
 0x16d   : > { %v996_v63 = vsel %vm984_vm2, %v965_v41, %v980_v57  ;;  %v4105_v61 = vsel %vm984_vm2, %v980_v57, %v965_v41  ;;  %v1230_v36 = vsel %vm1218_vm3, %v1199_v43, %v1214_v50  ;;  %v4111_v32 = vsel %vm1218_vm3, %v1214_v50, %v1199_v43 }
 0x16e   : > { %5752 = vst [vmem:[#allocation124_spill] sm:$0xff] %v4111_v32  ;;  %v1082_v27 = vmul.f32 %v3261_v14, %v996_v63  ;;  %v723_v58 = vmul.f32 %v691_v16, %v4063_v51  ;;  %v995_v41 = vsel %vm984_vm2, %v964_v29, %v979_v17  ;;  %v4121_v57 = vsel %vm984_vm2, %v979_v17, %v964_v29 }
 0x16f   : > { %v2950_v60 = vpop.eup %2949  ;;  %v1147_v43 = vmul.f32 %v3246_v6, %v4083_v33  ;;  %v4126_v50 = vadd.f32 %v3035_v42, %v3619_v37  ;;  %v1080_v0 = vmul.f32 %v3261_v14, %v995_v41  ;;  %v1229_v16 = vsel %vm1218_vm3, %v1198_v38, %v1213_v4 }
 0x170   : > { %v4128_v32 = vadd.f32 %v1149_v20, %v1082_v27  ;;  %v4135_v5 = vsel %vm1218_vm3, %v1213_v4, %v1198_v38  ;;  %v4139_v29 = vmul.f32 %v3252_v10, %v4011_v23  ;;  %v4143_v17 = vmul.f32 %v3255_v11, %v4011_v23 }
 0x171   : > { %5754 = vst [vmem:[#allocation126_spill] sm:$0xff] %v4135_v5  ;;  %v4146_v37 = vmul.f32 %v3252_v10, %v940_v48  ;;  %v4149_v27 = vmul.f32 %v3255_v11, %v940_v48  ;;  %v2952_v42 = vpop.eup %2951  ;;  %v4152_v20 = vmul.f32 %v3326_v18, %v1230_v36  ;;  %v4155_v38 = vmul.f32 %v3355_v13, %v996_v63  ;;  %v5795_v5 = vld [vmem:[#allocation22_spill] sm:$0xff] }
 0x172   : > { %5753 = vst [vmem:[#allocation125_spill] sm:$0xff] %v4128_v32  ;;  %5755 = vst [vmem:[#allocation127_spill] sm:$0xff] %v4139_v29  ;;  %v4158_v4 = vmul.f32 %v3361_v24, %v1230_v36  ;;  %v4160_v29 = vadd.f32 %v1147_v43, %v1080_v0  ;;  %v879_v23 = vadd.f32 1.0, %v2950_v60  ;;  %2953 = vtanh.f32 %v816_v55 }
 0x173   : > { %5756 = vst [vmem:[#allocation128_spill] sm:$0xff] %v4143_v17  ;;  %5757 = vst [vmem:[#allocation129_spill] sm:$0xff] %v4146_v37  ;;  %v877_v17 = vadd.f32 1.0, %v2952_v42  ;;  %v750_v32 = vmul.f32 0.044715, %v718_v31  ;;  %v721_v48 = vmul.f32 %v689_v25, %v4069_v62  ;;  %v4171_v43 = vmul.f32 %v3452_v1, %v1230_v36 }
 0x174   : > { %5758 = vst [vmem:[#allocation130_spill] sm:$0xff] %v4149_v27  ;;  %5759 = vst [vmem:[#allocation131_spill] sm:$0xff] %v4152_v20  ;;  %v755_v37 = vmul.f32 0.044715, %v723_v58  ;;  %v724_v27 = vmul.f32 %v692_v21, %v4073_v59  ;;  %v690_v20 = vmul.f32 %v4126_v50, %v4126_v50  ;;  %v911_v60 = vmul.f32 0.5, %v879_v23 }
 0x175   : > { %5760 = vst [vmem:[#allocation132_spill] sm:$0xff] %v4155_v38  ;;  %5761 = vst [vmem:[#allocation133_spill] sm:$0xff] %v4158_v4  ;;  %v4168_v38 = vmul.f32 %v3366_v54, %v996_v63  ;;  %v782_v55 = vadd.f32 %v750_v32, %v4060_v7  ;;  %v753_v31 = vmul.f32 0.044715, %v721_v48  ;;  %v4177_v0 = vmul.f32 %v3326_v18, %v1229_v16 }
 0x176   : > { %5762 = vst [vmem:[#allocation134_spill] sm:$0xff] %v4160_v29  ;;  %5764 = vst [vmem:[#allocation136_spill] sm:$0xff] %v4171_v43  ;;  %v787_v58 = vadd.f32 %v755_v37, %v4063_v51  ;;  %v756_v25 = vmul.f32 0.044715, %v724_v27  ;;  %v722_v21 = vmul.f32 %v690_v20, %v4126_v50  ;;  %v4180_v42 = vmul.f32 %v911_v60, %v3808_v15  ;;  %v5793_v29 = vld [vmem:[#allocation34_spill] sm:$0xff] }
 0x177   : > { %5763 = vst [vmem:[#allocation135_spill] sm:$0xff] %v4168_v38  ;;  %5765 = vst [vmem:[#allocation137_spill] sm:$0xff] %v4177_v0  ;;  %v909_v63 = vmul.f32 0.5, %v877_v17  ;;  %v814_v38 = vmul.f32 0.7978846, %v782_v55  ;;  %v785_v36 = vadd.f32 %v753_v31, %v4069_v62  ;;  %v4185_v37 = vmul.f32 %v3355_v13, %v995_v41 }
 0x178   : > { %v819_v4 = vmul.f32 0.7978846, %v787_v58  ;;  %v788_v23 = vadd.f32 %v756_v25, %v4073_v59  ;;  %v754_v32 = vmul.f32 0.044715, %v722_v21  ;;  %v4189_v27 = vmul.f32 %v3252_v10, %v4083_v33 }
 0x179   : > { %5766 = vst [vmem:[#allocation138_spill] sm:$0xff] %v4185_v37  ;;  %v4192_v20 = vmul.f32 %v3361_v24, %v1229_v16  ;;  %v1023_v15 = vmul.f32 %v3297_v44, %v3423_v19  ;;  %v4197_v17 = vmul.f32 %v3366_v54, %v995_v41  ;;  %v4201_v48 = vmul.f32 %v3255_v11, %v4083_v33 }
 0x17a   : > { %5767 = vst [vmem:[#allocation139_spill] sm:$0xff] %v4189_v27  ;;  %v4204_v60 = vmul.f32 %v3452_v1, %v1229_v16  ;;  %v4208_v55 = vmul.f32 %v3297_v44, %v3409_v53  ;;  %v967_v58 = vrot.slane %v4180_v42, 7  ;;  %v4212_v31 = vmul.f32 %v909_v63, %v3828_v49 }
 0x17b   : > { %5768 = vst [vmem:[#allocation140_spill] sm:$0xff] %v4192_v20  ;;  %5769 = vst [vmem:[#allocation141_spill] sm:$0xff] %v4197_v17  ;;  %2955 = vtanh.f32 %v814_v38  ;;  %v817_v19 = vmul.f32 0.7978846, %v785_v36  ;;  %v4216_v41 = vmul.f32 %v3246_v6, %v4180_v42  ;;  %v820_v33 = vmul.f32 0.7978846, %v788_v23 }
 0x17c   : > { %5770 = vst [vmem:[#allocation142_spill] sm:$0xff] %v4201_v48  ;;  %5771 = vst [vmem:[#allocation143_spill] sm:$0xff] %v4204_v60  ;;  %2957 = vtanh.f32 %v819_v4  ;;  %v786_v1 = vadd.f32 %v754_v32, %v4126_v50  ;;  %v2954_v16 = vpop.eup %2953  ;;  %v1201_v25 = vrot.slane %v4180_v42, 1  ;;  %v4222_v53 = vmul.f32 %v3252_v10, %v4180_v42  ;;  %v5788_v48 = vld [vmem:[#allocation16_spill] sm:$0xff] }
 0x17d   : > { %5772 = vst [vmem:[#allocation144_spill] sm:$0xff] %v4216_v41  ;;  %2959 = vtanh.f32 %v817_v19  ;;  %v1059_v49 = vmul.f32 %v3261_v14, %v1023_v15  ;;  %v880_v38 = vadd.f32 1.0, %v2954_v16  ;;  %v1061_v63 = vmul.f32 %v3261_v14, %v4208_v55 }
 0x17e   : > { %5773 = vst [vmem:[#allocation145_spill] sm:$0xff] %v4222_v53  ;;  %2961 = vtanh.f32 %v820_v33  ;;  %v818_v21 = vmul.f32 0.7978846, %v786_v1  ;;  %v4229_v4 = vmul.f32 %v3255_v11, %v4180_v42  ;;  %v4235_v23 = vsel %vm1250_vm4, 1.0, %v5662_v12 }
 0x17f   : > { %v1158_v36 = vadd.f32 %v3399_v40, %v1059_v49  ;;  %5775 = vst [vmem:[#allocation147_spill] sm:$0xff] %v4235_v23  ;;  %v1291_v32 = vmul.f32 0.0, %v3326_v18  ;;  %v912_v19 = vmul.f32 0.5, %v880_v38  ;;  %v4239_v33 = vadd.f32 %v3386_v34, %v1061_v63  ;;  %v5783_v49 = vld [vmem:[#allocation30_spill] sm:$0xff] }
 0x180   : > { %5774 = vst [vmem:[#allocation146_spill] sm:$0xff] %v4229_v4  ;;  %2963 = vtanh.f32 %v818_v21  ;;  %v4242_v1 = vmul.f32 0.0, %v4235_v23  ;;  %v4247_v40 = vmul.f32 %v3246_v6, %v4212_v31  ;;  %v4251_v26 = vmul.f32 %v3297_v44, %v3549_v35  ;;  %v5781_v35 = vld [vmem:[#allocation7_spill] sm:$0xff] }
 0x181   : > { %5776 = vst [vmem:[#allocation148_spill] sm:$0xff] %v4239_v33  ;;  %v1258_v16 = vmul.f32 %v4235_v23, %v3436_v2  ;;  %v944_v34 = vmul.f32 %v912_v19, %v3839_v46  ;;  %v1325_v21 = vadd.f32 %v3480_v3, %v1158_v36  ;;  %v4262_v63 = vmul.f32 %v3252_v10, %v4212_v31  ;;  %v5785_v36 = vld [vmem:[#allocation56_spill] sm:$0xff] }
 0x182   : > { %5777 = vst [vmem:[#allocation149_spill] sm:$0xff] %v4242_v1  ;;  %5778 = vst [vmem:[#allocation150_spill] sm:$0xff] %v4247_v40  ;;  %v1292_v38 = vmul.f32 %v3326_v18, %v4242_v1  ;;  %v1323_v43 = vadd.f32 %v1291_v32, %v5781_v35  ;;  %v1365_v60 = vmul.f32 %v3355_v13, %v1023_v15  ;;  %v5787_v15 = vld [vmem:[#allocation8_spill] sm:$0xff] }
 0x183   : > { %5779 = vst [vmem:[#allocation151_spill] sm:$0xff] %v4251_v26  ;;  %5780 = vst [vmem:[#allocation152_spill] sm:$0xff] %v4262_v63  ;;  %v1294_v42 = vmul.f32 %v3326_v18, %v1258_v16  ;;  %v4269_v2 = vmul.f32 %v3255_v11, %v4212_v31  ;;  %v982_v46 = vrot.slane %v944_v34, 7  ;;  %v1216_v19 = vrot.slane %v944_v34, 1 }
 0x184   : > { %v4273_v1 = vmul.f32 %v3297_v44, %v5783_v49  ;;  %v4277_v4 = vmul.f32 %v3297_v44, %v5785_v36  ;;  %v4281_v32 = vmul.f32 %v3261_v14, %v4251_v26  ;;  %v1324_v35 = vadd.f32 %v1292_v38, %v5787_v15 }
 0x185   : > { %5782 = vst [vmem:[#allocation7_spill] sm:$0xff] %v4269_v2  ;;  %v2956_v3 = vpop.eup %2955  ;;  %v1326_v17 = vadd.f32 %v1294_v42, %v5788_v48  ;;  %v998_v20 = vsel %vm984_vm2, %v967_v58, %v982_v46  ;;  %v4289_v49 = vsel %vm984_vm2, %v982_v46, %v967_v58  ;;  %v4293_v36 = vsel %vm1218_vm3, %v1201_v25, %v1216_v19  ;;  %v5791_v42 = vld [vmem:[#allocation11_spill] sm:$0xff] }
 0x186   : > { %5784 = vst [vmem:[#allocation30_spill] sm:$0xff] %v4273_v1  ;;  %5786 = vst [vmem:[#allocation56_spill] sm:$0xff] %v4277_v4  ;;  %v2958_v2 = vpop.eup %2957  ;;  %v4297_v53 = vsel %vm1218_vm3, %v1216_v19, %v1201_v25  ;;  %v1086_v38 = vmul.f32 %v3261_v14, %v998_v20  ;;  %v1153_v48 = vmul.f32 %v3246_v6, %v944_v34  ;;  %v878_v46 = vadd.f32 1.0, %v2956_v3 }
 0x187   : > { %5789 = vst [vmem:[#allocation8_spill] sm:$0xff] %v4293_v36  ;;  %5790 = vst [vmem:[#allocation16_spill] sm:$0xff] %v4297_v53  ;;  %v2960_v63 = vpop.eup %2959  ;;  %v4303_v15 = vmul.f32 %v4235_v23, %v5791_v42  ;;  %v1397_v27 = vadd.f32 %v1365_v60, %v1323_v43  ;;  %v883_v37 = vadd.f32 1.0, %v2958_v2  ;;  %v4307_v0 = vmul.f32 %v4235_v23, %v5793_v29  ;;  %v5797_v60 = vld [vmem:[#allocation18_spill] sm:$0xff] }
 0x188   : > { %v2962_v58 = vpop.eup %2961  ;;  %v1367_v25 = vmul.f32 %v3355_v13, %v4208_v55  ;;  %v4311_v19 = vadd.f32 %v1153_v48, %v1086_v38  ;;  %v881_v33 = vadd.f32 1.0, %v2960_v63  ;;  %v1398_v30 = vadd.f32 %v5795_v5, %v1324_v35  ;;  %v5799_v38 = vld [vmem:[#allocation13_spill] sm:$0xff] }
 0x189   : > { %5792 = vst [vmem:[#allocation11_spill] sm:$0xff] %v4303_v15  ;;  %5794 = vst [vmem:[#allocation34_spill] sm:$0xff] %v4307_v0  ;;  %v884_v53 = vadd.f32 1.0, %v2962_v58  ;;  %v910_v42 = vmul.f32 0.5, %v878_v46  ;;  %v915_v40 = vmul.f32 0.5, %v883_v37  ;;  %v4317_v2 = vadd.f32 %v5797_v60, %v1326_v17  ;;  %v5803_v17 = vld [vmem:[#allocation23_spill] sm:$0xff] }
 0x18a   : > { %v2964_v41 = vpop.eup %2963  ;;  %v4314_v43 = vadd.f32 %v1367_v25, %v1325_v21  ;;  %v913_v3 = vmul.f32 0.5, %v881_v33  ;;  %v4321_v0 = vmul.f32 %v3326_v18, %v4303_v15  ;;  %v4324_v48 = vadd.f32 %v5799_v38, %v1397_v27 }
 0x18b   : > { %5798 = vst [vmem:[#allocation18_spill] sm:$0xff] %v4317_v2  ;;  %v916_v29 = vmul.f32 0.5, %v884_v53  ;;  %v4327_v63 = vmul.f32 %v3252_v10, %v944_v34  ;;  %v942_v5 = vmul.f32 %v910_v42, %v4060_v7  ;;  %v4332_v37 = vmul.f32 %v3355_v13, %v4251_v26 }
 0x18c   : > { %5796 = vst [vmem:[#allocation22_spill] sm:$0xff] %v4314_v43  ;;  %5800 = vst [vmem:[#allocation13_spill] sm:$0xff] %v4324_v48  ;;  %v1466_v21 = vadd.f32 %v5803_v17, %v1398_v30  ;;  %v4337_v53 = vmul.f32 %v3326_v18, %v4293_v36  ;;  %v4340_v33 = vmul.f32 %v3355_v13, %v998_v20  ;;  %v882_v35 = vadd.f32 1.0, %v2964_v41 }
 0x18d   : > { %5801 = vst [vmem:[#allocation153_spill] sm:$0xff] %v4327_v63  ;;  %5802 = vst [vmem:[#allocation154_spill] sm:$0xff] %v4332_v37  ;;  %v4343_v27 = vmul.f32 %v3255_v11, %v944_v34  ;;  %v4347_v7 = vmul.f32 %v3361_v24, %v4293_v36  ;;  %v981_v58 = vrot.slane %v942_v5, 7  ;;  %v1215_v46 = vrot.slane %v942_v5, 1  ;;  %v5854_v63 = vld [vmem:[#allocation76_spill] sm:$0xff]  ;;  %v5886_v37 = vld [vmem:[#allocation33_spill] sm:$0xff] }
 0x18e   : > { %5804 = vst [vmem:[#allocation23_spill] sm:$0xff] %v4340_v33  ;;  %v947_v25 = vmul.f32 %v915_v40, %v4063_v51  ;;  %v4351_v30 = vmul.f32 %v3366_v54, %v998_v20  ;;  %v4354_v42 = vmul.f32 %v913_v3, %v4069_v62  ;;  %v4357_v60 = vmul.f32 %v916_v29, %v4073_v59 }
 0x18f   : > { %5805 = vst [vmem:[#allocation155_spill] sm:$0xff] %v4343_v27  ;;  %5806 = vst [vmem:[#allocation156_spill] sm:$0xff] %v4347_v7  ;;  %v1508_v34 = vmul.f32 %v3361_v24, %v1258_v16  ;;  %v5810_v41 = vrot.slane %v4212_v31, 7  ;;  %v5812_v20 = vrot.slane %v4212_v31, 1  ;;  %v1151_v3 = vmul.f32 %v3246_v6, %v942_v5  ;;  %v5849_v7 = vld [vmem:[#allocation28_spill] sm:$0xff] }
 0x190   : > { %5807 = vst [vmem:[#allocation157_spill] sm:$0xff] %v4351_v30  ;;  %5808 = vst [vmem:[#allocation158_spill] sm:$0xff] %v4354_v42  ;;  %v914_v29 = vmul.f32 0.5, %v882_v35  ;;  %v1355_v31 = vrot.slane %v947_v25, 7  ;;  %v1356_v27 = vrot.slane %v4357_v60, 7  ;;  %v4503_v52 = vmul.f32 %v3297_v44, %v3907_v39 }
 0x191   : > { %5809 = vst [vmem:[#allocation159_spill] sm:$0xff] %v4357_v60  ;;  %v997_v38 = vsel %vm984_vm2, %v5810_v41, %v981_v58  ;;  %v5811_v17 = vmov %v5810_v41  ;;  %v4372_v62 = vsel %vm1218_vm3, %v5812_v20, %v1215_v46  ;;  %v5814_v59 = vmov %v5812_v20 }
 0x192   : > { %v1012_v51 = vsel %vm984_vm2, %v981_v58, %v5811_v17  ;;  %5813 = vst [vmem:[#allocation160_spill] sm:$0xff] %v4372_v62  ;;  %v4378_v40 = vsel %vm1218_vm3, %v1215_v46, %v5814_v59  ;;  %v1084_v16 = vmul.f32 %v3261_v14, %v997_v38  ;;  %v4384_v58 = vmul.f32 %v3361_v24, %v4303_v15 }
 0x193   : > { %v4387_v41 = vmul.f32 %v3252_v10, %v942_v5  ;;  %v4390_v17 = vmul.f32 %v3255_v11, %v942_v5  ;;  %v4393_v20 = vmul.f32 %v3252_v10, %v947_v25  ;;  %v4399_v59 = vmul.f32 %v3326_v18, %v4372_v62  ;;  %5840 = vst [vmem:[#allocation184_spill] sm:$0xff] %v4503_v52 }
 0x194   : > { %5815 = vst [vmem:[#allocation161_spill] sm:$0xff] %v4384_v58  ;;  %v4395_v46 = vadd.f32 %v1151_v3, %v1084_v16  ;;  %v4402_v35 = vmul.f32 %v3355_v13, %v997_v38  ;;  %v1497_v15 = vrot.slane %v947_v25, 1  ;;  %v4406_v36 = vmul.f32 %v3361_v24, %v4372_v62  ;;  %v5850_v58 = vld [vmem:[#allocation25_spill] sm:$0xff] }
 0x195   : > { %5816 = vst [vmem:[#allocation162_spill] sm:$0xff] %v4387_v41  ;;  %5817 = vst [vmem:[#allocation163_spill] sm:$0xff] %v4390_v17  ;;  %v4409_v5 = vmul.f32 %v3366_v54, %v997_v38  ;;  %v1498_v16 = vrot.slane %v4357_v60, 1  ;;  %v4414_v3 = vmul.f32 %v3255_v11, %v947_v25  ;;  %v968_v17 = vrot.slane %v4354_v42, 7 }
 0x196   : > { %5818 = vst [vmem:[#allocation164_spill] sm:$0xff] %v4393_v20  ;;  %5819 = vst [vmem:[#allocation165_spill] sm:$0xff] %v4402_v35  ;;  %v4418_v30 = vmul.f32 %v914_v29, %v4126_v50  ;;  %v4420_v26 = vadd.f32 %v1508_v34, %v1466_v21  ;;  %v1357_v62 = vsel %vm984_vm2, %v1355_v31, %v1356_v27  ;;  %v1202_v21 = vrot.slane %v4354_v42, 1 }
 0x197   : > { %5820 = vst [vmem:[#allocation166_spill] sm:$0xff] %v4406_v36  ;;  %5821 = vst [vmem:[#allocation167_spill] sm:$0xff] %v4409_v5  ;;  %v4426_v38 = vsel %vm984_vm2, %v1356_v27, %v1355_v31  ;;  %v4430_v5 = vsel %vm1218_vm3, %v1497_v15, %v1498_v16  ;;  %v4434_v25 = vsel %vm1218_vm3, %v1498_v16, %v1497_v15 }
 0x198   : > { %5822 = vst [vmem:[#allocation168_spill] sm:$0xff] %v4414_v3  ;;  %5823 = vst [vmem:[#allocation169_spill] sm:$0xff] %v4418_v30  ;;  %v1154_v50 = vmul.f32 %v3246_v6, %v4354_v42  ;;  %v4441_v34 = vmul.f32 %v3252_v10, %v4354_v42  ;;  %v4445_v27 = vmul.f32 %v3252_v10, %v4357_v60  ;;  %v983_v31 = vrot.slane %v4418_v30, 7 }
 0x199   : > { %5824 = vst [vmem:[#allocation170_spill] sm:$0xff] %v4420_v26  ;;  %5825 = vst [vmem:[#allocation171_spill] sm:$0xff] %v4430_v5  ;;  %v4448_v29 = vmul.f32 %v3355_v13, %v1357_v62  ;;  %v1217_v15 = vrot.slane %v4418_v30, 1  ;;  %v4454_v16 = vmul.f32 %v3366_v54, %v4208_v55  ;;  %v4458_v3 = vmul.f32 %v3361_v24, %v4430_v5 }
 0x19a   : > { %5826 = vst [vmem:[#allocation172_spill] sm:$0xff] %v4434_v25  ;;  %5827 = vst [vmem:[#allocation173_spill] sm:$0xff] %v4441_v34  ;;  %v4461_v11 = vmul.f32 %v3366_v54, %v1357_v62  ;;  %v1155_v60 = vmul.f32 %v3246_v6, %v4418_v30  ;;  %v4467_v42 = vsel %vm984_vm2, %v968_v17, %v983_v31 }
 0x19b   : > { %5828 = vst [vmem:[#allocation174_spill] sm:$0xff] %v4445_v27  ;;  %5829 = vst [vmem:[#allocation175_spill] sm:$0xff] %v4448_v29  ;;  %v1014_v26 = vsel %vm984_vm2, %v983_v31, %v968_v17  ;;  %v4473_v55 = vsel %vm1218_vm3, %v1202_v21, %v1217_v15  ;;  %v1248_v5 = vsel %vm1218_vm3, %v1217_v15, %v1202_v21  ;;  %v5836_v31 = vld [vmem:[#allocation54_spill] sm:$0xff] }
 0x19c   : > { %5830 = vst [vmem:[#allocation176_spill] sm:$0xff] %v4454_v16  ;;  %5831 = vst [vmem:[#allocation177_spill] sm:$0xff] %v4458_v3  ;;  %v1088_v6 = vmul.f32 %v3261_v14, %v4467_v42  ;;  %v4482_v62 = vmul.f32 %v3326_v18, %v4473_v55  ;;  %v4486_v17 = vmul.f32 %v3252_v10, %v4418_v30  ;;  %v5852_v27 = vld [vmem:[#allocation50_spill] sm:$0xff] }
 0x19d   : > { %5832 = vst [vmem:[#allocation178_spill] sm:$0xff] %v4461_v11  ;;  %5833 = vst [vmem:[#allocation179_spill] sm:$0xff] %v4467_v42  ;;  %v4490_v11 = vmul.f32 %v3297_v44, %v5836_v31  ;;  %v4495_v21 = vmul.f32 %v3355_v13, %v4467_v42  ;;  %v4499_v15 = vmul.f32 %v3361_v24, %v4473_v55  ;;  %v5851_v24 = vld [vmem:[#allocation53_spill] sm:$0xff] }
 0x19e   : > { %5834 = vst [vmem:[#allocation180_spill] sm:$0xff] %v4473_v55  ;;  %5835 = vst [vmem:[#allocation181_spill] sm:$0xff] %v4486_v17  ;;  %v4507_v10 = vmul.f32 %v3297_v44, %v3874_v28  ;;  %v4509_v31 = vadd.f32 %v1155_v60, %v1088_v6  ;;  %v4513_v12 = vmul.f32 %v3297_v44, %v4008_v8  ;;  %v5853_v17 = vld [vmem:[#allocation79_spill] sm:$0xff] }
 0x19f   : > { %5837 = vst [vmem:[#allocation54_spill] sm:$0xff] %v4490_v11  ;;  %5838 = vst [vmem:[#allocation182_spill] sm:$0xff] %v4495_v21  ;;  %v4517_v30 = vmul.f32 %v3297_v44, %v3973_v22  ;;  %v4521_v55 = vmul.f32 %v3297_v44, %v4121_v57  ;;  %v4525_v39 = vmul.f32 %v3297_v44, %v4105_v61  ;;  %v5855_v21 = vld [vmem:[#allocation150_spill] sm:$0xff] }
 0x1a0   : > { %5839 = vst [vmem:[#allocation183_spill] sm:$0xff] %v4499_v15  ;;  %5841 = vst [vmem:[#allocation185_spill] sm:$0xff] %v4507_v10  ;;  %v4528_v28 = vmul.f32 %v3297_v44, %v1012_v51  ;;  %v4532_v60 = vmul.f32 %v3297_v44, %v4289_v49  ;;  %v4535_v8 = vmul.f32 %v3297_v44, %v1014_v26 }
 0x1a1   : > { %5842 = vst [vmem:[#allocation186_spill] sm:$0xff] %v4513_v12  ;;  %5843 = vst [vmem:[#allocation187_spill] sm:$0xff] %v4517_v30  ;;  %v1065_v22 = vmul.f32 %v3261_v14, %v4273_v1  ;;  %v1067_v57 = vmul.f32 %v3261_v14, %v4277_v4  ;;  %v1069_v61 = vmul.f32 %v3261_v14, %v4490_v11 }
 0x1a2   : > { %5844 = vst [vmem:[#allocation188_spill] sm:$0xff] %v4521_v55  ;;  %5845 = vst [vmem:[#allocation189_spill] sm:$0xff] %v4525_v39  ;;  %v1071_v51 = vmul.f32 %v3261_v14, %v4503_v52  ;;  %v1073_v6 = vmul.f32 %v3261_v14, %v4507_v10  ;;  %v1075_v49 = vmul.f32 %v3261_v14, %v4513_v12 }
 0x1a3   : > { %5846 = vst [vmem:[#allocation190_spill] sm:$0xff] %v4528_v28  ;;  %5847 = vst [vmem:[#allocation191_spill] sm:$0xff] %v4532_v60  ;;  %v1077_v26 = vmul.f32 %v3261_v14, %v4517_v30  ;;  %v1079_v16 = vmul.f32 %v3261_v14, %v4521_v55  ;;  %v1081_v54 = vmul.f32 %v3261_v14, %v4525_v39  ;;  %v5889_v39 = vld [vmem:[#allocation63_spill] sm:$0xff]  ;;  %v5892_v30 = vld [vmem:[#allocation92_spill] sm:$0xff] }
 0x1a4   : > { %5848 = vst [vmem:[#allocation192_spill] sm:$0xff] %v4535_v8  ;;  %v1083_v42 = vmul.f32 %v3261_v14, %v4528_v28  ;;  %v1085_v3 = vmul.f32 %v3261_v14, %v4532_v60  ;;  %v1087_v15 = vmul.f32 %v3261_v14, %v4535_v8  ;;  %v1162_v36 = vadd.f32 %v5849_v7, %v4281_v32  ;;  %v5856_v7 = vld [vmem:[#allocation144_spill] sm:$0xff]  ;;  %v5887_v8 = vld [vmem:[#allocation69_spill] sm:$0xff] }
 0x1a5   : > { %v1164_v48 = vadd.f32 %v5850_v58, %v1065_v22  ;;  %v1166_v25 = vadd.f32 %v5851_v24, %v1067_v57  ;;  %v1168_v20 = vadd.f32 %v5852_v27, %v1069_v61  ;;  %v1170_v34 = vadd.f32 %v5853_v17, %v1071_v51  ;;  %v5857_v24 = vld [vmem:[#allocation31_spill] sm:$0xff]  ;;  %v5859_v17 = vld [vmem:[#allocation58_spill] sm:$0xff]  ;;  %v5873_v61 = vld [vmem:[#allocation124_spill] sm:$0xff] }
 0x1a6   : > { %v1172_v41 = vadd.f32 %v5854_v63, %v1073_v6  ;;  %v1174_v2 = vadd.f32 %v3966_v45, %v1075_v49  ;;  %v1176_v43 = vadd.f32 %v3941_v56, %v1077_v26  ;;  %v1178_v29 = vadd.f32 %v4088_v9, %v1079_v16  ;;  %v5861_v45 = vld [vmem:[#allocation55_spill] sm:$0xff]  ;;  %v5869_v16 = vld [vmem:[#allocation102_spill] sm:$0xff]  ;;  %v5876_v49 = vld [vmem:[#allocation16_spill] sm:$0xff] }
 0x1a7   : > { %v1180_v14 = vadd.f32 %v4051_v47, %v1081_v54  ;;  %v1182_v32 = vadd.f32 %v5855_v21, %v1083_v42  ;;  %v1184_v58 = vadd.f32 %v5856_v7, %v1085_v3  ;;  %v1186_v22 = vadd.f32 %v1154_v50, %v1087_v15  ;;  %v5863_v9 = vld [vmem:[#allocation87_spill] sm:$0xff]  ;;  %v5865_v47 = vld [vmem:[#allocation80_spill] sm:$0xff]  ;;  %v5867_v3 = vld [vmem:[#allocation109_spill] sm:$0xff] }
 0x1a8   : > { %v4576_v27 = vmul.f32 %v4235_v23, %v5857_v24  ;;  %v4580_v63 = vmul.f32 %v4235_v23, %v5859_v17  ;;  %v4584_v56 = vmul.f32 %v4235_v23, %v5861_v45  ;;  %v4588_v54 = vmul.f32 %v4235_v23, %v5863_v9  ;;  %v5871_v15 = vld [vmem:[#allocation126_spill] sm:$0xff] }
 0x1a9   : > { %v4592_v42 = vmul.f32 %v4235_v23, %v5865_v47  ;;  %v4596_v50 = vmul.f32 %v4235_v23, %v5867_v3  ;;  %v4600_v21 = vmul.f32 %v4235_v23, %v5869_v16  ;;  %v4604_v57 = vmul.f32 %v4235_v23, %v5871_v15  ;;  %v5879_v24 = vld [vmem:[#allocation34_spill] sm:$0xff] }
 0x1aa   : > { %5858 = vst [vmem:[#allocation28_spill] sm:$0xff] %v4576_v27  ;;  %5860 = vst [vmem:[#allocation25_spill] sm:$0xff] %v4580_v63  ;;  %v4608_v51 = vmul.f32 %v4235_v23, %v5873_v61  ;;  %v4612_v6 = vmul.f32 %v4235_v23, %v4378_v40  ;;  %v4616_v26 = vmul.f32 %v4235_v23, %v5876_v49 }
 0x1ab   : > { %5862 = vst [vmem:[#allocation53_spill] sm:$0xff] %v4584_v56  ;;  %5864 = vst [vmem:[#allocation50_spill] sm:$0xff] %v4588_v54  ;;  %v4619_v7 = vmul.f32 %v4235_v23, %v1248_v5  ;;  %v1298_v17 = vmul.f32 %v3326_v18, %v5879_v24  ;;  %v1300_v45 = vmul.f32 %v3326_v18, %v4576_v27  ;;  %v5882_v27 = vld [vmem:[#allocation12_spill] sm:$0xff]  ;;  %v5883_v24 = vld [vmem:[#allocation43_spill] sm:$0xff] }
 0x1ac   : > { %5866 = vst [vmem:[#allocation79_spill] sm:$0xff] %v4592_v42  ;;  %5868 = vst [vmem:[#allocation76_spill] sm:$0xff] %v4596_v50  ;;  %v1302_v9 = vmul.f32 %v3326_v18, %v4580_v63  ;;  %v1304_v40 = vmul.f32 %v3326_v18, %v4584_v56  ;;  %v1306_v47 = vmul.f32 %v3326_v18, %v4588_v54  ;;  %v5880_v56 = vld [vmem:[#allocation148_spill] sm:$0xff] }
 0x1ad   : > { %5870 = vst [vmem:[#allocation150_spill] sm:$0xff] %v4600_v21  ;;  %5872 = vst [vmem:[#allocation144_spill] sm:$0xff] %v4604_v57  ;;  %v1308_v3 = vmul.f32 %v3326_v18, %v4592_v42  ;;  %v1310_v5 = vmul.f32 %v3326_v18, %v4596_v50  ;;  %v1312_v16 = vmul.f32 %v3326_v18, %v4600_v21  ;;  %v5881_v50 = vld [vmem:[#allocation17_spill] sm:$0xff]  ;;  %v5884_v23 = vld [vmem:[#allocation40_spill] sm:$0xff] }
 0x1ae   : > { %5874 = vst [vmem:[#allocation31_spill] sm:$0xff] %v4608_v51  ;;  %5875 = vst [vmem:[#allocation58_spill] sm:$0xff] %v4612_v6  ;;  %v1314_v15 = vmul.f32 %v3326_v18, %v4604_v57  ;;  %v1316_v61 = vmul.f32 %v3326_v18, %v4608_v51  ;;  %v1318_v49 = vmul.f32 %v3326_v18, %v4612_v6  ;;  %v5885_v51 = vld [vmem:[#allocation37_spill] sm:$0xff] }
 0x1af   : > { %5877 = vst [vmem:[#allocation55_spill] sm:$0xff] %v4616_v26  ;;  %5878 = vst [vmem:[#allocation87_spill] sm:$0xff] %v4619_v7  ;;  %v1320_v54 = vmul.f32 %v3326_v18, %v4616_v26  ;;  %v1322_v42 = vmul.f32 %v3326_v18, %v4619_v7  ;;  %v1327_v63 = vadd.f32 %v5881_v50, %v5880_v56  ;;  %v5888_v26 = vld [vmem:[#allocation66_spill] sm:$0xff]  ;;  %v5890_v7 = vld [vmem:[#allocation57_spill] sm:$0xff] }
 0x1b0   : > { %v1328_v21 = vadd.f32 %v4321_v0, %v5882_v27  ;;  %v1329_v57 = vadd.f32 %v5883_v24, %v1162_v36  ;;  %v1330_v33 = vadd.f32 %v1298_v17, %v5884_v23  ;;  %v1331_v35 = vadd.f32 %v5885_v51, %v1164_v48  ;;  %v5891_v56 = vld [vmem:[#allocation96_spill] sm:$0xff]  ;;  %v5893_v27 = vld [vmem:[#allocation86_spill] sm:$0xff]  ;;  %v5895_v17 = vld [vmem:[#allocation117_spill] sm:$0xff] }
 0x1b1   : > { %v1332_v6 = vadd.f32 %v1300_v45, %v5886_v37  ;;  %v1333_v60 = vadd.f32 %v5887_v8, %v1166_v25  ;;  %v1334_v28 = vadd.f32 %v1302_v9, %v5888_v26  ;;  %v1335_v18 = vadd.f32 %v5889_v39, %v1168_v20  ;;  %v5894_v24 = vld [vmem:[#allocation84_spill] sm:$0xff]  ;;  %v5896_v51 = vld [vmem:[#allocation114_spill] sm:$0xff]  ;;  %v5899_v9 = vld [vmem:[#allocation137_spill] sm:$0xff] }
 0x1b2   : > { %v1336_v55 = vadd.f32 %v1304_v40, %v5890_v7  ;;  %v1337_v50 = vadd.f32 %v5891_v56, %v1170_v34  ;;  %v1338_v0 = vadd.f32 %v1306_v47, %v5892_v30  ;;  %v1339_v36 = vadd.f32 %v5893_v27, %v1172_v41  ;;  %v5897_v45 = vld [vmem:[#allocation108_spill] sm:$0xff]  ;;  %v5898_v8 = vld [vmem:[#allocation106_spill] sm:$0xff]  ;;  %v5901_v40 = vld [vmem:[#allocation131_spill] sm:$0xff] }
 0x1b3   : > { %v1340_v23 = vadd.f32 %v1308_v3, %v5894_v24  ;;  %v1341_v48 = vadd.f32 %v5895_v17, %v1174_v2  ;;  %v1342_v37 = vadd.f32 %v1310_v5, %v5896_v51  ;;  %v1343_v25 = vadd.f32 %v5897_v45, %v1176_v43  ;;  %v5900_v39 = vld [vmem:[#allocation134_spill] sm:$0xff]  ;;  %v5902_v56 = vld [vmem:[#allocation125_spill] sm:$0xff]  ;;  %v5911_v51 = vld [vmem:[#allocation44_spill] sm:$0xff] }
 0x1b4   : > { %v1344_v26 = vadd.f32 %v1312_v16, %v5898_v8  ;;  %v1345_v20 = vadd.f32 %v5899_v9, %v1178_v29  ;;  %v1346_v7 = vadd.f32 %v1314_v15, %v5900_v39  ;;  %v1347_v34 = vadd.f32 %v5901_v40, %v1180_v14  ;;  %v5908_v16 = vld [vmem:[#allocation191_spill] sm:$0xff]  ;;  %v5910_v24 = vld [vmem:[#allocation154_spill] sm:$0xff] }
 0x1b5   : > { %v1348_v30 = vadd.f32 %v1316_v61, %v5902_v56  ;;  %v1349_v41 = vadd.f32 %v4399_v59, %v1182_v32  ;;  %v1350_v47 = vadd.f32 %v1318_v49, %v4395_v46  ;;  %v1351_v2 = vadd.f32 %v4337_v53, %v1184_v58  ;;  %v5906_v58 = vld [vmem:[#allocation189_spill] sm:$0xff]  ;;  %v5909_v61 = vld [vmem:[#allocation192_spill] sm:$0xff]  ;;  %v5912_v9 = vld [vmem:[#allocation38_spill] sm:$0xff] }
 0x1b6   : > { %v1352_v3 = vadd.f32 %v1320_v54, %v4311_v19  ;;  %v1353_v43 = vadd.f32 %v4482_v62, %v1186_v22  ;;  %v1354_v5 = vadd.f32 %v1322_v42, %v4509_v31  ;;  %v4679_v29 = vmul.f32 %v3297_v44, %v4426_v38  ;;  %v5904_v44 = vld [vmem:[#allocation187_spill] sm:$0xff]  ;;  %v5905_v31 = vld [vmem:[#allocation188_spill] sm:$0xff]  ;;  %v5907_v54 = vld [vmem:[#allocation190_spill] sm:$0xff] }
 0x1b7   : > { %v1371_v14 = vmul.f32 %v3355_v13, %v4273_v1  ;;  %v1373_v59 = vmul.f32 %v3355_v13, %v4277_v4  ;;  %v1375_v46 = vmul.f32 %v3355_v13, %v4490_v11  ;;  %v1377_v19 = vmul.f32 %v3355_v13, %v4503_v52  ;;  %v5913_v56 = vld [vmem:[#allocation70_spill] sm:$0xff]  ;;  %v5916_v52 = vld [vmem:[#allocation88_spill] sm:$0xff] }
 0x1b8   : > { %5903 = vst [vmem:[#allocation80_spill] sm:$0xff] %v4679_v29  ;;  %v1379_v53 = vmul.f32 %v3355_v13, %v4507_v10  ;;  %v1381_v62 = vmul.f32 %v3355_v13, %v4513_v12  ;;  %v1383_v38 = vmul.f32 %v3355_v13, %v5904_v44  ;;  %v1385_v32 = vmul.f32 %v3355_v13, %v5905_v31  ;;  %v5914_v31 = vld [vmem:[#allocation64_spill] sm:$0xff]  ;;  %v5915_v12 = vld [vmem:[#allocation95_spill] sm:$0xff] }
 0x1b9   : > { %v1387_v22 = vmul.f32 %v3355_v13, %v5906_v58  ;;  %v1389_v42 = vmul.f32 %v3355_v13, %v5907_v54  ;;  %v1391_v15 = vmul.f32 %v3355_v13, %v5908_v16  ;;  %v1393_v49 = vmul.f32 %v3355_v13, %v5909_v61 }
 0x1ba   : > { %v1395_v27 = vmul.f32 %v3355_v13, %v4679_v29  ;;  %v1401_v17 = vadd.f32 %v5910_v24, %v1327_v63  ;;  %v1402_v45 = vadd.f32 %v5911_v51, %v1328_v21  ;;  %v1403_v8 = vadd.f32 %v1371_v14, %v1329_v57  ;;  %v5917_v29 = vld [vmem:[#allocation118_spill] sm:$0xff]  ;;  %v5938_v51 = vld [vmem:[#allocation93_spill] sm:$0xff] }
 0x1bb   : > { %v1404_v39 = vadd.f32 %v5912_v9, %v1330_v33  ;;  %v1405_v40 = vadd.f32 %v1373_v59, %v1331_v35  ;;  %v1406_v58 = vadd.f32 %v5913_v56, %v1332_v6  ;;  %v1407_v54 = vadd.f32 %v1375_v46, %v1333_v60  ;;  %v5918_v21 = vld [vmem:[#allocation110_spill] sm:$0xff]  ;;  %v5920_v6 = vld [vmem:[#allocation132_spill] sm:$0xff]  ;;  %v5939_v56 = vld [vmem:[#allocation77_spill] sm:$0xff] }
 0x1bc   : > { %v1408_v44 = vadd.f32 %v5914_v31, %v1334_v28  ;;  %v1409_v16 = vadd.f32 %v1377_v19, %v1335_v18  ;;  %v1410_v10 = vadd.f32 %v5915_v12, %v1336_v55  ;;  %v1411_v61 = vadd.f32 %v1379_v53, %v1337_v50  ;;  %v5919_v33 = vld [vmem:[#allocation138_spill] sm:$0xff]  ;;  %v5921_v28 = vld [vmem:[#allocation165_spill] sm:$0xff]  ;;  %v5922_v55 = vld [vmem:[#allocation23_spill] sm:$0xff] }
 0x1bd   : > { %v1412_v11 = vadd.f32 %v5916_v52, %v1338_v0  ;;  %v1413_v13 = vadd.f32 %v1381_v62, %v1339_v36  ;;  %v1414_v63 = vadd.f32 %v5917_v29, %v1340_v23  ;;  %v1415_v24 = vadd.f32 %v1383_v38, %v1341_v48  ;;  %v5923_v52 = vld [vmem:[#allocation182_spill] sm:$0xff]  ;;  %v5924_v23 = vld [vmem:[#allocation175_spill] sm:$0xff]  ;;  %v5929_v62 = vld [vmem:[#allocation29_spill] sm:$0xff] }
 0x1be   : > { %v1416_v57 = vadd.f32 %v5918_v21, %v1342_v37  ;;  %v1417_v14 = vadd.f32 %v1385_v32, %v1343_v25  ;;  %v1418_v35 = vadd.f32 %v5919_v33, %v1344_v26  ;;  %v1419_v59 = vadd.f32 %v1387_v22, %v1345_v20  ;;  %v5925_v29 = vld [vmem:[#allocation22_spill] sm:$0xff]  ;;  %v5926_v37 = vld [vmem:[#allocation9_spill] sm:$0xff]  ;;  %v5932_v31 = vld [vmem:[#allocation35_spill] sm:$0xff] }
 0x1bf   : > { %v1420_v60 = vadd.f32 %v5920_v6, %v1346_v7  ;;  %v1421_v46 = vadd.f32 %v1389_v42, %v1347_v34  ;;  %v1422_v18 = vadd.f32 %v5921_v28, %v1348_v30  ;;  %v1423_v19 = vadd.f32 %v1391_v15, %v1349_v41  ;;  %v5927_v53 = vld [vmem:[#allocation18_spill] sm:$0xff]  ;;  %v5930_v34 = vld [vmem:[#allocation45_spill] sm:$0xff]  ;;  %v5935_v22 = vld [vmem:[#allocation51_spill] sm:$0xff] }
 0x1c0   : > { %v1424_v12 = vadd.f32 %v5922_v55, %v1350_v47  ;;  %v1425_v50 = vadd.f32 %v1393_v49, %v1351_v2  ;;  %v1426_v0 = vadd.f32 %v5923_v52, %v1352_v3  ;;  %v1427_v36 = vadd.f32 %v1395_v27, %v1353_v43  ;;  %v5928_v26 = vld [vmem:[#allocation14_spill] sm:$0xff]  ;;  %v5933_v2 = vld [vmem:[#allocation59_spill] sm:$0xff]  ;;  %v5936_v42 = vld [vmem:[#allocation61_spill] sm:$0xff] }
 0x1c1   : > { %v1428_v48 = vadd.f32 %v5924_v23, %v1354_v5  ;;  %v1467_v25 = vadd.f32 %v5926_v37, %v5925_v29  ;;  %v1468_v20 = vadd.f32 %v5928_v26, %v5927_v53  ;;  %v1469_v7 = vadd.f32 %v5929_v62, %v1401_v17  ;;  %v5931_v30 = vld [vmem:[#allocation26_spill] sm:$0xff]  ;;  %v5934_v3 = vld [vmem:[#allocation71_spill] sm:$0xff]  ;;  %v5937_v49 = vld [vmem:[#allocation81_spill] sm:$0xff] }
 0x1c2   : > { %v1470_v38 = vadd.f32 %v5930_v34, %v1402_v45  ;;  %v1471_v41 = vadd.f32 %v5931_v30, %v1403_v8  ;;  %v1472_v47 = vadd.f32 %v5932_v31, %v1404_v39  ;;  %v1473_v32 = vadd.f32 %v5933_v2, %v1405_v40  ;;  %v5940_v21 = vld [vmem:[#allocation83_spill] sm:$0xff]  ;;  %v5943_v28 = vld [vmem:[#allocation100_spill] sm:$0xff]  ;;  %v5944_v55 = vld [vmem:[#allocation105_spill] sm:$0xff] }
 0x1c3   : > { %v1474_v43 = vadd.f32 %v5934_v3, %v1406_v58  ;;  %v1475_v5 = vadd.f32 %v5935_v22, %v1407_v54  ;;  %v1476_v15 = vadd.f32 %v5936_v42, %v1408_v44  ;;  %v1477_v27 = vadd.f32 %v5937_v49, %v1409_v16  ;;  %v5941_v33 = vld [vmem:[#allocation103_spill] sm:$0xff]  ;;  %v5947_v29 = vld [vmem:[#allocation122_spill] sm:$0xff]  ;;  %v5948_v37 = vld [vmem:[#allocation129_spill] sm:$0xff] }
 0x1c4   : > { %v1478_v9 = vadd.f32 %v5938_v51, %v1410_v10  ;;  %v1479_v17 = vadd.f32 %v5939_v56, %v1411_v61  ;;  %v1480_v45 = vadd.f32 %v5940_v21, %v1412_v11  ;;  %v1481_v8 = vadd.f32 %v5941_v33, %v1413_v13  ;;  %v5942_v6 = vld [vmem:[#allocation115_spill] sm:$0xff]  ;;  %v5949_v53 = vld [vmem:[#allocation152_spill] sm:$0xff]  ;;  %v5950_v26 = vld [vmem:[#allocation162_spill] sm:$0xff] }
 0x1c5   : > { %v1482_v39 = vadd.f32 %v5942_v6, %v1414_v63  ;;  %v1483_v40 = vadd.f32 %v5943_v28, %v1415_v24  ;;  %v1484_v58 = vadd.f32 %v5944_v55, %v1416_v57  ;;  %v5945_v52 = vld [vmem:[#allocation127_spill] sm:$0xff]  ;;  %v1487_v16 = vadd.f32 %v5947_v29, %v1419_v59  ;;  %v5951_v62 = vld [vmem:[#allocation145_spill] sm:$0xff]  ;;  %v5955_v2 = vld [vmem:[#allocation164_spill] sm:$0xff] }
 0x1c6   : > { %v1485_v54 = vadd.f32 %v5945_v52, %v1417_v14  ;;  %v5946_v23 = vld [vmem:[#allocation139_spill] sm:$0xff]  ;;  %v1488_v10 = vadd.f32 %v5948_v37, %v1420_v60  ;;  %v1489_v61 = vadd.f32 %v5949_v53, %v1421_v46  ;;  %v1490_v11 = vadd.f32 %v5950_v26, %v1422_v18  ;;  %v5952_v34 = vld [vmem:[#allocation153_spill] sm:$0xff]  ;;  %v5956_v3 = vld [vmem:[#allocation174_spill] sm:$0xff] }
 0x1c7   : > { %v1486_v44 = vadd.f32 %v5946_v23, %v1418_v35  ;;  %v1491_v13 = vadd.f32 %v5951_v62, %v1423_v19  ;;  %v1492_v63 = vadd.f32 %v5952_v34, %v1424_v12  ;;  %v5953_v30 = vld [vmem:[#allocation173_spill] sm:$0xff]  ;;  %v1495_v14 = vadd.f32 %v5955_v2, %v1427_v36  ;;  %v5957_v22 = vld [vmem:[#allocation172_spill] sm:$0xff]  ;;  %v5958_v59 = vld [vmem:[#allocation147_spill] sm:$0xff] }
 0x1c8   : > { %v1493_v24 = vadd.f32 %v5953_v30, %v1425_v50  ;;  %v5954_v31 = vld [vmem:[#allocation181_spill] sm:$0xff]  ;;  %v1496_v35 = vadd.f32 %v5956_v3, %v1428_v48  ;;  %v4756_v42 = vmul.f32 %v5958_v59, %v5957_v22  ;;  %v5960_v60 = vld [vmem:[#allocation34_spill] sm:$0xff]  ;;  %v5962_v18 = vld [vmem:[#allocation28_spill] sm:$0xff] }
 0x1c9   : > { %v1494_v57 = vadd.f32 %v5954_v31, %v1426_v0  ;;  %v5961_v46 = vld [vmem:[#allocation5_spill] sm:$0xff]  ;;  %v5965_v56 = vld [vmem:[#allocation50_spill] sm:$0xff]  ;;  %v5966_v48 = vld [vmem:[#allocation79_spill] sm:$0xff] }
 0x1ca   : > { %5959 = vst [vmem:[#allocation109_spill] sm:$0xff] %v4756_v42  ;;  %v1512_v49 = vmul.f32 %v5961_v46, %v5960_v60  ;;  %v1514_v19 = vmul.f32 %v5961_v46, %v5962_v18  ;;  %v5963_v51 = vld [vmem:[#allocation25_spill] sm:$0xff]  ;;  %v1520_v36 = vmul.f32 %v5961_v46, %v5965_v56  ;;  %v1522_v21 = vmul.f32 %v5961_v46, %v5966_v48  ;;  %v5967_v33 = vld [vmem:[#allocation76_spill] sm:$0xff]  ;;  %v5968_v28 = vld [vmem:[#allocation150_spill] sm:$0xff] }
 0x1cb   : > { %v1516_v12 = vmul.f32 %v5961_v46, %v5963_v51  ;;  %v5964_v50 = vld [vmem:[#allocation53_spill] sm:$0xff]  ;;  %v1524_v6 = vmul.f32 %v5961_v46, %v5967_v33  ;;  %v1526_v55 = vmul.f32 %v5961_v46, %v5968_v28  ;;  %v5969_v52 = vld [vmem:[#allocation144_spill] sm:$0xff]  ;;  %v5970_v29 = vld [vmem:[#allocation31_spill] sm:$0xff]  ;;  %v1538_v2 = vmul.f32 %v5961_v46, %v4756_v42 }
 0x1cc   : > { %v1518_v0 = vmul.f32 %v5961_v46, %v5964_v50  ;;  %v1528_v23 = vmul.f32 %v5961_v46, %v5969_v52  ;;  %v1530_v37 = vmul.f32 %v5961_v46, %v5970_v29  ;;  %v5971_v53 = vld [vmem:[#allocation58_spill] sm:$0xff]  ;;  %v5972_v62 = vld [vmem:[#allocation55_spill] sm:$0xff]  ;;  %v5974_v3 = vld [vmem:[#allocation13_spill] sm:$0xff]  ;;  %v1544_v50 = vadd.f32 %v1512_v49, %v1470_v38 }
 0x1cd   : > { %v1532_v26 = vmul.f32 %v5961_v46, %v5971_v53  ;;  %v1534_v34 = vmul.f32 %v5961_v46, %v5972_v62  ;;  %v5973_v30 = vld [vmem:[#allocation87_spill] sm:$0xff]  ;;  %v5975_v22 = vld [vmem:[#allocation24_spill] sm:$0xff]  ;;  %v5977_v33 = vld [vmem:[#allocation161_spill] sm:$0xff]  ;;  %v1546_v18 = vadd.f32 %v1514_v19, %v1472_v47  ;;  %v1548_v4 = vadd.f32 %v1516_v12, %v1474_v43 }
 0x1ce   : > { %v1536_v31 = vmul.f32 %v5961_v46, %v5973_v30  ;;  %v1539_v59 = vadd.f32 %v5975_v22, %v5974_v3  ;;  %v5976_v28 = vld [vmem:[#allocation19_spill] sm:$0xff]  ;;  %v1542_v48 = vadd.f32 %v5977_v33, %v1468_v20  ;;  %v5978_v29 = vld [vmem:[#allocation46_spill] sm:$0xff]  ;;  %v5980_v62 = vld [vmem:[#allocation72_spill] sm:$0xff]  ;;  %v1550_v42 = vadd.f32 %v1518_v0, %v1476_v15 }
 0x1cf   : > { %v1541_v52 = vadd.f32 %v5976_v28, %v1467_v25  ;;  %v1543_v56 = vadd.f32 %v5978_v29, %v1469_v7  ;;  %v5979_v53 = vld [vmem:[#allocation39_spill] sm:$0xff]  ;;  %v1547_v60 = vadd.f32 %v5980_v62, %v1473_v32  ;;  %v5981_v30 = vld [vmem:[#allocation65_spill] sm:$0xff]  ;;  %v1552_v22 = vadd.f32 %v1520_v36, %v1478_v9 }
 0x1d0   : > { %v1545_v51 = vadd.f32 %v5979_v53, %v1471_v41  ;;  %v1549_v1 = vadd.f32 %v5981_v30, %v1475_v5  ;;  %v5982_v46 = vld [vmem:[#allocation97_spill] sm:$0xff]  ;;  %v1554_v20 = vadd.f32 %v1522_v21, %v1480_v45  ;;  %v5984_v33 = vld [vmem:[#allocation119_spill] sm:$0xff]  ;;  %v1556_v29 = vadd.f32 %v1524_v6, %v1482_v39  ;;  %v5986_v53 = vld [vmem:[#allocation140_spill] sm:$0xff] }
 0x1d1   : > { %v1551_v3 = vadd.f32 %v5982_v46, %v1477_v27  ;;  %v5983_v25 = vld [vmem:[#allocation89_spill] sm:$0xff]  ;;  %v1555_v7 = vadd.f32 %v5984_v33, %v1481_v8  ;;  %v5985_v38 = vld [vmem:[#allocation111_spill] sm:$0xff]  ;;  %v1558_v41 = vadd.f32 %v1526_v55, %v1484_v58  ;;  %v1559_v47 = vadd.f32 %v5986_v53, %v1485_v54  ;;  %v5988_v5 = vld [vmem:[#allocation166_spill] sm:$0xff] }
 0x1d2   : > { %v1553_v28 = vadd.f32 %v5983_v25, %v1479_v17  ;;  %v1557_v49 = vadd.f32 %v5985_v38, %v1483_v40  ;;  %v1560_v19 = vadd.f32 %v1528_v23, %v1486_v44  ;;  %v5987_v32 = vld [vmem:[#allocation133_spill] sm:$0xff]  ;;  %v1562_v12 = vadd.f32 %v1530_v37, %v1488_v10  ;;  %v5989_v27 = vld [vmem:[#allocation156_spill] sm:$0xff]  ;;  %v5990_v17 = vld [vmem:[#allocation183_spill] sm:$0xff] }
 0x1d3   : > { %v1561_v43 = vadd.f32 %v5987_v32, %v1487_v16  ;;  %v1563_v15 = vadd.f32 %v5988_v5, %v1489_v61  ;;  %v1564_v0 = vadd.f32 %v1532_v26, %v1490_v11  ;;  %v1565_v9 = vadd.f32 %v5989_v27, %v1491_v13  ;;  %v5991_v8 = vld [vmem:[#allocation177_spill] sm:$0xff]  ;;  %v5994_v58 = vld [vmem:[#allocation179_spill] sm:$0xff]  ;;  %v5995_v54 = vld [vmem:[#allocation6_spill] sm:$0xff] }
 0x1d4   : > { %v1566_v36 = vadd.f32 %v1534_v34, %v1492_v63  ;;  %v1567_v45 = vadd.f32 %v5990_v17, %v1493_v24  ;;  %v1568_v21 = vadd.f32 %v1536_v31, %v1494_v57  ;;  %v4804_v39 = vadd.f32 %v5991_v8, %v1495_v14  ;;  %v5996_v6 = vld [vmem:[#allocation151_spill] sm:$0xff]  ;;  %v5997_v10 = vld [vmem:[#allocation30_spill] sm:$0xff]  ;;  %v5998_v11 = vld [vmem:[#allocation56_spill] sm:$0xff] }
 0x1d5   : > { %v4806_v40 = vadd.f32 %v1538_v2, %v1496_v35  ;;  %v1602_v44 = vmul.f32 %v5995_v54, %v5994_v58  ;;  %v1577_v16 = vmul.f32 %v5995_v54, %v5996_v6  ;;  %v1579_v61 = vmul.f32 %v5995_v54, %v5997_v10  ;;  %v5999_v63 = vld [vmem:[#allocation54_spill] sm:$0xff]  ;;  %v6000_v57 = vld [vmem:[#allocation184_spill] sm:$0xff]  ;;  %v6001_v35 = vld [vmem:[#allocation185_spill] sm:$0xff] }
 0x1d6   : > { %5992 = vst [vmem:[#allocation102_spill] sm:$0xff] %v4804_v39  ;;  %v1581_v13 = vmul.f32 %v5995_v54, %v5998_v11  ;;  %v1583_v24 = vmul.f32 %v5995_v54, %v5999_v63  ;;  %v1585_v14 = vmul.f32 %v5995_v54, %v6000_v57  ;;  %v1587_v55 = vmul.f32 %v5995_v54, %v6001_v35  ;;  %v6002_v23 = vld [vmem:[#allocation186_spill] sm:$0xff]  ;;  %v6003_v26 = vld [vmem:[#allocation187_spill] sm:$0xff]  ;;  %v6004_v34 = vld [vmem:[#allocation188_spill] sm:$0xff] }
 0x1d7   : > { %5993 = vst [vmem:[#allocation126_spill] sm:$0xff] %v4806_v40  ;;  %v1589_v37 = vmul.f32 %v5995_v54, %v6002_v23  ;;  %v1591_v62 = vmul.f32 %v5995_v54, %v6003_v26  ;;  %v1593_v30 = vmul.f32 %v5995_v54, %v6004_v34  ;;  %v6005_v31 = vld [vmem:[#allocation189_spill] sm:$0xff]  ;;  %v6006_v46 = vld [vmem:[#allocation190_spill] sm:$0xff]  ;;  %v6007_v33 = vld [vmem:[#allocation191_spill] sm:$0xff]  ;;  %v1609_v11 = vadd.f32 %v1577_v16, %v1541_v52 }
 0x1d8   : > { %v1595_v2 = vmul.f32 %v5995_v54, %v6005_v31  ;;  %v1597_v25 = vmul.f32 %v5995_v54, %v6006_v46  ;;  %v1599_v38 = vmul.f32 %v5995_v54, %v6007_v33  ;;  %v6008_v53 = vld [vmem:[#allocation192_spill] sm:$0xff]  ;;  %v6011_v58 = vld [vmem:[#allocation170_spill] sm:$0xff]  ;;  %v6013_v63 = vld [vmem:[#allocation47_spill] sm:$0xff]  ;;  %v1611_v35 = vadd.f32 %v1579_v61, %v1543_v56 }
 0x1d9   : > { %v1601_v32 = vmul.f32 %v5995_v54, %v6008_v53  ;;  %v6009_v5 = vld [vmem:[#allocation80_spill] sm:$0xff]  ;;  %v1610_v57 = vadd.f32 %v6013_v63, %v1542_v48  ;;  %v6014_v23 = vld [vmem:[#allocation41_spill] sm:$0xff]  ;;  %v1613_v34 = vadd.f32 %v1581_v13, %v1545_v51  ;;  %v1615_v33 = vadd.f32 %v1583_v24, %v1547_v60  ;;  %v6016_v40 = vld [vmem:[#allocation67_spill] sm:$0xff] }
 0x1da   : > { %v1603_v27 = vmul.f32 %v5995_v54, %v6009_v5  ;;  %v6010_v17 = vld [vmem:[#allocation176_spill] sm:$0xff]  ;;  %v1612_v26 = vadd.f32 %v6014_v23, %v1544_v50  ;;  %v6015_v31 = vld [vmem:[#allocation73_spill] sm:$0xff]  ;;  %v1616_v53 = vadd.f32 %v6016_v40, %v1548_v4  ;;  %v1617_v39 = vadd.f32 %v1585_v14, %v1549_v1  ;;  %v6017_v5 = vld [vmem:[#allocation98_spill] sm:$0xff] }
 0x1db   : > { %v1607_v8 = vadd.f32 %v6010_v17, %v1539_v59  ;;  %v6012_v6 = vld [vmem:[#allocation20_spill] sm:$0xff]  ;;  %v1614_v46 = vadd.f32 %v6015_v31, %v1546_v18  ;;  %v1618_v54 = vadd.f32 %v6017_v5, %v1550_v42  ;;  %v1619_v17 = vadd.f32 %v1587_v55, %v1551_v3  ;;  %v6018_v59 = vld [vmem:[#allocation90_spill] sm:$0xff]  ;;  %v6021_v50 = vld [vmem:[#allocation141_spill] sm:$0xff] }
 0x1dc   : > { %v1608_v10 = vadd.f32 %v6012_v6, %v6011_v58  ;;  %v1620_v6 = vadd.f32 %v6018_v59, %v1552_v22  ;;  %v1621_v58 = vadd.f32 %v1589_v37, %v1553_v28  ;;  %v6019_v16 = vld [vmem:[#allocation120_spill] sm:$0xff]  ;;  %v1623_v48 = vadd.f32 %v1591_v62, %v1555_v7  ;;  %v6022_v18 = vld [vmem:[#allocation135_spill] sm:$0xff]  ;;  %v6024_v42 = vld [vmem:[#allocation157_spill] sm:$0xff] }
 0x1dd   : > { %v1622_v52 = vadd.f32 %v6019_v16, %v1554_v20  ;;  %v6020_v63 = vld [vmem:[#allocation112_spill] sm:$0xff]  ;;  %v1625_v61 = vadd.f32 %v1593_v30, %v1557_v49  ;;  %v1626_v51 = vadd.f32 %v6021_v50, %v1558_v41  ;;  %v1627_v13 = vadd.f32 %v1595_v2, %v1559_v47  ;;  %v6023_v4 = vld [vmem:[#allocation167_spill] sm:$0xff]  ;;  %v6025_v55 = vld [vmem:[#allocation158_spill] sm:$0xff] }
 0x1de   : > { %v1624_v56 = vadd.f32 %v6020_v63, %v1556_v29  ;;  %v1628_v60 = vadd.f32 %v6022_v18, %v1560_v19  ;;  %v1629_v24 = vadd.f32 %v1597_v25, %v1561_v43  ;;  %v1630_v1 = vadd.f32 %v6023_v4, %v1562_v12  ;;  %v6026_v20 = vld [vmem:[#allocation3_spill] sm:$0xff]  ;;  %v6028_v49 = vld [vmem:[#allocation169_spill] sm:$0xff]  ;;  %v6029_v47 = vld [vmem:[#allocation178_spill] sm:$0xff] }
 0x1df   : > { %v1631_v40 = vadd.f32 %v1599_v38, %v1563_v15  ;;  %v1632_v3 = vadd.f32 %v6024_v42, %v1564_v0  ;;  %v1633_v14 = vadd.f32 %v1601_v32, %v1565_v9  ;;  %v1634_v22 = vadd.f32 %v1602_v44, %v1566_v36  ;;  %v6027_v37 = vld [vmem:[#allocation159_spill] sm:$0xff]  ;;  %v6030_v43 = vld [vmem:[#allocation10_spill] sm:$0xff]  ;;  %v6032_v30 = vld [vmem:[#allocation32_spill] sm:$0xff] }
 0x1e0   : > { %v1635_v28 = vadd.f32 %v1603_v27, %v1567_v45  ;;  %v1669_v7 = vmul.f32 %v6026_v20, %v6025_v55  ;;  %v1672_v29 = vmul.f32 %v6026_v20, %v6027_v37  ;;  %v1670_v41 = vmul.f32 %v6026_v20, %v6028_v49  ;;  %v6031_v12 = vld [vmem:[#allocation15_spill] sm:$0xff]  ;;  %v6033_v9 = vld [vmem:[#allocation48_spill] sm:$0xff]  ;;  %v6037_v27 = vld [vmem:[#allocation74_spill] sm:$0xff] }
 0x1e1   : > { %v1636_v19 = vadd.f32 %v6029_v47, %v1568_v21  ;;  %v1674_v62 = vadd.f32 %v6030_v43, %v1607_v8  ;;  %v1675_v15 = vadd.f32 %v6031_v12, %v1608_v10  ;;  %v1676_v0 = vadd.f32 %v6032_v30, %v1609_v11  ;;  %v6034_v45 = vld [vmem:[#allocation27_spill] sm:$0xff]  ;;  %v6035_v2 = vld [vmem:[#allocation36_spill] sm:$0xff]  ;;  %v6039_v59 = vld [vmem:[#allocation62_spill] sm:$0xff] }
 0x1e2   : > { %v1677_v36 = vadd.f32 %v6033_v9, %v1610_v57  ;;  %v1678_v44 = vadd.f32 %v6034_v45, %v1611_v35  ;;  %v1679_v25 = vadd.f32 %v6035_v2, %v1612_v26  ;;  %v6036_v38 = vld [vmem:[#allocation60_spill] sm:$0xff]  ;;  %v1681_v23 = vadd.f32 %v6037_v27, %v1614_v46  ;;  %v6040_v16 = vld [vmem:[#allocation82_spill] sm:$0xff]  ;;  %v6043_v18 = vld [vmem:[#allocation85_spill] sm:$0xff] }
 0x1e3   : > { %v1680_v32 = vadd.f32 %v6036_v38, %v1613_v34  ;;  %v6038_v31 = vld [vmem:[#allocation52_spill] sm:$0xff]  ;;  %v1683_v21 = vadd.f32 %v6039_v59, %v1616_v53  ;;  %v1684_v8 = vadd.f32 %v6040_v16, %v1617_v39  ;;  %v6041_v63 = vld [vmem:[#allocation94_spill] sm:$0xff]  ;;  %v1687_v57 = vadd.f32 %v6043_v18, %v1620_v6  ;;  %v6046_v55 = vld [vmem:[#allocation101_spill] sm:$0xff] }
 0x1e4   : > { %v1682_v5 = vadd.f32 %v6038_v31, %v1615_v33  ;;  %v1685_v10 = vadd.f32 %v6041_v63, %v1618_v54  ;;  %v6042_v50 = vld [vmem:[#allocation78_spill] sm:$0xff]  ;;  %v6044_v4 = vld [vmem:[#allocation104_spill] sm:$0xff]  ;;  %v1690_v34 = vadd.f32 %v6046_v55, %v1623_v48  ;;  %v6047_v37 = vld [vmem:[#allocation107_spill] sm:$0xff]  ;;  %v1700_v38 = vadd.f32 %v1669_v7, %v1633_v14 }
 0x1e5   : > { %v1686_v11 = vadd.f32 %v6042_v50, %v1619_v17  ;;  %v1688_v35 = vadd.f32 %v6044_v4, %v1621_v58  ;;  %v6045_v42 = vld [vmem:[#allocation116_spill] sm:$0xff]  ;;  %v1691_v46 = vadd.f32 %v6047_v37, %v1624_v56  ;;  %v6049_v47 = vld [vmem:[#allocation142_spill] sm:$0xff]  ;;  %v6050_v43 = vld [vmem:[#allocation123_spill] sm:$0xff]  ;;  %v1701_v48 = vadd.f32 %v1670_v41, %v1634_v22 }
 0x1e6   : > { %v1689_v26 = vadd.f32 %v6045_v42, %v1622_v52  ;;  %v6048_v49 = vld [vmem:[#allocation128_spill] sm:$0xff]  ;;  %v1693_v53 = vadd.f32 %v6049_v47, %v1626_v51  ;;  %v1694_v39 = vadd.f32 %v6050_v43, %v1627_v13  ;;  %v6051_v12 = vld [vmem:[#allocation130_spill] sm:$0xff]  ;;  %v6052_v30 = vld [vmem:[#allocation7_spill] sm:$0xff]  ;;  %v1703_v59 = vadd.f32 %v1672_v29, %v1636_v19 }
 0x1e7   : > { %v1692_v33 = vadd.f32 %v6048_v49, %v1625_v61  ;;  %v1695_v54 = vadd.f32 %v6051_v12, %v1628_v60  ;;  %v1696_v17 = vadd.f32 %v6052_v30, %v1629_v24  ;;  %v6053_v9 = vld [vmem:[#allocation163_spill] sm:$0xff]  ;;  %v6054_v45 = vld [vmem:[#allocation146_spill] sm:$0xff]  ;;  %v6056_v61 = vld [vmem:[#allocation8_spill] sm:$0xff] }
 0x1e8   : > { %v1697_v6 = vadd.f32 %v6053_v9, %v1630_v1  ;;  %v1698_v58 = vadd.f32 %v6054_v45, %v1631_v40  ;;  %v6055_v2 = vld [vmem:[#allocation155_spill] sm:$0xff]  ;;  %v6057_v27 = vld [vmem:[#allocation160_spill] sm:$0xff]  ;;  %v6064_v41 = vld [vmem:[#allocation25_spill] sm:$0xff] }
 0x1e9   : > { %v1699_v52 = vadd.f32 %v6055_v2, %v1632_v3  ;;  %v3036_v56 = vld [vmem:[%s5530_s3 + $0x8] ss:$0 sm:$0xff]  ;;  %v6058_v31 = vld [vmem:[#allocation168_spill] sm:$0xff]  ;;  %v6062_v3 = vld [vmem:[#allocation34_spill] sm:$0xff] }
 0x1ea   : > { %v1734_v51 = vmul.f32 %v3036_v56, %v6056_v61  ;;  %v1732_v13 = vmul.f32 %v3036_v56, %v6057_v27  ;;  %v1702_v60 = vadd.f32 %v6058_v31, %v1635_v28  ;;  %v6059_v24 = vld [vmem:[#allocation171_spill] sm:$0xff]  ;;  %v6060_v1 = vld [vmem:[#allocation180_spill] sm:$0xff]  ;;  %v1713_v14 = vmul.f32 %v3036_v56, %v6062_v3  ;;  %v6065_v4 = vld [vmem:[#allocation53_spill] sm:$0xff] }
 0x1eb   : > { %v1738_v16 = vmul.f32 %v3036_v56, %v6059_v24  ;;  %v1736_v63 = vmul.f32 %v3036_v56, %v6060_v1  ;;  %v6061_v40 = vld [vmem:[#allocation11_spill] sm:$0xff]  ;;  %v6063_v22 = vld [vmem:[#allocation28_spill] sm:$0xff]  ;;  %v1717_v18 = vmul.f32 %v3036_v56, %v6064_v41  ;;  %v1719_v42 = vmul.f32 %v3036_v56, %v6065_v4  ;;  %v6066_v55 = vld [vmem:[#allocation50_spill] sm:$0xff] }
 0x1ec   : > { %v1711_v50 = vmul.f32 %v3036_v56, %v6061_v40  ;;  %v1715_v7 = vmul.f32 %v3036_v56, %v6063_v22  ;;  %v1721_v37 = vmul.f32 %v3036_v56, %v6066_v55  ;;  %v6067_v49 = vld [vmem:[#allocation79_spill] sm:$0xff]  ;;  %v6068_v28 = vld [vmem:[#allocation76_spill] sm:$0xff]  ;;  %v6069_v19 = vld [vmem:[#allocation150_spill] sm:$0xff] }
 0x1ed   : > { %v1723_v47 = vmul.f32 %v3036_v56, %v6067_v49  ;;  %v1725_v29 = vmul.f32 %v3036_v56, %v6068_v28  ;;  %v1727_v43 = vmul.f32 %v3036_v56, %v6069_v19  ;;  %v6070_v12 = vld [vmem:[#allocation144_spill] sm:$0xff]  ;;  %v6071_v9 = vld [vmem:[#allocation31_spill] sm:$0xff]  ;;  %v6072_v2 = vld [vmem:[#allocation58_spill] sm:$0xff]  ;;  %v1745_v28 = vadd.f32 %v1713_v14, %v1677_v36 }
 0x1ee   : > { %v1729_v30 = vmul.f32 %v3036_v56, %v6070_v12  ;;  %v1731_v45 = vmul.f32 %v3036_v56, %v6071_v9  ;;  %v1733_v61 = vmul.f32 %v3036_v56, %v6072_v2  ;;  %v6073_v27 = vld [vmem:[#allocation55_spill] sm:$0xff]  ;;  %v6075_v40 = vld [vmem:[#allocation109_spill] sm:$0xff]  ;;  %v1743_v4 = vadd.f32 %v1711_v50, %v1675_v15  ;;  %v6078_v20 = vld [vmem:[#allocation42_spill] sm:$0xff] }
 0x1ef   : > { %v1735_v31 = vmul.f32 %v3036_v56, %v6073_v27  ;;  %v6074_v24 = vld [vmem:[#allocation87_spill] sm:$0xff]  ;;  %v1739_v3 = vmul.f32 %v3036_v56, %v6075_v40  ;;  %v6076_v22 = vld [vmem:[#allocation21_spill] sm:$0xff]  ;;  %v1746_v19 = vadd.f32 %v6078_v20, %v1678_v44  ;;  %v1747_v12 = vadd.f32 %v1715_v7, %v1679_v25 }
 0x1f0   : > { %v1737_v1 = vmul.f32 %v3036_v56, %v6074_v24  ;;  %v1742_v41 = vadd.f32 %v6076_v22, %v1674_v62  ;;  %v6077_v55 = vld [vmem:[#allocation49_spill] sm:$0xff]  ;;  %v6079_v9 = vld [vmem:[#allocation75_spill] sm:$0xff]  ;;  %v1749_v27 = vadd.f32 %v1717_v18, %v1681_v23  ;;  %v6080_v24 = vld [vmem:[#allocation68_spill] sm:$0xff]  ;;  %v1751_v22 = vadd.f32 %v1719_v42, %v1683_v21 }
 0x1f1   : > { %v1744_v49 = vadd.f32 %v6077_v55, %v1676_v0  ;;  %v1748_v2 = vadd.f32 %v6079_v9, %v1680_v32  ;;  %v1750_v40 = vadd.f32 %v6080_v24, %v1682_v5  ;;  %v6081_v62 = vld [vmem:[#allocation99_spill] sm:$0xff]  ;;  %v1753_v50 = vadd.f32 %v1721_v37, %v1685_v10  ;;  %v6083_v36 = vld [vmem:[#allocation121_spill] sm:$0xff]  ;;  %v6086_v5 = vld [vmem:[#allocation136_spill] sm:$0xff] }
 0x1f2   : > { %v1752_v15 = vadd.f32 %v6081_v62, %v1684_v8  ;;  %v6082_v0 = vld [vmem:[#allocation91_spill] sm:$0xff]  ;;  %v1755_v14 = vadd.f32 %v1723_v47, %v1687_v57  ;;  %v1756_v20 = vadd.f32 %v6083_v36, %v1688_v35  ;;  %v1757_v44 = vadd.f32 %v1725_v29, %v1689_v26  ;;  %v6084_v7 = vld [vmem:[#allocation113_spill] sm:$0xff]  ;;  %v6087_v47 = vld [vmem:[#allocation4_spill] sm:$0xff] }
 0x1f3   : > { %v1754_v55 = vadd.f32 %v6082_v0, %v1686_v11  ;;  %v1758_v25 = vadd.f32 %v6084_v7, %v1690_v34  ;;  %v1759_v9 = vadd.f32 %v1727_v43, %v1691_v46  ;;  %v6085_v32 = vld [vmem:[#allocation143_spill] sm:$0xff]  ;;  %v1761_v23 = vadd.f32 %v1729_v30, %v1693_v53  ;;  %v6088_v35 = vld [vmem:[#allocation6_spill] sm:$0xff] }
 0x1f4   : > { %v1760_v18 = vadd.f32 %v6085_v32, %v1692_v33  ;;  %v1762_v24 = vadd.f32 %v6086_v5, %v1694_v39  ;;  %v1763_v21 = vadd.f32 %v1731_v45, %v1695_v54  ;;  %v1764_v42 = vadd.f32 %v1732_v13, %v1696_v17  ;;  %v6089_v46 = vld [vmem:[#allocation102_spill] sm:$0xff]  ;;  %v6091_v43 = vld [vmem:[#allocation3_spill] sm:$0xff] }
 0x1f5   : > { %v1765_v8 = vadd.f32 %v1733_v61, %v1697_v6  ;;  %v1766_v62 = vadd.f32 %v1734_v51, %v1698_v58  ;;  %v1767_v10 = vadd.f32 %v1735_v31, %v1699_v52  ;;  %v1768_v37 = vadd.f32 %v1736_v63, %v1700_v38  ;;  %v6090_v33 = vld [vmem:[#allocation126_spill] sm:$0xff]  ;;  %v6092_v58 = vld [vmem:[#allocation149_spill] sm:$0xff] }
 0x1f6   : > { %v1769_v0 = vadd.f32 %v1737_v1, %v1701_v48  ;;  %v1770_v11 = vadd.f32 %v1738_v16, %v1702_v60  ;;  %v1771_v57 = vadd.f32 %v1739_v3, %v1703_v59  ;;  %v1605_v26 = vmul.f32 %v6088_v35, %v6087_v47  ;;  %v2733_v38 = vld [vmem:[%s5531_s4] ss:$0 sm:$0xff] }
 0x1f7   : > { %v1606_v34 = vmul.f32 0.0, %v6088_v35  ;;  %v1673_v39 = vmul.f32 0.0, %v6091_v43  ;;  %v1740_v6 = vmul.f32 0.0, %v3036_v56  ;;  %v1741_v52 = vmul.f32 %v3036_v56, %v6092_v58 }
 0x1f8   : > { %v1637_v29 = vadd.f32 %v1605_v26, %v6089_v46  ;;  %v4930_v13 = vadd.f32 %v2733_v38, %v1742_v41  ;;  %v4932_v60 = vadd.f32 %v2733_v38, %v1743_v4  ;;  %v4934_v59 = vadd.f32 %v2733_v38, %v1744_v49 }
 0x1f9   : > { %v1638_v53 = vadd.f32 %v1606_v34, %v6090_v33  ;;  %v4936_v16 = vadd.f32 %v2733_v38, %v1745_v28  ;;  %v4938_v63 = vadd.f32 %v2733_v38, %v1746_v19  ;;  %v4940_v30 = vadd.f32 %v2733_v38, %v1747_v12 }
 0x1fa   : > { %v1704_v54 = vadd.f32 %v1673_v39, %v1637_v29  ;;  %6093 = vst [vmem:[#allocation124_spill] sm:$0xff] %v4930_v13  ;;  %6094 = vst [vmem:[#allocation16_spill] sm:$0xff] %v4932_v60  ;;  %v4942_v45 = vadd.f32 %v2733_v38, %v1748_v2  ;;  %v4944_v56 = vadd.f32 %v2733_v38, %v1749_v27 }
 0x1fb   : > { %v1705_v17 = vadd.f32 %v1673_v39, %v1638_v53  ;;  %6095 = vst [vmem:[#allocation148_spill] sm:$0xff] %v4940_v30  ;;  %v4946_v61 = vadd.f32 %v2733_v38, %v1750_v40  ;;  %v4948_v31 = vadd.f32 %v2733_v38, %v1751_v22  ;;  %v4950_v1 = vadd.f32 %v2733_v38, %v1752_v15 }
 0x1fc   : > { %v1772_v48 = vadd.f32 %v1740_v6, %v1704_v54  ;;  %6096 = vst [vmem:[#allocation17_spill] sm:$0xff] %v4942_v45  ;;  %v4952_v3 = vadd.f32 %v2733_v38, %v1753_v50  ;;  %v4954_v41 = vadd.f32 %v2733_v38, %v1754_v55  ;;  %v4956_v4 = vadd.f32 %v2733_v38, %v1755_v14 }
 0x1fd   : > { %v1773_v51 = vadd.f32 %v1741_v52, %v1705_v17  ;;  %v4958_v49 = vadd.f32 %v2733_v38, %v1756_v20  ;;  %v4960_v28 = vadd.f32 %v2733_v38, %v1757_v44  ;;  %v4962_v19 = vadd.f32 %v2733_v38, %v1758_v25 }
 0x1fe   : > { %v4964_v12 = vadd.f32 %v2733_v38, %v1759_v9  ;;  %v4966_v2 = vadd.f32 %v2733_v38, %v1760_v18  ;;  %v1813_v27 = vmul.f32 %v4930_v13, %v4930_v13  ;;  %v4970_v40 = vadd.f32 %v2733_v38, %v1761_v23 }
 0x1ff   : > { %v4972_v22 = vadd.f32 %v2733_v38, %v1762_v24  ;;  %v4974_v15 = vadd.f32 %v2733_v38, %v1763_v21  ;;  %v1814_v50 = vmul.f32 %v4932_v60, %v4932_v60  ;;  %v4978_v55 = vadd.f32 %v2733_v38, %v1764_v42 }
 0x200   : > { %v4980_v14 = vadd.f32 %v2733_v38, %v1765_v8  ;;  %v4982_v36 = vadd.f32 %v2733_v38, %v1766_v62  ;;  %v4984_v20 = vadd.f32 %v2733_v38, %v1767_v10  ;;  %v4986_v44 = vadd.f32 %v2733_v38, %v1768_v37 }
 0x201   : > { %v4988_v7 = vadd.f32 %v2733_v38, %v1769_v0  ;;  %v4990_v25 = vadd.f32 %v2733_v38, %v1770_v11  ;;  %v1815_v9 = vmul.f32 %v4934_v59, %v4934_v59  ;;  %v4994_v32 = vadd.f32 %v2733_v38, %v1771_v57 }
 0x202   : > { %6097 = vst [vmem:[#allocation12_spill] sm:$0xff] %v4980_v14  ;;  %6098 = vst [vmem:[#allocation43_spill] sm:$0xff] %v4982_v36  ;;  %v4996_v18 = vadd.f32 %v2733_v38, %v1772_v48  ;;  %v4998_v23 = vadd.f32 %v2733_v38, %v1773_v51  ;;  %v1845_v5 = vmul.f32 %v1813_v27, %v4930_v13 }
 0x203   : > { %6099 = vst [vmem:[#allocation40_spill] sm:$0xff] %v4984_v20  ;;  %6100 = vst [vmem:[#allocation37_spill] sm:$0xff] %v4988_v7  ;;  %v1816_v24 = vmul.f32 %v4936_v16, %v4936_v16  ;;  %v1817_v21 = vmul.f32 %v4938_v63, %v4938_v63  ;;  %v1818_v42 = vmul.f32 %v4940_v30, %v4940_v30 }
 0x204   : > { %6101 = vst [vmem:[#allocation33_spill] sm:$0xff] %v4990_v25  ;;  %6102 = vst [vmem:[#allocation69_spill] sm:$0xff] %v4994_v32  ;;  %v1846_v8 = vmul.f32 %v1814_v50, %v4932_v60  ;;  %v1819_v62 = vmul.f32 %v4942_v45, %v4942_v45  ;;  %v1820_v10 = vmul.f32 %v4944_v56, %v4944_v56  ;;  %v1877_v29 = vmul.f32 0.044715, %v1845_v5 }
 0x205   : > { %6103 = vst [vmem:[#allocation66_spill] sm:$0xff] %v4996_v18  ;;  %6104 = vst [vmem:[#allocation63_spill] sm:$0xff] %v4998_v23  ;;  %v1821_v37 = vmul.f32 %v4946_v61, %v4946_v61  ;;  %v1822_v0 = vmul.f32 %v4948_v31, %v4948_v31  ;;  %v1823_v11 = vmul.f32 %v4950_v1, %v4950_v1 }
 0x206   : > { %v1824_v57 = vmul.f32 %v4952_v3, %v4952_v3  ;;  %v1825_v47 = vmul.f32 %v4954_v41, %v4954_v41  ;;  %v1847_v35 = vmul.f32 %v1815_v9, %v4934_v59  ;;  %v1826_v26 = vmul.f32 %v4956_v4, %v4956_v4 }
 0x207   : > { %v1827_v34 = vmul.f32 %v4958_v49, %v4958_v49  ;;  %v1828_v46 = vmul.f32 %v4960_v28, %v4960_v28  ;;  %v1829_v33 = vmul.f32 %v4962_v19, %v4962_v19  ;;  %v1830_v53 = vmul.f32 %v4964_v12, %v4964_v12 }
 0x208   : > { %v1848_v43 = vmul.f32 %v1816_v24, %v4936_v16  ;;  %v1878_v39 = vmul.f32 0.044715, %v1846_v8  ;;  %v1831_v54 = vmul.f32 %v4966_v2, %v4966_v2  ;;  %v1832_v17 = vmul.f32 %v4970_v40, %v4970_v40 }
 0x209   : > { %v1833_v6 = vmul.f32 %v4972_v22, %v4972_v22  ;;  %v1834_v58 = vmul.f32 %v4974_v15, %v4974_v15  ;;  %v1835_v52 = vmul.f32 %v4978_v55, %v4978_v55  ;;  %v1836_v38 = vmul.f32 %v4980_v14, %v4980_v14 }
 0x20a   : > { %v1849_v48 = vmul.f32 %v1817_v21, %v4938_v63  ;;  %v1879_v51 = vmul.f32 0.044715, %v1847_v35  ;;  %v1837_v27 = vmul.f32 %v4982_v36, %v4982_v36  ;;  %v1838_v50 = vmul.f32 %v4984_v20, %v4984_v20 }
 0x20b   : > { %v1839_v9 = vmul.f32 %v4986_v44, %v4986_v44  ;;  %v1909_v5 = vadd.f32 %v1877_v29, %v4930_v13  ;;  %v1840_v24 = vmul.f32 %v4988_v7, %v4988_v7  ;;  %v1850_v8 = vmul.f32 %v1818_v42, %v4940_v30 }
 0x20c   : > { %v1880_v14 = vmul.f32 0.044715, %v1848_v43  ;;  %v1910_v21 = vadd.f32 %v1878_v39, %v4932_v60  ;;  %v1841_v35 = vmul.f32 %v4990_v25, %v4990_v25  ;;  %v1842_v36 = vmul.f32 %v4994_v32, %v4994_v32 }
 0x20d   : > { %v5064_v20 = vmul.f32 %v4996_v18, %v4996_v18  ;;  %v5068_v29 = vmul.f32 %v4998_v23, %v4998_v23  ;;  %v1851_v13 = vmul.f32 %v1819_v62, %v4942_v45  ;;  %v1852_v42 = vmul.f32 %v1820_v10, %v4944_v56 }
 0x20e   : > { %v1881_v43 = vmul.f32 0.044715, %v1849_v48  ;;  %v1911_v39 = vadd.f32 %v1879_v51, %v4934_v59  ;;  %v1853_v60 = vmul.f32 %v1821_v37, %v4946_v61  ;;  %v1854_v25 = vmul.f32 %v1822_v0, %v4948_v31 }
 0x20f   : > { %6105 = vst [vmem:[#allocation57_spill] sm:$0xff] %v5064_v20  ;;  %6106 = vst [vmem:[#allocation96_spill] sm:$0xff] %v5068_v29  ;;  %v1855_v32 = vmul.f32 %v1823_v11, %v4950_v1  ;;  %v1941_v7 = vmul.f32 0.7978846, %v1909_v5  ;;  %v1856_v20 = vmul.f32 %v1824_v57, %v4952_v3  ;;  %v1882_v18 = vmul.f32 0.044715, %v1850_v8 }
 0x210   : > { %v1912_v23 = vadd.f32 %v1880_v14, %v4936_v16  ;;  %v1942_v29 = vmul.f32 0.7978846, %v1910_v21  ;;  %v1857_v62 = vmul.f32 %v1825_v47, %v4954_v41  ;;  %v1858_v10 = vmul.f32 %v1826_v26, %v4956_v4 }
 0x211   : > { %v1859_v48 = vmul.f32 %v1827_v34, %v4958_v49  ;;  %v1860_v51 = vmul.f32 %v1828_v46, %v4960_v28  ;;  %v1861_v37 = vmul.f32 %v1829_v33, %v4962_v19  ;;  %v1883_v0 = vmul.f32 0.044715, %v1851_v13 }
 0x212   : > { %v1913_v11 = vadd.f32 %v1881_v43, %v4938_v63  ;;  %v1943_v5 = vmul.f32 0.7978846, %v1911_v39  ;;  %v1862_v57 = vmul.f32 %v1830_v53, %v4964_v12  ;;  %v1863_v8 = vmul.f32 %v1831_v54, %v4966_v2  ;;  %v6107_v43 = vld [vmem:[#allocation12_spill] sm:$0xff] }
 0x213   : > { %v1884_v14 = vmul.f32 0.044715, %v1852_v42  ;;  %2965 = vtanh.f32 %v1941_v7  ;;  %v1885_v21 = vmul.f32 0.044715, %v1853_v60  ;;  %v1914_v47 = vadd.f32 %v1882_v18, %v4940_v30  ;;  %v6108_v7 = vld [vmem:[#allocation43_spill] sm:$0xff]  ;;  %v6109_v42 = vld [vmem:[#allocation40_spill] sm:$0xff] }
 0x214   : > { %v1944_v26 = vmul.f32 0.7978846, %v1912_v23  ;;  %2967 = vtanh.f32 %v1942_v29  ;;  %v1864_v34 = vmul.f32 %v1832_v17, %v4970_v40  ;;  %v1865_v46 = vmul.f32 %v1833_v6, %v4972_v22 }
 0x215   : > { %v1866_v13 = vmul.f32 %v1834_v58, %v4974_v15  ;;  %v1867_v33 = vmul.f32 %v1835_v52, %v4978_v55  ;;  %v1868_v39 = vmul.f32 %v1836_v38, %v6107_v43  ;;  %v1915_v53 = vadd.f32 %v1883_v0, %v4942_v45  ;;  %v6110_v52 = vld [vmem:[#allocation37_spill] sm:$0xff] }
 0x216   : > { %v1945_v54 = vmul.f32 0.7978846, %v1913_v11  ;;  %2969 = vtanh.f32 %v1943_v5  ;;  %v1869_v60 = vmul.f32 %v1837_v27, %v6108_v7  ;;  %v1870_v18 = vmul.f32 %v1838_v50, %v6109_v42  ;;  %v6111_v43 = vld [vmem:[#allocation33_spill] sm:$0xff] }
 0x217   : > { %v1886_v23 = vmul.f32 0.044715, %v1854_v25  ;;  %v1916_v29 = vadd.f32 %v1884_v14, %v4944_v56  ;;  %v1887_v17 = vmul.f32 0.044715, %v1855_v32  ;;  %v1917_v6 = vadd.f32 %v1885_v21, %v4946_v61  ;;  %v6112_v11 = vld [vmem:[#allocation69_spill] sm:$0xff] }
 0x218   : > { %v1946_v30 = vmul.f32 0.7978846, %v1914_v47  ;;  %2971 = vtanh.f32 %v1944_v26  ;;  %v1871_v58 = vmul.f32 %v1839_v9, %v4986_v44  ;;  %v1872_v38 = vmul.f32 %v1840_v24, %v6110_v52  ;;  %v6113_v24 = vld [vmem:[#allocation66_spill] sm:$0xff]  ;;  %v6114_v52 = vld [vmem:[#allocation57_spill] sm:$0xff] }
 0x219   : > { %v1873_v0 = vmul.f32 %v1841_v35, %v6111_v43  ;;  %v1874_v5 = vmul.f32 %v1842_v36, %v6112_v11  ;;  %v1888_v45 = vmul.f32 0.044715, %v1856_v20  ;;  %v1889_v27 = vmul.f32 0.044715, %v1857_v62 }
 0x21a   : > { %v1947_v7 = vmul.f32 0.7978846, %v1915_v53  ;;  %2973 = vtanh.f32 %v1945_v54  ;;  %v1890_v25 = vmul.f32 0.044715, %v1858_v10  ;;  %v1891_v50 = vmul.f32 0.044715, %v1859_v48 }
 0x21b   : > { %v1918_v32 = vadd.f32 %v1886_v23, %v4948_v31  ;;  %v1948_v14 = vmul.f32 0.7978846, %v1916_v29  ;;  %v1892_v21 = vmul.f32 0.044715, %v1860_v51  ;;  %v1919_v47 = vadd.f32 %v1887_v17, %v4950_v1 }
 0x21c   : > { %v1949_v26 = vmul.f32 0.7978846, %v1917_v6  ;;  %2975 = vtanh.f32 %v1946_v30  ;;  %v1875_v35 = vmul.f32 %v6114_v52, %v6113_v24  ;;  %v1893_v43 = vmul.f32 0.044715, %v1861_v37  ;;  %v6115_v37 = vld [vmem:[#allocation63_spill] sm:$0xff] }
 0x21d   : > { %v2966_v9 = vpop.eup %2965  ;;  %v1894_v36 = vmul.f32 0.044715, %v1862_v57  ;;  %v1895_v20 = vmul.f32 0.044715, %v1863_v8  ;;  %v1896_v53 = vmul.f32 0.044715, %v1864_v34  ;;  %2977 = vtanh.f32 %v1947_v7 }
 0x21e   : > { %v2968_v62 = vpop.eup %2967  ;;  %v1897_v54 = vmul.f32 0.044715, %v1865_v46  ;;  %v1898_v10 = vmul.f32 0.044715, %v1866_v13  ;;  %v5105_v48 = vmul.f32 0.044715, %v1867_v33  ;;  %v1920_v51 = vadd.f32 %v1888_v45, %v4952_v3 }
 0x21f   : > { %v1950_v23 = vmul.f32 0.7978846, %v1918_v32  ;;  %2979 = vtanh.f32 %v1948_v14  ;;  %v1921_v30 = vadd.f32 %v1889_v27, %v4954_v41  ;;  %v1951_v17 = vmul.f32 0.7978846, %v1919_v47  ;;  %v6116_v57 = vld [vmem:[#allocation96_spill] sm:$0xff] }
 0x220   : > { %v2970_v29 = vpop.eup %2969  ;;  %2981 = vtanh.f32 %v1949_v26  ;;  %v2005_v6 = vadd.f32 1.0, %v2966_v9  ;;  %v1876_v8 = vmul.f32 %v6116_v57, %v6115_v37  ;;  %v5111_v52 = vmul.f32 0.044715, %v1868_v39 }
 0x221   : > { %v5113_v34 = vmul.f32 0.044715, %v1869_v60  ;;  %v2006_v46 = vadd.f32 1.0, %v2968_v62  ;;  %v5115_v33 = vmul.f32 0.044715, %v1870_v18  ;;  %v1922_v27 = vadd.f32 %v1890_v25, %v4956_v4 }
 0x222   : > { %v2972_v13 = vpop.eup %2971  ;;  %v5117_v45 = vmul.f32 0.044715, %v1871_v58  ;;  %v5119_v7 = vmul.f32 0.044715, %v1872_v38  ;;  %v1923_v32 = vadd.f32 %v1891_v50, %v4958_v49  ;;  %v1952_v14 = vmul.f32 0.7978846, %v1920_v51 }
 0x223   : > { %2983 = vtanh.f32 %v1950_v23  ;;  %v2007_v47 = vadd.f32 1.0, %v2970_v29  ;;  %v5123_v39 = vmul.f32 0.044715, %v1873_v0  ;;  %v1953_v60 = vmul.f32 0.7978846, %v1921_v30 }
 0x224   : > { %v2974_v26 = vpop.eup %2973  ;;  %2985 = vtanh.f32 %v1951_v17  ;;  %v2037_v9 = vmul.f32 0.5, %v2005_v6  ;;  %v5125_v62 = vmul.f32 0.044715, %v1874_v5  ;;  %v5127_v18 = vmul.f32 0.044715, %v1875_v35  ;;  %v6117_v17 = vld [vmem:[#allocation124_spill] sm:$0xff] }
 0x225   : > { %v2008_v58 = vadd.f32 1.0, %v2972_v13  ;;  %v2038_v38 = vmul.f32 0.5, %v2006_v46  ;;  %v5129_v37 = vmul.f32 0.044715, %v1876_v8  ;;  %v1924_v25 = vadd.f32 %v1892_v21, %v4960_v28 }
 0x226   : > { %v2976_v57 = vpop.eup %2975  ;;  %v1925_v50 = vadd.f32 %v1893_v43, %v4962_v19  ;;  %v1954_v51 = vmul.f32 0.7978846, %v1922_v27  ;;  %v1955_v23 = vmul.f32 0.7978846, %v1923_v32  ;;  %2987 = vtanh.f32 %v1952_v14  ;;  %v6118_v43 = vld [vmem:[#allocation16_spill] sm:$0xff] }
 0x227   : > { %v2009_v0 = vadd.f32 1.0, %v2974_v26  ;;  %v2039_v29 = vmul.f32 0.5, %v2007_v47  ;;  %v2978_v30 = vpop.eup %2977  ;;  %v1926_v5 = vadd.f32 %v1894_v36, %v4964_v12  ;;  %v1927_v35 = vadd.f32 %v1895_v20, %v4966_v2 }
 0x228   : > { %2989 = vtanh.f32 %v1953_v60  ;;  %v5136_v6 = vmul.f32 %v2037_v9, %v6117_v17  ;;  %v1928_v46 = vadd.f32 %v1896_v53, %v4970_v40  ;;  %v2010_v21 = vadd.f32 1.0, %v2976_v57 }
 0x229   : > { %v2980_v8 = vpop.eup %2979  ;;  %v2040_v13 = vmul.f32 0.5, %v2008_v58  ;;  %v5140_v27 = vmul.f32 %v2038_v38, %v6118_v43  ;;  %v1956_v14 = vmul.f32 0.7978846, %v1924_v25  ;;  %v1957_v47 = vmul.f32 0.7978846, %v1925_v50 }
 0x22a   : > { %v2982_v32 = vpop.eup %2981  ;;  %2991 = vtanh.f32 %v1954_v51  ;;  %v2011_v36 = vadd.f32 1.0, %v2978_v30  ;;  %v2041_v20 = vmul.f32 0.5, %v2009_v0  ;;  %v5143_v26 = vmul.f32 %v2039_v29, %v4934_v59 }
 0x22b   : > { %2993 = vtanh.f32 %v1955_v23  ;;  %v1929_v60 = vadd.f32 %v1897_v54, %v4972_v22  ;;  %v1930_v53 = vadd.f32 %v1898_v10, %v4974_v15  ;;  %v2012_v9 = vadd.f32 1.0, %v2980_v8 }
 0x22c   : > { %v2102_v58 = vsel %vm2101_vm6, %v5136_v6, 0.0  ;;  %v2013_v57 = vadd.f32 1.0, %v2982_v32  ;;  %v2042_v25 = vmul.f32 0.5, %v2010_v21  ;;  %v5150_v50 = vmul.f32 %v2040_v13, %v4936_v16 }
 0x22d   : > { %v2984_v38 = vpop.eup %2983  ;;  %v2103_v51 = vsel %vm2101_vm6, %v5140_v27, 0.0  ;;  %v1958_v59 = vmul.f32 0.7978846, %v1926_v5  ;;  %v1959_v0 = vmul.f32 0.7978846, %v1927_v35  ;;  %2995 = vtanh.f32 %v1956_v14  ;;  %v6119_v35 = vld [vmem:[#allocation148_spill] sm:$0xff] }
 0x22e   : > { %v2986_v23 = vpop.eup %2985  ;;  %v2104_v54 = vadd.f32 %v2103_v51, %v2102_v58  ;;  %2997 = vtanh.f32 %v1957_v47  ;;  %v2043_v10 = vmul.f32 0.5, %v2011_v36  ;;  %v5155_v29 = vmul.f32 %v2041_v20, %v4938_v63  ;;  %v6120_v47 = vld [vmem:[#allocation12_spill] sm:$0xff] }
 0x22f   : > { %v2105_v30 = vsel %vm2101_vm6, %v5143_v26, 0.0  ;;  %v1931_v16 = vadd.f32 %v5105_v48, %v4978_v55  ;;  %v2014_v17 = vadd.f32 1.0, %v2984_v38  ;;  %v2044_v8 = vmul.f32 0.5, %v2012_v9  ;;  %v6121_v9 = vld [vmem:[#allocation17_spill] sm:$0xff] }
 0x230   : > { %v2106_v21 = vadd.f32 %v2105_v30, %v2104_v54  ;;  %v2988_v13 = vpop.eup %2987  ;;  %v2015_v43 = vadd.f32 1.0, %v2986_v23  ;;  %v2045_v5 = vmul.f32 0.5, %v2013_v57  ;;  %v5162_v32 = vmul.f32 %v2042_v25, %v6119_v35 }
 0x231   : > { %v2107_v14 = vsel %vm2101_vm6, %v5150_v50, 0.0  ;;  %v1932_v36 = vadd.f32 %v5111_v52, %v6120_v47  ;;  %v1960_v20 = vmul.f32 0.7978846, %v1928_v46  ;;  %2999 = vtanh.f32 %v1958_v59 }
 0x232   : > { %v2990_v63 = vpop.eup %2989  ;;  %v2108_v58 = vadd.f32 %v2107_v14, %v2106_v21  ;;  %v1961_v48 = vmul.f32 0.7978846, %v1929_v60  ;;  %3001 = vtanh.f32 %v1959_v0  ;;  %v5169_v38 = vmul.f32 %v2043_v10, %v6121_v9  ;;  %v6122_v0 = vld [vmem:[#allocation43_spill] sm:$0xff] }
 0x233   : > { %v2109_v57 = vsel %vm2101_vm6, %v5155_v29, 0.0  ;;  %v2016_v51 = vadd.f32 1.0, %v2988_v13  ;;  %v2046_v23 = vmul.f32 0.5, %v2014_v17  ;;  %v5174_v54 = vmul.f32 %v2044_v8, %v4944_v56 }
 0x234   : > { %v2992_v25 = vpop.eup %2991  ;;  %v2110_v30 = vadd.f32 %v2109_v57, %v2108_v58  ;;  %v2017_v52 = vadd.f32 1.0, %v2990_v63  ;;  %v2047_v46 = vmul.f32 0.5, %v2015_v43  ;;  %v5177_v59 = vmul.f32 %v2045_v5, %v4946_v61 }
 0x235   : > { %v2994_v35 = vpop.eup %2993  ;;  %v2111_v60 = vsel %vm2101_vm6, %v5162_v32, 0.0  ;;  %v1933_v10 = vadd.f32 %v5113_v34, %v6122_v0  ;;  %v1962_v21 = vmul.f32 0.7978846, %v1930_v53  ;;  %3003 = vtanh.f32 %v1960_v20 }
 0x236   : > { %v2112_v13 = vadd.f32 %v2111_v60, %v2110_v30  ;;  %v1963_v17 = vmul.f32 0.7978846, %v1931_v16  ;;  %3005 = vtanh.f32 %v1961_v48  ;;  %v2018_v56 = vadd.f32 1.0, %v2992_v25 }
 0x237   : > { %v2113_v8 = vsel %vm2101_vm6, %v5169_v38, 0.0  ;;  %v2996_v14 = vpop.eup %2995  ;;  %v2019_v43 = vadd.f32 1.0, %v2994_v35  ;;  %v2048_v63 = vmul.f32 0.5, %v2016_v51  ;;  %v5186_v61 = vmul.f32 %v2046_v23, %v4948_v31 }
 0x238   : > { %v2114_v5 = vadd.f32 %v2113_v8, %v2112_v13  ;;  %v2998_v58 = vpop.eup %2997  ;;  %v2049_v9 = vmul.f32 0.5, %v2017_v52  ;;  %v5189_v34 = vmul.f32 %v2047_v46, %v4950_v1  ;;  %v2115_v53 = vsel %vm2101_vm6, %v5174_v54, 0.0 }
 0x239   : > { %v2117_v16 = vsel %vm2101_vm6, %v5177_v59, 0.0  ;;  %v1934_v20 = vadd.f32 %v5115_v33, %v6109_v42  ;;  %v1964_v48 = vmul.f32 0.7978846, %v1932_v36  ;;  %3007 = vtanh.f32 %v1962_v21 }
 0x23a   : > { %v2116_v57 = vadd.f32 %v2115_v53, %v2114_v5  ;;  %v1935_v31 = vadd.f32 %v5117_v45, %v4986_v44  ;;  %v1965_v25 = vmul.f32 0.7978846, %v1933_v10  ;;  %3009 = vtanh.f32 %v1963_v17  ;;  %v6123_v10 = vld [vmem:[#allocation37_spill] sm:$0xff] }
 0x23b   : > { %v2020_v51 = vadd.f32 1.0, %v2996_v14  ;;  %v3000_v1 = vpop.eup %2999  ;;  %v2021_v23 = vadd.f32 1.0, %v2998_v58  ;;  %v2050_v30 = vmul.f32 0.5, %v2018_v56  ;;  %v5200_v35 = vmul.f32 %v2048_v63, %v4952_v3  ;;  %v6124_v3 = vld [vmem:[#allocation33_spill] sm:$0xff] }
 0x23c   : > { %v2118_v52 = vadd.f32 %v2117_v16, %v2116_v57  ;;  %v3002_v46 = vpop.eup %3001  ;;  %v2051_v60 = vmul.f32 0.5, %v2019_v43  ;;  %v5203_v33 = vmul.f32 %v2049_v9, %v4954_v41  ;;  %v2119_v36 = vsel %vm2101_vm6, %v5186_v61, 0.0 }
 0x23d   : > { %v2121_v45 = vsel %vm2101_vm6, %v5189_v34, 0.0  ;;  %v1936_v21 = vadd.f32 %v5119_v7, %v6123_v10  ;;  %v1966_v13 = vmul.f32 0.7978846, %v1934_v20  ;;  %3011 = vtanh.f32 %v1964_v48 }
 0x23e   : > { %v2120_v17 = vadd.f32 %v2119_v36, %v2118_v52  ;;  %v1937_v56 = vadd.f32 %v5123_v39, %v6124_v3  ;;  %v1967_v8 = vmul.f32 0.7978846, %v1935_v31  ;;  %3013 = vtanh.f32 %v1965_v25 }
 0x23f   : > { %v2022_v14 = vadd.f32 1.0, %v3000_v1  ;;  %v3004_v41 = vpop.eup %3003  ;;  %v2023_v43 = vadd.f32 1.0, %v3002_v46  ;;  %v2052_v63 = vmul.f32 0.5, %v2020_v51  ;;  %v5214_v5 = vmul.f32 %v2050_v30, %v4956_v4 }
 0x240   : > { %v2122_v58 = vadd.f32 %v2121_v45, %v2120_v17  ;;  %v3006_v9 = vpop.eup %3005  ;;  %v2053_v53 = vmul.f32 0.5, %v2021_v23  ;;  %v5217_v7 = vmul.f32 %v2051_v60, %v4958_v49  ;;  %v2123_v16 = vsel %vm2101_vm6, %v5200_v35, 0.0 }
 0x241   : > { %v2125_v39 = vsel %vm2101_vm6, %v5203_v33, 0.0  ;;  %v1938_v20 = vadd.f32 %v5125_v62, %v6112_v11  ;;  %v1968_v48 = vmul.f32 0.7978846, %v1936_v21  ;;  %3015 = vtanh.f32 %v1966_v13  ;;  %v6125_v21 = vld [vmem:[#allocation63_spill] sm:$0xff] }
 0x242   : > { %v2124_v57 = vadd.f32 %v2123_v16, %v2122_v58  ;;  %v1939_v4 = vadd.f32 %v5127_v18, %v6113_v24  ;;  %v1969_v31 = vmul.f32 0.7978846, %v1937_v56  ;;  %3017 = vtanh.f32 %v1967_v8 }
 0x243   : > { %v2024_v25 = vadd.f32 1.0, %v3004_v41  ;;  %v3008_v49 = vpop.eup %3007  ;;  %v2025_v51 = vadd.f32 1.0, %v3006_v9  ;;  %v2054_v1 = vmul.f32 0.5, %v2022_v14  ;;  %v5228_v23 = vmul.f32 %v2052_v63, %v4960_v28 }
 0x244   : > { %v2126_v30 = vadd.f32 %v2125_v39, %v2124_v57  ;;  %v3010_v52 = vpop.eup %3009  ;;  %v2055_v46 = vmul.f32 0.5, %v2023_v43  ;;  %v5231_v62 = vmul.f32 %v2053_v53, %v4962_v19  ;;  %v2127_v60 = vsel %vm2101_vm6, %v5214_v5, 0.0 }
 0x245   : > { %v2129_v18 = vsel %vm2101_vm6, %v5217_v7, 0.0  ;;  %v1970_v36 = vmul.f32 0.7978846, %v1938_v20  ;;  %3019 = vtanh.f32 %v1968_v48  ;;  %v1940_v13 = vadd.f32 %v5129_v37, %v6125_v21 }
 0x246   : > { %v2128_v45 = vadd.f32 %v2127_v60, %v2126_v30  ;;  %v1971_v28 = vmul.f32 0.7978846, %v1939_v4  ;;  %3021 = vtanh.f32 %v1969_v31  ;;  %v2026_v17 = vadd.f32 1.0, %v3008_v49 }
 0x247   : > { %v3012_v56 = vpop.eup %3011  ;;  %v2027_v8 = vadd.f32 1.0, %v3010_v52  ;;  %v2056_v14 = vmul.f32 0.5, %v2024_v25  ;;  %v5240_v19 = vmul.f32 %v2054_v1, %v4964_v12  ;;  %v2057_v63 = vmul.f32 0.5, %v2025_v51 }
 0x248   : > { %v2130_v41 = vadd.f32 %v2129_v18, %v2128_v45  ;;  %v3014_v43 = vpop.eup %3013  ;;  %v5243_v58 = vmul.f32 %v2055_v46, %v4966_v2  ;;  %v2131_v9 = vsel %vm2101_vm6, %v5228_v23, 0.0  ;;  %v2133_v37 = vsel %vm2101_vm6, %v5231_v62, 0.0 }
 0x249   : > { %3023 = vtanh.f32 %v1970_v36  ;;  %v1972_v16 = vmul.f32 0.7978846, %v1940_v13  ;;  %v2028_v39 = vadd.f32 1.0, %v3012_v56  ;;  %v2029_v12 = vadd.f32 1.0, %v3014_v43 }
 0x24a   : > { %v2132_v53 = vadd.f32 %v2131_v9, %v2130_v41  ;;  %3025 = vtanh.f32 %v1971_v28  ;;  %v2058_v48 = vmul.f32 0.5, %v2026_v17  ;;  %v5250_v57 = vmul.f32 %v2056_v14, %v4970_v40 }
 0x24b   : > { %v3016_v20 = vpop.eup %3015  ;;  %v2059_v31 = vmul.f32 0.5, %v2027_v8  ;;  %v5253_v25 = vmul.f32 %v2057_v63, %v4972_v22  ;;  %v2135_v49 = vsel %vm2101_vm6, %v5240_v19, 0.0  ;;  %v2137_v51 = vsel %vm2101_vm6, %v5243_v58, 0.0 }
 0x24c   : > { %v2134_v4 = vadd.f32 %v2133_v37, %v2132_v53  ;;  %v3018_v2 = vpop.eup %3017  ;;  %3027 = vtanh.f32 %v1972_v16  ;;  %v2030_v30 = vadd.f32 1.0, %v3016_v20  ;;  %v2060_v60 = vmul.f32 0.5, %v2028_v39 }
 0x24d   : > { %v2031_v46 = vadd.f32 1.0, %v3018_v2  ;;  %v5260_v40 = vmul.f32 %v2058_v48, %v4974_v15  ;;  %v2061_v45 = vmul.f32 0.5, %v2029_v12  ;;  %v5263_v22 = vmul.f32 %v2059_v31, %v4978_v55 }
 0x24e   : > { %v2136_v1 = vadd.f32 %v2135_v49, %v2134_v4  ;;  %v2139_v13 = vsel %vm2101_vm6, %v5250_v57, 0.0  ;;  %v2141_v28 = vsel %vm2101_vm6, %v5253_v25, 0.0  ;;  %v2062_v41 = vmul.f32 0.5, %v2030_v30 }
 0x24f   : > { %v3020_v52 = vpop.eup %3019  ;;  %v5270_v15 = vmul.f32 %v2060_v60, %v6120_v47  ;;  %v2063_v9 = vmul.f32 0.5, %v2031_v46  ;;  %v5273_v55 = vmul.f32 %v2061_v45, %v6122_v0  ;;  %v2143_v37 = vsel %vm2101_vm6, %v5260_v40, 0.0 }
 0x250   : > { %v2138_v18 = vadd.f32 %v2137_v51, %v2136_v1  ;;  %v3022_v36 = vpop.eup %3021  ;;  %v2032_v56 = vadd.f32 1.0, %v3020_v52  ;;  %v2145_v53 = vsel %vm2101_vm6, %v5263_v22, 0.0  ;;  %v5280_v48 = vmul.f32 %v2062_v41, %v6109_v42 }
 0x251   : > { %v2033_v14 = vadd.f32 1.0, %v3022_v36  ;;  %v5283_v31 = vmul.f32 %v2063_v9, %v4986_v44  ;;  %v2147_v0 = vsel %vm2101_vm6, %v5270_v15, 0.0  ;;  %v2149_v49 = vsel %vm2101_vm6, %v5273_v55, 0.0 }
 0x252   : > { %v2140_v17 = vadd.f32 %v2139_v13, %v2138_v18  ;;  %v2064_v12 = vmul.f32 0.5, %v2032_v56  ;;  %v2151_v44 = vsel %vm2101_vm6, %v5280_v48, 0.0 }
 0x253   : > { %v3024_v8 = vpop.eup %3023  ;;  %v2065_v2 = vmul.f32 0.5, %v2033_v14  ;;  %v2153_v18 = vsel %vm2101_vm6, %v5283_v31, 0.0 }
 0x254   : > { %v2142_v43 = vadd.f32 %v2141_v28, %v2140_v17  ;;  %v3026_v63 = vpop.eup %3025  ;;  %v2034_v39 = vadd.f32 1.0, %v3024_v8  ;;  %v5290_v52 = vmul.f32 %v2064_v12, %v6123_v10 }
 0x255   : > { %v2035_v20 = vadd.f32 1.0, %v3026_v63  ;;  %v5293_v60 = vmul.f32 %v2065_v2, %v6124_v3 }
 0x256   : > { %v2144_v16 = vadd.f32 %v2143_v37, %v2142_v43  ;;  %v3028_v4 = vpop.eup %3027  ;;  %v2066_v30 = vmul.f32 0.5, %v2034_v39  ;;  %v2155_v17 = vsel %vm2101_vm6, %v5290_v52, 0.0 }
 0x257   : > { %v2036_v1 = vadd.f32 1.0, %v3028_v4  ;;  %v2067_v46 = vmul.f32 0.5, %v2035_v20  ;;  %v2157_v3 = vsel %vm2101_vm6, %v5293_v60, 0.0  ;;  %v2244_v4 = vld [vmem:[%s5534_s7] sm:$0xf] }
 0x258   : > { %v2146_v47 = vadd.f32 %v2145_v53, %v2144_v16  ;;  %v5300_v28 = vmul.f32 %v2066_v30, %v6112_v11  ;;  %v2252_v2 = vsel %vm2250_vm7, %v2244_v4, 0 }
 0x259   : > { %v2068_v45 = vmul.f32 0.5, %v2036_v1  ;;  %v5303_v10 = vmul.f32 %v2067_v46, %v6113_v24  ;;  %2845 = vmatpush3.bf16.msra.mxu1 %v2252_v2 }
 0x25a   : > { %v2148_v51 = vadd.f32 %v2147_v0, %v2146_v47  ;;  %v2159_v41 = vsel %vm2101_vm6, %v5300_v28, 0.0  ;;  %v2178_v0 = vld [vmem:[%s5533_s6] sm:$0x1] }
 0x25b   : > { %v5310_v14 = vmul.f32 %v2068_v45, %v6125_v21  ;;  %v2161_v11 = vsel %vm2101_vm6, %v5303_v10, 0.0 }
 0x25c   : > { %v2150_v42 = vadd.f32 %v2149_v49, %v2148_v51 }
 0x25d   : > { %v2163_v63 = vsel %vm2101_vm6, %v5310_v14, 0.0 }
 0x25e   : > { %v2152_v36 = vadd.f32 %v2151_v44, %v2150_v42 }
 0x260   : > { %v2154_v13 = vadd.f32 %v2153_v18, %v2152_v36 }
 0x262   : > { %v2156_v56 = vadd.f32 %v2155_v17, %v2154_v13 }
 0x264   : > { %v2158_v8 = vadd.f32 %v2157_v3, %v2156_v56 }
 0x266   : > { %v2160_v43 = vadd.f32 %v2159_v41, %v2158_v8  ;;  %v2899_v41 = vld [vmem:[%s5536_s9] sm:$0xff]  }
 0x267   : > { %2850 = vmatprep.subr.bf16.mxu1 %v2899_v41 }
 0x268   : > { %v2162_v24 = vadd.f32 %v2161_v11, %v2160_v43  ;;  %v2900_v11 = vld [vmem:[%s5536_s9 + $0x8] sm:$0xff]   ;;  %v2245_v43 = vld [vmem:[%s5535_s8] sm:$0x1] }
 0x26a   : > { %v2164_v9 = vadd.f32 %v2163_v63, %v2162_v24 }
 0x26c   : > { %v2165_v37 = vrot.slane %v2164_v9, 4 }
 0x26e   : > { %v2166_v53 = vadd.f32 %v2165_v37, %v2164_v9 }
 0x270   : > { %v2167_v16 = vrot.slane %v2166_v53, 2 }
 0x272   : > { %v2168_v39 = vadd.f32 %v2167_v16, %v2166_v53 }
 0x274   : > { %v2169_v20 = vrot.slane %v2168_v39, 1 }
 0x276   : > { %v2170_v12 = vadd.f32 %v2169_v20, %v2168_v39 }
 0x278   : > { %v2172_v21 = vmul.f32 0.00390625, %v2170_v12 }
 0x27a   : > { %v2173_v47 = vpack.c.bf16 %v2172_v21, %v2172_v21  ;;  %v6126_v21 = vld [vmem:[#allocation2_spill] sm:$0xff] }
 0x27c   : > { %2841 = vmatmul.mubr.msk.bf16.vlgmr.msra.gmra.mrb[32].mxu0 %vm2101_vm6, %v2173_v47  ;;  %v6127_v47 = vsub.s32 0, %v6126_v21  ;;  %v3039_v21 = vld [vmem:[%s3158_s24 + $0x18] sm:$0xff] }
 0x34f   : > { %v2228_v49 = vpop.f32.mrb[32].mxu0 }
 0x350   : > { %v2229_v51 = vadd.f32 %v2228_v49, %v2178_v0  ;;  %v2842_v1 = vpop.f32.mrb[33].mxu0 }
 0x351   : > { %v2231_v30 = vpop.f32.mrb[34].mxu0 }
 0x352   : > { %v2234_v42 = vmul.f32 %v2229_v51, %v2229_v51  ;;  %v2843_v46 = vpop.f32.mrb[35].mxu0 }
 0x354   : > { %v2235_v44 = vmul.f32 %v2234_v42, %v2229_v51 }
 0x356   : > { %v2236_v18 = vmul.f32 0.044715, %v2235_v44 }
 0x358   : > { %v2237_v36 = vadd.f32 %v2236_v18, %v2229_v51 }
 0x35a   : > { %v2238_v45 = vmul.f32 0.7978846, %v2237_v36 }
 0x35c   : > { %3029 = vtanh.f32 %v2238_v45 }
 0x366   : > { %v3030_v13 = vpop.eup %3029 }
 0x367   : > { %v2240_v17 = vadd.f32 1.0, %v3030_v13 }
 0x369   : > { %v2241_v3 = vmul.f32 0.5, %v2240_v17 }
 0x36b   : > { %v2242_v56 = vmul.f32 %v2241_v3, %v2229_v51 }
 0x36d   : > { %v2243_v8 = vpack.c.bf16 %v2242_v56, %v2242_v56 }
 0x36f   : > { %2847 = vmatmul.mubr.msk.bf16.vlgmr.msra.gmra.mrb[0].mxu1 %vm2246_vm8, %v2243_v8 }
 0x370   : > { %2851 = vmatpush3.bf16.msra.mxu1 %v2899_v41 }
 0x371   : > { %2852 = vmatprep.subr.bf16.mxu1 %v2900_v11 }
 0x374   : > { %2853 = vmatpush3.bf16.msra.mxu1 %v2900_v11 }
 0x442   : > { %v2288_v24 = vpop.f32.mrb[0].mxu1 }
 0x443   : > { %v2289_v63 = vadd.f32 %v2288_v24, %v2245_v43  ;;  %v2848_v9 = vpop.f32.mrb[1].mxu1 }
 0x444   : > { %v2291_v37 = vpop.f32.mrb[2].mxu1  ;;  %v3037_v9 = vld [vmem:[%s3158_s24 + $0x10] sm:$0xff] }
 0x445   : > { %v2738_v53 = vmul.f32 -1.442695, %v2289_v63  ;;  %v2849_v16 = vpop.f32.mrb[3].mxu1 }
 0x447   : > { %3031 = vpow2.f32 %v2738_v53 }
 0x451   : > { %v3032_v39 = vpop.eup %3031 }
 0x452   : > { %v2297_v20 = vadd.f32 1.0, %v3032_v39  ;;  %v3038_v39 = vld [vmem:[%s3158_s24] sm:$0xff] }
 0x454   : > { %3033 = vrcp.f32 %v2297_v20 }
 0x45e   : > { %v3034_v12 = vpop.eup %3033 }
 0x45f   : > { %v2303_v4 = vrot.slane %v3034_v12, %v6127_v47 }
 0x461   : > { %v2304_v2 = vmul.f32 %v2303_v4, %v5136_v6  ;;  %v2305_v0 = vmul.f32 %v2303_v4, %v5140_v27  ;;  %v2306_v49 = vmul.f32 %v2303_v4, %v5143_v26  ;;  %v2307_v51 = vmul.f32 %v2303_v4, %v5150_v50 }
 0x462   : > { %v2308_v1 = vmul.f32 %v2303_v4, %v5155_v29  ;;  %v2309_v30 = vmul.f32 %v2303_v4, %v5162_v32  ;;  %v2310_v6 = vmul.f32 %v2303_v4, %v5169_v38  ;;  %v2311_v27 = vmul.f32 %v2303_v4, %v5174_v54 }
 0x463   : > { %v2336_v42 = vpack.c.bf16 %v2305_v0, %v2304_v2  ;;  %v2337_v46 = vpack.c.bf16 %v2307_v51, %v2306_v49  ;;  %v2312_v26 = vmul.f32 %v2303_v4, %v5177_v59  ;;  %v2313_v50 = vmul.f32 %v2303_v4, %v5186_v61 }
 0x464   : > { %v2338_v44 = vpack.c.bf16 %v2309_v30, %v2308_v1  ;;  %v2339_v29 = vpack.c.bf16 %v2311_v27, %v2310_v6  ;;  %v2314_v32 = vmul.f32 %v2303_v4, %v5189_v34  ;;  %v2315_v36 = vmul.f32 %v2303_v4, %v5200_v35  ;;  %v3042_v27 = vld [vmem:[%s3158_s24 + $0x20] sm:$0xff] }
 0x465   : > { %2854 = vmatprep.mubr.msk.bf16.mxu1 %vm2101_vm6, %v2336_v42  ;;  %v2340_v18 = vpack.c.bf16 %v2313_v50, %v2312_v26  ;;  %v2316_v45 = vmul.f32 %v2303_v4, %v5203_v33  ;;  %v2317_v38 = vmul.f32 %v2303_v4, %v5214_v5  ;;  %v2318_v59 = vmul.f32 %v2303_v4, %v5217_v7  ;;  %v3041_v42 = vld [vmem:[%s3158_s24 + $0x30] sm:$0xff] }
 0x466   : > { %2855 = vmatmul.mubr.msk.bf16.vlgmr.msra.gmra.mrb[4].mxu1 %vm2101_vm6, %v2337_v46  ;;  %v2341_v13 = vpack.c.bf16 %v2315_v36, %v2314_v32  ;;  %v2319_v61 = vmul.f32 %v2303_v4, %v5228_v23  ;;  %v2320_v17 = vmul.f32 %v2303_v4, %v5231_v62  ;;  %v2321_v34 = vmul.f32 %v2303_v4, %v5240_v19  ;;  %v3044_v32 = vld [vmem:[%s3158_s24 + $0x28] sm:$0xff] }
 0x467   : > { %2858 = vmatprep.mubr.msk.bf16.mxu1 %vm2101_vm6, %v2338_v44  ;;  %v2342_v54 = vpack.c.bf16 %v2317_v38, %v2316_v45  ;;  %v2322_v33 = vmul.f32 %v2303_v4, %v5243_v58  ;;  %v2323_v5 = vmul.f32 %v2303_v4, %v5250_v57  ;;  %v2324_v56 = vmul.f32 %v2303_v4, %v5253_v25 }
 0x468   : > { %v2343_v3 = vpack.c.bf16 %v2319_v61, %v2318_v59  ;;  %v2344_v35 = vpack.c.bf16 %v2321_v34, %v2320_v17  ;;  %v2325_v7 = vmul.f32 %v2303_v4, %v5260_v40  ;;  %v2326_v62 = vmul.f32 %v2303_v4, %v5263_v22  ;;  %v3045_v61 = vld [vmem:[%s3158_s24 + $0x50] sm:$0xff] }
 0x469   : > { %v2345_v8 = vpack.c.bf16 %v2323_v5, %v2322_v33  ;;  %v2327_v19 = vmul.f32 %v2303_v4, %v5270_v15  ;;  %v2328_v41 = vmul.f32 %v2303_v4, %v5273_v55  ;;  %v2329_v58 = vmul.f32 %v2303_v4, %v5280_v48 }
 0x46a   : > { %v2346_v23 = vpack.c.bf16 %v2325_v7, %v2324_v56  ;;  %v2330_v25 = vmul.f32 %v2303_v4, %v5283_v31  ;;  %v2331_v40 = vmul.f32 %v2303_v4, %v5290_v52  ;;  %v2332_v43 = vmul.f32 %v2303_v4, %v5293_v60  ;;  %v5387_v52 = vld [vmem:[%s5537_s10] ss:$0 sm:$0xff]  ;;  %v3047_v56 = vld [vmem:[%s3158_s24 + $0x58] sm:$0xff] }
 0x46b   : > { %v2347_v11 = vpack.c.bf16 %v2327_v19, %v2326_v62  ;;  %v2348_v57 = vpack.c.bf16 %v2329_v58, %v2328_v41  ;;  %v2333_v22 = vmul.f32 %v2303_v4, %v5300_v28  ;;  %v2334_v48 = vmul.f32 %v2303_v4, %v5303_v10 }
 0x46c   : > { %v2349_v15 = vpack.c.bf16 %v2331_v40, %v2330_v25  ;;  %v2335_v24 = vmul.f32 %v2303_v4, %v5310_v14  ;;  %v3040_v4 = vld [vmem:[%s3158_s24 + $0x8] sm:$0xff] }
 0x46d   : > { %v2350_v55 = vpack.c.bf16 %v2333_v22, %v2332_v43  ;;  %v3050_v22 = vld [vmem:[%s3158_s24 + $0x60] sm:$0xff] }
 0x46e   : > { %2859 = vmatmul.mubr.msk.bf16.gmra.mrb[8].mxu1 %vm2101_vm6, %v2339_v29  ;;  %v2351_v31 = vpack.c.bf16 %v2335_v24, %v2334_v48  ;;  %v3043_v29 = vld [vmem:[%s3158_s24 + $0x38] sm:$0xff] }
 0x46f   : > { %2862 = vmatprep.mubr.msk.bf16.mxu1 %vm2101_vm6, %v2340_v18  ;;  %v3051_v48 = vld [vmem:[%s3158_s24 + $0x78] sm:$0xff] }
 0x476   : > { %2863 = vmatmul.mubr.msk.bf16.gmra.mrb[12].mxu1 %vm2101_vm6, %v2341_v13 }
 0x477   : > { %2866 = vmatprep.mubr.msk.bf16.mxu1 %vm2101_vm6, %v2342_v54 }
 0x47e   : > { %2867 = vmatmul.mubr.msk.bf16.gmra.mrb[16].mxu1 %vm2101_vm6, %v2343_v3 }
 0x47f   : > { %2870 = vmatprep.mubr.msk.bf16.mxu1 %vm2101_vm6, %v2344_v35  ;;  %v3046_v35 = vld [vmem:[%s3158_s24 + $0x40] sm:$0xff] }
 0x486   : > { %2871 = vmatmul.mubr.msk.bf16.gmra.mrb[20].mxu1 %vm2101_vm6, %v2345_v8  ;;  %v3048_v8 = vld [vmem:[%s3158_s24 + $0x48] sm:$0xff] }
 0x487   : > { %2874 = vmatprep.mubr.msk.bf16.mxu1 %vm2101_vm6, %v2346_v23 }
 0x48e   : > { %2875 = vmatmul.mubr.msk.bf16.gmra.mrb[24].mxu1 %vm2101_vm6, %v2347_v11 }
 0x48f   : > { %2878 = vmatprep.mubr.msk.bf16.mxu1 %vm2101_vm6, %v2348_v57  ;;  %v3049_v57 = vld [vmem:[%s3158_s24 + $0x70] sm:$0xff] }
 0x496   : > { %2879 = vmatmul.mubr.msk.bf16.gmra.mrb[28].mxu1 %vm2101_vm6, %v2349_v15 }
 0x497   : > { %2882 = vmatprep.mubr.msk.bf16.mxu1 %vm2101_vm6, %v2350_v55 }
 0x49e   : > { %2883 = vmatmul.mubr.msk.bf16.gmra.mrb[32].mxu1 %vm2101_vm6, %v2351_v31  ;;  %v3052_v31 = vld [vmem:[%s3158_s24 + $0x68] sm:$0xff] }
 0x539   : > { %v2856_v60 = vpop.f32.mrb[4].mxu1 }
 0x53a   : > { %v2466_v28 = vadd.f32 %v2856_v60, %v5387_v52  ;;  %v2457_v63 = vpop.f32.mrb[5].mxu1 }
 0x53b   : > { %v2458_v10 = vadd.f32 %v5387_v52, %v2457_v63  ;;  %v2857_v14 = vpop.f32.mrb[6].mxu1 }
 0x53c   : > { %v2586_v37 = vadd.f32 %v3037_v9, %v2466_v28  ;;  %v2469_v53 = vadd.f32 %v2857_v14, %v5387_v52  ;;  %v2460_v16 = vpop.f32.mrb[7].mxu1 }
 0x53d   : > { %v2584_v20 = vadd.f32 %v3038_v39, %v2458_v10  ;;  %v2461_v12 = vadd.f32 %v5387_v52, %v2460_v16 }
 0x53e   : > { %2618 = vst.msk [vmem:[%s5395_s25 + $0x10] sm:$0xff] %vm451_vm0, %v2586_v37  ;;  %v2587_v47 = vadd.f32 %v3039_v21, %v2469_v53  ;;  %v3053_v37 = vld [vmem:[%s3158_s24 + $0x90] sm:$0xff] }
 0x53f   : > { %2616 = vst.msk [vmem:[%s5395_s25] sm:$0xff] %vm451_vm0, %v2584_v20  ;;  %v2585_v2 = vadd.f32 %v3040_v4, %v2461_v12  ;;  %v3054_v20 = vld [vmem:[%s3158_s24 + $0x80] sm:$0xff] }
 0x540   : > { %2619 = vst.msk [vmem:[%s5395_s25 + $0x18] sm:$0xff] %vm451_vm0, %v2587_v47  ;;  %v3055_v47 = vld [vmem:[%s3158_s24 + $0x98] sm:$0xff] }
 0x541   : > { %2617 = vst.msk [vmem:[%s5395_s25 + $0x8] sm:$0xff] %vm451_vm0, %v2585_v2  ;;  %v2860_v0 = vpop.f32.mrb[8].mxu1  ;;  %v3056_v2 = vld [vmem:[%s3158_s24 + $0x88] sm:$0xff] }
 0x542   : > { %v2482_v49 = vadd.f32 %v2860_v0, %v5387_v52  ;;  %v2473_v51 = vpop.f32.mrb[9].mxu1 }
 0x543   : > { %v2474_v1 = vadd.f32 %v5387_v52, %v2473_v51  ;;  %v2861_v30 = vpop.f32.mrb[10].mxu1 }
 0x544   : > { %v2590_v46 = vadd.f32 %v3041_v42, %v2482_v49  ;;  %v2485_v44 = vadd.f32 %v2861_v30, %v5387_v52  ;;  %v2476_v6 = vpop.f32.mrb[11].mxu1 }
 0x545   : > { %v2588_v26 = vadd.f32 %v3042_v27, %v2474_v1  ;;  %v2477_v50 = vadd.f32 %v5387_v52, %v2476_v6 }
 0x546   : > { %2622 = vst.msk [vmem:[%s5395_s25 + $0x30] sm:$0xff] %vm451_vm0, %v2590_v46  ;;  %v2591_v18 = vadd.f32 %v3043_v29, %v2485_v44  ;;  %v3057_v46 = vld [vmem:[%s3158_s24 + $0xb0] sm:$0xff] }
 0x547   : > { %2620 = vst.msk [vmem:[%s5395_s25 + $0x20] sm:$0xff] %vm451_vm0, %v2588_v26  ;;  %v2589_v36 = vadd.f32 %v3044_v32, %v2477_v50  ;;  %v3058_v26 = vld [vmem:[%s3158_s24 + $0xa0] sm:$0xff] }
 0x548   : > { %2623 = vst.msk [vmem:[%s5395_s25 + $0x38] sm:$0xff] %vm451_vm0, %v2591_v18  ;;  %v3059_v18 = vld [vmem:[%s3158_s24 + $0xb8] sm:$0xff] }
 0x549   : > { %2621 = vst.msk [vmem:[%s5395_s25 + $0x28] sm:$0xff] %vm451_vm0, %v2589_v36  ;;  %v2864_v45 = vpop.f32.mrb[12].mxu1  ;;  %v3060_v36 = vld [vmem:[%s3158_s24 + $0xa8] sm:$0xff] }
 0x54a   : > { %v2498_v38 = vadd.f32 %v2864_v45, %v5387_v52  ;;  %v2489_v13 = vpop.f32.mrb[13].mxu1 }
 0x54b   : > { %v2490_v54 = vadd.f32 %v5387_v52, %v2489_v13  ;;  %v2865_v59 = vpop.f32.mrb[14].mxu1 }
 0x54c   : > { %v2594_v17 = vadd.f32 %v3045_v61, %v2498_v38  ;;  %v2501_v34 = vadd.f32 %v2865_v59, %v5387_v52  ;;  %v2492_v3 = vpop.f32.mrb[15].mxu1 }
 0x54d   : > { %v2592_v33 = vadd.f32 %v3046_v35, %v2490_v54  ;;  %v2493_v5 = vadd.f32 %v5387_v52, %v2492_v3 }
 0x54e   : > { %2626 = vst.msk [vmem:[%s5395_s25 + $0x50] sm:$0xff] %vm451_vm0, %v2594_v17  ;;  %v2595_v7 = vadd.f32 %v3047_v56, %v2501_v34  ;;  %v3061_v17 = vld [vmem:[%s3158_s24 + $0xd0] sm:$0xff] }
 0x54f   : > { %2624 = vst.msk [vmem:[%s5395_s25 + $0x40] sm:$0xff] %vm451_vm0, %v2592_v33  ;;  %v2593_v23 = vadd.f32 %v3048_v8, %v2493_v5  ;;  %v3062_v33 = vld [vmem:[%s3158_s24 + $0xc0] sm:$0xff] }
 0x550   : > { %2627 = vst.msk [vmem:[%s5395_s25 + $0x58] sm:$0xff] %vm451_vm0, %v2595_v7  ;;  %v3063_v7 = vld [vmem:[%s3158_s24 + $0xd8] sm:$0xff] }
 0x551   : > { %2625 = vst.msk [vmem:[%s5395_s25 + $0x48] sm:$0xff] %vm451_vm0, %v2593_v23  ;;  %v2868_v62 = vpop.f32.mrb[16].mxu1  ;;  %v3064_v23 = vld [vmem:[%s3158_s24 + $0xc8] sm:$0xff] }
 0x552   : > { %v2514_v19 = vadd.f32 %v2868_v62, %v5387_v52  ;;  %v2505_v41 = vpop.f32.mrb[17].mxu1 }
 0x553   : > { %v2506_v58 = vadd.f32 %v5387_v52, %v2505_v41  ;;  %v2869_v11 = vpop.f32.mrb[18].mxu1 }
 0x554   : > { %v2598_v25 = vadd.f32 %v3049_v57, %v2514_v19  ;;  %v2517_v40 = vadd.f32 %v2869_v11, %v5387_v52  ;;  %v2508_v43 = vpop.f32.mrb[19].mxu1 }
 0x555   : > { %v2596_v15 = vadd.f32 %v3050_v22, %v2506_v58  ;;  %v2509_v55 = vadd.f32 %v5387_v52, %v2508_v43 }
 0x556   : > { %2630 = vst.msk [vmem:[%s5395_s25 + $0x70] sm:$0xff] %vm451_vm0, %v2598_v25  ;;  %v2599_v24 = vadd.f32 %v3051_v48, %v2517_v40  ;;  %v3065_v25 = vld [vmem:[%s3158_s24 + $0xf0] sm:$0xff] }
 0x557   : > { %2628 = vst.msk [vmem:[%s5395_s25 + $0x60] sm:$0xff] %vm451_vm0, %v2596_v15  ;;  %v2597_v60 = vadd.f32 %v3052_v31, %v2509_v55  ;;  %v3066_v15 = vld [vmem:[%s3158_s24 + $0xe0] sm:$0xff] }
 0x558   : > { %2631 = vst.msk [vmem:[%s5395_s25 + $0x78] sm:$0xff] %vm451_vm0, %v2599_v24  ;;  %v3067_v24 = vld [vmem:[%s3158_s24 + $0xf8] sm:$0xff] }
 0x559   : > { %2629 = vst.msk [vmem:[%s5395_s25 + $0x68] sm:$0xff] %vm451_vm0, %v2597_v60  ;;  %v2872_v28 = vpop.f32.mrb[20].mxu1  ;;  %v3068_v60 = vld [vmem:[%s3158_s24 + $0xe8] sm:$0xff] }
 0x55a   : > { %v2530_v63 = vadd.f32 %v2872_v28, %v5387_v52  ;;  %v2521_v10 = vpop.f32.mrb[21].mxu1 }
 0x55b   : > { %v2522_v14 = vadd.f32 %v5387_v52, %v2521_v10  ;;  %v2873_v9 = vpop.f32.mrb[22].mxu1 }
 0x55c   : > { %v2602_v53 = vadd.f32 %v3053_v37, %v2530_v63  ;;  %v2533_v16 = vadd.f32 %v2873_v9, %v5387_v52  ;;  %v2524_v39 = vpop.f32.mrb[23].mxu1 }
 0x55d   : > { %v2600_v12 = vadd.f32 %v3054_v20, %v2522_v14  ;;  %v2525_v21 = vadd.f32 %v5387_v52, %v2524_v39 }
 0x55e   : > { %2634 = vst.msk [vmem:[%s5395_s25 + $0x90] sm:$0xff] %vm451_vm0, %v2602_v53  ;;  %v2603_v4 = vadd.f32 %v3055_v47, %v2533_v16 }
 0x55f   : > { %2632 = vst.msk [vmem:[%s5395_s25 + $0x80] sm:$0xff] %vm451_vm0, %v2600_v12  ;;  %v2601_v0 = vadd.f32 %v3056_v2, %v2525_v21 }
 0x560   : > { %2635 = vst.msk [vmem:[%s5395_s25 + $0x98] sm:$0xff] %vm451_vm0, %v2603_v4 }
 0x561   : > { %2633 = vst.msk [vmem:[%s5395_s25 + $0x88] sm:$0xff] %vm451_vm0, %v2601_v0  ;;  %v2876_v49 = vpop.f32.mrb[24].mxu1 }
 0x562   : > { %v2546_v51 = vadd.f32 %v2876_v49, %v5387_v52  ;;  %v2537_v1 = vpop.f32.mrb[25].mxu1 }
 0x563   : > { %v2538_v30 = vadd.f32 %v5387_v52, %v2537_v1  ;;  %v2877_v42 = vpop.f32.mrb[26].mxu1 }
 0x564   : > { %v2606_v44 = vadd.f32 %v3057_v46, %v2546_v51  ;;  %v2549_v6 = vadd.f32 %v2877_v42, %v5387_v52  ;;  %v2540_v27 = vpop.f32.mrb[27].mxu1 }
 0x565   : > { %v2604_v50 = vadd.f32 %v3058_v26, %v2538_v30  ;;  %v2541_v29 = vadd.f32 %v5387_v52, %v2540_v27 }
 0x566   : > { %2638 = vst.msk [vmem:[%s5395_s25 + $0xb0] sm:$0xff] %vm451_vm0, %v2606_v44  ;;  %v2607_v32 = vadd.f32 %v3059_v18, %v2549_v6 }
 0x567   : > { %2636 = vst.msk [vmem:[%s5395_s25 + $0xa0] sm:$0xff] %vm451_vm0, %v2604_v50  ;;  %v2605_v45 = vadd.f32 %v3060_v36, %v2541_v29 }
 0x568   : > { %2639 = vst.msk [vmem:[%s5395_s25 + $0xb8] sm:$0xff] %vm451_vm0, %v2607_v32 }
 0x569   : > { %2637 = vst.msk [vmem:[%s5395_s25 + $0xa8] sm:$0xff] %vm451_vm0, %v2605_v45  ;;  %v2880_v38 = vpop.f32.mrb[28].mxu1 }
 0x56a   : > { %v2562_v13 = vadd.f32 %v2880_v38, %v5387_v52  ;;  %v2553_v54 = vpop.f32.mrb[29].mxu1 }
 0x56b   : > { %v2554_v59 = vadd.f32 %v5387_v52, %v2553_v54  ;;  %v2881_v61 = vpop.f32.mrb[30].mxu1 }
 0x56c   : > { %v2610_v34 = vadd.f32 %v3061_v17, %v2562_v13  ;;  %v2565_v3 = vadd.f32 %v2881_v61, %v5387_v52  ;;  %v2556_v35 = vpop.f32.mrb[31].mxu1 }
 0x56d   : > { %v2608_v5 = vadd.f32 %v3062_v33, %v2554_v59  ;;  %v2557_v56 = vadd.f32 %v5387_v52, %v2556_v35 }
 0x56e   : > { %2642 = vst.msk [vmem:[%s5395_s25 + $0xd0] sm:$0xff] %vm451_vm0, %v2610_v34  ;;  %v2611_v8 = vadd.f32 %v3063_v7, %v2565_v3 }
 0x56f   : > { %2640 = vst.msk [vmem:[%s5395_s25 + $0xc0] sm:$0xff] %vm451_vm0, %v2608_v5  ;;  %v2609_v62 = vadd.f32 %v3064_v23, %v2557_v56 }
 0x570   : > { %2643 = vst.msk [vmem:[%s5395_s25 + $0xd8] sm:$0xff] %vm451_vm0, %v2611_v8 }
 0x571   : > { %2641 = vst.msk [vmem:[%s5395_s25 + $0xc8] sm:$0xff] %vm451_vm0, %v2609_v62  ;;  %v2884_v19 = vpop.f32.mrb[32].mxu1 }
 0x572   : > { %v2578_v41 = vadd.f32 %v2884_v19, %v5387_v52  ;;  %v2569_v58 = vpop.f32.mrb[33].mxu1 }
 0x573   : > { %v2570_v11 = vadd.f32 %v5387_v52, %v2569_v58  ;;  %v2885_v57 = vpop.f32.mrb[34].mxu1 }
 0x574   : > { %v2614_v40 = vadd.f32 %v3065_v25, %v2578_v41  ;;  %v2581_v43 = vadd.f32 %v2885_v57, %v5387_v52  ;;  %v2572_v22 = vpop.f32.mrb[35].mxu1 }
 0x575   : > { %v2612_v55 = vadd.f32 %v3066_v15, %v2570_v11  ;;  %v2573_v48 = vadd.f32 %v5387_v52, %v2572_v22 }
 0x576   : > { %2646 = vst.msk [vmem:[%s5395_s25 + $0xf0] sm:$0xff] %vm451_vm0, %v2614_v40  ;;  %v2615_v31 = vadd.f32 %v3067_v24, %v2581_v43 }
 0x577   : > { %2644 = vst.msk [vmem:[%s5395_s25 + $0xe0] sm:$0xff] %vm451_vm0, %v2612_v55  ;;  %v2613_v28 = vadd.f32 %v3068_v60, %v2573_v48 }
 0x578   : > { %2647 = vst.msk [vmem:[%s5395_s25 + $0xf8] sm:$0xff] %vm451_vm0, %v2615_v31 }
 0x579   : > { %2645 = vst.msk [vmem:[%s5395_s25 + $0xe8] sm:$0xff] %vm451_vm0, %v2613_v28 }
 0x57a PF: > { %s21_s17 = sadd.s32 1, %s3075_s17  }
 0x57b   : > { %p18_p4 = scmp.ge.s32.totalorder %s21_s17, 4  }
 0x57d   :  { %20 = sbr.rel (!%p18_p4) target bundleno = 1 (0x1), region = 94 }

// kernel: maxvit_blocks_forward.7
= control target key start
LH: loop header
LB: loop body
LE: loop exit
PB: predicated region body
PF: predicated region fallthrough
CT: control target
= control target key end

     0   :  { %s5073_s0 = inlined_call_operand.vmem [shape: f32[2,4,4,4,4,16], index: 0, kind: input, shape index: {}]   ;;  %s5074_s1 = inlined_call_operand.vmem [shape: f32[2,16,16], index: 1, kind: input, shape index: {}]   ;;  %s5075_s2 = inlined_call_operand.vmem [shape: f32[1,16], index: 2, kind: input, shape index: {}]   ;;  %s5076_s3 = inlined_call_operand.vmem [shape: f32[1,16], index: 3, kind: input, shape index: {}]   ;;  %s5077_s4 = inlined_call_operand.vmem [shape: bf16[16,48], index: 4, kind: input, shape index: {}]   ;;  %s5078_s5 = inlined_call_operand.vmem [shape: f32[1,48], index: 5, kind: input, shape index: {}]   ;;  %s5079_s6 = inlined_call_operand.vmem [shape: bf16[16,16], index: 6, kind: input, shape index: {}]   ;;  %s5080_s7 = inlined_call_operand.vmem [shape: f32[1,16], index: 7, kind: input, shape index: {}]   ;;  %s5081_s8 = inlined_call_operand.vmem [shape: f32[1,16], index: 8, kind: input, shape index: {}]   ;;  %s5082_s9 = inlined_call_operand.vmem [shape: f32[1,16], index: 9, kind: input, shape index: {}]   ;;  %s5083_s10 = inlined_call_operand.vmem [shape: bf16[16,32], index: 10, kind: input, shape index: {}]   ;;  %s5084_s11 = inlined_call_operand.vmem [shape: f32[1,32], index: 11, kind: input, shape index: {}]   ;;  %s5085_s12 = inlined_call_operand.vmem [shape: bf16[32,16], index: 12, kind: input, shape index: {}]   ;;  %s5086_s13 = inlined_call_operand.vmem [shape: f32[1,16], index: 13, kind: input, shape index: {}]   ;;  %s5087_s14 = inlined_call_operand.vmem [shape: f32[2,4,4,4,4,16], index: 14, kind: output, shape index: {}]  }
   0x1   :  { %5090 = sst [smem:[#allocation8_spill]] %s5086_s13 }
   0x2   :  { %5091 = sst [smem:[#allocation9_spill]] %s5087_s14 }
   0x3   :  { %s4086_s29 = smov 0   ;;  %s4088_s30 = smov 0  }
   0x4   :  { %s4090_s15 = smov 0   ;;  %s4092_s16 = smov 0  }
   0x5   :  { %s4094_s17 = smov 0   ;;  %s4096_s18 = smov 0  }
   0x6   :  { %s4098_s19 = smov 0  }
   0x7 LB: > { %5092 = sst [smem:[#allocation4_spill]] %s3983_s15  ;;  %s33_s20 = sadd.s32 1, %s3991_s17  ;;  %s3999_s19 = sphi %s4098_s19, %s24_s19   ;;  %s3995_s18 = sphi %s4096_s18, %s5108_s18   ;;  %s3991_s17 = sphi %s4094_s17, %s5107_s17   ;;  %s3987_s16 = sphi %s4092_s16, %s5106_s16   ;;  %s3983_s15 = sphi %s4090_s15, %s5105_s15   ;;  %s3979_s30 = sphi %s4088_s30, %s5104_s30   ;;  %s3975_s29 = sphi %s4086_s29, %s5103_s29  }
   0x8   : > { %5093 = sst [smem:[#allocation5_spill]] %s3987_s16  ;;  %p34_p0 = scmp.ge.s32.totalorder %s33_s20, 4 }
   0x9   : > { %s36_s21 = sadd.s32 1, %s3995_s18  ;;  %s3465_s22 = sadd.s32 4294967295, %s3999_s19  }
   0xa   : > { %p52_p1 = scmp.ne.s32.totalorder %s3979_s30, %s3975_s29  ;;  %s5110_s20 = smov (%p34_p0, %s33_s20), 0 }
   0xb   : > { %5094 = sst [smem:[#allocation6_spill]] %s5110_s20  ;;  %s5112_s21 = smov (!%p34_p0, %s36_s21), %s3995_s18 }
   0xc   : > { %p53_p2 = scmp.eq.s32.totalorder %s3999_s19, 0  ;;  %p38_p3 = scmp.ge.s32.totalorder %s5112_s21, 2 }
   0xd   : > { %p357_p4 = scmp.eq.s32.totalorder %s3465_s22, 7  ;;  %s41_s23 = ssub.s32 %s3991_s17, %s5110_s20 }
   0xe   : > { %p54_p5 = por %p53_p2, %p52_p1  ;;  %s5114_s21 = smov (%p38_p3, %s5112_s21), 0 }
   0xf   : > { %p4134_p6 = por %p357_p4, %p52_p1  ;;  %s40_s25 = ssub.s32 %s3995_s18, %s5114_s21 }
  0x10   : > { %s42_s26 = sor.u32 %s41_s23, %s40_s25  ;;  %s45_s27 = sadd.s32 1, %s3979_s30 }
  0x11   : > { %s5095_s24 = scalar_select %p4134_p6, 1, 0 }
  0x12   : > { %p43_p7 = scmp.eq.s32.totalorder %s42_s26, 0  ;;  %p3468_p8 = scmp.ge.s32.totalorder %s3999_s19, 8 }
  0x13   : > { %5096 = sst [smem:[#allocation7_spill]] %s5095_s24 }
  0x14   : > { %s4142_s28 = scalar_select %p43_p7, %s3979_s30, %s45_s27  }
  0x15   : > { %418 = sbr.rel (%p3468_p8) target bundleno = 45 (0x2d), region = 68 }
  0x1c   : > { %421 = sbr.rel (!%p54_p5) target bundleno = 45 (0x2d), region = 72  ;;  %s423_s22 = sand.u32 (%p54_p5), 1, %s3979_s30  }
  0x1d   : > { %s3470_s20 = sshll.u32 (%p54_p5), %s3995_s18, 6  ;;  %s3469_s14 = sshll.u32 (%p54_p5), %s423_s22, 6 }
  0x1e   : > { %s427_s15 = sadd.s32 (%p54_p5), %s3991_s17, %s3470_s20  ;;  %s425_s25 = scalar_lea.vmem (%p54_p5), [#allocation2], %s3469_s14 }
  0x1f   : > { %s3471_s16 = sshll.u32 (%p54_p5), %s427_s15, 2 }
  0x20   : > { %s4151_s23 = scalar_lea.vmem (%p54_p5), %s5073_s0, %s3471_s16 }
  0x21   : > { %v445_v0 = vld [vmem:[%s4151_s23] sm:$0xf] (%p54_p5)  ;;  %v447_v1 = vld [vmem:[%s4151_s23 + $0x10] sm:$0xf] (%p54_p5) }
  0x22   : > { %v449_v2 = vld [vmem:[%s4151_s23 + $0x20] sm:$0xf] (%p54_p5)  ;;  %446 = vst [vmem:[%s425_s25] sm:$0xf] (%p54_p5), %v445_v0  ;;  %448 = vst [vmem:[%s425_s25 + $0x4] sm:$0xf] (%p54_p5), %v447_v1 }
  0x23   : > { %450 = vst [vmem:[%s425_s25 + $0x8] sm:$0xf] %v449_v2  ;;  %v451_v3 = vld [vmem:[%s4151_s23 + $0x30] sm:$0xf]  ;;  %v453_v4 = vld [vmem:[%s4151_s23 + $0x40] sm:$0xf] }
  0x24   : > { %v455_v5 = vld [vmem:[%s4151_s23 + $0x50] sm:$0xf]  ;;  %452 = vst [vmem:[%s425_s25 + $0xc] sm:$0xf] %v451_v3  ;;  %454 = vst [vmem:[%s425_s25 + $0x10] sm:$0xf] %v453_v4 }
  0x25   : > { %456 = vst [vmem:[%s425_s25 + $0x14] sm:$0xf] %v455_v5  ;;  %v457_v6 = vld [vmem:[%s4151_s23 + $0x60] sm:$0xf]  ;;  %v459_v7 = vld [vmem:[%s4151_s23 + $0x70] sm:$0xf] }
  0x26   : > { %v461_v8 = vld [vmem:[%s4151_s23 + $0x80] sm:$0xf]  ;;  %458 = vst [vmem:[%s425_s25 + $0x18] sm:$0xf] %v457_v6  ;;  %460 = vst [vmem:[%s425_s25 + $0x1c] sm:$0xf] %v459_v7 }
  0x27   : > { %462 = vst [vmem:[%s425_s25 + $0x20] sm:$0xf] %v461_v8  ;;  %v463_v9 = vld [vmem:[%s4151_s23 + $0x90] sm:$0xf]  ;;  %v465_v10 = vld [vmem:[%s4151_s23 + $0xa0] sm:$0xf] }
  0x28   : > { %v467_v11 = vld [vmem:[%s4151_s23 + $0xb0] sm:$0xf]  ;;  %464 = vst [vmem:[%s425_s25 + $0x24] sm:$0xf] %v463_v9  ;;  %466 = vst [vmem:[%s425_s25 + $0x28] sm:$0xf] %v465_v10 }
  0x29   : > { %468 = vst [vmem:[%s425_s25 + $0x2c] sm:$0xf] %v467_v11  ;;  %v469_v12 = vld [vmem:[%s4151_s23 + $0xc0] sm:$0xf]  ;;  %v471_v13 = vld [vmem:[%s4151_s23 + $0xd0] sm:$0xf] }
  0x2a   : > { %v473_v14 = vld [vmem:[%s4151_s23 + $0xe0] sm:$0xf]  ;;  %470 = vst [vmem:[%s425_s25 + $0x30] sm:$0xf] %v469_v12  ;;  %472 = vst [vmem:[%s425_s25 + $0x34] sm:$0xf] %v471_v13 }
  0x2b   : > { %474 = vst [vmem:[%s425_s25 + $0x38] sm:$0xf] %v473_v14  ;;  %v475_v15 = vld [vmem:[%s4151_s23 + $0xf0] sm:$0xf] }
  0x2c   : > { %476 = vst [vmem:[%s425_s25 + $0x3c] sm:$0xf] %v475_v15 }
  0x2d PF: > { %p3472_p9 = scmp.ge.s32.totalorder %s3999_s19, 1  ;;  %p530_p10 = scmp.lt.s32.totalorder %s3999_s19, 9 }
  0x2f   : > { %p531_p11 = pnand %p3472_p9, %p530_p10 }
  0x30   : > { %s537_s13 = sand.u32 (!%p531_p11), 1, %s3975_s29   ;;  %vm652_vm0 = vcmask (!%p531_p11), 130048   ;;  %v4001_v48 = vmov (!%p531_p11), 839922192   ;;  %v697_v50 = vlaneseq (!%p531_p11)  ;;  %v4002_v51 = vmov (!%p531_p11), 1985246804  }
  0x31   : > { %534 = sbr.rel (%p531_p11) target bundleno = 3348 (0xd14), region = 113  ;;  %s4172_s14 = sshll.u32 (!%p531_p11), %s537_s13, 6  ;;  %v695_v49 = vunpack.c.l.s4 (!%p531_p11), %v4001_v48  ;;  %v702_v52 = vunpack.c.l.s4 (!%p531_p11), %v4002_v51  ;;  %vm4004_vm1 = vmmov (!%p531_p11), 0   ;;  %vm1278_vm2 = vcmask (!%p531_p11), 64512  }
  0x32   : > { %s4175_s15 = scalar_lea.vmem (!%p531_p11), [#allocation2], %s4172_s14  ;;  %v698_v54 = vshrl.u32 (!%p531_p11), %v697_v50, 7  ;;  %s4005_s25 = smov (!%p531_p11), 112   ;;  %vm3148_vm3 = vcmask (!%p531_p11), 261120   ;;  %vm3266_vm4 = vcmask (!%p531_p11), 125952  }
  0x33   : > { %v582_v16 = vld [vmem:[%s4175_s15] sm:$0xf] (!%p531_p11)  ;;  %v583_v17 = vld [vmem:[%s4175_s15 + $0x4] sm:$0xf] (!%p531_p11)  ;;  %v586_v18 = vld [vmem:[%s4175_s15 + $0x10] sm:$0xf] (!%p531_p11)  ;;  %v696_v53 = vunpack.c.0.s8 (!%p531_p11), %v695_v49  ;;  %v703_v55 = vunpack.c.0.s8 (!%p531_p11), %v702_v52 }
  0x34   : > { %v636_v19 = vcombine.low (!%p531_p11), %v582_v16, %v583_v17  ;;  %v587_v20 = vld [vmem:[%s4175_s15 + $0x14] sm:$0xf] (!%p531_p11)  ;;  %v4182_v21 = vld [vmem:[%s4175_s15 + $0x8] sm:$0xf] (!%p531_p11)  ;;  %v4185_v22 = vld [vmem:[%s4175_s15 + $0xc] sm:$0xf] (!%p531_p11) }
  0x35   : > { %v638_v23 = vcombine.low (!%p531_p11), %v586_v18, %v587_v20  ;;  %v637_v24 = vcombine.low (!%p531_p11), %v4182_v21, %v4185_v22  ;;  %v4190_v25 = vld [vmem:[%s4175_s15 + $0x18] sm:$0xf] (!%p531_p11)  ;;  %v4193_v26 = vld [vmem:[%s4175_s15 + $0x1c] sm:$0xf] (!%p531_p11)  ;;  %v4196_v27 = vld [vmem:[%s4175_s15 + $0x20] sm:$0xf] (!%p531_p11)  ;;  %v4237_v56 = vsub.s32 (!%p531_p11), %v696_v53, %v698_v54  ;;  %v4239_v57 = vsub.s32 (!%p531_p11), %v703_v55, %v698_v54 }
  0x36   : > { %v653_v28 = vsel (!%p531_p11), %vm652_vm0, %v636_v19, 0.0  ;;  %v639_v29 = vcombine.low (!%p531_p11), %v4190_v25, %v4193_v26  ;;  %v4202_v30 = vld [vmem:[%s4175_s15 + $0x24] sm:$0xf] (!%p531_p11)  ;;  %v4205_v31 = vld [vmem:[%s4175_s15 + $0x28] sm:$0xf] (!%p531_p11)  ;;  %s4006_s24 = smov (!%p531_p11), 96  }
  0x37   : > { %654 = vadd.xlane.f32.xlu0 (!%p531_p11), %v653_v28  ;;  %v659_v32 = vsel (!%p531_p11), %vm652_vm0, %v638_v23, 0.0  ;;  %v4209_v33 = vld [vmem:[%s4175_s15 + $0x2c] sm:$0xf] (!%p531_p11)  ;;  %v656_v34 = vsel (!%p531_p11), %vm652_vm0, %v637_v24, 0.0  ;;  %v640_v36 = vcombine.low (!%p531_p11), %v4196_v27, %v4202_v30  ;;  %v4216_v37 = vld [vmem:[%s4175_s15 + $0x30] sm:$0xf] (!%p531_p11) }
  0x38   : > { %660 = vadd.xlane.f32.xlu1 %v659_v32  ;;  %v662_v35 = vsel %vm652_vm0, %v639_v29, 0.0  ;;  %v641_v38 = vcombine.low %v4205_v31, %v4209_v33  ;;  %v4221_v39 = vld [vmem:[%s4175_s15 + $0x34] sm:$0xf]  ;;  %v4224_v40 = vld [vmem:[%s4175_s15 + $0x38] sm:$0xf]  ;;  %s4007_s26 = smov 104  }
  0x39   : > { %v4227_v41 = vld [vmem:[%s4175_s15 + $0x3c] sm:$0xf]  ;;  %v665_v42 = vsel %vm652_vm0, %v640_v36, 0.0  ;;  %v642_v43 = vcombine.low %v4216_v37, %v4221_v39  ;;  %s4008_s27 = smov 120   ;;  %s4009_s29 = smov 88  }
  0x3a   : > { %v668_v44 = vsel %vm652_vm0, %v641_v38, 0.0  ;;  %v643_v45 = vcombine.low %v4224_v40, %v4227_v41  ;;  %s4982_s13 = scalar_lea.vmem [#allocation3], %s4172_s14  ;;  %s5100_s16 = sld [smem:[#allocation4_spill]] (%p4134_p6) }
  0x3b   : > { %657 = vadd.xlane.f32.xlu0 %v656_v34  ;;  %v671_v46 = vsel %vm652_vm0, %v642_v43, 0.0  ;;  %s5101_s22 = sld [smem:[#allocation9_spill]] (%p4134_p6) }
  0x3c   : > { %663 = vadd.xlane.f32.xlu1 %v662_v35  ;;  %v674_v47 = vsel %vm652_vm0, %v643_v45, 0.0 }
  0x3f   : > { %666 = vadd.xlane.f32.xlu0 %v665_v42 }
  0x40   : > { %669 = vadd.xlane.f32.xlu1 %v668_v44 }
  0x43   : > { %672 = vadd.xlane.f32.xlu0 %v671_v46 }
  0x44   : > { %675 = vadd.xlane.f32.xlu1 %v674_v47 }
  0xc4   : > { %v655_v58 = vpop.xlane.xlu0 %654 }
  0xc5   : > { %v678_v59 = vmul.f32 0.0625, %v655_v58  ;;  %v661_v60 = vpop.xlane.xlu1 %660 }
  0xc6   : > { %v680_v61 = vmul.f32 0.0625, %v661_v60 }
  0xc7   : > { %v700_v62 = vrot.slane %v678_v59, %v4237_v56  ;;  %v707_v63 = vrot.slane %v678_v59, %v4239_v57 }
  0xc8   : > { %v728_v0 = vrot.slane %v680_v61, %v4237_v56  ;;  %v735_v1 = vrot.slane %v680_v61, %v4239_v57  ;;  %v658_v2 = vpop.xlane.xlu0 %657 }
  0xc9   : > { %v4245_v3 = vsub.f32 %v582_v16, %v700_v62  ;;  %v4247_v4 = vsub.f32 %v583_v17, %v707_v63  ;;  %v679_v5 = vmul.f32 0.0625, %v658_v2  ;;  %v664_v6 = vpop.xlane.xlu1 %663 }
  0xca   : > { %v4249_v7 = vsub.f32 %v586_v18, %v728_v0  ;;  %v4251_v8 = vsub.f32 %v587_v20, %v735_v1  ;;  %v681_v9 = vmul.f32 0.0625, %v664_v6 }
  0xcb   : > { %v714_v10 = vrot.slane %v679_v5, %v4237_v56  ;;  %v721_v11 = vrot.slane %v679_v5, %v4239_v57  ;;  %v838_v12 = vmul.f32 %v4245_v3, %v4245_v3  ;;  %v839_v13 = vmul.f32 %v4247_v4, %v4247_v4 }
  0xcc   : > { %v742_v14 = vrot.slane %v681_v9, %v4237_v56  ;;  %v749_v15 = vrot.slane %v681_v9, %v4239_v57  ;;  %v667_v16 = vpop.xlane.xlu0 %666  ;;  %v842_v17 = vmul.f32 %v4249_v7, %v4249_v7  ;;  %v843_v18 = vmul.f32 %v4251_v8, %v4251_v8 }
  0xcd   : > { %v4266_v19 = vsub.f32 %v4182_v21, %v714_v10  ;;  %v4269_v20 = vsub.f32 %v4185_v22, %v721_v11  ;;  %v682_v23 = vmul.f32 0.0625, %v667_v16  ;;  %v670_v24 = vpop.xlane.xlu1 %669  ;;  %v870_v28 = vcombine.low %v838_v12, %v839_v13  ;;  %v3812_v16 = vld [vmem:[%s5077_s4] sm:$0xff]  }
  0xce   : > { %v4272_v29 = vsub.f32 %v4190_v25, %v742_v14  ;;  %v4275_v32 = vsub.f32 %v4193_v26, %v749_v15  ;;  %v683_v34 = vmul.f32 0.0625, %v670_v24  ;;  %v872_v35 = vcombine.low %v842_v17, %v843_v18  ;;  %3578 = vmatprep.subr.bf16.mxu0 %v3812_v16  ;;  %3716 = vmatprep.subr.bf16.mxu1 %v3812_v16 }
  0xcf   : > { %v756_v36 = vrot.slane %v682_v23, %v4237_v56  ;;  %v763_v38 = vrot.slane %v682_v23, %v4239_v57  ;;  %v886_v21 = vsel %vm652_vm0, %v870_v28, 0.0  ;;  %v840_v22 = vmul.f32 %v4266_v19, %v4266_v19  ;;  %3579 = vmatpush3.bf16.msra.mxu0 %v3812_v16  ;;  %3717 = vmatpush3.bf16.msra.mxu1 %v3812_v16 }
  0xd0   : > { %v770_v42 = vrot.slane %v683_v34, %v4237_v56  ;;  %v777_v43 = vrot.slane %v683_v34, %v4239_v57  ;;  %887 = vadd.xlane.f32.xlu0 %v886_v21  ;;  %v673_v25 = vpop.xlane.xlu0 %672  ;;  %v892_v26 = vsel %vm652_vm0, %v872_v35, 0.0  ;;  %v841_v44 = vmul.f32 %v4269_v20, %v4269_v20 }
  0xd1   : > { %v4288_v45 = vsub.f32 %v4196_v27, %v756_v36  ;;  %v4291_v46 = vsub.f32 %v4202_v30, %v763_v38  ;;  %v684_v47 = vmul.f32 0.0625, %v673_v25  ;;  %v676_v48 = vpop.xlane.xlu1 %675  ;;  %v844_v49 = vmul.f32 %v4272_v29, %v4272_v29 }
  0xd2   : > { %v4296_v50 = vsub.f32 %v4205_v31, %v770_v42  ;;  %v4299_v51 = vsub.f32 %v4209_v33, %v777_v43  ;;  %v685_v52 = vmul.f32 0.0625, %v676_v48  ;;  %v871_v53 = vcombine.low %v840_v22, %v841_v44 }
  0xd3   : > { %v784_v54 = vrot.slane %v684_v47, %v4237_v56  ;;  %v791_v27 = vrot.slane %v684_v47, %v4239_v57  ;;  %v845_v30 = vmul.f32 %v4275_v32, %v4275_v32  ;;  %v846_v55 = vmul.f32 %v4288_v45, %v4288_v45 }
  0xd4   : > { %v798_v58 = vrot.slane %v685_v52, %v4237_v56  ;;  %v805_v31 = vrot.slane %v685_v52, %v4239_v57  ;;  %893 = vadd.xlane.f32.xlu0 %v892_v26  ;;  %v889_v33 = vsel %vm652_vm0, %v871_v53, 0.0  ;;  %v847_v59 = vmul.f32 %v4291_v46, %v4291_v46  ;;  %v4347_v52 = vld [vmem:[%s5075_s2] ss:$0 sm:$0xff] }
  0xd5   : > { %v4313_v60 = vsub.f32 %v4216_v37, %v784_v54  ;;  %v4316_v61 = vsub.f32 %v4221_v39, %v791_v27  ;;  %890 = vadd.xlane.f32.xlu1 %v889_v33  ;;  %v873_v62 = vcombine.low %v844_v49, %v845_v30  ;;  %v848_v63 = vmul.f32 %v4296_v50, %v4296_v50  ;;  %v4352_v30 = vld [vmem:[%s5076_s3] ss:$0 sm:$0xff] }
  0xd6   : > { %v4321_v0 = vsub.f32 %v4224_v40, %v798_v58  ;;  %v4324_v1 = vsub.f32 %v4227_v41, %v805_v31  ;;  %v874_v2 = vcombine.low %v846_v55, %v847_v59  ;;  %v849_v5 = vmul.f32 %v4299_v51, %v4299_v51 }
  0xd7   : > { %v895_v37 = vsel %vm652_vm0, %v873_v62, 0.0  ;;  %v850_v39 = vmul.f32 %v4313_v60, %v4313_v60  ;;  %v851_v6 = vmul.f32 %v4316_v61, %v4316_v61  ;;  %v4358_v33 = vcombine.high %v4347_v52, %v4347_v52 }
  0xd8   : > { %v898_v9 = vsel %vm652_vm0, %v874_v2, 0.0  ;;  %v875_v10 = vcombine.low %v848_v63, %v849_v5  ;;  %v852_v40 = vmul.f32 %v4321_v0, %v4321_v0  ;;  %v853_v41 = vmul.f32 %v4324_v1, %v4324_v1 }
  0xd9   : > { %896 = vadd.xlane.f32.xlu1 %v895_v37  ;;  %899 = vadd.xlane.f32.xlu0 %v898_v9  ;;  %v876_v11 = vcombine.low %v850_v39, %v851_v6  ;;  %v4364_v5 = vcombine.high %v4352_v30, %v4352_v30 }
  0xda   : > { %v901_v12 = vsel %vm652_vm0, %v875_v10, 0.0  ;;  %v877_v13 = vcombine.low %v852_v40, %v853_v41 }
  0xdb   : > { %v904_v14 = vsel %vm652_vm0, %v876_v11, 0.0 }
  0xdc   : > { %v907_v15 = vsel %vm652_vm0, %v877_v13, 0.0 }
  0xdd   : > { %902 = vadd.xlane.f32.xlu1 %v901_v12  ;;  %905 = vadd.xlane.f32.xlu0 %v904_v14 }
  0xe1   : > { %908 = vadd.xlane.f32.xlu1 %v907_v15 }
 0x15d   : > { %v888_v17 = vpop.xlane.xlu0 %887 }
 0x15e   : > { %v910_v18 = vmul.f32 0.0625, %v888_v17 }
 0x160   : > { %v918_v23 = vadd.f32 1e-05, %v910_v18 }
 0x161   : > { %v894_v24 = vpop.xlane.xlu0 %893 }
 0x162   : > { %3817 = vrsqrt.f32 %v918_v23  ;;  %v891_v28 = vpop.xlane.xlu1 %890  ;;  %v912_v34 = vmul.f32 0.0625, %v894_v24 }
 0x163   : > { %v911_v35 = vmul.f32 0.0625, %v891_v28 }
 0x164   : > { %v920_v36 = vadd.f32 1e-05, %v912_v34 }
 0x165   : > { %v919_v38 = vadd.f32 1e-05, %v911_v35 }
 0x166   : > { %3819 = vrsqrt.f32 %v920_v36  ;;  %v897_v21 = vpop.xlane.xlu1 %896  ;;  %v900_v22 = vpop.xlane.xlu0 %899 }
 0x167   : > { %3821 = vrsqrt.f32 %v919_v38  ;;  %v913_v42 = vmul.f32 0.0625, %v897_v21  ;;  %v914_v43 = vmul.f32 0.0625, %v900_v22 }
 0x169   : > { %v921_v25 = vadd.f32 1e-05, %v913_v42  ;;  %v922_v26 = vadd.f32 1e-05, %v914_v43 }
 0x16a   : > { %v903_v44 = vpop.xlane.xlu1 %902  ;;  %v906_v47 = vpop.xlane.xlu0 %905 }
 0x16b   : > { %3823 = vrsqrt.f32 %v921_v25  ;;  %v915_v48 = vmul.f32 0.0625, %v903_v44  ;;  %v916_v49 = vmul.f32 0.0625, %v906_v47 }
 0x16c   : > { %v3818_v53 = vpop.eup %3817  ;;  %3825 = vrsqrt.f32 %v922_v26 }
 0x16d   : > { %v923_v54 = vadd.f32 1e-05, %v915_v48  ;;  %v924_v27 = vadd.f32 1e-05, %v916_v49  ;;  %v948_v55 = vrot.slane %v3818_v53, %v4237_v56  ;;  %v955_v58 = vrot.slane %v3818_v53, %v4239_v57 }
 0x16e   : > { %v909_v31 = vpop.xlane.xlu1 %908 }
 0x16f   : > { %3827 = vrsqrt.f32 %v923_v54  ;;  %v917_v59 = vmul.f32 0.0625, %v909_v31  ;;  %v1070_v62 = vmul.f32 %v948_v55, %v4245_v3  ;;  %v1071_v63 = vmul.f32 %v955_v58, %v4247_v4 }
 0x170   : > { %v3820_v2 = vpop.eup %3819  ;;  %3829 = vrsqrt.f32 %v924_v27 }
 0x171   : > { %v3822_v37 = vpop.eup %3821  ;;  %v976_v39 = vrot.slane %v3820_v2, %v4237_v56  ;;  %v983_v6 = vrot.slane %v3820_v2, %v4239_v57  ;;  %v925_v9 = vadd.f32 1e-05, %v917_v59  ;;  %v1094_v10 = vmul.f32 %v4347_v52, %v1070_v62 }
 0x172   : > { %v962_v40 = vrot.slane %v3822_v37, %v4237_v56  ;;  %v969_v3 = vrot.slane %v3822_v37, %v4239_v57  ;;  %v1095_v4 = vmul.f32 %v4358_v33, %v1071_v63 }
 0x173   : > { %v1074_v41 = vmul.f32 %v976_v39, %v4249_v7  ;;  %v1075_v11 = vmul.f32 %v983_v6, %v4251_v8  ;;  %3831 = vrsqrt.f32 %v925_v9  ;;  %v1118_v15 = vadd.f32 %v4352_v30, %v1094_v10 }
 0x174   : > { %v1072_v12 = vmul.f32 %v962_v40, %v4266_v19  ;;  %v1073_v13 = vmul.f32 %v969_v3, %v4269_v20  ;;  %v1119_v16 = vadd.f32 %v4364_v5, %v1095_v4 }
 0x175   : > { %v3824_v14 = vpop.eup %3823  ;;  %v1098_v17 = vmul.f32 %v4347_v52, %v1074_v41  ;;  %v1099_v18 = vmul.f32 %v4358_v33, %v1075_v11 }
 0x176   : > { %v3826_v23 = vpop.eup %3825  ;;  %v990_v24 = vrot.slane %v3824_v14, %v4237_v56  ;;  %v997_v7 = vrot.slane %v3824_v14, %v4239_v57  ;;  %v1096_v8 = vmul.f32 %v4347_v52, %v1072_v12  ;;  %v1097_v19 = vmul.f32 %v4358_v33, %v1073_v13 }
 0x177   : > { %v1122_v20 = vadd.f32 %v4352_v30, %v1098_v17  ;;  %v1123_v28 = vadd.f32 %v4364_v5, %v1099_v18  ;;  %v1004_v34 = vrot.slane %v3826_v23, %v4237_v56  ;;  %v1150_v42 = vcombine.low %v1118_v15, %v1119_v16 }
 0x178   : > { %v1076_v35 = vmul.f32 %v990_v24, %v4272_v29  ;;  %v1077_v36 = vmul.f32 %v997_v7, %v4275_v32  ;;  %v1120_v38 = vadd.f32 %v4352_v30, %v1096_v8  ;;  %v1121_v21 = vadd.f32 %v4364_v5, %v1097_v19 }
 0x179   : > { %v3828_v22 = vpop.eup %3827  ;;  %v1152_v43 = vcombine.low %v1122_v20, %v1123_v28  ;;  %v1011_v25 = vrot.slane %v3826_v23, %v4239_v57  ;;  %v1078_v26 = vmul.f32 %v1004_v34, %v4288_v45 }
 0x17a   : > { %v3830_v44 = vpop.eup %3829  ;;  %v1151_v47 = vcombine.low %v1120_v38, %v1121_v21  ;;  %v1100_v48 = vmul.f32 %v4347_v52, %v1076_v35  ;;  %v1101_v49 = vmul.f32 %v4358_v33, %v1077_v36  ;;  %v1018_v29 = vrot.slane %v3828_v22, %v4237_v56 }
 0x17b   : > { %v1032_v32 = vrot.slane %v3830_v44, %v4237_v56  ;;  %v1039_v53 = vrot.slane %v3830_v44, %v4239_v57  ;;  %v1025_v54 = vrot.slane %v3828_v22, %v4239_v57  ;;  %v1079_v27 = vmul.f32 %v1011_v25, %v4291_v46 }
 0x17c   : > { %v1166_v55 = vpack.c.bf16 %v1151_v47, %v1150_v42  ;;  %v1124_v58 = vadd.f32 %v4352_v30, %v1100_v48  ;;  %v1125_v45 = vadd.f32 %v4364_v5, %v1101_v49  ;;  %v1080_v31 = vmul.f32 %v1018_v29, %v4296_v50 }
 0x17d   : > { %v3832_v59 = vpop.eup %3831  ;;  %v1082_v62 = vmul.f32 %v1032_v32, %v4313_v60  ;;  %v1083_v63 = vmul.f32 %v1039_v53, %v4316_v61  ;;  %v1081_v2 = vmul.f32 %v1025_v54, %v4299_v51  ;;  %v1102_v37 = vmul.f32 %v4347_v52, %v1078_v26 }
 0x17e   : > { %v1046_v39 = vrot.slane %v3832_v59, %v4237_v56  ;;  %v1053_v46 = vrot.slane %v3832_v59, %v4239_v57  ;;  %3580 = vmatprep.mubr.msk.bf16.mxu0 %vm652_vm0, %v1166_v55  ;;  %v1153_v6 = vcombine.low %v1124_v58, %v1125_v45  ;;  %v1103_v9 = vmul.f32 %v4358_v33, %v1079_v27 }
 0x17f   : > { %v1104_v50 = vmul.f32 %v4347_v52, %v1080_v31  ;;  %v1105_v10 = vmul.f32 %v4358_v33, %v1081_v2  ;;  %v1126_v60 = vadd.f32 %v4352_v30, %v1102_v37  ;;  %v1106_v61 = vmul.f32 %v4347_v52, %v1082_v62 }
 0x180   : > { %v1084_v51 = vmul.f32 %v1046_v39, %v4321_v0  ;;  %v1085_v40 = vmul.f32 %v1053_v46, %v4324_v1  ;;  %v1167_v3 = vpack.c.bf16 %v1153_v6, %v1152_v43  ;;  %v1127_v4 = vadd.f32 %v4364_v5, %v1103_v9 }
 0x181   : > { %v1128_v41 = vadd.f32 %v4352_v30, %v1104_v50  ;;  %v1129_v11 = vadd.f32 %v4364_v5, %v1105_v10  ;;  %v1107_v12 = vmul.f32 %v4358_v33, %v1083_v63  ;;  %v1130_v15 = vadd.f32 %v4352_v30, %v1106_v61  ;;  %v598_v61 = vld [vmem:[%s5074_s1] sm:$0xff] }
 0x182   : > { %3581 = vmatmul.mubr.msk.bf16.vlgmr.msra.gmra.mrb[0].mxu0 %vm652_vm0, %v1167_v3  ;;  %v1108_v13 = vmul.f32 %v4347_v52, %v1084_v51  ;;  %v1109_v14 = vmul.f32 %v4358_v33, %v1085_v40  ;;  %v1154_v0 = vcombine.low %v1126_v60, %v1127_v4  ;;  %v4003_v52 = vmov 0.0   ;;  %v599_v40 = vld [vmem:[%s5074_s1 + $0x8] sm:$0xff] }
 0x183   : > { %v1155_v16 = vcombine.low %v1128_v41, %v1129_v11  ;;  %v1131_v1 = vadd.f32 %v4364_v5, %v1107_v12  ;;  %3588 = vmatprep.subr.bf16.mxu1 %v4003_v52  ;;  %3600 = vmatprep.subr.bf16.mxu0 %v4003_v52 }
 0x184   : > { %v1132_v17 = vadd.f32 %v4352_v30, %v1108_v13  ;;  %v1133_v18 = vadd.f32 %v4364_v5, %v1109_v14  ;;  %3602 = vmatprep.mubr.msk.bf16.mxu0 %vm4004_vm1, %v4003_v52  ;;  %v3477_v30 = vld [vmem:[%s5078_s5] ss:$0 sm:$0xff] }
 0x185   : > { %v1168_v23 = vpack.c.bf16 %v1155_v16, %v1154_v0  ;;  %v1156_v24 = vcombine.low %v1130_v15, %v1131_v1 }
 0x186   : > { %v1157_v7 = vcombine.low %v1132_v17, %v1133_v18 }
 0x187   : > { %3584 = vmatprep.mubr.msk.bf16.mxu1 %vm652_vm0, %v1168_v23 }
 0x188   : > { %v1169_v8 = vpack.c.bf16 %v1157_v7, %v1156_v24 }
 0x18a   : > { %3585 = vmatmul.mubr.msk.bf16.vlgmr.msra.gmra.mrb[0].mxu1 %vm652_vm0, %v1169_v8 }
 0x18b   : > { %3590 = vmatprep.mubr.msk.bf16.mxu1 %vm4004_vm1, %v4003_v52 }
 0x255   : > { %v3582_v33 = vpop.f32.mrb[0].mxu0 }
 0x256   : > { %v1237_v5 = vadd.f32 %v3582_v33, %v3477_v30  ;;  %v1228_v19 = vpop.f32.mrb[1].mxu0 }
 0x257   : > { %v1229_v20 = vadd.f32 %v3477_v30, %v1228_v19  ;;  %v3583_v28 = vpop.f32.mrb[2].mxu0 }
 0x258   : > { %v1240_v34 = vadd.f32 %v3583_v28, %v3477_v30  ;;  %v1231_v35 = vpop.f32.mrb[3].mxu0  ;;  %v1261_v38 = vmul.f32 0.35355338, %v1237_v5 }
 0x259   : > { %v1232_v36 = vadd.f32 %v3477_v30, %v1231_v35  ;;  %v1259_v42 = vmul.f32 0.35355338, %v1229_v20 }
 0x25a   : > { %v1262_v21 = vmul.f32 0.35355338, %v1240_v34  ;;  %v4439_v22 = vpack.c.bf16 %v1240_v34, %v1237_v5 }
 0x25b   : > { %v1260_v43 = vmul.f32 0.35355338, %v1232_v36  ;;  %v4441_v25 = vpack.c.bf16 %v1232_v36, %v1229_v20 }
 0x25c   : > { %v4443_v26 = vpack.c.bf16 %v1262_v21, %v1261_v38  ;;  %1327 = vrot.lane.b32.xlu1 %v4439_v22, %s4005_s25 }
 0x25d   : > { %v4446_v44 = vpack.c.bf16 %v1260_v43, %v1259_v42  ;;  %1276 = vrot.lane.b32.xlu0 %v4441_v25, %s4005_s25  ;;  %v3586_v47 = vpop.f32.mrb[0].mxu1 }
 0x25e   : > { %v1253_v48 = vadd.f32 %v3586_v47, %v3477_v30  ;;  %v1244_v49 = vpop.f32.mrb[1].mxu1 }
 0x25f   : > { %v1245_v29 = vadd.f32 %v3477_v30, %v1244_v49  ;;  %v3587_v32 = vpop.f32.mrb[2].mxu1 }
 0x260   : > { %v1256_v53 = vadd.f32 %v3587_v32, %v3477_v30  ;;  %v1247_v54 = vpop.f32.mrb[3].mxu1  ;;  %v1265_v55 = vmul.f32 0.35355338, %v1253_v48 }
 0x261   : > { %v1248_v27 = vadd.f32 %v3477_v30, %v1247_v54  ;;  %v1263_v31 = vmul.f32 0.35355338, %v1245_v29 }
 0x262   : > { %v1266_v58 = vmul.f32 0.35355338, %v1256_v53  ;;  %v4449_v45 = vpack.c.bf16 %v1256_v53, %v1253_v48 }
 0x263   : > { %v1264_v59 = vmul.f32 0.35355338, %v1248_v27  ;;  %v4451_v62 = vpack.c.bf16 %v1248_v27, %v1245_v29 }
 0x264   : > { %v4453_v63 = vpack.c.bf16 %v1266_v58, %v1265_v55 }
 0x265   : > { %v4455_v2 = vpack.c.bf16 %v1264_v59, %v1263_v31  ;;  %1377 = vrot.lane.b32.xlu1 %v4451_v62, %s4005_s25 }
 0x269   : > { %1427 = vrot.lane.b32.xlu1 %v4449_v45, %s4005_s25  ;;  %s5097_s25 = sld [smem:[#allocation8_spill]] }
 0x2ce   : > { %v1328_v46 = vpop.permute.xlu1 %1327 }
 0x2cf   : > { %v1277_v37 = vpop.permute.xlu0 %1276  ;;  %v1333_v9 = vsel %vm1278_vm2, %v1328_v46, 0 }
 0x2d0   : > { %v1283_v39 = vsel %vm1278_vm2, %v1277_v37, 0 }
 0x2d1   : > { %3589 = vmatpush3.bf16.xpose.msra.mxu1 %v1283_v39 }
 0x2d2   : > { %3594 = vmatprep.subr.bf16.mxu1 %v4003_v52 }
 0x2d7   : > { %v1378_v6 = vpop.permute.xlu1 %1377 }
 0x2d8   : > { %v1383_v50 = vsel %vm1278_vm2, %v1378_v6, 0  ;;  %3591 = vmatmul.mubr.msk.bf16.vlgmr.msra.gmra.mrb[4].mxu1 %vm1278_vm2, %v4446_v44 }
 0x2d9   : > { %3595 = vmatpush3.bf16.xpose.msra.mxu1 %v1333_v9  ;;  %3601 = vmatpush3.bf16.xpose.msra.mxu0 %v1383_v50 }
 0x2da   : > { %3596 = vmatprep.mubr.msk.bf16.mxu1 %vm4004_vm1, %v4003_v52  ;;  %3606 = vmatprep.subr.bf16.mxu1 %v4003_v52 }
 0x2db   : > { %3612 = vmatprep.subr.bf16.mxu0 %v4003_v52  ;;  %v1428_v10 = vpop.permute.xlu1 %1427 }
 0x2dc   : > { %v1433_v60 = vsel %vm1278_vm2, %v1428_v10, 0 }
 0x2e0   : > { %3597 = vmatmul.mubr.msk.bf16.vlgmr.msra.gmra.mrb[8].mxu1 %vm1278_vm2, %v4443_v26  ;;  %3603 = vmatmul.mubr.msk.bf16.vlgmr.msra.gmra.mrb[4].mxu0 %vm1278_vm2, %v4455_v2 }
 0x2e1   : > { %3607 = vmatpush3.bf16.xpose.msra.mxu1 %v1433_v60  ;;  %3608 = vmatprep.mubr.msk.bf16.mxu1 %vm4004_vm1, %v4003_v52 }
 0x2e2   : > { %3618 = vmatprep.subr.bf16.mxu1 %v4003_v52  ;;  %3614 = vmatprep.mubr.msk.bf16.mxu0 %vm4004_vm1, %v4003_v52 }
 0x2e8   : > { %3609 = vmatmul.mubr.msk.bf16.vlgmr.msra.gmra.mrb[12].mxu1 %vm1278_vm2, %v4453_v63 }
 0x2e9   : > { %3620 = vmatprep.mubr.msk.bf16.mxu1 %vm4004_vm1, %v4003_v52 }
 0x3ab   : > { %v1319_v51 = vpop.f32.mrb[4].mxu1 }
 0x3ac   : > { %v1320_v3 = vadd.f32 %v1319_v51, %v598_v61  ;;  %v3592_v4 = vpop.f32.mrb[5].mxu1 }
 0x3ad   : > { %v1322_v41 = vpop.f32.mrb[6].mxu1 }
 0x3ae   : > { %v1323_v11 = vadd.f32 %v1322_v41, %v599_v40  ;;  %v3593_v12 = vpop.f32.mrb[7].mxu1  ;;  %v1476_v13 = vsel %vm652_vm0, %v1320_v3, -inf }
 0x3af   : > { %1477 = vmax.xlane.f32.xlu0 %v1476_v13 }
 0x3b0   : > { %v1479_v14 = vsel %vm652_vm0, %v1323_v11, -inf }
 0x3b1   : > { %1480 = vmax.xlane.f32.xlu1 %v1479_v14 }
 0x3b3   : > { %v1369_v15 = vpop.f32.mrb[8].mxu1  ;;  %v1419_v0 = vpop.f32.mrb[4].mxu0 }
 0x3b4   : > { %v1370_v16 = vadd.f32 %v1369_v15, %v598_v61  ;;  %v3598_v1 = vpop.f32.mrb[9].mxu1  ;;  %v3604_v17 = vpop.f32.mrb[5].mxu0  ;;  %v1420_v19 = vadd.f32 %v1419_v0, %v598_v61 }
 0x3b5   : > { %v1372_v18 = vpop.f32.mrb[10].mxu1  ;;  %v1422_v23 = vpop.f32.mrb[6].mxu0 }
 0x3b6   : > { %v4491_v24 = vadd.f32 %v1372_v18, %v599_v40  ;;  %v1423_v7 = vadd.f32 %v1422_v23, %v599_v40  ;;  %v3599_v8 = vpop.f32.mrb[11].mxu1  ;;  %v3605_v30 = vpop.f32.mrb[7].mxu0  ;;  %v1482_v33 = vsel %vm652_vm0, %v1370_v16, -inf  ;;  %v1488_v42 = vsel %vm652_vm0, %v1420_v19, -inf }
 0x3b7   : > { %1483 = vmax.xlane.f32.xlu0 %v1482_v33 }
 0x3b8   : > { %v1491_v5 = vsel %vm652_vm0, %v1423_v7, -inf  ;;  %v1485_v20 = vsel %vm652_vm0, %v4491_v24, -inf }
 0x3b9   : > { %1492 = vmax.xlane.f32.xlu1 %v1491_v5 }
 0x3bb   : > { %1486 = vmax.xlane.f32.xlu0 %v1485_v20  ;;  %v1469_v28 = vpop.f32.mrb[12].mxu1 }
 0x3bc   : > { %v3610_v34 = vpop.f32.mrb[13].mxu1  ;;  %v1470_v36 = vadd.f32 %v1469_v28, %v598_v61 }
 0x3bd   : > { %v1472_v35 = vpop.f32.mrb[14].mxu1 }
 0x3be   : > { %v4497_v38 = vadd.f32 %v1472_v35, %v599_v40  ;;  %v3611_v21 = vpop.f32.mrb[15].mxu1  ;;  %v1494_v47 = vsel %vm652_vm0, %v1470_v36, -inf }
 0x3bf   : > { %1489 = vmax.xlane.f32.xlu0 %v1488_v42 }
 0x3c0   : > { %v1497_v43 = vsel %vm652_vm0, %v4497_v38, -inf }
 0x3c1   : > { %1498 = vmax.xlane.f32.xlu1 %v1497_v43 }
 0x3c3   : > { %1495 = vmax.xlane.f32.xlu0 %v1494_v47 }
 0x43c   : > { %v1478_v48 = vpop.xlane.xlu0 %1477 }
 0x43d   : > { %v1500_v49 = vsub.f32 %v1320_v3, %v1478_v48 }
 0x43e   : > { %v1481_v29 = vpop.xlane.xlu1 %1480 }
 0x43f   : > { %v1508_v32 = vmul.f32 1.442695, %v1500_v49  ;;  %v1501_v53 = vsub.f32 %v1323_v11, %v1481_v29 }
 0x441   : > { %3833 = vpow2.f32 %v1508_v32  ;;  %v1510_v54 = vmul.f32 1.442695, %v1501_v53 }
 0x443   : > { %3835 = vpow2.f32 %v1510_v54 }
 0x444   : > { %v1484_v27 = vpop.xlane.xlu0 %1483 }
 0x445   : > { %v1502_v39 = vsub.f32 %v1370_v16, %v1484_v27 }
 0x446   : > { %v1493_v55 = vpop.xlane.xlu1 %1492 }
 0x447   : > { %v1505_v58 = vsub.f32 %v1423_v7, %v1493_v55  ;;  %v1512_v60 = vmul.f32 1.442695, %v1502_v39 }
 0x448   : > { %v1487_v31 = vpop.xlane.xlu0 %1486 }
 0x449   : > { %v1518_v59 = vmul.f32 1.442695, %v1505_v58  ;;  %v1503_v13 = vsub.f32 %v4491_v24, %v1487_v31 }
 0x44b   : > { %v4503_v37 = vpop.eup %3833  ;;  %3837 = vpow2.f32 %v1518_v59  ;;  %v1514_v15 = vmul.f32 1.442695, %v1503_v13 }
 0x44c   : > { %v1490_v46 = vpop.xlane.xlu0 %1489  ;;  %v1524_v6 = vsel %vm652_vm0, %v4503_v37, 0.0 }
 0x44d   : > { %v4507_v9 = vpop.eup %3835  ;;  %v1504_v50 = vsub.f32 %v1420_v19, %v1490_v46  ;;  %1525 = vadd.xlane.f32.xlu0 %v1524_v6 }
 0x44e   : > { %v1527_v10 = vsel %vm652_vm0, %v4507_v9, 0.0  ;;  %v1499_v23 = vpop.xlane.xlu1 %1498 }
 0x44f   : > { %v1516_v61 = vmul.f32 1.442695, %v1504_v50  ;;  %1528 = vadd.xlane.f32.xlu1 %v1527_v10  ;;  %v1507_v24 = vsub.f32 %v4497_v38, %v1499_v23  ;;  %v600_v23 = vld [vmem:[%s5074_s1 + $0x10] sm:$0xff] }
 0x450   : > { %v1496_v12 = vpop.xlane.xlu0 %1495 }
 0x451   : > { %3839 = vpow2.f32 %v1516_v61  ;;  %v1506_v14 = vsub.f32 %v1470_v36, %v1496_v12  ;;  %v1522_v7 = vmul.f32 1.442695, %v1507_v24 }
 0x452   : > { %3841 = vpow2.f32 %v1512_v60 }
 0x453   : > { %v1520_v0 = vmul.f32 1.442695, %v1506_v14  ;;  %3843 = vpow2.f32 %v1514_v15 }
 0x455   : > { %v4511_v51 = vpop.eup %3837  ;;  %3845 = vpow2.f32 %v1520_v0 }
 0x456   : > { %v1539_v40 = vsel %vm652_vm0, %v4511_v51, 0.0  ;;  %3847 = vpow2.f32 %v1522_v7  ;;  %v601_v7 = vld [vmem:[%s5074_s1 + $0x18] sm:$0xff] }
 0x457   : > { %1540 = vadd.xlane.f32.xlu1 %v1539_v40 }
 0x45b   : > { %v4515_v3 = vpop.eup %3839 }
 0x45c   : > { %v1536_v4 = vsel %vm652_vm0, %v4515_v3, 0.0  ;;  %v4519_v41 = vpop.eup %3841 }
 0x45d   : > { %1537 = vadd.xlane.f32.xlu0 %v1536_v4  ;;  %v1530_v11 = vsel %vm652_vm0, %v4519_v41, 0.0  ;;  %v4528_v16 = vpop.eup %3843 }
 0x45e   : > { %v1533_v17 = vsel %vm652_vm0, %v4528_v16, 0.0 }
 0x45f   : > { %v4530_v1 = vpop.eup %3845 }
 0x460   : > { %v1542_v18 = vsel %vm652_vm0, %v4530_v1, 0.0  ;;  %v4542_v8 = vpop.eup %3847 }
 0x461   : > { %1531 = vadd.xlane.f32.xlu0 %v1530_v11  ;;  %v1545_v30 = vsel %vm652_vm0, %v4542_v8, 0.0 }
 0x468   : > { %1615 = vrot.lane.b32.xlu1 %v4439_v22, %s4006_s24 }
 0x46c   : > { %1662 = vrot.lane.b32.xlu1 %v4451_v62, %s4006_s24 }
 0x470   : > { %1709 = vrot.lane.b32.xlu1 %v4449_v45, %s4006_s24 }
 0x477   : > { %1568 = vrot.lane.b32.xlu0 %v4441_v25, %s4006_s24  ;;  %s4010_s24 = smov 8  }
 0x494   : > { %1534 = vadd.xlane.f32.xlu1 %v1533_v17 }
 0x496   : > { %1543 = vadd.xlane.f32.xlu0 %v1542_v18 }
 0x4a5   : > { %1811 = vrot.lane.b32.xlu1 %v4439_v22, %s4007_s26 }
 0x4ac   : > { %1759 = vrot.lane.b32.xlu0 %v4441_v25, %s4007_s26 }
 0x4b0   : > { %1757 = vrot.lane.b32.xlu0 %v4446_v44, %s4008_s27 }
 0x4b4   : > { %1809 = vrot.lane.b32.xlu0 %v4443_v26, %s4008_s27 }
 0x4b8   : > { %1861 = vrot.lane.b32.xlu0 %v4455_v2, %s4008_s27 }
 0x4c9   : > { %1546 = vadd.xlane.f32.xlu1 %v1545_v30 }
 0x4da   : > { %1863 = vrot.lane.b32.xlu1 %v4451_v62, %s4007_s26  ;;  %v1526_v44 = vpop.xlane.xlu0 %1525 }
 0x4dc   : > { %v1529_v33 = vpop.xlane.xlu1 %1528 }
 0x4dd   : > { %3849 = vrcp.f32 %v1529_v33 }
 0x4de   : > { %1915 = vrot.lane.b32.xlu1 %v4449_v45, %s4007_s26  ;;  %3851 = vrcp.f32 %v1526_v44 }
 0x4e2   : > { %1913 = vrot.lane.b32.xlu1 %v4453_v63, %s4008_s27 }
 0x4e4   : > { %v1541_v26 = vpop.xlane.xlu1 %1540 }
 0x4e7   : > { %v3850_v19 = vpop.eup %3849 }
 0x4e8   : > { %v1616_v5 = vpop.permute.xlu1 %1615  ;;  %v3852_v28 = vpop.eup %3851  ;;  %v1551_v34 = vmul.f32 %v3850_v19, %v4507_v9 }
 0x4e9   : > { %3619 = vmatpush3.bf16.msra.mxu1 %v1616_v5  ;;  %v1549_v35 = vmul.f32 %v3852_v28, %v4503_v37 }
 0x4ea   : > { %v1538_v2 = vpop.xlane.xlu0 %1537  ;;  %3630 = vmatprep.subr.bf16.mxu1 %v4003_v52 }
 0x4eb   : > { %3853 = vrcp.f32 %v1538_v2  ;;  %v1564_v63 = vpack.c.bf16 %v1551_v34, %v1549_v35 }
 0x4ec   : > { %3855 = vrcp.f32 %v1541_v26  ;;  %v1663_v21 = vpop.permute.xlu1 %1662 }
 0x4ee   : > { %v1532_v20 = vpop.xlane.xlu0 %1531 }
 0x4ef   : > { %3857 = vrcp.f32 %v1532_v20 }
 0x4f0   : > { %v1710_v49 = vpop.permute.xlu1 %1709 }
 0x4f2   : > { %v1569_v36 = vpop.permute.xlu0 %1568 }
 0x4f3   : > { %3613 = vmatpush3.bf16.msra.mxu0 %v1569_v36 }
 0x4f4   : > { %3624 = vmatprep.subr.bf16.mxu0 %v4003_v52 }
 0x4f5   : > { %v3854_v38 = vpop.eup %3853 }
 0x4f6   : > { %3615 = vmatmul.mubr.msk.bf16.vlgmr.msra.gmra.mrb[8].mxu0 %vm652_vm0, %v1564_v63  ;;  %v3856_v42 = vpop.eup %3855  ;;  %v1557_v43 = vmul.f32 %v3854_v38, %v4515_v3 }
 0x4f7   : > { %3625 = vmatpush3.bf16.msra.mxu0 %v1663_v21  ;;  %3626 = vmatprep.mubr.msk.bf16.mxu0 %vm4004_vm1, %v4003_v52  ;;  %v1559_v47 = vmul.f32 %v3856_v42, %v4511_v51 }
 0x4f8   : > { %3636 = vmatprep.subr.bf16.mxu0 %v4003_v52 }
 0x4f9   : > { %v1566_v48 = vpack.c.bf16 %v1559_v47, %v1557_v43  ;;  %v3858_v27 = vpop.eup %3857 }
 0x4fa   : > { %v1553_v58 = vmul.f32 %v3858_v27, %v4519_v41 }
 0x4fe   : > { %3627 = vmatmul.mubr.msk.bf16.vlgmr.msra.gmra.mrb[12].mxu0 %vm652_vm0, %v1566_v48 }
 0x4ff   : > { %3638 = vmatprep.mubr.msk.bf16.mxu0 %vm4004_vm1, %v4003_v52 }
 0x521   : > { %v1535_v29 = vpop.xlane.xlu1 %1534 }
 0x522   : > { %3859 = vrcp.f32 %v1535_v29 }
 0x523   : > { %v1544_v32 = vpop.xlane.xlu0 %1543 }
 0x524   : > { %3861 = vrcp.f32 %v1544_v32 }
 0x525   : > { %v1812_v39 = vpop.permute.xlu1 %1811 }
 0x526   : > { %v1817_v4 = vsel %vm1278_vm2, %v1812_v39, 0 }
 0x527   : > { %v1760_v53 = vpop.permute.xlu0 %1759 }
 0x528   : > { %v1765_v54 = vsel %vm1278_vm2, %v1760_v53, 0 }
 0x529   : > { %3637 = vmatpush3.bf16.xpose.msra.mxu0 %v1765_v54 }
 0x52a   : > { %3648 = vmatprep.subr.bf16.mxu0 %v4003_v52 }
 0x52b   : > { %v1758_v59 = vpop.permute.xlu0 %1757 }
 0x52c   : > { %v3860_v55 = vpop.eup %3859 }
 0x52d   : > { %v1555_v31 = vmul.f32 %v3860_v55, %v4528_v16 }
 0x52e   : > { %v3862_v10 = vpop.eup %3861 }
 0x52f   : > { %v1565_v37 = vpack.c.bf16 %v1555_v31, %v1553_v58  ;;  %v1810_v50 = vpop.permute.xlu0 %1809  ;;  %v1561_v61 = vmul.f32 %v3862_v10, %v4530_v1 }
 0x530   : > { %3639 = vmatmul.mubr.msk.bf16.vlgmr.msra.gmra.mrb[16].mxu0 %vm1278_vm2, %v1758_v59 }
 0x531   : > { %3621 = vmatmul.mubr.msk.bf16.vlgmr.msra.gmra.mrb[16].mxu1 %vm652_vm0, %v1565_v37  ;;  %3650 = vmatprep.mubr.msk.bf16.mxu0 %vm4004_vm1, %v4003_v52 }
 0x532   : > { %3631 = vmatpush3.bf16.msra.mxu1 %v1710_v49  ;;  %3632 = vmatprep.mubr.msk.bf16.mxu1 %vm4004_vm1, %v4003_v52 }
 0x533   : > { %3642 = vmatprep.subr.bf16.mxu1 %v4003_v52  ;;  %v1862_v51 = vpop.permute.xlu0 %1861 }
 0x556   : > { %v1547_v46 = vpop.xlane.xlu1 %1546 }
 0x557   : > { %3863 = vrcp.f32 %v1547_v46 }
 0x55a   : > { %v1864_v6 = vpop.permute.xlu1 %1863 }
 0x55b   : > { %v1869_v9 = vsel %vm1278_vm2, %v1864_v6, 0 }
 0x55c   : > { %3649 = vmatpush3.bf16.xpose.msra.mxu0 %v1869_v9 }
 0x55d   : > { %3660 = vmatprep.subr.bf16.mxu0 %v4003_v52 }
 0x55e   : > { %v1916_v41 = vpop.permute.xlu1 %1915 }
 0x55f   : > { %v1921_v11 = vsel %vm1278_vm2, %v1916_v41, 0 }
 0x561   : > { %v3864_v60 = vpop.eup %3863 }
 0x562   : > { %v1563_v40 = vmul.f32 %v3864_v60, %v4542_v8  ;;  %v1914_v12 = vpop.permute.xlu1 %1913 }
 0x563   : > { %3651 = vmatmul.mubr.msk.bf16.vlgmr.msra.gmra.mrb[20].mxu0 %vm1278_vm2, %v1862_v51 }
 0x564   : > { %v1567_v3 = vpack.c.bf16 %v1563_v40, %v1561_v61  ;;  %3662 = vmatprep.mubr.msk.bf16.mxu0 %vm4004_vm1, %v4003_v52 }
 0x566   : > { %3633 = vmatmul.mubr.msk.bf16.vlgmr.msra.gmra.mrb[20].mxu1 %vm652_vm0, %v1567_v3 }
 0x567   : > { %3643 = vmatpush3.bf16.xpose.msra.mxu1 %v1817_v4  ;;  %3644 = vmatprep.mubr.msk.bf16.mxu1 %vm4004_vm1, %v4003_v52 }
 0x568   : > { %3654 = vmatprep.subr.bf16.mxu1 %v4003_v52 }
 0x56e   : > { %3645 = vmatmul.mubr.msk.bf16.vlgmr.msra.gmra.mrb[24].mxu1 %vm1278_vm2, %v1810_v50 }
 0x56f   : > { %3655 = vmatpush3.bf16.xpose.msra.mxu1 %v1921_v11  ;;  %3656 = vmatprep.mubr.msk.bf16.mxu1 %vm4004_vm1, %v4003_v52 }
 0x570   : > { %3666 = vmatprep.subr.bf16.mxu1 %v4003_v52 }
 0x576   : > { %3657 = vmatmul.mubr.msk.bf16.vlgmr.msra.gmra.mrb[28].mxu1 %vm1278_vm2, %v1914_v12 }
 0x577   : > { %3668 = vmatprep.mubr.msk.bf16.mxu1 %vm4004_vm1, %v4003_v52 }
 0x5c9   : > { %v4593_v13 = vpop.f32.mrb[8].mxu0 }
 0x5ca   : > { %v3616_v14 = vpop.f32.mrb[9].mxu0 }
 0x5cb   : > { %v4595_v15 = vpop.f32.mrb[10].mxu0 }
 0x5cc   : > { %v3617_v0 = vpop.f32.mrb[11].mxu0 }
 0x5d1   : > { %v4597_v16 = vpop.f32.mrb[12].mxu0 }
 0x5d2   : > { %v3628_v1 = vpop.f32.mrb[13].mxu0 }
 0x5d3   : > { %v4599_v17 = vpop.f32.mrb[14].mxu0 }
 0x5d4   : > { %v3629_v18 = vpop.f32.mrb[15].mxu0 }
 0x603   : > { %v1801_v24 = vpop.f32.mrb[16].mxu0 }
 0x604   : > { %v1802_v8 = vadd.f32 %v1801_v24, %v600_v23  ;;  %v4607_v30 = vpop.f32.mrb[16].mxu1  ;;  %v3640_v33 = vpop.f32.mrb[17].mxu0 }
 0x605   : > { %v3622_v44 = vpop.f32.mrb[17].mxu1  ;;  %v1804_v26 = vpop.f32.mrb[18].mxu0 }
 0x606   : > { %v1805_v5 = vadd.f32 %v1804_v26, %v601_v7  ;;  %v4609_v2 = vpop.f32.mrb[18].mxu1  ;;  %v3641_v19 = vpop.f32.mrb[19].mxu0  ;;  %v1964_v20 = vsel %vm652_vm0, %v1802_v8, -inf }
 0x607   : > { %1965 = vmax.xlane.f32.xlu0 %v1964_v20  ;;  %v3623_v28 = vpop.f32.mrb[19].mxu1 }
 0x608   : > { %v1967_v34 = vsel %vm652_vm0, %v1805_v5, -inf }
 0x609   : > { %1968 = vmax.xlane.f32.xlu1 %v1967_v34 }
 0x636   : > { %v1905_v35 = vpop.f32.mrb[20].mxu0 }
 0x637   : > { %v3652_v36 = vpop.f32.mrb[21].mxu0  ;;  %v1906_v31 = vadd.f32 %v1905_v35, %v600_v23 }
 0x638   : > { %v1908_v63 = vpop.f32.mrb[22].mxu0 }
 0x639   : > { %v1909_v38 = vadd.f32 %v1908_v63, %v601_v7  ;;  %v4613_v21 = vpop.f32.mrb[20].mxu1  ;;  %v3653_v42 = vpop.f32.mrb[23].mxu0  ;;  %v1976_v10 = vsel %vm652_vm0, %v1906_v31, -inf }
 0x63a   : > { %v3634_v43 = vpop.f32.mrb[21].mxu1 }
 0x63b   : > { %v4615_v47 = vpop.f32.mrb[22].mxu1  ;;  %v1979_v48 = vsel %vm652_vm0, %v1909_v38, -inf }
 0x63c   : > { %1980 = vmax.xlane.f32.xlu1 %v1979_v48  ;;  %v3635_v49 = vpop.f32.mrb[23].mxu1 }
 0x641   : > { %v1853_v29 = vpop.f32.mrb[24].mxu1 }
 0x642   : > { %v1854_v32 = vadd.f32 %v1853_v29, %v600_v23  ;;  %v3646_v53 = vpop.f32.mrb[25].mxu1 }
 0x643   : > { %v1856_v54 = vpop.f32.mrb[26].mxu1 }
 0x644   : > { %v1857_v27 = vadd.f32 %v1856_v54, %v601_v7  ;;  %v3647_v55 = vpop.f32.mrb[27].mxu1  ;;  %v1970_v58 = vsel %vm652_vm0, %v1854_v32, -inf }
 0x645   : > { %1971 = vmax.xlane.f32.xlu0 %v1970_v58 }
 0x646   : > { %v1973_v59 = vsel %vm652_vm0, %v1857_v27, -inf }
 0x649   : > { %1974 = vmax.xlane.f32.xlu0 %v1973_v59  ;;  %v1957_v37 = vpop.f32.mrb[28].mxu1 }
 0x64a   : > { %v3658_v39 = vpop.f32.mrb[29].mxu1  ;;  %v1958_v6 = vadd.f32 %v1957_v37, %v600_v23 }
 0x64b   : > { %v1960_v46 = vpop.f32.mrb[30].mxu1 }
 0x64c   : > { %v4620_v9 = vadd.f32 %v1960_v46, %v601_v7  ;;  %v3659_v50 = vpop.f32.mrb[31].mxu1  ;;  %v1982_v61 = vsel %vm652_vm0, %v1958_v6, -inf }
 0x64d   : > { %1977 = vmax.xlane.f32.xlu0 %v1976_v10 }
 0x64e   : > { %v1985_v60 = vsel %vm652_vm0, %v4620_v9, -inf }
 0x64f   : > { %1986 = vmax.xlane.f32.xlu1 %v1985_v60 }
 0x651   : > { %1983 = vmax.xlane.f32.xlu0 %v1982_v61 }
 0x694   : > { %v1966_v51 = vpop.xlane.xlu0 %1965 }
 0x695   : > { %v1988_v40 = vsub.f32 %v1802_v8, %v1966_v51 }
 0x696   : > { %v1969_v3 = vpop.xlane.xlu1 %1968 }
 0x697   : > { %v1996_v4 = vmul.f32 1.442695, %v1988_v40  ;;  %v1989_v41 = vsub.f32 %v1805_v5, %v1969_v3 }
 0x699   : > { %3865 = vpow2.f32 %v1996_v4  ;;  %v1998_v11 = vmul.f32 1.442695, %v1989_v41 }
 0x69b   : > { %3867 = vpow2.f32 %v1998_v11 }
 0x6a3   : > { %v4626_v12 = vpop.eup %3865 }
 0x6a4   : > { %v2012_v14 = vsel %vm652_vm0, %v4626_v12, 0.0 }
 0x6a5   : > { %v4630_v0 = vpop.eup %3867  ;;  %2013 = vadd.xlane.f32.xlu0 %v2012_v14 }
 0x6a6   : > { %v2015_v1 = vsel %vm652_vm0, %v4630_v0, 0.0 }
 0x6a7   : > { %2016 = vadd.xlane.f32.xlu1 %v2015_v1 }
 0x6c9   : > { %v1981_v18 = vpop.xlane.xlu1 %1980 }
 0x6ca   : > { %v1993_v7 = vsub.f32 %v1909_v38, %v1981_v18 }
 0x6cc   : > { %v2006_v26 = vmul.f32 1.442695, %v1993_v7 }
 0x6d2   : > { %v1972_v23 = vpop.xlane.xlu0 %1971 }
 0x6d3   : > { %v1990_v24 = vsub.f32 %v1854_v32, %v1972_v23 }
 0x6d5   : > { %v2000_v8 = vmul.f32 1.442695, %v1990_v24 }
 0x6d6   : > { %v1975_v33 = vpop.xlane.xlu0 %1974 }
 0x6d7   : > { %3869 = vpow2.f32 %v2000_v8  ;;  %v1991_v44 = vsub.f32 %v1857_v27, %v1975_v33 }
 0x6d9   : > { %v2002_v5 = vmul.f32 1.442695, %v1991_v44 }
 0x6da   : > { %v1978_v19 = vpop.xlane.xlu0 %1977 }
 0x6db   : > { %3871 = vpow2.f32 %v2002_v5  ;;  %v1992_v20 = vsub.f32 %v1906_v31, %v1978_v19 }
 0x6dc   : > { %3873 = vpow2.f32 %v2006_v26  ;;  %v1987_v27 = vpop.xlane.xlu1 %1986 }
 0x6dd   : > { %v2004_v28 = vmul.f32 1.442695, %v1992_v20  ;;  %v1995_v55 = vsub.f32 %v4620_v9, %v1987_v27 }
 0x6de   : > { %v1984_v34 = vpop.xlane.xlu0 %1983 }
 0x6df   : > { %3875 = vpow2.f32 %v2004_v28  ;;  %v1994_v35 = vsub.f32 %v1958_v6, %v1984_v34  ;;  %v2010_v58 = vmul.f32 1.442695, %v1995_v55 }
 0x6e1   : > { %v3870_v36 = vpop.eup %3869  ;;  %v2008_v63 = vmul.f32 1.442695, %v1994_v35 }
 0x6e2   : > { %v2018_v42 = vsel %vm652_vm0, %v3870_v36, 0.0 }
 0x6e3   : > { %3877 = vpow2.f32 %v2008_v63  ;;  %2019 = vadd.xlane.f32.xlu0 %v2018_v42 }
 0x6e4   : > { %3879 = vpow2.f32 %v2010_v58 }
 0x6e5   : > { %v3872_v38 = vpop.eup %3871 }
 0x6e6   : > { %v2021_v43 = vsel %vm652_vm0, %v3872_v38, 0.0  ;;  %v3874_v48 = vpop.eup %3873 }
 0x6e7   : > { %2022 = vadd.xlane.f32.xlu1 %v2021_v43  ;;  %v2027_v32 = vsel %vm652_vm0, %v3874_v48, 0.0 }
 0x6e9   : > { %v3876_v49 = vpop.eup %3875 }
 0x6ea   : > { %v2024_v29 = vsel %vm652_vm0, %v3876_v49, 0.0 }
 0x6eb   : > { %2025 = vadd.xlane.f32.xlu0 %v2024_v29  ;;  %2028 = vadd.xlane.f32.xlu1 %v2027_v32 }
 0x6ed   : > { %v4638_v53 = vpop.eup %3877 }
 0x6ee   : > { %v2030_v54 = vsel %vm652_vm0, %v4638_v53, 0.0  ;;  %v3880_v31 = vpop.eup %3879 }
 0x6ef   : > { %2031 = vadd.xlane.f32.xlu0 %v2030_v54  ;;  %v2033_v59 = vsel %vm652_vm0, %v3880_v31, 0.0 }
 0x6fc   : > { %2103 = vrot.lane.b32.xlu1 %v4439_v22, %s4009_s29 }
 0x700   : > { %2150 = vrot.lane.b32.xlu1 %v4451_v62, %s4009_s29 }
 0x705   : > { %2056 = vrot.lane.b32.xlu0 %v4441_v25, %s4009_s29 }
 0x724   : > { %2034 = vadd.xlane.f32.xlu1 %v2033_v59 }
 0x732   : > { %v2014_v37 = vpop.xlane.xlu0 %2013 }
 0x734   : > { %v2017_v39 = vpop.xlane.xlu1 %2016 }
 0x735   : > { %2197 = vrot.lane.b32.xlu1 %v4449_v45, %s4009_s29  ;;  %3881 = vrcp.f32 %v2017_v39  ;;  %s5099_s29 = sld [smem:[#allocation5_spill]] (%p4134_p6) }
 0x736   : > { %3883 = vrcp.f32 %v2014_v37 }
 0x73b   : > { %s3521_s20 = sshll.u32 (%p4134_p6), %s5099_s29, 6 }
 0x73f   : > { %v3882_v6 = vpop.eup %3881 }
 0x740   : > { %v3884_v9 = vpop.eup %3883  ;;  %v2039_v45 = vmul.f32 %v3882_v6, %v4630_v0 }
 0x741   : > { %v2037_v51 = vmul.f32 %v3884_v9, %v4626_v12 }
 0x743   : > { %v2052_v41 = vpack.c.bf16 %v2039_v45, %v2037_v51 }
 0x770   : > { %v2020_v46 = vpop.xlane.xlu0 %2019 }
 0x771   : > { %3885 = vrcp.f32 %v2020_v46 }
 0x774   : > { %v2023_v22 = vpop.xlane.xlu1 %2022 }
 0x775   : > { %3887 = vrcp.f32 %v2023_v22 }
 0x778   : > { %v2026_v25 = vpop.xlane.xlu0 %2025  ;;  %v2029_v62 = vpop.xlane.xlu1 %2028 }
 0x779   : > { %3889 = vrcp.f32 %v2026_v25 }
 0x77a   : > { %3891 = vrcp.f32 %v2029_v62 }
 0x77b   : > { %v3886_v60 = vpop.eup %3885 }
 0x77c   : > { %v2032_v50 = vpop.xlane.xlu0 %2031  ;;  %v2104_v10 = vpop.permute.xlu1 %2103  ;;  %v2041_v40 = vmul.f32 %v3886_v60, %v3870_v36 }
 0x77d   : > { %3667 = vmatpush3.bf16.msra.mxu1 %v2104_v10  ;;  %3893 = vrcp.f32 %v2032_v50 }
 0x77e   : > { %3678 = vmatprep.subr.bf16.mxu1 %v4003_v52 }
 0x77f   : > { %v3888_v61 = vpop.eup %3887 }
 0x780   : > { %v2043_v3 = vmul.f32 %v3888_v61, %v3872_v38  ;;  %v2057_v4 = vpop.permute.xlu0 %2056  ;;  %v2151_v18 = vpop.permute.xlu1 %2150 }
 0x781   : > { %3661 = vmatpush3.bf16.msra.mxu0 %v2057_v4 }
 0x782   : > { %v2053_v11 = vpack.c.bf16 %v2043_v3, %v2041_v40  ;;  %3672 = vmatprep.subr.bf16.mxu0 %v4003_v52 }
 0x783   : > { %v3890_v14 = vpop.eup %3889 }
 0x784   : > { %v3892_v1 = vpop.eup %3891  ;;  %3663 = vmatmul.mubr.msk.bf16.vlgmr.msra.gmra.mrb[24].mxu0 %vm652_vm0, %v2052_v41  ;;  %3669 = vmatmul.mubr.msk.bf16.vlgmr.msra.gmra.mrb[32].mxu1 %vm652_vm0, %v2053_v11  ;;  %v2045_v12 = vmul.f32 %v3890_v14, %v3876_v49 }
 0x785   : > { %3673 = vmatpush3.bf16.msra.mxu0 %v2151_v18  ;;  %3674 = vmatprep.mubr.msk.bf16.mxu0 %vm4004_vm1, %v4003_v52  ;;  %v2047_v0 = vmul.f32 %v3892_v1, %v3874_v48 }
 0x786   : > { %3680 = vmatprep.mubr.msk.bf16.mxu1 %vm4004_vm1, %v4003_v52  ;;  %v3813_v52 = vld [vmem:[%s5079_s6] sm:$0xff]  }
 0x787   : > { %v2054_v23 = vpack.c.bf16 %v2047_v0, %v2045_v12  ;;  %v3894_v8 = vpop.eup %3893  ;;  %3684 = vmatprep.subr.bf16.mxu0 %v3813_v52 }
 0x788   : > { %v2049_v44 = vmul.f32 %v3894_v8, %v4638_v53 }
 0x78c   : > { %3675 = vmatmul.mubr.msk.bf16.vlgmr.msra.gmra.mrb[28].mxu0 %vm652_vm0, %v2054_v23 }
 0x78d   : > { %3685 = vmatpush3.bf16.msra.mxu0 %v3813_v52 }
 0x7b1   : > { %v2035_v24 = vpop.xlane.xlu1 %2034 }
 0x7b2   : > { %3895 = vrcp.f32 %v2035_v24 }
 0x7b5   : > { %v2198_v7 = vpop.permute.xlu1 %2197 }
 0x7b6   : > { %3679 = vmatpush3.bf16.msra.mxu1 %v2198_v7  ;;  %v3929_v7 = vld [vmem:[%s4175_s15] sm:$0xf] }
 0x7bc   : > { %v3896_v33 = vpop.eup %3895 }
 0x7bd   : > { %v2051_v26 = vmul.f32 %v3896_v33, %v3880_v31  ;;  %v3930_v33 = vld [vmem:[%s4175_s15 + $0x14] sm:$0xf] }
 0x7bf   : > { %v2055_v5 = vpack.c.bf16 %v2051_v26, %v2049_v44  ;;  %v3931_v26 = vld [vmem:[%s4175_s15 + $0x4] sm:$0xf] }
 0x7c1   : > { %3681 = vmatmul.mubr.msk.bf16.vlgmr.msra.gmra.mrb[36].mxu1 %vm652_vm0, %v2055_v5 }
 0x857   : > { %v2096_v19 = vpop.f32.mrb[24].mxu0  ;;  %v2143_v20 = vpop.f32.mrb[32].mxu1 }
 0x858   : > { %v3664_v28 = vpop.f32.mrb[25].mxu0  ;;  %v3670_v34 = vpop.f32.mrb[33].mxu1 }
 0x859   : > { %v2099_v35 = vpop.f32.mrb[26].mxu0  ;;  %v2146_v36 = vpop.f32.mrb[34].mxu1  ;;  %v3933_v34 = vld [vmem:[%s4175_s15 + $0x8] sm:$0xf] }
 0x85a   : > { %v3784_v63 = vpack.i.bf16 %v2099_v35, %v2096_v19  ;;  %v3789_v42 = vpack.i.bf16 %v2146_v36, %v2143_v20  ;;  %v3665_v38 = vpop.f32.mrb[27].mxu0  ;;  %v3671_v43 = vpop.f32.mrb[35].mxu1  ;;  %v3932_v20 = vld [vmem:[%s4175_s15 + $0x10] sm:$0xf]  ;;  %v3934_v36 = vld [vmem:[%s4175_s15 + $0xc] sm:$0xf] }
 0x85b   : > { %v3935_v38 = vld [vmem:[%s4175_s15 + $0x1c] sm:$0xf] }
 0x85c   : > { %3785 = vrot.lane.b32.xlu0 %v3784_v63, %s4010_s24  ;;  %3790 = vrot.lane.b32.xlu1 %v3789_v42, %s4010_s24 }
 0x85f   : > { %v2190_v48 = vpop.f32.mrb[28].mxu0 }
 0x860   : > { %v3676_v49 = vpop.f32.mrb[29].mxu0 }
 0x861   : > { %v2193_v29 = vpop.f32.mrb[30].mxu0 }
 0x862   : > { %v3794_v32 = vpack.i.bf16 %v2193_v29, %v2190_v48  ;;  %v3677_v53 = vpop.f32.mrb[31].mxu0 }
 0x864   : > { %3795 = vrot.lane.b32.xlu0 %v3794_v32, %s4010_s24  ;;  %v3936_v32 = vld [vmem:[%s4175_s15 + $0x18] sm:$0xf] }
 0x894   : > { %v2237_v54 = vpop.f32.mrb[36].mxu1 }
 0x895   : > { %v3682_v27 = vpop.f32.mrb[37].mxu1 }
 0x896   : > { %v2240_v55 = vpop.f32.mrb[38].mxu1 }
 0x897   : > { %v3799_v58 = vpack.i.bf16 %v2240_v55, %v2237_v54  ;;  %v3683_v31 = vpop.f32.mrb[39].mxu1 }
 0x899   : > { %3800 = vrot.lane.b32.xlu1 %v3799_v58, %s4010_s24  ;;  %s3291_s24 = sadd.s32 (%p4134_p6), %s5100_s16, %s3521_s20 }
 0x89a   : > { %s3522_s26 = sshll.u32 (%p4134_p6), %s3291_s24, 2 }
 0x89b   : > { %s3293_s23 = scalar_lea.vmem (%p4134_p6), %s5101_s22, %s3522_s26 }
 0x8ce   : > { %v3786_v59 = vpop.permute.xlu0 %3785  ;;  %v3791_v37 = vpop.permute.xlu1 %3790 }
 0x8cf   : > { %v3788_v39 = vunpack.i.h.bf16 %v3786_v59  ;;  %v3787_v46 = vunpack.i.l.bf16 %v3786_v59  ;;  %v3793_v22 = vunpack.i.h.bf16 %v3791_v37  ;;  %v3792_v25 = vunpack.i.l.bf16 %v3791_v37 }
 0x8d1   : > { %v2277_v62 = vsel %vm1278_vm2, %v4595_v15, %v3788_v39  ;;  %v2276_v6 = vsel %vm1278_vm2, %v4593_v13, %v3787_v46  ;;  %v2279_v9 = vsel %vm1278_vm2, %v4609_v2, %v3793_v22  ;;  %v2278_v50 = vsel %vm1278_vm2, %v4607_v30, %v3792_v25 }
 0x8d2   : > { %v2284_v10 = vpack.c.bf16 %v2277_v62, %v2276_v6  ;;  %v2285_v60 = vpack.c.bf16 %v2279_v9, %v2278_v50 }
 0x8d4   : > { %3686 = vmatprep.mubr.msk.bf16.mxu0 %vm652_vm0, %v2284_v10  ;;  %v3937_v10 = vld [vmem:[%s4175_s15 + $0x34] sm:$0xf] }
 0x8d5   : > { %3687 = vmatmul.mubr.msk.bf16.vlgmr.msra.gmra.mrb[32].mxu0 %vm652_vm0, %v2285_v60 }
 0x8d6   : > { %v3796_v45 = vpop.permute.xlu0 %3795 }
 0x8d7   : > { %v3798_v61 = vunpack.i.h.bf16 %v3796_v45  ;;  %v3797_v51 = vunpack.i.l.bf16 %v3796_v45  ;;  %v3938_v45 = vld [vmem:[%s4175_s15 + $0x20] sm:$0xf] }
 0x8d9   : > { %v2281_v15 = vsel %vm1278_vm2, %v4599_v17, %v3798_v61  ;;  %v2280_v13 = vsel %vm1278_vm2, %v4597_v16, %v3797_v51  ;;  %v3499_v16 = vld [vmem:[%s5080_s7] ss:$0 sm:$0xff]  ;;  %v3939_v51 = vld [vmem:[%s4175_s15 + $0x24] sm:$0xf] }
 0x8da   : > { %v2286_v40 = vpack.c.bf16 %v2281_v15, %v2280_v13 }
 0x8dc   : > { %3690 = vmatprep.mubr.msk.bf16.mxu0 %vm652_vm0, %v2286_v40  ;;  %v3940_v40 = vld [vmem:[%s4175_s15 + $0x30] sm:$0xf] }
 0x90b   : > { %v3801_v2 = vpop.permute.xlu1 %3800 }
 0x90c   : > { %v3803_v30 = vunpack.i.h.bf16 %v3801_v2  ;;  %v3802_v3 = vunpack.i.l.bf16 %v3801_v2 }
 0x90e   : > { %v2283_v4 = vsel %vm1278_vm2, %v4615_v47, %v3803_v30  ;;  %v2282_v41 = vsel %vm1278_vm2, %v4613_v21, %v3802_v3  ;;  %v3941_v30 = vld [vmem:[%s4175_s15 + $0x3c] sm:$0xf] }
 0x90f   : > { %v2287_v11 = vpack.c.bf16 %v2283_v4, %v2282_v41  ;;  %v3942_v4 = vld [vmem:[%s4175_s15 + $0x28] sm:$0xf] }
 0x911   : > { %3691 = vmatmul.mubr.msk.bf16.gmra.mrb[36].mxu0 %vm652_vm0, %v2287_v11  ;;  %v3943_v11 = vld [vmem:[%s4175_s15 + $0x2c] sm:$0xf] }
 0x9a8   : > { %v3688_v17 = vpop.f32.mrb[32].mxu0 }
 0x9a9   : > { %v2355_v14 = vadd.f32 %v3688_v17, %v3499_v16  ;;  %v2346_v1 = vpop.f32.mrb[33].mxu0 }
 0x9aa   : > { %v2347_v18 = vadd.f32 %v3499_v16, %v2346_v1  ;;  %v3689_v12 = vpop.f32.mrb[34].mxu0 }
 0x9ab   : > { %v2387_v47 = vcombine.high %v2355_v14, %v2355_v14  ;;  %v2358_v0 = vadd.f32 %v3689_v12, %v3499_v16  ;;  %v2349_v21 = vpop.f32.mrb[35].mxu0  ;;  %v4697_v28 = vadd.f32 %v3932_v20, %v2355_v14  ;;  %v3944_v14 = vld [vmem:[%s4175_s15 + $0x38] sm:$0xf] }
 0x9ac   : > { %v2385_v23 = vcombine.high %v2347_v18, %v2347_v18  ;;  %v2350_v24 = vadd.f32 %v3499_v16, %v2349_v21  ;;  %v4688_v8 = vadd.f32 %v3929_v7, %v2347_v18 }
 0x9ad   : > { %v4691_v44 = vadd.f32 %v3930_v33, %v2387_v47  ;;  %v2388_v52 = vcombine.high %v2358_v0, %v2358_v0  ;;  %v4716_v53 = vadd.f32 %v3936_v32, %v2358_v0 }
 0x9ae   : > { %v4694_v5 = vadd.f32 %v3931_v26, %v2385_v23  ;;  %v2386_v19 = vcombine.high %v2350_v24, %v2350_v24  ;;  %v4700_v35 = vadd.f32 %v3933_v34, %v2350_v24 }
 0x9af   : > { %v4708_v43 = vadd.f32 %v3935_v38, %v2388_v52  ;;  %v2435_v29 = vcombine.low %v4697_v28, %v4691_v44 }
 0x9b0   : > { %v4703_v63 = vadd.f32 %v3934_v36, %v2386_v19  ;;  %v2433_v42 = vcombine.low %v4688_v8, %v4694_v5 }
 0x9b1   : > { %v2455_v27 = vsel %vm652_vm0, %v2435_v29, 0.0  ;;  %v2436_v55 = vcombine.low %v4716_v53, %v4708_v43 }
 0x9b2   : > { %v2449_v48 = vsel %vm652_vm0, %v2433_v42, 0.0  ;;  %v2434_v49 = vcombine.low %v4700_v35, %v4703_v63 }
 0x9b3   : > { %2450 = vadd.xlane.f32.xlu0 %v2449_v48  ;;  %v2458_v58 = vsel %vm652_vm0, %v2436_v55, 0.0 }
 0x9b4   : > { %v2452_v54 = vsel %vm652_vm0, %v2434_v49, 0.0 }
 0x9b5   : > { %2453 = vadd.xlane.f32.xlu1 %v2452_v54 }
 0x9b7   : > { %2456 = vadd.xlane.f32.xlu0 %v2455_v27 }
 0x9bb   : > { %2459 = vadd.xlane.f32.xlu0 %v2458_v58 }
 0x9e4   : > { %v3692_v31 = vpop.f32.mrb[36].mxu0 }
 0x9e5   : > { %v2371_v59 = vadd.f32 %v3692_v31, %v3499_v16  ;;  %v2362_v37 = vpop.f32.mrb[37].mxu0 }
 0x9e6   : > { %v2363_v39 = vadd.f32 %v3499_v16, %v2362_v37  ;;  %v3693_v46 = vpop.f32.mrb[38].mxu0 }
 0x9e7   : > { %v2391_v22 = vcombine.high %v2371_v59, %v2371_v59  ;;  %v2374_v25 = vadd.f32 %v3693_v46, %v3499_v16  ;;  %v2365_v62 = vpop.f32.mrb[39].mxu0  ;;  %v4733_v2 = vadd.f32 %v3940_v40, %v2371_v59 }
 0x9e8   : > { %v2389_v6 = vcombine.high %v2363_v39, %v2363_v39  ;;  %v2366_v9 = vadd.f32 %v3499_v16, %v2365_v62  ;;  %v4727_v61 = vadd.f32 %v3938_v45, %v2363_v39 }
 0x9e9   : > { %v2392_v50 = vcombine.high %v2374_v25, %v2374_v25  ;;  %v4724_v60 = vadd.f32 %v3937_v10, %v2391_v22  ;;  %v4747_v1 = vadd.f32 %v3944_v14, %v2374_v25 }
 0x9ea   : > { %v4730_v15 = vadd.f32 %v3939_v51, %v2389_v6  ;;  %v2390_v13 = vcombine.high %v2366_v9, %v2366_v9  ;;  %v4739_v41 = vadd.f32 %v3942_v4, %v2366_v9 }
 0x9eb   : > { %v4736_v3 = vadd.f32 %v3941_v30, %v2392_v50  ;;  %v2439_v47 = vcombine.low %v4733_v2, %v4724_v60 }
 0x9ec   : > { %v4742_v16 = vadd.f32 %v3943_v11, %v2390_v13  ;;  %v2437_v17 = vcombine.low %v4727_v61, %v4730_v15 }
 0x9ed   : > { %v2440_v21 = vcombine.low %v4747_v1, %v4736_v3  ;;  %v2467_v23 = vsel %vm652_vm0, %v2439_v47, 0.0 }
 0x9ee   : > { %v2461_v18 = vsel %vm652_vm0, %v2437_v17, 0.0  ;;  %v2438_v12 = vcombine.low %v4739_v41, %v4742_v16 }
 0x9ef   : > { %2462 = vadd.xlane.f32.xlu0 %v2461_v18  ;;  %v2470_v24 = vsel %vm652_vm0, %v2440_v21, 0.0 }
 0x9f0   : > { %v2464_v0 = vsel %vm652_vm0, %v2438_v12, 0.0  ;;  %v3814_v12 = vld [vmem:[%s5083_s10] sm:$0xff]  }
 0x9f1   : > { %2465 = vadd.xlane.f32.xlu1 %v2464_v0  ;;  %3694 = vmatprep.subr.bf16.mxu1 %v3814_v12 }
 0x9f2   : > { %3695 = vmatpush3.bf16.msra.mxu1 %v3814_v12 }
 0x9f3   : > { %2468 = vadd.xlane.f32.xlu0 %v2467_v23 }
 0x9f5   : > { %2471 = vadd.xlane.f32.xlu1 %v2470_v24 }
 0xa40   : > { %v2451_v7 = vpop.xlane.xlu0 %2450 }
 0xa41   : > { %v2473_v33 = vmul.f32 0.0625, %v2451_v7 }
 0xa42   : > { %v2454_v26 = vpop.xlane.xlu1 %2453 }
 0xa43   : > { %v2495_v52 = vrot.slane %v2473_v33, %v4237_v56  ;;  %v2502_v19 = vrot.slane %v2473_v33, %v4239_v57  ;;  %v2474_v20 = vmul.f32 0.0625, %v2454_v26 }
 0xa44   : > { %v2457_v34 = vpop.xlane.xlu0 %2456 }
 0xa45   : > { %v4762_v36 = vsub.f32 %v4688_v8, %v2495_v52  ;;  %v4765_v42 = vsub.f32 %v4694_v5, %v2502_v19  ;;  %v2509_v38 = vrot.slane %v2474_v20, %v4237_v56  ;;  %v2516_v48 = vrot.slane %v2474_v20, %v4239_v57 }
 0xa46   : > { %v2475_v49 = vmul.f32 0.0625, %v2457_v34 }
 0xa47   : > { %v4770_v29 = vsub.f32 %v4700_v35, %v2509_v38  ;;  %v4773_v32 = vsub.f32 %v4703_v63, %v2516_v48  ;;  %v2633_v54 = vmul.f32 %v4762_v36, %v4762_v36  ;;  %v2634_v27 = vmul.f32 %v4765_v42, %v4765_v42 }
 0xa48   : > { %v2523_v55 = vrot.slane %v2475_v49, %v4237_v56  ;;  %v2530_v58 = vrot.slane %v2475_v49, %v4239_v57  ;;  %v2460_v31 = vpop.xlane.xlu0 %2459 }
 0xa49   : > { %v2476_v59 = vmul.f32 0.0625, %v2460_v31  ;;  %v2665_v37 = vcombine.low %v2633_v54, %v2634_v27  ;;  %v2635_v39 = vmul.f32 %v4770_v29, %v4770_v29  ;;  %v2636_v46 = vmul.f32 %v4773_v32, %v4773_v32 }
 0xa4a   : > { %v4786_v22 = vsub.f32 %v4697_v28, %v2523_v55  ;;  %v4789_v25 = vsub.f32 %v4691_v44, %v2530_v58 }
 0xa4b   : > { %v2537_v62 = vrot.slane %v2476_v59, %v4237_v56  ;;  %v2544_v6 = vrot.slane %v2476_v59, %v4239_v57  ;;  %v2681_v9 = vsel %vm652_vm0, %v2665_v37, 0.0  ;;  %v2666_v50 = vcombine.low %v2635_v39, %v2636_v46 }
 0xa4c   : > { %2682 = vadd.xlane.f32.xlu0 %v2681_v9  ;;  %v2637_v10 = vmul.f32 %v4786_v22, %v4786_v22  ;;  %v2638_v45 = vmul.f32 %v4789_v25, %v4789_v25 }
 0xa4d   : > { %v4799_v51 = vsub.f32 %v4716_v53, %v2537_v62  ;;  %v4802_v13 = vsub.f32 %v4708_v43, %v2544_v6  ;;  %v2684_v40 = vsel %vm652_vm0, %v2666_v50, 0.0 }
 0xa4e   : > { %2685 = vadd.xlane.f32.xlu1 %v2684_v40  ;;  %v2667_v30 = vcombine.low %v2637_v10, %v2638_v45 }
 0xa4f   : > { %v2639_v4 = vmul.f32 %v4799_v51, %v4799_v51  ;;  %v2640_v11 = vmul.f32 %v4802_v13, %v4802_v13 }
 0xa50   : > { %v2687_v17 = vsel %vm652_vm0, %v2667_v30, 0.0 }
 0xa51   : > { %2688 = vadd.xlane.f32.xlu0 %v2687_v17  ;;  %v2668_v14 = vcombine.low %v2639_v4, %v2640_v11 }
 0xa53   : > { %v2690_v18 = vsel %vm652_vm0, %v2668_v14, 0.0 }
 0xa54   : > { %2691 = vadd.xlane.f32.xlu1 %v2690_v18 }
 0xa7c   : > { %v2463_v47 = vpop.xlane.xlu0 %2462 }
 0xa7d   : > { %v2477_v0 = vmul.f32 0.0625, %v2463_v47 }
 0xa7e   : > { %v2466_v21 = vpop.xlane.xlu1 %2465 }
 0xa7f   : > { %v2551_v23 = vrot.slane %v2477_v0, %v4237_v56  ;;  %v2558_v24 = vrot.slane %v2477_v0, %v4239_v57  ;;  %v2478_v7 = vmul.f32 0.0625, %v2466_v21 }
 0xa80   : > { %v2469_v33 = vpop.xlane.xlu0 %2468 }
 0xa81   : > { %v4817_v26 = vsub.f32 %v4727_v61, %v2551_v23  ;;  %v4820_v52 = vsub.f32 %v4730_v15, %v2558_v24  ;;  %v2565_v19 = vrot.slane %v2478_v7, %v4237_v56  ;;  %v2572_v20 = vrot.slane %v2478_v7, %v4239_v57 }
 0xa82   : > { %v2479_v34 = vmul.f32 0.0625, %v2469_v33  ;;  %v2472_v38 = vpop.xlane.xlu1 %2471 }
 0xa83   : > { %v4825_v48 = vsub.f32 %v4739_v41, %v2565_v19  ;;  %v4828_v49 = vsub.f32 %v4742_v16, %v2572_v20  ;;  %v2480_v54 = vmul.f32 0.0625, %v2472_v38  ;;  %v2641_v27 = vmul.f32 %v4817_v26, %v4817_v26 }
 0xa84   : > { %v2579_v55 = vrot.slane %v2479_v34, %v4237_v56  ;;  %v2586_v58 = vrot.slane %v2479_v34, %v4239_v57  ;;  %v2642_v31 = vmul.f32 %v4820_v52, %v4820_v52 }
 0xa85   : > { %v2593_v59 = vrot.slane %v2480_v54, %v4237_v56  ;;  %v2600_v37 = vrot.slane %v2480_v54, %v4239_v57  ;;  %v2643_v39 = vmul.f32 %v4825_v48, %v4825_v48  ;;  %v2644_v46 = vmul.f32 %v4828_v49, %v4828_v49 }
 0xa86   : > { %v4843_v62 = vsub.f32 %v4733_v2, %v2579_v55  ;;  %v4846_v6 = vsub.f32 %v4724_v60, %v2586_v58  ;;  %v2669_v9 = vcombine.low %v2641_v27, %v2642_v31  ;;  %v4869_v58 = vld [vmem:[%s5081_s8] ss:$0 sm:$0xff] }
 0xa87   : > { %v4849_v50 = vsub.f32 %v4747_v1, %v2593_v59  ;;  %v4852_v10 = vsub.f32 %v4736_v3, %v2600_v37  ;;  %v2670_v45 = vcombine.low %v2643_v39, %v2644_v46  ;;  %v4874_v31 = vld [vmem:[%s5082_s9] ss:$0 sm:$0xff]  ;;  %v4880_v46 = vcombine.high %v4869_v58, %v4869_v58 }
 0xa88   : > { %v2693_v40 = vsel %vm652_vm0, %v2669_v9, 0.0  ;;  %v2645_v30 = vmul.f32 %v4843_v62, %v4843_v62  ;;  %v2646_v4 = vmul.f32 %v4846_v6, %v4846_v6 }
 0xa89   : > { %2694 = vadd.xlane.f32.xlu0 %v2693_v40  ;;  %v2696_v11 = vsel %vm652_vm0, %v2670_v45, 0.0  ;;  %v2647_v17 = vmul.f32 %v4849_v50, %v4849_v50  ;;  %v2648_v14 = vmul.f32 %v4852_v10, %v4852_v10  ;;  %v4884_v45 = vcombine.high %v4874_v31, %v4874_v31 }
 0xa8a   : > { %2697 = vadd.xlane.f32.xlu1 %v2696_v11  ;;  %v2671_v18 = vcombine.low %v2645_v30, %v2646_v4 }
 0xa8b   : > { %v2672_v12 = vcombine.low %v2647_v17, %v2648_v14 }
 0xa8c   : > { %v2699_v47 = vsel %vm652_vm0, %v2671_v18, 0.0 }
 0xa8d   : > { %2700 = vadd.xlane.f32.xlu0 %v2699_v47  ;;  %v2702_v0 = vsel %vm652_vm0, %v2672_v12, 0.0 }
 0xa8e   : > { %2703 = vadd.xlane.f32.xlu1 %v2702_v0 }
 0xad9   : > { %v2683_v21 = vpop.xlane.xlu0 %2682 }
 0xada   : > { %v2705_v23 = vmul.f32 0.0625, %v2683_v21 }
 0xadb   : > { %v2686_v24 = vpop.xlane.xlu1 %2685 }
 0xadc   : > { %v2713_v7 = vadd.f32 1e-05, %v2705_v23  ;;  %v2706_v33 = vmul.f32 0.0625, %v2686_v24 }
 0xade   : > { %3897 = vrsqrt.f32 %v2713_v7  ;;  %v2714_v19 = vadd.f32 1e-05, %v2706_v33  ;;  %v2689_v20 = vpop.xlane.xlu0 %2688 }
 0xadf   : > { %v2707_v34 = vmul.f32 0.0625, %v2689_v20 }
 0xae0   : > { %3899 = vrsqrt.f32 %v2714_v19 }
 0xae1   : > { %v2715_v38 = vadd.f32 1e-05, %v2707_v34  ;;  %v2692_v54 = vpop.xlane.xlu1 %2691 }
 0xae2   : > { %v2708_v27 = vmul.f32 0.0625, %v2692_v54 }
 0xae3   : > { %3901 = vrsqrt.f32 %v2715_v38 }
 0xae4   : > { %v2716_v55 = vadd.f32 1e-05, %v2708_v27 }
 0xae6   : > { %3903 = vrsqrt.f32 %v2716_v55 }
 0xae8   : > { %v3898_v59 = vpop.eup %3897 }
 0xae9   : > { %v2743_v37 = vrot.slane %v3898_v59, %v4237_v56  ;;  %v2750_v39 = vrot.slane %v3898_v59, %v4239_v57 }
 0xaea   : > { %v3900_v9 = vpop.eup %3899 }
 0xaeb   : > { %v2865_v40 = vmul.f32 %v2743_v37, %v4762_v36  ;;  %v2866_v30 = vmul.f32 %v2750_v39, %v4765_v42  ;;  %v2757_v4 = vrot.slane %v3900_v9, %v4237_v56  ;;  %v2764_v11 = vrot.slane %v3900_v9, %v4239_v57 }
 0xaed   : > { %v3902_v17 = vpop.eup %3901  ;;  %v2867_v14 = vmul.f32 %v2757_v4, %v4770_v29  ;;  %v2868_v18 = vmul.f32 %v2764_v11, %v4773_v32  ;;  %v2889_v12 = vmul.f32 %v4869_v58, %v2865_v40  ;;  %v2890_v47 = vmul.f32 %v4880_v46, %v2866_v30 }
 0xaee   : > { %v2771_v0 = vrot.slane %v3902_v17, %v4237_v56  ;;  %v2778_v21 = vrot.slane %v3902_v17, %v4239_v57 }
 0xaef   : > { %v2891_v36 = vmul.f32 %v4869_v58, %v2867_v14  ;;  %v2892_v42 = vmul.f32 %v4880_v46, %v2868_v18  ;;  %v2913_v23 = vadd.f32 %v4874_v31, %v2889_v12  ;;  %v2914_v24 = vadd.f32 %v4884_v45, %v2890_v47 }
 0xaf0   : > { %v3904_v7 = vpop.eup %3903  ;;  %v2869_v29 = vmul.f32 %v2771_v0, %v4786_v22  ;;  %v2870_v32 = vmul.f32 %v2778_v21, %v4789_v25 }
 0xaf1   : > { %v2785_v33 = vrot.slane %v3904_v7, %v4237_v56  ;;  %v2792_v19 = vrot.slane %v3904_v7, %v4239_v57  ;;  %v2915_v20 = vadd.f32 %v4874_v31, %v2891_v36  ;;  %v2916_v34 = vadd.f32 %v4884_v45, %v2892_v42 }
 0xaf2   : > { %v2893_v38 = vmul.f32 %v4869_v58, %v2869_v29  ;;  %v2894_v54 = vmul.f32 %v4880_v46, %v2870_v32  ;;  %v2945_v59 = vcombine.low %v2913_v23, %v2914_v24 }
 0xaf3   : > { %v2871_v27 = vmul.f32 %v2785_v33, %v4799_v51  ;;  %v2872_v55 = vmul.f32 %v2792_v19, %v4802_v13  ;;  %v2946_v22 = vcombine.low %v2915_v20, %v2916_v34 }
 0xaf4   : > { %v2917_v25 = vadd.f32 %v4874_v31, %v2893_v38  ;;  %v2918_v40 = vadd.f32 %v4884_v45, %v2894_v54 }
 0xaf5   : > { %v2895_v37 = vmul.f32 %v4869_v58, %v2871_v27  ;;  %v2896_v39 = vmul.f32 %v4880_v46, %v2872_v55  ;;  %v2961_v9 = vpack.c.bf16 %v2946_v22, %v2945_v59 }
 0xaf6   : > { %v2947_v51 = vcombine.low %v2917_v25, %v2918_v40 }
 0xaf7   : > { %3696 = vmatprep.mubr.msk.bf16.mxu1 %vm652_vm0, %v2961_v9  ;;  %v2919_v30 = vadd.f32 %v4874_v31, %v2895_v37  ;;  %v2920_v4 = vadd.f32 %v4884_v45, %v2896_v39 }
 0xaf9   : > { %v2948_v11 = vcombine.low %v2919_v30, %v2920_v4 }
 0xafb   : > { %v2962_v13 = vpack.c.bf16 %v2948_v11, %v2947_v51 }
 0xafd   : > { %3697 = vmatmul.mubr.msk.bf16.vlgmr.msra.gmra.mrb[40].mxu1 %vm652_vm0, %v2962_v13 }
 0xb16   : > { %v2695_v17 = vpop.xlane.xlu0 %2694 }
 0xb17   : > { %v2709_v14 = vmul.f32 0.0625, %v2695_v17  ;;  %v2698_v18 = vpop.xlane.xlu1 %2697 }
 0xb18   : > { %v2710_v12 = vmul.f32 0.0625, %v2698_v18 }
 0xb19   : > { %v2717_v47 = vadd.f32 1e-05, %v2709_v14 }
 0xb1a   : > { %v2718_v0 = vadd.f32 1e-05, %v2710_v12  ;;  %v2701_v21 = vpop.xlane.xlu0 %2700 }
 0xb1b   : > { %3905 = vrsqrt.f32 %v2717_v47  ;;  %v2711_v36 = vmul.f32 0.0625, %v2701_v21  ;;  %v2704_v42 = vpop.xlane.xlu1 %2703 }
 0xb1c   : > { %3907 = vrsqrt.f32 %v2718_v0  ;;  %v2712_v23 = vmul.f32 0.0625, %v2704_v42 }
 0xb1d   : > { %v2719_v24 = vadd.f32 1e-05, %v2711_v36 }
 0xb1e   : > { %v2720_v7 = vadd.f32 1e-05, %v2712_v23 }
 0xb1f   : > { %3909 = vrsqrt.f32 %v2719_v24 }
 0xb20   : > { %3911 = vrsqrt.f32 %v2720_v7 }
 0xb25   : > { %v3906_v29 = vpop.eup %3905 }
 0xb26   : > { %v3908_v32 = vpop.eup %3907  ;;  %v2799_v33 = vrot.slane %v3906_v29, %v4237_v56  ;;  %v2806_v19 = vrot.slane %v3906_v29, %v4239_v57 }
 0xb27   : > { %v2813_v20 = vrot.slane %v3908_v32, %v4237_v56  ;;  %v2820_v34 = vrot.slane %v3908_v32, %v4239_v57 }
 0xb28   : > { %v2873_v38 = vmul.f32 %v2799_v33, %v4817_v26  ;;  %v2874_v54 = vmul.f32 %v2806_v19, %v4820_v52 }
 0xb29   : > { %v3910_v27 = vpop.eup %3909  ;;  %v2875_v55 = vmul.f32 %v2813_v20, %v4825_v48  ;;  %v2876_v59 = vmul.f32 %v2820_v34, %v4828_v49 }
 0xb2a   : > { %v3912_v22 = vpop.eup %3911  ;;  %v2827_v25 = vrot.slane %v3910_v27, %v4237_v56  ;;  %v2834_v37 = vrot.slane %v3910_v27, %v4239_v57  ;;  %v2897_v39 = vmul.f32 %v4869_v58, %v2873_v38  ;;  %v2898_v9 = vmul.f32 %v4880_v46, %v2874_v54 }
 0xb2b   : > { %v2841_v40 = vrot.slane %v3912_v22, %v4237_v56  ;;  %v2848_v26 = vrot.slane %v3912_v22, %v4239_v57  ;;  %v2899_v52 = vmul.f32 %v4869_v58, %v2875_v55  ;;  %v2900_v30 = vmul.f32 %v4880_v46, %v2876_v59 }
 0xb2c   : > { %v2877_v48 = vmul.f32 %v2827_v25, %v4843_v62  ;;  %v2878_v49 = vmul.f32 %v2834_v37, %v4846_v6  ;;  %v2921_v4 = vadd.f32 %v4874_v31, %v2897_v39  ;;  %v2922_v51 = vadd.f32 %v4884_v45, %v2898_v9 }
 0xb2d   : > { %v2879_v11 = vmul.f32 %v2841_v40, %v4849_v50  ;;  %v2880_v13 = vmul.f32 %v2848_v26, %v4852_v10  ;;  %v2923_v56 = vadd.f32 %v4874_v31, %v2899_v52  ;;  %v2924_v57 = vadd.f32 %v4884_v45, %v2900_v30 }
 0xb2e   : > { %v2901_v17 = vmul.f32 %v4869_v58, %v2877_v48  ;;  %v2902_v14 = vmul.f32 %v4880_v46, %v2878_v49  ;;  %v2949_v18 = vcombine.low %v2921_v4, %v2922_v51 }
 0xb2f   : > { %v2950_v62 = vcombine.low %v2923_v56, %v2924_v57  ;;  %v2903_v6 = vmul.f32 %v4869_v58, %v2879_v11  ;;  %v2904_v12 = vmul.f32 %v4880_v46, %v2880_v13  ;;  %v3815_v58 = vld [vmem:[%s5085_s12] sm:$0xff]   ;;  %v3816_v46 = vld [vmem:[%s5085_s12 + $0x8] sm:$0xff]  }
 0xb30   : > { %v2925_v47 = vadd.f32 %v4874_v31, %v2901_v17  ;;  %v2926_v50 = vadd.f32 %v4884_v45, %v2902_v14  ;;  %3704 = vmatprep.subr.bf16.mxu0 %v3815_v58 }
 0xb31   : > { %v2963_v0 = vpack.c.bf16 %v2950_v62, %v2949_v18  ;;  %v2927_v10 = vadd.f32 %v4874_v31, %v2903_v6  ;;  %v2928_v21 = vadd.f32 %v4884_v45, %v2904_v12  ;;  %3705 = vmatpush3.bf16.msra.mxu0 %v3815_v58  ;;  %v4961_v31 = vld [vmem:[%s5084_s11] ss:$0 sm:$0xff] }
 0xb32   : > { %v2951_v36 = vcombine.low %v2925_v47, %v2926_v50  ;;  %3706 = vmatprep.subr.bf16.mxu0 %v3816_v46 }
 0xb33   : > { %3700 = vmatprep.mubr.msk.bf16.mxu1 %vm652_vm0, %v2963_v0  ;;  %v2952_v42 = vcombine.low %v2927_v10, %v2928_v21 }
 0xb35   : > { %v2964_v23 = vpack.c.bf16 %v2952_v42, %v2951_v36  ;;  %3707 = vmatpush3.bf16.msra.mxu0 %v3816_v46 }
 0xb37   : > { %3701 = vmatmul.mubr.msk.bf16.gmra.mrb[44].mxu1 %vm652_vm0, %v2964_v23 }
 0xbd0   : > { %v3698_v45 = vpop.f32.mrb[40].mxu1 }
 0xbd1   : > { %v3032_v24 = vadd.f32 %v3698_v45, %v4961_v31  ;;  %v3023_v7 = vpop.f32.mrb[41].mxu1 }
 0xbd2   : > { %v3024_v29 = vadd.f32 %v4961_v31, %v3023_v7  ;;  %v3699_v32 = vpop.f32.mrb[42].mxu1 }
 0xbd3   : > { %v3056_v33 = vmul.f32 %v3032_v24, %v3032_v24  ;;  %v3035_v19 = vadd.f32 %v3699_v32, %v4961_v31  ;;  %v3026_v20 = vpop.f32.mrb[43].mxu1 }
 0xbd4   : > { %v3054_v34 = vmul.f32 %v3024_v29, %v3024_v29  ;;  %v3027_v38 = vadd.f32 %v4961_v31, %v3026_v20 }
 0xbd5   : > { %v3064_v54 = vmul.f32 %v3056_v33, %v3032_v24  ;;  %v3057_v27 = vmul.f32 %v3035_v19, %v3035_v19 }
 0xbd6   : > { %v3062_v55 = vmul.f32 %v3054_v34, %v3024_v29  ;;  %v3055_v59 = vmul.f32 %v3027_v38, %v3027_v38 }
 0xbd7   : > { %v3072_v22 = vmul.f32 0.044715, %v3064_v54  ;;  %v3065_v25 = vmul.f32 %v3057_v27, %v3035_v19 }
 0xbd8   : > { %v3070_v37 = vmul.f32 0.044715, %v3062_v55  ;;  %v3063_v39 = vmul.f32 %v3055_v59, %v3027_v38 }
 0xbd9   : > { %v3080_v9 = vadd.f32 %v3072_v22, %v3032_v24  ;;  %v3073_v40 = vmul.f32 0.044715, %v3065_v25 }
 0xbda   : > { %v3078_v26 = vadd.f32 %v3070_v37, %v3024_v29  ;;  %v3071_v52 = vmul.f32 0.044715, %v3063_v39 }
 0xbdb   : > { %v3088_v30 = vmul.f32 0.7978846, %v3080_v9  ;;  %v3081_v48 = vadd.f32 %v3073_v40, %v3035_v19 }
 0xbdc   : > { %v3086_v49 = vmul.f32 0.7978846, %v3078_v26  ;;  %v3079_v4 = vadd.f32 %v3071_v52, %v3027_v38 }
 0xbdd   : > { %3913 = vtanh.f32 %v3088_v30  ;;  %v3089_v51 = vmul.f32 0.7978846, %v3081_v48 }
 0xbde   : > { %3915 = vtanh.f32 %v3086_v49  ;;  %v3087_v11 = vmul.f32 0.7978846, %v3079_v4 }
 0xbdf   : > { %3917 = vtanh.f32 %v3089_v51 }
 0xbe0   : > { %3919 = vtanh.f32 %v3087_v11 }
 0xbe7   : > { %v3914_v13 = vpop.eup %3913 }
 0xbe8   : > { %v3916_v56 = vpop.eup %3915  ;;  %v3104_v57 = vadd.f32 1.0, %v3914_v13 }
 0xbe9   : > { %v3918_v17 = vpop.eup %3917  ;;  %v3102_v14 = vadd.f32 1.0, %v3916_v56 }
 0xbea   : > { %v3920_v18 = vpop.eup %3919  ;;  %v3112_v62 = vmul.f32 0.5, %v3104_v57  ;;  %v3105_v6 = vadd.f32 1.0, %v3918_v17 }
 0xbeb   : > { %v3110_v12 = vmul.f32 0.5, %v3102_v14  ;;  %v3103_v47 = vadd.f32 1.0, %v3920_v18 }
 0xbec   : > { %v3113_v50 = vmul.f32 0.5, %v3105_v6  ;;  %v3120_v10 = vmul.f32 %v3112_v62, %v3032_v24 }
 0xbed   : > { %v3111_v0 = vmul.f32 0.5, %v3103_v47  ;;  %v3118_v36 = vmul.f32 %v3110_v12, %v3024_v29 }
 0xbee   : > { %v3121_v21 = vmul.f32 %v3113_v50, %v3035_v19 }
 0xbef   : > { %v3119_v42 = vmul.f32 %v3111_v0, %v3027_v38 }
 0xbf0   : > { %v3127_v23 = vpack.c.bf16 %v3121_v21, %v3120_v10 }
 0xbf1   : > { %v3126_v58 = vpack.c.bf16 %v3119_v42, %v3118_v36 }
 0xbf3   : > { %3708 = vmatprep.mubr.msk.bf16.mxu0 %vm3148_vm3, %v3126_v58 }
 0xbf4   : > { %3709 = vmatmul.mubr.msk.bf16.vlgmr.msra.gmra.mrb[40].mxu0 %vm3148_vm3, %v3127_v23  ;;  %v3513_v23 = vld [vmem:[%s5097_s25] ss:$0 sm:$0xff] }
 0xc0a   : > { %v3702_v46 = vpop.f32.mrb[44].mxu1 }
 0xc0b   : > { %v3048_v45 = vadd.f32 %v3702_v46, %v4961_v31  ;;  %v3039_v7 = vpop.f32.mrb[45].mxu1 }
 0xc0c   : > { %v3040_v32 = vadd.f32 %v4961_v31, %v3039_v7  ;;  %v3703_v33 = vpop.f32.mrb[46].mxu1 }
 0xc0d   : > { %v3060_v20 = vmul.f32 %v3048_v45, %v3048_v45  ;;  %v3051_v24 = vadd.f32 %v3703_v33, %v4961_v31  ;;  %v3042_v19 = vpop.f32.mrb[47].mxu1 }
 0xc0e   : > { %v3058_v29 = vmul.f32 %v3040_v32, %v3040_v32  ;;  %v3043_v34 = vadd.f32 %v4961_v31, %v3042_v19 }
 0xc0f   : > { %v3068_v38 = vmul.f32 %v3060_v20, %v3048_v45  ;;  %v3061_v54 = vmul.f32 %v3051_v24, %v3051_v24 }
 0xc10   : > { %v3066_v27 = vmul.f32 %v3058_v29, %v3040_v32  ;;  %v3059_v55 = vmul.f32 %v3043_v34, %v3043_v34 }
 0xc11   : > { %v3076_v59 = vmul.f32 0.044715, %v3068_v38  ;;  %v3069_v22 = vmul.f32 %v3061_v54, %v3051_v24 }
 0xc12   : > { %v3074_v25 = vmul.f32 0.044715, %v3066_v27  ;;  %v3067_v37 = vmul.f32 %v3059_v55, %v3043_v34 }
 0xc13   : > { %v3084_v39 = vadd.f32 %v3076_v59, %v3048_v45  ;;  %v3077_v9 = vmul.f32 0.044715, %v3069_v22 }
 0xc14   : > { %v3082_v40 = vadd.f32 %v3074_v25, %v3040_v32  ;;  %v3075_v26 = vmul.f32 0.044715, %v3067_v37 }
 0xc15   : > { %v3092_v52 = vmul.f32 0.7978846, %v3084_v39  ;;  %v3085_v30 = vadd.f32 %v3077_v9, %v3051_v24 }
 0xc16   : > { %v3090_v48 = vmul.f32 0.7978846, %v3082_v40  ;;  %v3083_v49 = vadd.f32 %v3075_v26, %v3043_v34 }
 0xc17   : > { %3921 = vtanh.f32 %v3092_v52  ;;  %v3093_v4 = vmul.f32 0.7978846, %v3085_v30 }
 0xc18   : > { %3923 = vtanh.f32 %v3090_v48  ;;  %v3091_v31 = vmul.f32 0.7978846, %v3083_v49 }
 0xc19   : > { %3925 = vtanh.f32 %v3093_v4 }
 0xc1a   : > { %3927 = vtanh.f32 %v3091_v31 }
 0xc21   : > { %v3922_v51 = vpop.eup %3921 }
 0xc22   : > { %v3924_v11 = vpop.eup %3923  ;;  %v3108_v13 = vadd.f32 1.0, %v3922_v51 }
 0xc23   : > { %v3926_v56 = vpop.eup %3925  ;;  %v3106_v57 = vadd.f32 1.0, %v3924_v11 }
 0xc24   : > { %v3928_v17 = vpop.eup %3927  ;;  %v3116_v14 = vmul.f32 0.5, %v3108_v13  ;;  %v3109_v18 = vadd.f32 1.0, %v3926_v56 }
 0xc25   : > { %v3114_v62 = vmul.f32 0.5, %v3106_v57  ;;  %v3107_v6 = vadd.f32 1.0, %v3928_v17 }
 0xc26   : > { %v3117_v12 = vmul.f32 0.5, %v3109_v18  ;;  %v3124_v50 = vmul.f32 %v3116_v14, %v3048_v45 }
 0xc27   : > { %v3115_v47 = vmul.f32 0.5, %v3107_v6  ;;  %v3122_v10 = vmul.f32 %v3114_v62, %v3040_v32 }
 0xc28   : > { %v3125_v0 = vmul.f32 %v3117_v12, %v3051_v24 }
 0xc29   : > { %v3123_v21 = vmul.f32 %v3115_v47, %v3043_v34 }
 0xc2a   : > { %v3129_v36 = vpack.c.bf16 %v3125_v0, %v3124_v50 }
 0xc2b   : > { %v3128_v42 = vpack.c.bf16 %v3123_v21, %v3122_v10 }
 0xc2d   : > { %3712 = vmatprep.mubr.msk.bf16.mxu0 %vm3148_vm3, %v3128_v42 }
 0xc2e   : > { %3713 = vmatmul.mubr.msk.bf16.gmra.mrb[44].mxu0 %vm3148_vm3, %v3129_v36 }
 0xcc7   : > { %v3710_v58 = vpop.f32.mrb[40].mxu0 }
 0xcc8   : > { %v3204_v46 = vadd.f32 %v3710_v58, %v3513_v23  ;;  %v3195_v7 = vpop.f32.mrb[41].mxu0 }
 0xcc9   : > { %v3196_v33 = vadd.f32 %v3513_v23, %v3195_v7  ;;  %v3711_v45 = vpop.f32.mrb[42].mxu0 }
 0xcca   : > { %v3236_v20 = vcombine.high %v3204_v46, %v3204_v46  ;;  %v3254_v32 = vadd.f32 %v3204_v46, %v4697_v28  ;;  %v3207_v24 = vadd.f32 %v3711_v45, %v3513_v23  ;;  %v3198_v19 = vpop.f32.mrb[43].mxu0 }
 0xccb   : > { %v3234_v29 = vcombine.high %v3196_v33, %v3196_v33  ;;  %v3250_v34 = vadd.f32 %v3196_v33, %v4688_v8  ;;  %v3199_v38 = vadd.f32 %v3513_v23, %v3198_v19 }
 0xccc   : > { %v3255_v54 = vadd.f32 %v3236_v20, %v4691_v44  ;;  %3271 = vst.msk [vmem:[%s4982_s13 + $0x10] sm:$0xf] %vm3266_vm4, %v3254_v32  ;;  %v3237_v28 = vcombine.high %v3207_v24, %v3207_v24  ;;  %v3256_v27 = vadd.f32 %v3207_v24, %v4716_v53 }
 0xccd   : > { %v3251_v8 = vadd.f32 %v3234_v29, %v4694_v5  ;;  %3267 = vst.msk [vmem:[%s4982_s13] sm:$0xf] %vm3266_vm4, %v3250_v34  ;;  %v3235_v44 = vcombine.high %v3199_v38, %v3199_v38  ;;  %v3252_v55 = vadd.f32 %v3199_v38, %v4700_v35 }
 0xcce   : > { %3272 = vst.msk [vmem:[%s4982_s13 + $0x14] sm:$0xf] %vm3266_vm4, %v3255_v54  ;;  %v3257_v59 = vadd.f32 %v3237_v28, %v4708_v43  ;;  %3273 = vst.msk [vmem:[%s4982_s13 + $0x18] sm:$0xf] %vm3266_vm4, %v3256_v27 }
 0xccf   : > { %3268 = vst.msk [vmem:[%s4982_s13 + $0x4] sm:$0xf] %vm3266_vm4, %v3251_v8  ;;  %v3253_v22 = vadd.f32 %v3235_v44, %v4703_v63  ;;  %3269 = vst.msk [vmem:[%s4982_s13 + $0x8] sm:$0xf] %vm3266_vm4, %v3252_v55 }
 0xcd0   : > { %3274 = vst.msk [vmem:[%s4982_s13 + $0x1c] sm:$0xf] %vm3266_vm4, %v3257_v59 }
 0xcd1   : > { %3270 = vst.msk [vmem:[%s4982_s13 + $0xc] sm:$0xf] %vm3266_vm4, %v3253_v22 }
 0xcd5   : > { %v3319_v51 = vld [vmem:[%s4982_s13 + $0x14] sm:$0xf] (%p4134_p6)  ;;  %v3321_v11 = vld [vmem:[%s4982_s13 + $0x18] sm:$0xf] (%p4134_p6) }
 0xcd6   : > { %3320 = vst [vmem:[%s3293_s23 + $0x50] sm:$0xf] (%p4134_p6), %v3319_v51  ;;  %3322 = vst [vmem:[%s3293_s23 + $0x60] sm:$0xf] (%p4134_p6), %v3321_v11 }
 0xcd7   : > { %v3323_v13 = vld [vmem:[%s4982_s13 + $0x1c] sm:$0xf] (%p4134_p6) }
 0xcd8   : > { %3324 = vst [vmem:[%s3293_s23 + $0x70] sm:$0xf] (%p4134_p6), %v3323_v13 }
 0xd01   : > { %v3714_v5 = vpop.f32.mrb[44].mxu0 }
 0xd02   : > { %v3220_v53 = vadd.f32 %v3714_v5, %v3513_v23  ;;  %v3211_v35 = vpop.f32.mrb[45].mxu0 }
 0xd03   : > { %v3212_v25 = vadd.f32 %v3513_v23, %v3211_v35  ;;  %v3715_v37 = vpop.f32.mrb[46].mxu0 }
 0xd04   : > { %v3240_v43 = vcombine.high %v3220_v53, %v3220_v53  ;;  %v3262_v39 = vadd.f32 %v3220_v53, %v4733_v2  ;;  %v3223_v9 = vadd.f32 %v3715_v37, %v3513_v23  ;;  %v3214_v63 = vpop.f32.mrb[47].mxu0 }
 0xd05   : > { %v3238_v40 = vcombine.high %v3212_v25, %v3212_v25  ;;  %v3258_v26 = vadd.f32 %v3212_v25, %v4727_v61  ;;  %v3215_v52 = vadd.f32 %v3513_v23, %v3214_v63  ;;  %3289 = sbr.rel (!%p4134_p6) target bundleno = 3348 (0xd14), region = 121 }
 0xd06   : > { %v3263_v30 = vadd.f32 %v3240_v43, %v4724_v60  ;;  %3279 = vst.msk [vmem:[%s4982_s13 + $0x30] sm:$0xf] %vm3266_vm4, %v3262_v39  ;;  %v3241_v48 = vcombine.high %v3223_v9, %v3223_v9  ;;  %v3264_v49 = vadd.f32 %v3223_v9, %v4747_v1  ;;  %v3317_v1 = vld [vmem:[%s4982_s13 + $0x10] sm:$0xf] (%p4134_p6) }
 0xd07   : > { %v3259_v2 = vadd.f32 %v3238_v40, %v4730_v15  ;;  %3275 = vst.msk [vmem:[%s4982_s13 + $0x20] sm:$0xf] %vm3266_vm4, %v3258_v26  ;;  %v3239_v4 = vcombine.high %v3215_v52, %v3215_v52  ;;  %v3260_v31 = vadd.f32 %v3215_v52, %v4739_v41  ;;  %v3309_v15 = vld [vmem:[%s4982_s13] sm:$0xf] (%p4134_p6)  ;;  %v3313_v41 = vld [vmem:[%s4982_s13 + $0x8] sm:$0xf] (%p4134_p6) }
 0xd08   : > { %3280 = vst.msk [vmem:[%s4982_s13 + $0x34] sm:$0xf] %vm3266_vm4, %v3263_v30  ;;  %v3265_v61 = vadd.f32 %v3241_v48, %v4736_v3  ;;  %3281 = vst.msk [vmem:[%s4982_s13 + $0x38] sm:$0xf] %vm3266_vm4, %v3264_v49  ;;  %v3311_v3 = vld [vmem:[%s4982_s13 + $0x4] sm:$0xf] (%p4134_p6) }
 0xd09   : > { %3276 = vst.msk [vmem:[%s4982_s13 + $0x24] sm:$0xf] %vm3266_vm4, %v3259_v2  ;;  %v3261_v60 = vadd.f32 %v3239_v4, %v4742_v16  ;;  %3277 = vst.msk [vmem:[%s4982_s13 + $0x28] sm:$0xf] %vm3266_vm4, %v3260_v31  ;;  %v3315_v16 = vld [vmem:[%s4982_s13 + $0xc] sm:$0xf] (%p4134_p6) }
 0xd0a   : > { %3282 = vst.msk [vmem:[%s4982_s13 + $0x3c] sm:$0xf] %vm3266_vm4, %v3265_v61  ;;  %3310 = vst [vmem:[%s3293_s23] sm:$0xf] (%p4134_p6), %v3309_v15 }
 0xd0b   : > { %3278 = vst.msk [vmem:[%s4982_s13 + $0x2c] sm:$0xf] %vm3266_vm4, %v3261_v60  ;;  %3312 = vst [vmem:[%s3293_s23 + $0x10] sm:$0xf] (%p4134_p6), %v3311_v3 }
 0xd0c   : > { %3314 = vst [vmem:[%s3293_s23 + $0x20] sm:$0xf] %v3313_v41  ;;  %3316 = vst [vmem:[%s3293_s23 + $0x30] sm:$0xf] %v3315_v16 }
 0xd0d   : > { %3318 = vst [vmem:[%s3293_s23 + $0x40] sm:$0xf] %v3317_v1  ;;  %v3333_v18 = vld [vmem:[%s4982_s13 + $0x30] sm:$0xf] }
 0xd0e   : > { %v3325_v56 = vld [vmem:[%s4982_s13 + $0x20] sm:$0xf]  ;;  %3334 = vst [vmem:[%s3293_s23 + $0xc0] sm:$0xf] %v3333_v18 }
 0xd0f   : > { %3326 = vst [vmem:[%s3293_s23 + $0x80] sm:$0xf] %v3325_v56  ;;  %v3335_v62 = vld [vmem:[%s4982_s13 + $0x34] sm:$0xf]  ;;  %v3337_v6 = vld [vmem:[%s4982_s13 + $0x38] sm:$0xf] }
 0xd10   : > { %v3327_v57 = vld [vmem:[%s4982_s13 + $0x24] sm:$0xf]  ;;  %v3329_v17 = vld [vmem:[%s4982_s13 + $0x28] sm:$0xf]  ;;  %3336 = vst [vmem:[%s3293_s23 + $0xd0] sm:$0xf] %v3335_v62 }
 0xd11   : > { %3328 = vst [vmem:[%s3293_s23 + $0x90] sm:$0xf] %v3327_v57  ;;  %3330 = vst [vmem:[%s3293_s23 + $0xa0] sm:$0xf] %v3329_v17  ;;  %v3339_v12 = vld [vmem:[%s4982_s13 + $0x3c] sm:$0xf] }
 0xd12   : > { %v3331_v14 = vld [vmem:[%s4982_s13 + $0x2c] sm:$0xf]  ;;  %3338 = vst [vmem:[%s3293_s23 + $0xe0] sm:$0xf] %v3337_v6  ;;  %3340 = vst [vmem:[%s3293_s23 + $0xf0] sm:$0xf] %v3339_v12 }
 0xd13   : > { %3332 = vst [vmem:[%s3293_s23 + $0xb0] sm:$0xf] %v3331_v14 }
 0xd14 PF: > { %s24_s19 = sadd.s32 1, %s3999_s19   ;;  %s5102_s25 = sld [smem:[#allocation6_spill]] }
 0xd15   : > { %p21_p12 = scmp.ge.s32.totalorder %s24_s19, 10   ;;  %s5103_s29 = smov %s3979_s30 }
 0xd16   : > { %s5104_s30 = smov %s4142_s28  ;;  %s5105_s15 = smov %s3991_s17 }
 0xd17   : > { %s5106_s16 = smov %s3995_s18  ;;  %s5108_s18 = smov %s5114_s21 }
 0xd18   :  { %23 = sbr.rel (!%p21_p12) target bundleno = 7 (0x7), region = 193 }
 0xd1a   : > { %s5107_s17 = smov %s5102_s25 }

// kernel: maxvit_blocks_forward.8
= control target key start
LH: loop header
LB: loop body
LE: loop exit
PB: predicated region body
PF: predicated region fallthrough
CT: control target
= control target key end

     0   :  { %s4744_s29 = smov 0   ;;  %s6184_s0 = inlined_call_operand.vmem [shape: f32[32,16,16], index: 0, kind: input, shape index: {}]   ;;  %s6185_s1 = inlined_call_operand.vmem [shape: f32[2,16,16], index: 1, kind: input, shape index: {}]   ;;  %s6186_s2 = inlined_call_operand.vmem [shape: f32[1,16], index: 2, kind: input, shape index: {}]   ;;  %s6187_s3 = inlined_call_operand.vmem [shape: f32[1,16], index: 3, kind: input, shape index: {}]   ;;  %s6188_s4 = inlined_call_operand.vmem [shape: bf16[16,48], index: 4, kind: input, shape index: {}]   ;;  %s6189_s5 = inlined_call_operand.vmem [shape: f32[1,48], index: 5, kind: input, shape index: {}]   ;;  %s6190_s6 = inlined_call_operand.vmem [shape: bf16[16,16], index: 6, kind: input, shape index: {}]   ;;  %s6191_s7 = inlined_call_operand.vmem [shape: f32[1,16], index: 7, kind: input, shape index: {}]   ;;  %s6192_s8 = inlined_call_operand.vmem [shape: f32[1,16], index: 8, kind: input, shape index: {}]   ;;  %s6193_s9 = inlined_call_operand.vmem [shape: f32[1,16], index: 9, kind: input, shape index: {}]   ;;  %s6194_s10 = inlined_call_operand.vmem [shape: bf16[16,32], index: 10, kind: input, shape index: {}]   ;;  %s6195_s11 = inlined_call_operand.vmem [shape: f32[1,32], index: 11, kind: input, shape index: {}]   ;;  %s6196_s12 = inlined_call_operand.vmem [shape: bf16[32,16], index: 12, kind: input, shape index: {}]   ;;  %s6197_s13 = inlined_call_operand.vmem [shape: f32[1,16], index: 13, kind: input, shape index: {}]   ;;  %s6198_s14 = inlined_call_operand.vmem [shape: f32[32,16,16], index: 14, kind: output, shape index: {}]  }
   0x1 LB: > { %s3891_s30 = sadd.s32 4294967295, %s4659_s29   ;;  %p3895_p0 = scmp.ge.s32.totalorder %s4659_s29, 1  ;;  %s4659_s29 = sphi %s4744_s29, %s24_s29  }
   0x2   : > { %p414_p1 = scmp.lt.s32.totalorder %s4659_s29, 5 }
   0x4   : > { %p415_p2 = pnand %p3895_p0, %p414_p1 }
   0x5   : > { %s3896_s15 = sshll.u32 (!%p415_p2), %s3891_s30, 3  ;;  %vm515_vm0 = vcmask (!%p415_p2), 130048   ;;  %vm4662_vm1 = vmmov (!%p415_p2), 0   ;;  %s4663_s28 = smov (!%p415_p2), 112   ;;  %vm945_vm2 = vcmask (!%p415_p2), 64512   ;;  %vm3679_vm3 = vcmask (!%p415_p2), 261120  }
   0x6   : > { %418 = sbr.rel (%p415_p2) target bundleno = 3320 (0xcf8), region = 76  ;;  %p463_p3 = scmp.lt.s32.totalorder (!%p415_p2), %s3896_s15, 31 }
   0x7   : > { %s4664_s30 = smov (!%p415_p2), 96   ;;  %s4665_s22 = smov (!%p415_p2), 104  }
   0x8   : > { %s4666_s23 = smov (!%p415_p2), 120  }
   0xd   : > { %s6200_s15 = smov (!%p463_p3, %s3896_s15), 31 }
   0xe   : > { %s3981_s16 = sshll.u32 %s6200_s15, 4 }
   0xf   : > { %s4760_s19 = scalar_lea.vmem %s6184_s0, %s3981_s16  ;;  %s6131_s24 = scalar_lea.vmem %s6198_s14, %s3981_s16 }
  0x10   : > { %v477_v0 = vld [vmem:[%s4760_s19] sm:$0xff]  ;;  %v479_v1 = vld [vmem:[%s4760_s19 + $0x10] sm:$0xff]  ;;  %v478_v2 = vld [vmem:[%s4760_s19 + $0x8] sm:$0xff] }
  0x11   : > { %v516_v3 = vsel %vm515_vm0, %v477_v0, 0.0  ;;  %v522_v4 = vsel %vm515_vm0, %v479_v1, 0.0  ;;  %v480_v5 = vld [vmem:[%s4760_s19 + $0x18] sm:$0xff]  ;;  %v519_v6 = vsel %vm515_vm0, %v478_v2, 0.0  ;;  %v481_v8 = vld [vmem:[%s4760_s19 + $0x20] sm:$0xff]  ;;  %v482_v9 = vld [vmem:[%s4760_s19 + $0x28] sm:$0xff] }
  0x12   : > { %517 = vadd.xlane.f32.xlu0 %v516_v3  ;;  %523 = vadd.xlane.f32.xlu1 %v522_v4  ;;  %v525_v7 = vsel %vm515_vm0, %v480_v5, 0.0  ;;  %v528_v10 = vsel %vm515_vm0, %v481_v8, 0.0  ;;  %v531_v11 = vsel %vm515_vm0, %v482_v9, 0.0  ;;  %v4775_v12 = vld [vmem:[%s4760_s19 + $0x30] sm:$0xff]  ;;  %v4778_v13 = vld [vmem:[%s4760_s19 + $0x38] sm:$0xff]  ;;  %v4785_v16 = vld [vmem:[%s4760_s19 + $0x40] sm:$0xff] }
  0x13   : > { %v534_v14 = vsel %vm515_vm0, %v4775_v12, 0.0  ;;  %v537_v15 = vsel %vm515_vm0, %v4778_v13, 0.0  ;;  %v4788_v17 = vld [vmem:[%s4760_s19 + $0x48] sm:$0xff]  ;;  %v540_v18 = vsel %vm515_vm0, %v4785_v16, 0.0  ;;  %v4795_v20 = vld [vmem:[%s4760_s19 + $0x50] sm:$0xff]  ;;  %v4798_v21 = vld [vmem:[%s4760_s19 + $0x58] sm:$0xff] }
  0x14   : > { %v543_v19 = vsel %vm515_vm0, %v4788_v17, 0.0  ;;  %v546_v22 = vsel %vm515_vm0, %v4795_v20, 0.0  ;;  %v549_v23 = vsel %vm515_vm0, %v4798_v21, 0.0  ;;  %v4805_v24 = vld [vmem:[%s4760_s19 + $0x60] sm:$0xff]  ;;  %v4808_v25 = vld [vmem:[%s4760_s19 + $0x68] sm:$0xff]  ;;  %v4815_v28 = vld [vmem:[%s4760_s19 + $0x70] sm:$0xff] }
  0x15   : > { %v552_v26 = vsel %vm515_vm0, %v4805_v24, 0.0  ;;  %v555_v27 = vsel %vm515_vm0, %v4808_v25, 0.0  ;;  %v4818_v29 = vld [vmem:[%s4760_s19 + $0x78] sm:$0xff]  ;;  %v558_v30 = vsel %vm515_vm0, %v4815_v28, 0.0 }
  0x16   : > { %520 = vadd.xlane.f32.xlu0 %v519_v6  ;;  %526 = vadd.xlane.f32.xlu1 %v525_v7  ;;  %v561_v31 = vsel %vm515_vm0, %v4818_v29, 0.0 }
  0x1a   : > { %529 = vadd.xlane.f32.xlu0 %v528_v10  ;;  %532 = vadd.xlane.f32.xlu1 %v531_v11 }
  0x1e   : > { %535 = vadd.xlane.f32.xlu0 %v534_v14  ;;  %538 = vadd.xlane.f32.xlu1 %v537_v15 }
  0x22   : > { %541 = vadd.xlane.f32.xlu0 %v540_v18  ;;  %544 = vadd.xlane.f32.xlu1 %v543_v19 }
  0x26   : > { %547 = vadd.xlane.f32.xlu0 %v546_v22  ;;  %550 = vadd.xlane.f32.xlu1 %v549_v23 }
  0x2a   : > { %553 = vadd.xlane.f32.xlu0 %v552_v26  ;;  %556 = vadd.xlane.f32.xlu1 %v555_v27 }
  0x2e   : > { %559 = vadd.xlane.f32.xlu0 %v558_v30  ;;  %562 = vadd.xlane.f32.xlu1 %v561_v31 }
  0x9f   : > { %v518_v32 = vpop.xlane.xlu0 %517  ;;  %v524_v33 = vpop.xlane.xlu1 %523 }
  0xa0   : > { %v565_v34 = vmul.f32 0.0625, %v518_v32  ;;  %v567_v35 = vmul.f32 0.0625, %v524_v33 }
  0xa2   : > { %v4824_v36 = vsub.f32 %v477_v0, %v565_v34  ;;  %v4826_v37 = vsub.f32 %v479_v1, %v567_v35 }
  0xa3   : > { %v521_v38 = vpop.xlane.xlu0 %520  ;;  %v527_v39 = vpop.xlane.xlu1 %526 }
  0xa4   : > { %v566_v40 = vmul.f32 0.0625, %v521_v38  ;;  %v568_v41 = vmul.f32 0.0625, %v527_v39  ;;  %v597_v42 = vmul.f32 %v4824_v36, %v4824_v36  ;;  %v599_v43 = vmul.f32 %v4826_v37, %v4826_v37 }
  0xa6   : > { %v4832_v44 = vsub.f32 %v478_v2, %v566_v40  ;;  %v4834_v45 = vsub.f32 %v480_v5, %v568_v41  ;;  %v613_v46 = vsel %vm515_vm0, %v597_v42, 0.0  ;;  %v619_v49 = vsel %vm515_vm0, %v599_v43, 0.0 }
  0xa7   : > { %614 = vadd.xlane.f32.xlu0 %v613_v46  ;;  %v530_v47 = vpop.xlane.xlu0 %529  ;;  %v533_v48 = vpop.xlane.xlu1 %532 }
  0xa8   : > { %v569_v50 = vmul.f32 0.0625, %v530_v47  ;;  %v570_v51 = vmul.f32 0.0625, %v533_v48  ;;  %v598_v52 = vmul.f32 %v4832_v44, %v4832_v44  ;;  %v600_v53 = vmul.f32 %v4834_v45, %v4834_v45 }
  0xaa   : > { %v4842_v54 = vsub.f32 %v481_v8, %v569_v50  ;;  %v4844_v55 = vsub.f32 %v482_v9, %v570_v51  ;;  %v616_v56 = vsel %vm515_vm0, %v598_v52, 0.0  ;;  %v622_v59 = vsel %vm515_vm0, %v600_v53, 0.0 }
  0xab   : > { %620 = vadd.xlane.f32.xlu0 %v619_v49  ;;  %617 = vadd.xlane.f32.xlu1 %v616_v56  ;;  %v536_v57 = vpop.xlane.xlu0 %535  ;;  %v539_v58 = vpop.xlane.xlu1 %538 }
  0xac   : > { %v571_v60 = vmul.f32 0.0625, %v536_v57  ;;  %v572_v61 = vmul.f32 0.0625, %v539_v58  ;;  %v601_v62 = vmul.f32 %v4842_v54, %v4842_v54  ;;  %v602_v63 = vmul.f32 %v4844_v55, %v4844_v55 }
  0xae   : > { %v4853_v0 = vsub.f32 %v4775_v12, %v571_v60  ;;  %v4856_v1 = vsub.f32 %v4778_v13, %v572_v61  ;;  %v625_v2 = vsel %vm515_vm0, %v601_v62, 0.0  ;;  %v628_v5 = vsel %vm515_vm0, %v602_v63, 0.0 }
  0xaf   : > { %623 = vadd.xlane.f32.xlu1 %v622_v59  ;;  %626 = vadd.xlane.f32.xlu0 %v625_v2  ;;  %v542_v3 = vpop.xlane.xlu0 %541  ;;  %v545_v4 = vpop.xlane.xlu1 %544 }
  0xb0   : > { %v573_v6 = vmul.f32 0.0625, %v542_v3  ;;  %v574_v7 = vmul.f32 0.0625, %v545_v4  ;;  %v603_v8 = vmul.f32 %v4853_v0, %v4853_v0  ;;  %v604_v9 = vmul.f32 %v4856_v1, %v4856_v1 }
  0xb2   : > { %v4865_v10 = vsub.f32 %v4785_v16, %v573_v6  ;;  %v4868_v11 = vsub.f32 %v4788_v17, %v574_v7  ;;  %v631_v12 = vsel %vm515_vm0, %v603_v8, 0.0  ;;  %v634_v15 = vsel %vm515_vm0, %v604_v9, 0.0 }
  0xb3   : > { %629 = vadd.xlane.f32.xlu1 %v628_v5  ;;  %632 = vadd.xlane.f32.xlu0 %v631_v12  ;;  %v548_v13 = vpop.xlane.xlu0 %547  ;;  %v551_v14 = vpop.xlane.xlu1 %550 }
  0xb4   : > { %v575_v18 = vmul.f32 0.0625, %v548_v13  ;;  %v576_v19 = vmul.f32 0.0625, %v551_v14  ;;  %v605_v22 = vmul.f32 %v4865_v10, %v4865_v10  ;;  %v606_v16 = vmul.f32 %v4868_v11, %v4868_v11 }
  0xb6   : > { %v4877_v23 = vsub.f32 %v4795_v20, %v575_v18  ;;  %v4880_v17 = vsub.f32 %v4798_v21, %v576_v19  ;;  %v637_v26 = vsel %vm515_vm0, %v605_v22, 0.0  ;;  %v640_v31 = vsel %vm515_vm0, %v606_v16, 0.0 }
  0xb7   : > { %635 = vadd.xlane.f32.xlu1 %v634_v15  ;;  %638 = vadd.xlane.f32.xlu0 %v637_v26  ;;  %v554_v27 = vpop.xlane.xlu0 %553  ;;  %v557_v30 = vpop.xlane.xlu1 %556 }
  0xb8   : > { %v577_v32 = vmul.f32 0.0625, %v554_v27  ;;  %v578_v33 = vmul.f32 0.0625, %v557_v30  ;;  %v607_v34 = vmul.f32 %v4877_v23, %v4877_v23  ;;  %v608_v20 = vmul.f32 %v4880_v17, %v4880_v17  ;;  %v4921_v30 = vld [vmem:[%s6186_s2] ss:$0 sm:$0xff] }
  0xba   : > { %v4889_v35 = vsub.f32 %v4805_v24, %v577_v32  ;;  %v4892_v21 = vsub.f32 %v4808_v25, %v578_v33  ;;  %v643_v38 = vsel %vm515_vm0, %v607_v34, 0.0  ;;  %v646_v41 = vsel %vm515_vm0, %v608_v20, 0.0 }
  0xbb   : > { %641 = vadd.xlane.f32.xlu1 %v640_v31  ;;  %644 = vadd.xlane.f32.xlu0 %v643_v38  ;;  %v560_v39 = vpop.xlane.xlu0 %559  ;;  %v563_v40 = vpop.xlane.xlu1 %562 }
  0xbc   : > { %v579_v42 = vmul.f32 0.0625, %v560_v39  ;;  %v580_v43 = vmul.f32 0.0625, %v563_v40  ;;  %v609_v46 = vmul.f32 %v4889_v35, %v4889_v35  ;;  %v610_v24 = vmul.f32 %v4892_v21, %v4892_v21 }
  0xbe   : > { %v4901_v47 = vsub.f32 %v4815_v28, %v579_v42  ;;  %v4904_v25 = vsub.f32 %v4818_v29, %v580_v43  ;;  %v649_v48 = vsel %vm515_vm0, %v609_v46, 0.0  ;;  %v652_v49 = vsel %vm515_vm0, %v610_v24, 0.0  ;;  %v4408_v29 = vld [vmem:[%s6188_s4] sm:$0xff]  }
  0xbf   : > { %647 = vadd.xlane.f32.xlu1 %v646_v41  ;;  %650 = vadd.xlane.f32.xlu0 %v649_v48  ;;  %v4928_v42 = vld [vmem:[%s6187_s3] ss:$0 sm:$0xff] }
  0xc0   : > { %v611_v50 = vmul.f32 %v4901_v47, %v4901_v47  ;;  %v612_v51 = vmul.f32 %v4904_v25, %v4904_v25  ;;  %4084 = vmatprep.subr.bf16.mxu0 %v4408_v29  ;;  %4350 = vmatprep.subr.bf16.mxu1 %v4408_v29 }
  0xc1   : > { %4085 = vmatpush3.bf16.msra.mxu0 %v4408_v29  ;;  %4351 = vmatpush3.bf16.msra.mxu1 %v4408_v29 }
  0xc2   : > { %v655_v52 = vsel %vm515_vm0, %v611_v50, 0.0  ;;  %v658_v28 = vsel %vm515_vm0, %v612_v51, 0.0 }
  0xc3   : > { %653 = vadd.xlane.f32.xlu1 %v652_v49  ;;  %656 = vadd.xlane.f32.xlu0 %v655_v52 }
  0xc7   : > { %659 = vadd.xlane.f32.xlu1 %v658_v28 }
 0x134   : > { %v615_v53 = vpop.xlane.xlu0 %614 }
 0x135   : > { %v661_v56 = vmul.f32 0.0625, %v615_v53 }
 0x137   : > { %v677_v57 = vadd.f32 1e-05, %v661_v56 }
 0x138   : > { %v618_v58 = vpop.xlane.xlu1 %617  ;;  %v621_v59 = vpop.xlane.xlu0 %620 }
 0x139   : > { %4413 = vrsqrt.f32 %v677_v57  ;;  %v662_v60 = vmul.f32 0.0625, %v618_v58  ;;  %v663_v61 = vmul.f32 0.0625, %v621_v59 }
 0x13b   : > { %v678_v62 = vadd.f32 1e-05, %v662_v60  ;;  %v679_v63 = vadd.f32 1e-05, %v663_v61 }
 0x13c   : > { %v624_v2 = vpop.xlane.xlu1 %623  ;;  %v627_v3 = vpop.xlane.xlu0 %626 }
 0x13d   : > { %4415 = vrsqrt.f32 %v678_v62  ;;  %v664_v4 = vmul.f32 0.0625, %v624_v2  ;;  %v665_v5 = vmul.f32 0.0625, %v627_v3 }
 0x13e   : > { %4417 = vrsqrt.f32 %v679_v63 }
 0x13f   : > { %v680_v6 = vadd.f32 1e-05, %v664_v4  ;;  %v681_v7 = vadd.f32 1e-05, %v665_v5 }
 0x140   : > { %v630_v8 = vpop.xlane.xlu1 %629  ;;  %v633_v9 = vpop.xlane.xlu0 %632 }
 0x141   : > { %4419 = vrsqrt.f32 %v680_v6  ;;  %v666_v12 = vmul.f32 0.0625, %v630_v8  ;;  %v667_v13 = vmul.f32 0.0625, %v633_v9 }
 0x142   : > { %4421 = vrsqrt.f32 %v681_v7 }
 0x143   : > { %v4414_v14 = vpop.eup %4413  ;;  %v682_v15 = vadd.f32 1e-05, %v666_v12  ;;  %v683_v18 = vadd.f32 1e-05, %v667_v13 }
 0x144   : > { %v636_v19 = vpop.xlane.xlu1 %635  ;;  %v639_v22 = vpop.xlane.xlu0 %638  ;;  %v709_v16 = vmul.f32 %v4414_v14, %v4824_v36 }
 0x145   : > { %4423 = vrsqrt.f32 %v682_v15  ;;  %v668_v26 = vmul.f32 0.0625, %v636_v19  ;;  %v669_v27 = vmul.f32 0.0625, %v639_v22 }
 0x146   : > { %4425 = vrsqrt.f32 %v683_v18  ;;  %v731_v40 = vmul.f32 %v4921_v30, %v709_v16 }
 0x147   : > { %v4416_v31 = vpop.eup %4415  ;;  %v684_v32 = vadd.f32 1e-05, %v668_v26  ;;  %v685_v33 = vadd.f32 1e-05, %v669_v27 }
 0x148   : > { %v4418_v34 = vpop.eup %4417  ;;  %v642_v20 = vpop.xlane.xlu1 %641  ;;  %v710_v39 = vmul.f32 %v4416_v31, %v4832_v44  ;;  %v753_v52 = vadd.f32 %v4928_v42, %v731_v40 }
 0x149   : > { %v645_v38 = vpop.xlane.xlu0 %644  ;;  %4427 = vrsqrt.f32 %v684_v32  ;;  %v670_v36 = vmul.f32 0.0625, %v642_v20  ;;  %v711_v43 = vmul.f32 %v4418_v34, %v4826_v37 }
 0x14a   : > { %v671_v41 = vmul.f32 0.0625, %v645_v38  ;;  %4429 = vrsqrt.f32 %v685_v33  ;;  %v732_v46 = vmul.f32 %v4921_v30, %v710_v39 }
 0x14b   : > { %v4420_v24 = vpop.eup %4419  ;;  %v686_v48 = vadd.f32 1e-05, %v670_v36  ;;  %v733_v53 = vmul.f32 %v4921_v30, %v711_v43 }
 0x14c   : > { %v687_v49 = vadd.f32 1e-05, %v671_v41  ;;  %v4422_v50 = vpop.eup %4421  ;;  %v648_v44 = vpop.xlane.xlu1 %647  ;;  %v754_v28 = vadd.f32 %v4928_v42, %v732_v46  ;;  %v712_v29 = vmul.f32 %v4420_v24, %v4834_v45 }
 0x14d   : > { %v651_v51 = vpop.xlane.xlu0 %650  ;;  %4431 = vrsqrt.f32 %v686_v48  ;;  %v672_v56 = vmul.f32 0.0625, %v648_v44  ;;  %v713_v59 = vmul.f32 %v4422_v50, %v4842_v54  ;;  %v755_v45 = vadd.f32 %v4928_v42, %v733_v53 }
 0x14e   : > { %v673_v37 = vmul.f32 0.0625, %v651_v51  ;;  %4433 = vrsqrt.f32 %v687_v49  ;;  %v769_v57 = vpack.c.bf16 %v754_v28, %v753_v52  ;;  %v734_v58 = vmul.f32 %v4921_v30, %v712_v29 }
 0x14f   : > { %v4424_v60 = vpop.eup %4423  ;;  %v688_v61 = vadd.f32 1e-05, %v672_v56  ;;  %v735_v6 = vmul.f32 %v4921_v30, %v713_v59 }
 0x150   : > { %v689_v62 = vadd.f32 1e-05, %v673_v37  ;;  %v4426_v63 = vpop.eup %4425  ;;  %v654_v2 = vpop.xlane.xlu1 %653  ;;  %4086 = vmatprep.mubr.msk.bf16.mxu0 %vm515_vm0, %v769_v57  ;;  %v756_v4 = vadd.f32 %v4928_v42, %v734_v58  ;;  %v714_v5 = vmul.f32 %v4424_v60, %v4844_v55 }
 0x151   : > { %v657_v3 = vpop.xlane.xlu0 %656  ;;  %4435 = vrsqrt.f32 %v688_v61  ;;  %v674_v7 = vmul.f32 0.0625, %v654_v2  ;;  %v715_v54 = vmul.f32 %v4426_v63, %v4853_v0  ;;  %v757_v55 = vadd.f32 %v4928_v42, %v735_v6 }
 0x152   : > { %v675_v8 = vmul.f32 0.0625, %v657_v3  ;;  %4437 = vrsqrt.f32 %v689_v62  ;;  %v770_v9 = vpack.c.bf16 %v756_v4, %v755_v45  ;;  %v736_v12 = vmul.f32 %v4921_v30, %v714_v5 }
 0x153   : > { %v4428_v13 = vpop.eup %4427  ;;  %v690_v14 = vadd.f32 1e-05, %v674_v7  ;;  %v737_v26 = vmul.f32 %v4921_v30, %v715_v54  ;;  %v4661_v3 = vmov 0.0  }
 0x154   : > { %v691_v15 = vadd.f32 1e-05, %v675_v8  ;;  %v4430_v18 = vpop.eup %4429  ;;  %v660_v19 = vpop.xlane.xlu1 %659  ;;  %4087 = vmatmul.mubr.msk.bf16.vlgmr.msra.gmra.mrb[0].mxu0 %vm515_vm0, %v770_v9  ;;  %v758_v22 = vadd.f32 %v4928_v42, %v736_v12  ;;  %v716_v16 = vmul.f32 %v4428_v13, %v4856_v1  ;;  %4102 = vmatprep.subr.bf16.mxu1 %v4661_v3 }
 0x155   : > { %4439 = vrsqrt.f32 %v690_v14  ;;  %v676_v0 = vmul.f32 0.0625, %v660_v19  ;;  %v717_v27 = vmul.f32 %v4430_v18, %v4865_v10  ;;  %v759_v38 = vadd.f32 %v4928_v42, %v737_v26  ;;  %4126 = vmatprep.subr.bf16.mxu0 %v4661_v3 }
 0x156   : > { %4441 = vrsqrt.f32 %v691_v15  ;;  %v771_v31 = vpack.c.bf16 %v758_v22, %v757_v55  ;;  %v738_v32 = vmul.f32 %v4921_v30, %v716_v16 }
 0x157   : > { %v4432_v33 = vpop.eup %4431  ;;  %v692_v34 = vadd.f32 1e-05, %v676_v0  ;;  %v739_v40 = vmul.f32 %v4921_v30, %v717_v27 }
 0x158   : > { %v4434_v20 = vpop.eup %4433  ;;  %4090 = vmatprep.mubr.msk.bf16.mxu0 %vm515_vm0, %v771_v31  ;;  %v760_v39 = vadd.f32 %v4928_v42, %v738_v32  ;;  %v718_v1 = vmul.f32 %v4432_v33, %v4868_v11 }
 0x159   : > { %4443 = vrsqrt.f32 %v692_v34  ;;  %v719_v10 = vmul.f32 %v4434_v20, %v4877_v23  ;;  %v761_v24 = vadd.f32 %v4928_v42, %v739_v40 }
 0x15a   : > { %v772_v36 = vpack.c.bf16 %v760_v39, %v759_v38  ;;  %v740_v41 = vmul.f32 %v4921_v30, %v718_v1 }
 0x15b   : > { %v4436_v43 = vpop.eup %4435  ;;  %v741_v11 = vmul.f32 %v4921_v30, %v719_v10 }
 0x15c   : > { %v4438_v46 = vpop.eup %4437  ;;  %4091 = vmatmul.mubr.msk.bf16.gmra.mrb[4].mxu0 %vm515_vm0, %v772_v36  ;;  %v762_v48 = vadd.f32 %v4928_v42, %v740_v41  ;;  %v720_v49 = vmul.f32 %v4436_v43, %v4880_v17 }
 0x15d   : > { %v721_v50 = vmul.f32 %v4438_v46, %v4889_v35  ;;  %v763_v28 = vadd.f32 %v4928_v42, %v741_v11  ;;  %4128 = vmatprep.mubr.msk.bf16.mxu0 %vm4662_vm1, %v4661_v3 }
 0x15e   : > { %v773_v44 = vpack.c.bf16 %v762_v48, %v761_v24  ;;  %v742_v23 = vmul.f32 %v4921_v30, %v720_v49 }
 0x15f   : > { %v4440_v51 = vpop.eup %4439  ;;  %v743_v56 = vmul.f32 %v4921_v30, %v721_v50 }
 0x160   : > { %v4442_v52 = vpop.eup %4441  ;;  %4094 = vmatprep.mubr.msk.bf16.mxu1 %vm515_vm0, %v773_v44  ;;  %v764_v29 = vadd.f32 %v4928_v42, %v742_v23  ;;  %v722_v53 = vmul.f32 %v4440_v51, %v4892_v21 }
 0x161   : > { %v723_v17 = vmul.f32 %v4442_v52, %v4901_v47  ;;  %v765_v58 = vadd.f32 %v4928_v42, %v743_v56 }
 0x162   : > { %v774_v37 = vpack.c.bf16 %v764_v29, %v763_v28  ;;  %v744_v35 = vmul.f32 %v4921_v30, %v722_v53 }
 0x163   : > { %v4444_v57 = vpop.eup %4443  ;;  %v745_v61 = vmul.f32 %v4921_v30, %v723_v17 }
 0x164   : > { %4095 = vmatmul.mubr.msk.bf16.vlgmr.msra.gmra.mrb[0].mxu1 %vm515_vm0, %v774_v37  ;;  %v766_v59 = vadd.f32 %v4928_v42, %v744_v35  ;;  %v724_v60 = vmul.f32 %v4444_v57, %v4904_v25  ;;  %v4988_v25 = vld [vmem:[%s6189_s5] ss:$0 sm:$0xff] }
 0x165   : > { %v767_v47 = vadd.f32 %v4928_v42, %v745_v61 }
 0x166   : > { %v775_v62 = vpack.c.bf16 %v766_v59, %v765_v58  ;;  %v746_v21 = vmul.f32 %v4921_v30, %v724_v60 }
 0x168   : > { %4098 = vmatprep.mubr.msk.bf16.mxu1 %vm515_vm0, %v775_v62  ;;  %v768_v63 = vadd.f32 %v4928_v42, %v746_v21 }
 0x16a   : > { %v776_v2 = vpack.c.bf16 %v768_v63, %v767_v47 }
 0x16c   : > { %4099 = vmatmul.mubr.msk.bf16.gmra.mrb[4].mxu1 %vm515_vm0, %v776_v2 }
 0x16d   : > { %4104 = vmatprep.mubr.msk.bf16.mxu1 %vm4662_vm1, %v4661_v3 }
 0x227   : > { %v4088_v30 = vpop.f32.mrb[0].mxu0 }
 0x228   : > { %v856_v45 = vadd.f32 %v4088_v30, %v4988_v25  ;;  %v847_v4 = vpop.f32.mrb[1].mxu0 }
 0x229   : > { %v848_v5 = vadd.f32 %v4988_v25, %v847_v4  ;;  %v4089_v42 = vpop.f32.mrb[2].mxu0 }
 0x22a   : > { %v859_v6 = vadd.f32 %v4089_v42, %v4988_v25  ;;  %v850_v7 = vpop.f32.mrb[3].mxu0  ;;  %v912_v54 = vmul.f32 0.35355338, %v856_v45 }
 0x22b   : > { %v851_v8 = vadd.f32 %v4988_v25, %v850_v7  ;;  %v910_v13 = vmul.f32 0.35355338, %v848_v5 }
 0x22c   : > { %v913_v9 = vmul.f32 0.35355338, %v859_v6  ;;  %v4998_v12 = vpack.c.bf16 %v859_v6, %v856_v45 }
 0x22d   : > { %v911_v14 = vmul.f32 0.35355338, %v851_v8  ;;  %v5000_v15 = vpack.c.bf16 %v851_v8, %v848_v5 }
 0x22e   : > { %v5002_v18 = vpack.c.bf16 %v913_v9, %v912_v54  ;;  %994 = vrot.lane.b32.xlu1 %v4998_v12, %s4663_s28 }
 0x22f   : > { %v5006_v19 = vpack.c.bf16 %v911_v14, %v910_v13  ;;  %943 = vrot.lane.b32.xlu0 %v5000_v15, %s4663_s28  ;;  %v4092_v55 = vpop.f32.mrb[4].mxu0 }
 0x230   : > { %v872_v22 = vadd.f32 %v4092_v55, %v4988_v25  ;;  %v863_v16 = vpop.f32.mrb[5].mxu0 }
 0x231   : > { %v864_v26 = vadd.f32 %v4988_v25, %v863_v16  ;;  %v4093_v0 = vpop.f32.mrb[6].mxu0 }
 0x232   : > { %v875_v27 = vadd.f32 %v4093_v0, %v4988_v25  ;;  %v866_v31 = vpop.f32.mrb[7].mxu0  ;;  %v916_v33 = vmul.f32 0.35355338, %v872_v22 }
 0x233   : > { %v867_v32 = vadd.f32 %v4988_v25, %v866_v31  ;;  %v914_v38 = vmul.f32 0.35355338, %v864_v26 }
 0x234   : > { %v917_v34 = vmul.f32 0.35355338, %v875_v27  ;;  %v5014_v20 = vpack.c.bf16 %v875_v27, %v872_v22 }
 0x235   : > { %v915_v39 = vmul.f32 0.35355338, %v867_v32  ;;  %v5016_v1 = vpack.c.bf16 %v867_v32, %v864_v26  ;;  %v5119_v32 = vld [vmem:[%s6185_s1] sm:$0xff] }
 0x236   : > { %v5018_v40 = vpack.c.bf16 %v917_v34, %v916_v33  ;;  %v5124_v34 = vld [vmem:[%s6185_s1 + $0x8] sm:$0xff] }
 0x237   : > { %v5020_v10 = vpack.c.bf16 %v915_v39, %v914_v38  ;;  %1044 = vrot.lane.b32.xlu1 %v5016_v1, %s4663_s28  ;;  %v4096_v36 = vpop.f32.mrb[0].mxu1 }
 0x238   : > { %v888_v41 = vadd.f32 %v4096_v36, %v4988_v25  ;;  %v879_v43 = vpop.f32.mrb[1].mxu1 }
 0x239   : > { %v880_v46 = vadd.f32 %v4988_v25, %v879_v43  ;;  %v4097_v24 = vpop.f32.mrb[2].mxu1 }
 0x23a   : > { %v891_v48 = vadd.f32 %v4097_v24, %v4988_v25  ;;  %v882_v49 = vpop.f32.mrb[3].mxu1  ;;  %v920_v50 = vmul.f32 0.35355338, %v888_v41 }
 0x23b   : > { %v883_v11 = vadd.f32 %v4988_v25, %v882_v49  ;;  %1094 = vrot.lane.b32.xlu1 %v5014_v20, %s4663_s28  ;;  %v918_v51 = vmul.f32 0.35355338, %v880_v46 }
 0x23c   : > { %v921_v44 = vmul.f32 0.35355338, %v891_v48  ;;  %v5030_v23 = vpack.c.bf16 %v891_v48, %v888_v41 }
 0x23d   : > { %v919_v52 = vmul.f32 0.35355338, %v883_v11  ;;  %v5032_v28 = vpack.c.bf16 %v883_v11, %v880_v46 }
 0x23e   : > { %v5034_v29 = vpack.c.bf16 %v921_v44, %v920_v50 }
 0x23f   : > { %v5036_v53 = vpack.c.bf16 %v919_v52, %v918_v51  ;;  %1194 = vrot.lane.b32.xlu1 %v5030_v23, %s4663_s28  ;;  %1144 = vrot.lane.b32.xlu0 %v5032_v28, %s4663_s28  ;;  %v4100_v56 = vpop.f32.mrb[4].mxu1 }
 0x240   : > { %v904_v17 = vadd.f32 %v4100_v56, %v4988_v25  ;;  %v895_v37 = vpop.f32.mrb[5].mxu1 }
 0x241   : > { %v896_v35 = vadd.f32 %v4988_v25, %v895_v37  ;;  %v4101_v57 = vpop.f32.mrb[6].mxu1 }
 0x242   : > { %v907_v58 = vadd.f32 %v4101_v57, %v4988_v25  ;;  %v898_v59 = vpop.f32.mrb[7].mxu1  ;;  %v924_v61 = vmul.f32 0.35355338, %v904_v17 }
 0x243   : > { %v899_v60 = vadd.f32 %v4988_v25, %v898_v59  ;;  %v922_v47 = vmul.f32 0.35355338, %v896_v35 }
 0x244   : > { %v925_v62 = vmul.f32 0.35355338, %v907_v58  ;;  %v5046_v21 = vpack.c.bf16 %v907_v58, %v904_v17 }
 0x245   : > { %v923_v63 = vmul.f32 0.35355338, %v899_v60  ;;  %v5048_v2 = vpack.c.bf16 %v899_v60, %v896_v35 }
 0x246   : > { %v5050_v30 = vpack.c.bf16 %v925_v62, %v924_v61  ;;  %1294 = vrot.lane.b32.xlu1 %v5046_v21, %s4663_s28 }
 0x247   : > { %v5054_v45 = vpack.c.bf16 %v923_v63, %v922_v47  ;;  %1244 = vrot.lane.b32.xlu0 %v5048_v2, %s4663_s28  ;;  %s4667_s28 = smov 88  }
 0x24a   : > { %1574 = vrot.lane.b32.xlu1 %v4998_v12, %s4664_s30 }
 0x24b   : > { %1527 = vrot.lane.b32.xlu0 %v5000_v15, %s4664_s30 }
 0x24e   : > { %1668 = vrot.lane.b32.xlu1 %v5014_v20, %s4664_s30 }
 0x252   : > { %1621 = vrot.lane.b32.xlu1 %v5016_v1, %s4664_s30 }
 0x2a0   : > { %v995_v5 = vpop.permute.xlu1 %994 }
 0x2a1   : > { %v944_v25 = vpop.permute.xlu0 %943  ;;  %v1000_v42 = vsel %vm945_vm2, %v995_v5, 0 }
 0x2a2   : > { %v950_v4 = vsel %vm945_vm2, %v944_v25, 0 }
 0x2a3   : > { %4103 = vmatpush3.bf16.xpose.msra.mxu1 %v950_v4 }
 0x2a4   : > { %4108 = vmatprep.subr.bf16.mxu1 %v4661_v3 }
 0x2a9   : > { %v1045_v6 = vpop.permute.xlu1 %1044 }
 0x2aa   : > { %4105 = vmatmul.mubr.msk.bf16.vlgmr.msra.gmra.mrb[8].mxu1 %vm945_vm2, %v5006_v19  ;;  %v1050_v8 = vsel %vm945_vm2, %v1045_v6, 0 }
 0x2ab   : > { %4109 = vmatpush3.bf16.xpose.msra.mxu1 %v1000_v42  ;;  %4110 = vmatprep.mubr.msk.bf16.mxu1 %vm4662_vm1, %v4661_v3 }
 0x2ac   : > { %4114 = vmatprep.subr.bf16.mxu1 %v4661_v3 }
 0x2ad   : > { %v1095_v9 = vpop.permute.xlu1 %1094 }
 0x2ae   : > { %v1100_v14 = vsel %vm945_vm2, %v1095_v9, 0 }
 0x2b1   : > { %v1145_v7 = vpop.permute.xlu0 %1144  ;;  %v1195_v22 = vpop.permute.xlu1 %1194 }
 0x2b2   : > { %v1150_v54 = vsel %vm945_vm2, %v1145_v7, 0  ;;  %4111 = vmatmul.mubr.msk.bf16.vlgmr.msra.gmra.mrb[12].mxu1 %vm945_vm2, %v5002_v18  ;;  %v1200_v16 = vsel %vm945_vm2, %v1195_v22, 0 }
 0x2b3   : > { %4115 = vmatpush3.bf16.xpose.msra.mxu1 %v1050_v8  ;;  %4127 = vmatpush3.bf16.xpose.msra.mxu0 %v1150_v54 }
 0x2b4   : > { %4116 = vmatprep.mubr.msk.bf16.mxu1 %vm4662_vm1, %v4661_v3  ;;  %4120 = vmatprep.subr.bf16.mxu1 %v4661_v3 }
 0x2b5   : > { %4138 = vmatprep.subr.bf16.mxu0 %v4661_v3 }
 0x2b8   : > { %v1295_v0 = vpop.permute.xlu1 %1294 }
 0x2b9   : > { %v1245_v13 = vpop.permute.xlu0 %1244  ;;  %v1300_v27 = vsel %vm945_vm2, %v1295_v0, 0 }
 0x2ba   : > { %v1250_v55 = vsel %vm945_vm2, %v1245_v13, 0  ;;  %4117 = vmatmul.mubr.msk.bf16.vlgmr.msra.gmra.mrb[16].mxu1 %vm945_vm2, %v5020_v10  ;;  %4129 = vmatmul.mubr.msk.bf16.vlgmr.msra.gmra.mrb[8].mxu0 %vm945_vm2, %v5036_v53 }
 0x2bb   : > { %4121 = vmatpush3.bf16.xpose.msra.mxu1 %v1100_v14  ;;  %4139 = vmatpush3.bf16.xpose.msra.mxu0 %v1250_v55 }
 0x2bc   : > { %4122 = vmatprep.mubr.msk.bf16.mxu1 %vm4662_vm1, %v4661_v3  ;;  %4140 = vmatprep.mubr.msk.bf16.mxu0 %vm4662_vm1, %v4661_v3  ;;  %v1575_v31 = vpop.permute.xlu1 %1574 }
 0x2bd   : > { %4132 = vmatprep.subr.bf16.mxu1 %v4661_v3  ;;  %4150 = vmatprep.subr.bf16.mxu0 %v4661_v3  ;;  %v1528_v26 = vpop.permute.xlu0 %1527 }
 0x2c2   : > { %4123 = vmatmul.mubr.msk.bf16.vlgmr.msra.gmra.mrb[20].mxu1 %vm945_vm2, %v5018_v40  ;;  %4141 = vmatmul.mubr.msk.bf16.vlgmr.msra.gmra.mrb[12].mxu0 %vm945_vm2, %v5054_v45 }
 0x2c3   : > { %4133 = vmatpush3.bf16.xpose.msra.mxu1 %v1200_v16  ;;  %4151 = vmatpush3.bf16.msra.mxu0 %v1528_v26 }
 0x2c4   : > { %4134 = vmatprep.mubr.msk.bf16.mxu1 %vm4662_vm1, %v4661_v3  ;;  %4144 = vmatprep.subr.bf16.mxu1 %v4661_v3 }
 0x2c5   : > { %4152 = vmatprep.mubr.msk.bf16.mxu0 %vm4662_vm1, %v4661_v3  ;;  %4162 = vmatprep.subr.bf16.mxu0 %v4661_v3 }
 0x2ca   : > { %4135 = vmatmul.mubr.msk.bf16.vlgmr.msra.gmra.mrb[24].mxu1 %vm945_vm2, %v5034_v29 }
 0x2cb   : > { %4145 = vmatpush3.bf16.xpose.msra.mxu1 %v1300_v27  ;;  %4146 = vmatprep.mubr.msk.bf16.mxu1 %vm4662_vm1, %v4661_v3 }
 0x2cc   : > { %4156 = vmatprep.subr.bf16.mxu1 %v4661_v3 }
 0x2d2   : > { %4147 = vmatmul.mubr.msk.bf16.vlgmr.msra.gmra.mrb[28].mxu1 %vm945_vm2, %v5050_v30 }
 0x2d3   : > { %4157 = vmatpush3.bf16.msra.mxu1 %v1575_v31  ;;  %4158 = vmatprep.mubr.msk.bf16.mxu1 %vm4662_vm1, %v4661_v3 }
 0x2d4   : > { %4168 = vmatprep.subr.bf16.mxu1 %v4661_v3 }
 0x37d   : > { %v986_v33 = vpop.f32.mrb[8].mxu1 }
 0x37e   : > { %v5127_v38 = vadd.f32 %v986_v33, %v5119_v32  ;;  %v4106_v39 = vpop.f32.mrb[9].mxu1 }
 0x37f   : > { %v989_v36 = vpop.f32.mrb[10].mxu1 }
 0x380   : > { %v5130_v41 = vadd.f32 %v989_v36, %v5124_v34  ;;  %v4107_v43 = vpop.f32.mrb[11].mxu1  ;;  %v1343_v46 = vsel %vm515_vm0, %v5127_v38, -inf }
 0x381   : > { %1344 = vmax.xlane.f32.xlu0 %v1343_v46 }
 0x382   : > { %v1346_v24 = vsel %vm515_vm0, %v5130_v41, -inf }
 0x383   : > { %1347 = vmax.xlane.f32.xlu1 %v1346_v24 }
 0x385   : > { %v1036_v48 = vpop.f32.mrb[12].mxu1 }
 0x386   : > { %v4112_v49 = vpop.f32.mrb[13].mxu1  ;;  %v5140_v57 = vadd.f32 %v1036_v48, %v5119_v32 }
 0x387   : > { %v1039_v11 = vpop.f32.mrb[14].mxu1 }
 0x388   : > { %v4113_v50 = vpop.f32.mrb[15].mxu1  ;;  %v1349_v47 = vsel %vm515_vm0, %v5140_v57, -inf  ;;  %v5155_v8 = vadd.f32 %v1039_v11, %v5124_v34 }
 0x38a   : > { %v1352_v26 = vsel %vm515_vm0, %v5155_v8, -inf }
 0x38d   : > { %v1086_v44 = vpop.f32.mrb[16].mxu1  ;;  %v1186_v51 = vpop.f32.mrb[8].mxu0 }
 0x38e   : > { %v5137_v52 = vadd.f32 %v1186_v51, %v5119_v32  ;;  %v4118_v56 = vpop.f32.mrb[17].mxu1  ;;  %v4130_v17 = vpop.f32.mrb[9].mxu0  ;;  %v5168_v16 = vadd.f32 %v1086_v44, %v5119_v32 }
 0x38f   : > { %v1089_v37 = vpop.f32.mrb[18].mxu1  ;;  %v1189_v35 = vpop.f32.mrb[10].mxu0 }
 0x390   : > { %v5143_v58 = vadd.f32 %v1189_v35, %v5124_v34  ;;  %v4119_v59 = vpop.f32.mrb[19].mxu1  ;;  %v4131_v60 = vpop.f32.mrb[11].mxu0  ;;  %v1367_v61 = vsel %vm515_vm0, %v5137_v52, -inf  ;;  %v5163_v55 = vadd.f32 %v1089_v37, %v5124_v34  ;;  %v1355_v46 = vsel %vm515_vm0, %v5168_v16, -inf }
 0x391   : > { %1368 = vmax.xlane.f32.xlu0 %v1367_v61 }
 0x392   : > { %v1370_v62 = vsel %vm515_vm0, %v5143_v58, -inf  ;;  %v1358_v33 = vsel %vm515_vm0, %v5163_v55, -inf }
 0x393   : > { %1371 = vmax.xlane.f32.xlu1 %v1370_v62 }
 0x395   : > { %v1136_v63 = vpop.f32.mrb[20].mxu1  ;;  %1350 = vmax.xlane.f32.xlu0 %v1349_v47  ;;  %v1286_v25 = vpop.f32.mrb[12].mxu0 }
 0x396   : > { %v5152_v4 = vadd.f32 %v1286_v25, %v5119_v32  ;;  %v4124_v5 = vpop.f32.mrb[21].mxu1  ;;  %v4142_v42 = vpop.f32.mrb[13].mxu0  ;;  %v5178_v36 = vadd.f32 %v1136_v63, %v5119_v32 }
 0x397   : > { %v1139_v6 = vpop.f32.mrb[22].mxu1  ;;  %v1289_v7 = vpop.f32.mrb[14].mxu0 }
 0x398   : > { %v5158_v54 = vadd.f32 %v1289_v7, %v5124_v34  ;;  %v4125_v9 = vpop.f32.mrb[23].mxu1  ;;  %v4143_v13 = vpop.f32.mrb[15].mxu0  ;;  %v1379_v14 = vsel %vm515_vm0, %v5152_v4, -inf  ;;  %v5173_v27 = vadd.f32 %v1139_v6, %v5124_v34  ;;  %v1361_v11 = vsel %vm515_vm0, %v5178_v36, -inf }
 0x399   : > { %1380 = vmax.xlane.f32.xlu0 %v1379_v14 }
 0x39a   : > { %v1382_v22 = vsel %vm515_vm0, %v5158_v54, -inf  ;;  %v1364_v48 = vsel %vm515_vm0, %v5173_v27, -inf }
 0x39b   : > { %1383 = vmax.xlane.f32.xlu1 %v1382_v22 }
 0x39d   : > { %v1236_v0 = vpop.f32.mrb[24].mxu1  ;;  %1353 = vmax.xlane.f32.xlu0 %v1352_v26 }
 0x39e   : > { %v4136_v31 = vpop.f32.mrb[25].mxu1  ;;  %v5188_v49 = vadd.f32 %v1236_v0, %v5119_v32 }
 0x39f   : > { %v1239_v39 = vpop.f32.mrb[26].mxu1  ;;  %1359 = vmax.xlane.f32.xlu1 %v1358_v33 }
 0x3a0   : > { %v4137_v43 = vpop.f32.mrb[27].mxu1  ;;  %v5183_v24 = vadd.f32 %v1239_v39, %v5124_v34  ;;  %v1373_v59 = vsel %vm515_vm0, %v5188_v49, -inf }
 0x3a1   : > { %1356 = vmax.xlane.f32.xlu0 %v1355_v46 }
 0x3a2   : > { %v1376_v51 = vsel %vm515_vm0, %v5183_v24, -inf }
 0x3a3   : > { %1365 = vmax.xlane.f32.xlu1 %v1364_v48 }
 0x3a5   : > { %v1336_v50 = vpop.f32.mrb[28].mxu1  ;;  %1362 = vmax.xlane.f32.xlu0 %v1361_v11 }
 0x3a6   : > { %v4148_v44 = vpop.f32.mrb[29].mxu1  ;;  %v5195_v17 = vadd.f32 %v1336_v50, %v5119_v32 }
 0x3a7   : > { %v1339_v56 = vpop.f32.mrb[30].mxu1  ;;  %1377 = vmax.xlane.f32.xlu1 %v1376_v51 }
 0x3a8   : > { %v5198_v37 = vadd.f32 %v1339_v56, %v5124_v34  ;;  %v4149_v35 = vpop.f32.mrb[31].mxu1  ;;  %v1385_v60 = vsel %vm515_vm0, %v5195_v17, -inf  ;;  %v5210_v34 = vpop.permute.xlu1 %1668 }
 0x3a9   : > { %1374 = vmax.xlane.f32.xlu0 %v1373_v59 }
 0x3aa   : > { %v1388_v32 = vsel %vm515_vm0, %v5198_v37, -inf }
 0x3ac   : > { %v5212_v61 = vpop.permute.xlu1 %1621 }
 0x3ad   : > { %1386 = vmax.xlane.f32.xlu0 %v1385_v60 }
 0x3b8   : > { %1762 = vrot.lane.b32.xlu1 %v5030_v23, %s4664_s30 }
 0x3c3   : > { %1715 = vrot.lane.b32.xlu0 %v5032_v28, %s4664_s30 }
 0x3dc   : > { %1389 = vmax.xlane.f32.xlu1 %v1388_v32 }
 0x40e   : > { %v1345_v62 = vpop.xlane.xlu0 %1344 }
 0x40f   : > { %v1391_v47 = vsub.f32 %v5127_v38, %v1345_v62 }
 0x410   : > { %v1348_v63 = vpop.xlane.xlu1 %1347 }
 0x411   : > { %v1407_v25 = vmul.f32 1.442695, %v1391_v47  ;;  %v1392_v5 = vsub.f32 %v5130_v41, %v1348_v63 }
 0x413   : > { %4445 = vpow2.f32 %v1407_v25  ;;  %v1409_v42 = vmul.f32 1.442695, %v1392_v5 }
 0x415   : > { %4447 = vpow2.f32 %v1409_v42 }
 0x41d   : > { %v5216_v6 = vpop.eup %4445 }
 0x41e   : > { %v1369_v7 = vpop.xlane.xlu0 %1368  ;;  %v1439_v9 = vsel %vm515_vm0, %v5216_v6, 0.0 }
 0x41f   : > { %v5220_v13 = vpop.eup %4447  ;;  %v1399_v14 = vsub.f32 %v5137_v52, %v1369_v7  ;;  %1440 = vadd.xlane.f32.xlu0 %v1439_v9 }
 0x420   : > { %v1372_v22 = vpop.xlane.xlu1 %1371  ;;  %v1442_v38 = vsel %vm515_vm0, %v5220_v13, 0.0 }
 0x421   : > { %v1423_v26 = vmul.f32 1.442695, %v1399_v14  ;;  %v1400_v41 = vsub.f32 %v5143_v58, %v1372_v22  ;;  %1443 = vadd.xlane.f32.xlu1 %v1442_v38 }
 0x422   : > { %v1351_v0 = vpop.xlane.xlu0 %1350 }
 0x423   : > { %4449 = vpow2.f32 %v1423_v26  ;;  %v1425_v31 = vmul.f32 1.442695, %v1400_v41  ;;  %v1393_v33 = vsub.f32 %v5140_v57, %v1351_v0 }
 0x425   : > { %4451 = vpow2.f32 %v1425_v31  ;;  %v1411_v39 = vmul.f32 1.442695, %v1393_v33 }
 0x426   : > { %v1381_v43 = vpop.xlane.xlu0 %1380 }
 0x427   : > { %4453 = vpow2.f32 %v1411_v39  ;;  %v1403_v52 = vsub.f32 %v5152_v4, %v1381_v43 }
 0x428   : > { %v1384_v46 = vpop.xlane.xlu1 %1383 }
 0x429   : > { %v1431_v48 = vmul.f32 1.442695, %v1403_v52  ;;  %v1404_v11 = vsub.f32 %v5158_v54, %v1384_v46 }
 0x42a   : > { %v1354_v50 = vpop.xlane.xlu0 %1353 }
 0x42b   : > { %4455 = vpow2.f32 %v1431_v48  ;;  %v1394_v58 = vsub.f32 %v5155_v8, %v1354_v50  ;;  %v1433_v56 = vmul.f32 1.442695, %v1404_v11 }
 0x42c   : > { %v1360_v44 = vpop.xlane.xlu1 %1359 }
 0x42d   : > { %v5230_v51 = vpop.eup %4449  ;;  %v1413_v35 = vmul.f32 1.442695, %v1394_v58  ;;  %v1396_v57 = vsub.f32 %v5163_v55, %v1360_v44 }
 0x42e   : > { %v1357_v59 = vpop.xlane.xlu0 %1356  ;;  %v1463_v60 = vsel %vm515_vm0, %v5230_v51, 0.0 }
 0x42f   : > { %v5235_v4 = vpop.eup %4451  ;;  %4457 = vpow2.f32 %v1413_v35  ;;  %v1395_v54 = vsub.f32 %v5168_v16, %v1357_v59  ;;  %1464 = vadd.xlane.f32.xlu0 %v1463_v60  ;;  %v1417_v47 = vmul.f32 1.442695, %v1396_v57 }
 0x430   : > { %v1366_v32 = vpop.xlane.xlu1 %1365  ;;  %v1466_v8 = vsel %vm515_vm0, %v5235_v4, 0.0  ;;  %4459 = vpow2.f32 %v1433_v56 }
 0x431   : > { %v5240_v62 = vpop.eup %4453  ;;  %v1415_v63 = vmul.f32 1.442695, %v1395_v54  ;;  %v1398_v55 = vsub.f32 %v5173_v27, %v1366_v32  ;;  %1467 = vadd.xlane.f32.xlu1 %v1466_v8 }
 0x432   : > { %v1363_v25 = vpop.xlane.xlu0 %1362  ;;  %v1445_v5 = vsel %vm515_vm0, %v5240_v62, 0.0 }
 0x433   : > { %4461 = vpow2.f32 %v1415_v63  ;;  %v1397_v16 = vsub.f32 %v5178_v36, %v1363_v25  ;;  %1446 = vadd.xlane.f32.xlu0 %v1445_v5  ;;  %v1421_v7 = vmul.f32 1.442695, %v1398_v55 }
 0x434   : > { %4463 = vpow2.f32 %v1417_v47  ;;  %v1378_v58 = vpop.xlane.xlu1 %1377 }
 0x435   : > { %v5246_v42 = vpop.eup %4455  ;;  %v1419_v9 = vmul.f32 1.442695, %v1397_v16  ;;  %v1402_v56 = vsub.f32 %v5183_v24, %v1378_v58 }
 0x436   : > { %v1375_v14 = vpop.xlane.xlu0 %1374  ;;  %v1475_v22 = vsel %vm515_vm0, %v5246_v42, 0.0 }
 0x437   : > { %4465 = vpow2.f32 %v1419_v9  ;;  %v1401_v27 = vsub.f32 %v5188_v49, %v1375_v14  ;;  %1476 = vadd.xlane.f32.xlu0 %v1475_v22  ;;  %v1429_v57 = vmul.f32 1.442695, %v1402_v56 }
 0x438   : > { %4467 = vpow2.f32 %v1421_v7  ;;  %v5297_v24 = vpop.permute.xlu1 %1762 }
 0x439   : > { %v5251_v38 = vpop.eup %4457  ;;  %v1427_v26 = vmul.f32 1.442695, %v1401_v27 }
 0x43a   : > { %v1448_v36 = vsel %vm515_vm0, %v5251_v38, 0.0  ;;  %v5255_v41 = vpop.eup %4459  ;;  %v1387_v44 = vpop.xlane.xlu0 %1386 }
 0x43b   : > { %4469 = vpow2.f32 %v1427_v26  ;;  %1449 = vadd.xlane.f32.xlu1 %v1448_v36  ;;  %v1478_v31 = vsel %vm515_vm0, %v5255_v41, 0.0  ;;  %v1405_v35 = vsub.f32 %v5195_v17, %v1387_v44 }
 0x43c   : > { %4471 = vpow2.f32 %v1429_v57 }
 0x43d   : > { %v5257_v0 = vpop.eup %4461  ;;  %v1435_v59 = vmul.f32 1.442695, %v1405_v35 }
 0x43e   : > { %v1451_v49 = vsel %vm515_vm0, %v5257_v0, 0.0  ;;  %v5263_v33 = vpop.eup %4463  ;;  %v5310_v55 = vpop.permute.xlu0 %1715 }
 0x43f   : > { %1479 = vadd.xlane.f32.xlu1 %v1478_v31  ;;  %1452 = vadd.xlane.f32.xlu0 %v1451_v49  ;;  %v1454_v43 = vsel %vm515_vm0, %v5263_v33, 0.0  ;;  %4473 = vpow2.f32 %v1435_v59 }
 0x441   : > { %v5265_v39 = vpop.eup %4465 }
 0x442   : > { %v1457_v52 = vsel %vm515_vm0, %v5265_v39, 0.0  ;;  %v5271_v46 = vpop.eup %4467 }
 0x443   : > { %1455 = vadd.xlane.f32.xlu1 %v1454_v43  ;;  %1458 = vadd.xlane.f32.xlu0 %v1457_v52  ;;  %v1460_v11 = vsel %vm515_vm0, %v5271_v46, 0.0 }
 0x445   : > { %v5273_v48 = vpop.eup %4469 }
 0x446   : > { %v1469_v50 = vsel %vm515_vm0, %v5273_v48, 0.0  ;;  %v5285_v60 = vpop.eup %4471 }
 0x447   : > { %1461 = vadd.xlane.f32.xlu1 %v1460_v11  ;;  %1470 = vadd.xlane.f32.xlu0 %v1469_v50  ;;  %v1472_v32 = vsel %vm515_vm0, %v5285_v60, 0.0 }
 0x449   : > { %v5287_v54 = vpop.eup %4473 }
 0x44a   : > { %v1481_v8 = vsel %vm515_vm0, %v5287_v54, 0.0 }
 0x458   : > { %1856 = vrot.lane.b32.xlu1 %v5046_v21, %s4664_s30 }
 0x45d   : > { %1809 = vrot.lane.b32.xlu0 %v5048_v2, %s4664_s30  ;;  %s4668_s30 = smov 8  }
 0x469   : > { %v1390_v17 = vpop.xlane.xlu1 %1389 }
 0x46a   : > { %v1406_v47 = vsub.f32 %v5198_v37, %v1390_v17 }
 0x46c   : > { %v1437_v63 = vmul.f32 1.442695, %v1406_v47 }
 0x46e   : > { %4475 = vpow2.f32 %v1437_v63 }
 0x47c   : > { %1473 = vadd.xlane.f32.xlu1 %v1472_v32  ;;  %1482 = vadd.xlane.f32.xlu0 %v1481_v8 }
 0x48d   : > { %1958 = vrot.lane.b32.xlu1 %v4998_v12, %s4665_s22 }
 0x492   : > { %1906 = vrot.lane.b32.xlu0 %v5000_v15, %s4665_s22 }
 0x496   : > { %1904 = vrot.lane.b32.xlu0 %v5006_v19, %s4666_s23 }
 0x49a   : > { %1956 = vrot.lane.b32.xlu0 %v5002_v18, %s4666_s23  ;;  %v5314_v18 = vpop.eup %4475 }
 0x49e   : > { %2008 = vrot.lane.b32.xlu0 %v5020_v10, %s4666_s23 }
 0x4a2   : > { %2060 = vrot.lane.b32.xlu0 %v5018_v40, %s4666_s23  ;;  %v1484_v40 = vsel %vm515_vm0, %v5314_v18, 0.0 }
 0x4a6   : > { %2112 = vrot.lane.b32.xlu0 %v5036_v53, %s4666_s23 }
 0x4aa   : > { %2164 = vrot.lane.b32.xlu0 %v5034_v29, %s4666_s23 }
 0x4ac   : > { %v1441_v19 = vpop.xlane.xlu0 %1440 }
 0x4ad   : > { %4477 = vrcp.f32 %v1441_v19 }
 0x4ae   : > { %v1444_v37 = vpop.xlane.xlu1 %1443  ;;  %2216 = vrot.lane.b32.xlu0 %v5054_v45, %s4666_s23 }
 0x4af   : > { %4479 = vrcp.f32 %v1444_v37 }
 0x4b1   : > { %1485 = vadd.xlane.f32.xlu1 %v1484_v40 }
 0x4b7   : > { %v4478_v10 = vpop.eup %4477 }
 0x4b8   : > { %v1488_v25 = vmul.f32 %v4478_v10, %v5216_v6 }
 0x4b9   : > { %v4480_v53 = vpop.eup %4479 }
 0x4ba   : > { %v1490_v5 = vmul.f32 %v4480_v53, %v5220_v13 }
 0x4bc   : > { %v1465_v29 = vpop.xlane.xlu0 %1464  ;;  %v1519_v16 = vpack.c.bf16 %v1490_v5, %v1488_v25 }
 0x4be   : > { %4153 = vmatmul.mubr.msk.bf16.vlgmr.msra.gmra.mrb[16].mxu0 %vm515_vm0, %v1519_v16  ;;  %v1468_v7 = vpop.xlane.xlu1 %1467 }
 0x4bf   : > { %4163 = vmatpush3.bf16.msra.mxu0 %v5212_v61  ;;  %4164 = vmatprep.mubr.msk.bf16.mxu0 %vm4662_vm1, %v4661_v3 }
 0x4c0   : > { %4174 = vmatprep.subr.bf16.mxu0 %v4661_v3  ;;  %v1447_v45 = vpop.xlane.xlu0 %1446 }
 0x4c1   : > { %4481 = vrcp.f32 %v1447_v45 }
 0x4c2   : > { %2010 = vrot.lane.b32.xlu1 %v5016_v1, %s4665_s22 }
 0x4c4   : > { %v1477_v6 = vpop.xlane.xlu0 %1476 }
 0x4c6   : > { %2062 = vrot.lane.b32.xlu1 %v5014_v20, %s4665_s22 }
 0x4c8   : > { %v1450_v13 = vpop.xlane.xlu1 %1449 }
 0x4c9   : > { %4483 = vrcp.f32 %v1450_v13 }
 0x4ca   : > { %2114 = vrot.lane.b32.xlu1 %v5032_v28, %s4665_s22 }
 0x4cb   : > { %v4482_v27 = vpop.eup %4481 }
 0x4cc   : > { %v1480_v61 = vpop.xlane.xlu1 %1479  ;;  %v1453_v9 = vpop.xlane.xlu0 %1452  ;;  %v1492_v36 = vmul.f32 %v4482_v27, %v5240_v62 }
 0x4cd   : > { %4485 = vrcp.f32 %v1453_v9 }
 0x4ce   : > { %2166 = vrot.lane.b32.xlu1 %v5030_v23, %s4665_s22 }
 0x4d0   : > { %v1456_v14 = vpop.xlane.xlu1 %1455  ;;  %v1459_v22 = vpop.xlane.xlu0 %1458 }
 0x4d1   : > { %4487 = vrcp.f32 %v1456_v14 }
 0x4d2   : > { %2218 = vrot.lane.b32.xlu1 %v5048_v2, %s4665_s22  ;;  %4489 = vrcp.f32 %v1459_v22 }
 0x4d3   : > { %v4484_v26 = vpop.eup %4483  ;;  %4491 = vrcp.f32 %v1468_v7 }
 0x4d4   : > { %v1494_v31 = vmul.f32 %v4484_v26, %v5251_v38  ;;  %v1462_v49 = vpop.xlane.xlu1 %1461 }
 0x4d5   : > { %4493 = vrcp.f32 %v1462_v49 }
 0x4d6   : > { %2270 = vrot.lane.b32.xlu1 %v5046_v21, %s4665_s22  ;;  %v1520_v43 = vpack.c.bf16 %v1494_v31, %v1492_v36  ;;  %4495 = vrcp.f32 %v1465_v29 }
 0x4d7   : > { %v4486_v52 = vpop.eup %4485  ;;  %4497 = vrcp.f32 %v1480_v61 }
 0x4d8   : > { %4159 = vmatmul.mubr.msk.bf16.vlgmr.msra.gmra.mrb[32].mxu1 %vm515_vm0, %v1520_v43  ;;  %v1496_v38 = vmul.f32 %v4486_v52, %v5257_v0  ;;  %4499 = vrcp.f32 %v1477_v6  ;;  %v1857_v17 = vpop.permute.xlu1 %1856 }
 0x4d9   : > { %4169 = vmatpush3.bf16.msra.mxu1 %v5210_v34  ;;  %4170 = vmatprep.mubr.msk.bf16.mxu1 %vm4662_vm1, %v4661_v3 }
 0x4da   : > { %2268 = vrot.lane.b32.xlu1 %v5050_v30, %s4666_s23  ;;  %4180 = vmatprep.subr.bf16.mxu1 %v4661_v3 }
 0x4db   : > { %v4488_v62 = vpop.eup %4487 }
 0x4dc   : > { %v1498_v11 = vmul.f32 %v4488_v62, %v5263_v33  ;;  %v4490_v50 = vpop.eup %4489  ;;  %v1471_v33 = vpop.xlane.xlu0 %1470 }
 0x4dd   : > { %v4492_v58 = vpop.eup %4491  ;;  %v1500_v34 = vmul.f32 %v4490_v50, %v5265_v39  ;;  %4501 = vrcp.f32 %v1471_v33 }
 0x4de   : > { %v1521_v44 = vpack.c.bf16 %v1498_v11, %v1496_v38  ;;  %v1506_v0 = vmul.f32 %v4492_v58, %v5235_v4 }
 0x4df   : > { %v4494_v56 = vpop.eup %4493 }
 0x4e0   : > { %v1502_v35 = vmul.f32 %v4494_v56, %v5271_v46  ;;  %4165 = vmatmul.mubr.msk.bf16.vlgmr.msra.gmra.mrb[20].mxu0 %vm515_vm0, %v1521_v44  ;;  %v4496_v30 = vpop.eup %4495  ;;  %v1810_v32 = vpop.permute.xlu0 %1809 }
 0x4e1   : > { %4175 = vmatpush3.bf16.msra.mxu0 %v5310_v55  ;;  %4176 = vmatprep.mubr.msk.bf16.mxu0 %vm4662_vm1, %v4661_v3  ;;  %v1504_v59 = vmul.f32 %v4496_v30, %v5230_v51  ;;  %v4498_v46 = vpop.eup %4497 }
 0x4e2   : > { %v1522_v57 = vpack.c.bf16 %v1502_v35, %v1500_v34  ;;  %4186 = vmatprep.subr.bf16.mxu0 %v4661_v3  ;;  %v4500_v4 = vpop.eup %4499  ;;  %v1514_v51 = vmul.f32 %v4498_v46, %v5255_v41 }
 0x4e3   : > { %v1523_v39 = vpack.c.bf16 %v1506_v0, %v1504_v59  ;;  %v1512_v8 = vmul.f32 %v4500_v4, %v5246_v42 }
 0x4e4   : > { %4171 = vmatmul.mubr.msk.bf16.vlgmr.msra.gmra.mrb[36].mxu1 %vm515_vm0, %v1522_v57 }
 0x4e5   : > { %4181 = vmatpush3.bf16.msra.mxu1 %v5297_v24  ;;  %4182 = vmatprep.mubr.msk.bf16.mxu1 %vm4662_vm1, %v4661_v3  ;;  %v1525_v24 = vpack.c.bf16 %v1514_v51, %v1512_v8 }
 0x4e6   : > { %4192 = vmatprep.subr.bf16.mxu1 %v4661_v3 }
 0x4e7   : > { %v4502_v41 = vpop.eup %4501 }
 0x4e8   : > { %4177 = vmatmul.mubr.msk.bf16.vlgmr.msra.gmra.mrb[24].mxu0 %vm515_vm0, %v1523_v39  ;;  %v1508_v42 = vmul.f32 %v4502_v41, %v5273_v48 }
 0x4e9   : > { %4187 = vmatpush3.bf16.msra.mxu0 %v1810_v32  ;;  %4188 = vmatprep.mubr.msk.bf16.mxu0 %vm4662_vm1, %v4661_v3 }
 0x4ea   : > { %4198 = vmatprep.subr.bf16.mxu0 %v4661_v3 }
 0x4f0   : > { %4189 = vmatmul.mubr.msk.bf16.vlgmr.msra.gmra.mrb[28].mxu0 %vm515_vm0, %v1525_v24 }
 0x4f1   : > { %4200 = vmatprep.mubr.msk.bf16.mxu0 %vm4662_vm1, %v4661_v3 }
 0x509   : > { %v1474_v47 = vpop.xlane.xlu1 %1473  ;;  %v1483_v63 = vpop.xlane.xlu0 %1482 }
 0x50a   : > { %4503 = vrcp.f32 %v1474_v47 }
 0x50b   : > { %4505 = vrcp.f32 %v1483_v63 }
 0x50d   : > { %v1907_v55 = vpop.permute.xlu0 %1906  ;;  %v1959_v25 = vpop.permute.xlu1 %1958 }
 0x50e   : > { %v1912_v19 = vsel %vm945_vm2, %v1907_v55, 0  ;;  %v1964_v26 = vsel %vm945_vm2, %v1959_v25, 0 }
 0x50f   : > { %4199 = vmatpush3.bf16.xpose.msra.mxu0 %v1912_v19 }
 0x510   : > { %4210 = vmatprep.subr.bf16.mxu0 %v4661_v3 }
 0x511   : > { %v1905_v10 = vpop.permute.xlu0 %1904 }
 0x514   : > { %v4504_v37 = vpop.eup %4503 }
 0x515   : > { %v1510_v40 = vmul.f32 %v4504_v37, %v5285_v60  ;;  %v1957_v5 = vpop.permute.xlu0 %1956  ;;  %v4506_v7 = vpop.eup %4505 }
 0x516   : > { %4201 = vmatmul.mubr.msk.bf16.vlgmr.msra.gmra.mrb[32].mxu0 %vm945_vm2, %v1905_v10  ;;  %v1516_v61 = vmul.f32 %v4506_v7, %v5287_v54  ;;  %v5456_v10 = vld [vmem:[%s6185_s1 + $0x18] sm:$0xff] }
 0x517   : > { %v1524_v53 = vpack.c.bf16 %v1510_v40, %v1508_v42  ;;  %4212 = vmatprep.mubr.msk.bf16.mxu0 %vm4662_vm1, %v4661_v3  ;;  %v5451_v42 = vld [vmem:[%s6185_s1 + $0x10] sm:$0xff] }
 0x519   : > { %4183 = vmatmul.mubr.msk.bf16.vlgmr.msra.gmra.mrb[40].mxu1 %vm515_vm0, %v1524_v53  ;;  %v2009_v60 = vpop.permute.xlu0 %2008 }
 0x51a   : > { %4193 = vmatpush3.bf16.msra.mxu1 %v1857_v17  ;;  %4194 = vmatprep.mubr.msk.bf16.mxu1 %vm4662_vm1, %v4661_v3 }
 0x51b   : > { %4204 = vmatprep.subr.bf16.mxu1 %v4661_v3 }
 0x51d   : > { %v2061_v6 = vpop.permute.xlu0 %2060 }
 0x521   : > { %v2113_v36 = vpop.permute.xlu0 %2112 }
 0x525   : > { %v2165_v49 = vpop.permute.xlu0 %2164 }
 0x529   : > { %v2217_v52 = vpop.permute.xlu0 %2216 }
 0x53e   : > { %v1486_v48 = vpop.xlane.xlu1 %1485 }
 0x53f   : > { %4507 = vrcp.f32 %v1486_v48 }
 0x542   : > { %v2011_v29 = vpop.permute.xlu1 %2010 }
 0x543   : > { %v2016_v16 = vsel %vm945_vm2, %v2011_v29, 0 }
 0x544   : > { %4211 = vmatpush3.bf16.xpose.msra.mxu0 %v2016_v16 }
 0x545   : > { %4222 = vmatprep.subr.bf16.mxu0 %v4661_v3 }
 0x546   : > { %v2063_v45 = vpop.permute.xlu1 %2062 }
 0x547   : > { %v2068_v43 = vsel %vm945_vm2, %v2063_v45, 0 }
 0x549   : > { %v4508_v13 = vpop.eup %4507 }
 0x54a   : > { %v1518_v9 = vmul.f32 %v4508_v13, %v5314_v18  ;;  %v2115_v14 = vpop.permute.xlu1 %2114 }
 0x54b   : > { %v2120_v22 = vsel %vm945_vm2, %v2115_v14, 0  ;;  %4213 = vmatmul.mubr.msk.bf16.vlgmr.msra.gmra.mrb[36].mxu0 %vm945_vm2, %v2009_v60 }
 0x54c   : > { %4223 = vmatpush3.bf16.xpose.msra.mxu0 %v2120_v22  ;;  %v1526_v27 = vpack.c.bf16 %v1518_v9, %v1516_v61  ;;  %4224 = vmatprep.mubr.msk.bf16.mxu0 %vm4662_vm1, %v4661_v3 }
 0x54d   : > { %4234 = vmatprep.subr.bf16.mxu0 %v4661_v3 }
 0x54e   : > { %v2167_v31 = vpop.permute.xlu1 %2166  ;;  %4195 = vmatmul.mubr.msk.bf16.vlgmr.msra.gmra.mrb[44].mxu1 %vm515_vm0, %v1526_v27 }
 0x54f   : > { %4205 = vmatpush3.bf16.xpose.msra.mxu1 %v1964_v26  ;;  %4206 = vmatprep.mubr.msk.bf16.mxu1 %vm4662_vm1, %v4661_v3  ;;  %v2172_v62 = vsel %vm945_vm2, %v2167_v31, 0 }
 0x550   : > { %4216 = vmatprep.subr.bf16.mxu1 %v4661_v3 }
 0x552   : > { %v2219_v54 = vpop.permute.xlu1 %2218 }
 0x553   : > { %v2224_v18 = vsel %vm945_vm2, %v2219_v54, 0  ;;  %4225 = vmatmul.mubr.msk.bf16.vlgmr.msra.gmra.mrb[40].mxu0 %vm945_vm2, %v2113_v36 }
 0x554   : > { %4235 = vmatpush3.bf16.xpose.msra.mxu0 %v2224_v18  ;;  %4236 = vmatprep.mubr.msk.bf16.mxu0 %vm4662_vm1, %v4661_v3 }
 0x555   : > { %4246 = vmatprep.subr.bf16.mxu0 %v4661_v3 }
 0x556   : > { %4207 = vmatmul.mubr.msk.bf16.vlgmr.msra.gmra.mrb[48].mxu1 %vm945_vm2, %v1957_v5  ;;  %v2271_v38 = vpop.permute.xlu1 %2270 }
 0x557   : > { %4217 = vmatpush3.bf16.xpose.msra.mxu1 %v2068_v43  ;;  %4218 = vmatprep.mubr.msk.bf16.mxu1 %vm4662_vm1, %v4661_v3  ;;  %v2276_v11 = vsel %vm945_vm2, %v2271_v38, 0 }
 0x558   : > { %4228 = vmatprep.subr.bf16.mxu1 %v4661_v3 }
 0x55a   : > { %v2269_v50 = vpop.permute.xlu1 %2268 }
 0x55b   : > { %4237 = vmatmul.mubr.msk.bf16.vlgmr.msra.gmra.mrb[44].mxu0 %vm945_vm2, %v2217_v52 }
 0x55c   : > { %4248 = vmatprep.mubr.msk.bf16.mxu0 %vm4662_vm1, %v4661_v3 }
 0x55e   : > { %4219 = vmatmul.mubr.msk.bf16.vlgmr.msra.gmra.mrb[52].mxu1 %vm945_vm2, %v2061_v6 }
 0x55f   : > { %4229 = vmatpush3.bf16.xpose.msra.mxu1 %v2172_v62  ;;  %4230 = vmatprep.mubr.msk.bf16.mxu1 %vm4662_vm1, %v4661_v3 }
 0x560   : > { %4240 = vmatprep.subr.bf16.mxu1 %v4661_v3 }
 0x566   : > { %4231 = vmatmul.mubr.msk.bf16.vlgmr.msra.gmra.mrb[56].mxu1 %vm945_vm2, %v2165_v49 }
 0x567   : > { %4241 = vmatpush3.bf16.xpose.msra.mxu1 %v2276_v11  ;;  %4242 = vmatprep.mubr.msk.bf16.mxu1 %vm4662_vm1, %v4661_v3 }
 0x568   : > { %4252 = vmatprep.subr.bf16.mxu1 %v4661_v3 }
 0x56e   : > { %4243 = vmatmul.mubr.msk.bf16.vlgmr.msra.gmra.mrb[60].mxu1 %vm945_vm2, %v2269_v50 }
 0x56f   : > { %4254 = vmatprep.mubr.msk.bf16.mxu1 %vm4662_vm1, %v4661_v3 }
 0x591   : > { %v5424_v58 = vpop.f32.mrb[16].mxu0 }
 0x592   : > { %v4154_v44 = vpop.f32.mrb[17].mxu0 }
 0x593   : > { %v5426_v56 = vpop.f32.mrb[18].mxu0 }
 0x594   : > { %v4155_v34 = vpop.f32.mrb[19].mxu0 }
 0x5ab   : > { %v5428_v35 = vpop.f32.mrb[32].mxu1 }
 0x5ac   : > { %v4160_v30 = vpop.f32.mrb[33].mxu1 }
 0x5ad   : > { %v5430_v0 = vpop.f32.mrb[34].mxu1 }
 0x5ae   : > { %v4161_v33 = vpop.f32.mrb[35].mxu1 }
 0x5b3   : > { %v5432_v57 = vpop.f32.mrb[20].mxu0 }
 0x5b4   : > { %v4166_v59 = vpop.f32.mrb[21].mxu0 }
 0x5b5   : > { %v5434_v39 = vpop.f32.mrb[22].mxu0 }
 0x5b6   : > { %v4167_v46 = vpop.f32.mrb[23].mxu0 }
 0x5b7   : > { %v5436_v32 = vpop.f32.mrb[36].mxu1 }
 0x5b8   : > { %v4172_v4 = vpop.f32.mrb[37].mxu1 }
 0x5b9   : > { %v5438_v51 = vpop.f32.mrb[38].mxu1 }
 0x5ba   : > { %v4173_v8 = vpop.f32.mrb[39].mxu1 }
 0x5bb   : > { %v5440_v24 = vpop.f32.mrb[24].mxu0 }
 0x5bc   : > { %v4178_v17 = vpop.f32.mrb[25].mxu0 }
 0x5bd   : > { %v5442_v47 = vpop.f32.mrb[26].mxu0 }
 0x5be   : > { %v4179_v63 = vpop.f32.mrb[27].mxu0 }
 0x5c3   : > { %v5444_v55 = vpop.f32.mrb[28].mxu0 }
 0x5c4   : > { %v4190_v19 = vpop.f32.mrb[29].mxu0 }
 0x5c5   : > { %v5446_v41 = vpop.f32.mrb[30].mxu0 }
 0x5c6   : > { %v4191_v37 = vpop.f32.mrb[31].mxu0 }
 0x5e9   : > { %v1948_v40 = vpop.f32.mrb[32].mxu0 }
 0x5ea   : > { %v5459_v53 = vadd.f32 %v1948_v40, %v5451_v42  ;;  %v4202_v25 = vpop.f32.mrb[33].mxu0 }
 0x5eb   : > { %v1951_v5 = vpop.f32.mrb[34].mxu0 }
 0x5ec   : > { %v5462_v48 = vadd.f32 %v1951_v5, %v5456_v10  ;;  %v5464_v60 = vpop.f32.mrb[40].mxu1  ;;  %v4203_v29 = vpop.f32.mrb[35].mxu0  ;;  %v2319_v16 = vsel %vm515_vm0, %v5459_v53, -inf }
 0x5ed   : > { %v4184_v45 = vpop.f32.mrb[41].mxu1  ;;  %2320 = vmax.xlane.f32.xlu0 %v2319_v16 }
 0x5ee   : > { %v5468_v7 = vpop.f32.mrb[42].mxu1  ;;  %v2322_v6 = vsel %vm515_vm0, %v5462_v48, -inf }
 0x5ef   : > { %v4185_v13 = vpop.f32.mrb[43].mxu1  ;;  %2323 = vmax.xlane.f32.xlu1 %v2322_v6 }
 0x61e   : > { %v2052_v61 = vpop.f32.mrb[36].mxu0 }
 0x61f   : > { %v4214_v9 = vpop.f32.mrb[37].mxu0  ;;  %v5490_v4 = vadd.f32 %v2052_v61, %v5451_v42 }
 0x620   : > { %v2055_v14 = vpop.f32.mrb[38].mxu0 }
 0x621   : > { %v5473_v22 = vadd.f32 %v2055_v14, %v5456_v10  ;;  %v5475_v27 = vpop.f32.mrb[44].mxu1  ;;  %v4215_v26 = vpop.f32.mrb[39].mxu0  ;;  %v2331_v16 = vsel %vm515_vm0, %v5490_v4, -inf }
 0x622   : > { %v4196_v36 = vpop.f32.mrb[45].mxu1 }
 0x623   : > { %v5477_v31 = vpop.f32.mrb[46].mxu1  ;;  %v2334_v54 = vsel %vm515_vm0, %v5473_v22, -inf }
 0x624   : > { %v4197_v18 = vpop.f32.mrb[47].mxu1  ;;  %2335 = vmax.xlane.f32.xlu1 %v2334_v54 }
 0x626   : > { %v2156_v49 = vpop.f32.mrb[40].mxu0 }
 0x627   : > { %v4226_v43 = vpop.f32.mrb[41].mxu0  ;;  %v5508_v13 = vadd.f32 %v2156_v49, %v5451_v42 }
 0x628   : > { %v2159_v52 = vpop.f32.mrb[42].mxu0 }
 0x629   : > { %v2000_v62 = vpop.f32.mrb[48].mxu1  ;;  %v4227_v38 = vpop.f32.mrb[43].mxu0  ;;  %v5503_v45 = vadd.f32 %v2159_v52, %v5456_v10  ;;  %v2343_v49 = vsel %vm515_vm0, %v5508_v13, -inf }
 0x62a   : > { %v5482_v11 = vadd.f32 %v2000_v62, %v5451_v42  ;;  %v4208_v50 = vpop.f32.mrb[49].mxu1 }
 0x62b   : > { %v2003_v44 = vpop.f32.mrb[50].mxu1  ;;  %v2346_v26 = vsel %vm515_vm0, %v5503_v45, -inf }
 0x62c   : > { %v5485_v34 = vadd.f32 %v2003_v44, %v5456_v10  ;;  %v4209_v30 = vpop.f32.mrb[51].mxu1  ;;  %v2325_v33 = vsel %vm515_vm0, %v5482_v11, -inf }
 0x62d   : > { %2326 = vmax.xlane.f32.xlu0 %v2325_v33 }
 0x62e   : > { %v2260_v59 = vpop.f32.mrb[44].mxu0  ;;  %v2328_v17 = vsel %vm515_vm0, %v5485_v34, -inf }
 0x62f   : > { %v4238_v46 = vpop.f32.mrb[45].mxu0  ;;  %v5528_v38 = vadd.f32 %v2260_v59, %v5451_v42 }
 0x630   : > { %v2263_v8 = vpop.f32.mrb[46].mxu0 }
 0x631   : > { %2329 = vmax.xlane.f32.xlu0 %v2328_v17  ;;  %v2104_v63 = vpop.f32.mrb[52].mxu1  ;;  %v4239_v19 = vpop.f32.mrb[47].mxu0  ;;  %v5523_v52 = vadd.f32 %v2263_v8, %v5456_v10 }
 0x632   : > { %v4220_v37 = vpop.f32.mrb[53].mxu1  ;;  %v5495_v25 = vadd.f32 %v2104_v63, %v5451_v42  ;;  %v2355_v63 = vsel %vm515_vm0, %v5528_v38, -inf }
 0x633   : > { %v2107_v40 = vpop.f32.mrb[54].mxu1  ;;  %v2358_v33 = vsel %vm515_vm0, %v5523_v52, -inf }
 0x634   : > { %v5498_v5 = vadd.f32 %v2107_v40, %v5456_v10  ;;  %v4221_v29 = vpop.f32.mrb[55].mxu1  ;;  %v2337_v61 = vsel %vm515_vm0, %v5495_v25, -inf }
 0x635   : > { %2332 = vmax.xlane.f32.xlu0 %v2331_v16 }
 0x636   : > { %v2340_v6 = vsel %vm515_vm0, %v5498_v5, -inf }
 0x637   : > { %2341 = vmax.xlane.f32.xlu1 %v2340_v6 }
 0x639   : > { %2338 = vmax.xlane.f32.xlu0 %v2337_v61  ;;  %v2208_v9 = vpop.f32.mrb[56].mxu1 }
 0x63a   : > { %v4232_v14 = vpop.f32.mrb[57].mxu1  ;;  %v5515_v54 = vadd.f32 %v2208_v9, %v5451_v42 }
 0x63b   : > { %2347 = vmax.xlane.f32.xlu1 %v2346_v26  ;;  %v2211_v36 = vpop.f32.mrb[58].mxu1 }
 0x63c   : > { %v5518_v18 = vadd.f32 %v2211_v36, %v5456_v10  ;;  %v4233_v43 = vpop.f32.mrb[59].mxu1  ;;  %v2349_v50 = vsel %vm515_vm0, %v5515_v54, -inf }
 0x63d   : > { %2344 = vmax.xlane.f32.xlu0 %v2343_v49 }
 0x63e   : > { %v2352_v62 = vsel %vm515_vm0, %v5518_v18, -inf }
 0x63f   : > { %2353 = vmax.xlane.f32.xlu1 %v2352_v62 }
 0x641   : > { %2350 = vmax.xlane.f32.xlu0 %v2349_v50  ;;  %v2312_v44 = vpop.f32.mrb[60].mxu1 }
 0x642   : > { %v4244_v30 = vpop.f32.mrb[61].mxu1  ;;  %v5535_v8 = vadd.f32 %v2312_v44, %v5451_v42 }
 0x643   : > { %v2315_v46 = vpop.f32.mrb[62].mxu1  ;;  %2359 = vmax.xlane.f32.xlu1 %v2358_v33 }
 0x644   : > { %v4245_v17 = vpop.f32.mrb[63].mxu1  ;;  %v2361_v59 = vsel %vm515_vm0, %v5535_v8, -inf  ;;  %v5552_v19 = vadd.f32 %v2315_v46, %v5456_v10 }
 0x645   : > { %2356 = vmax.xlane.f32.xlu0 %v2355_v63 }
 0x649   : > { %2362 = vmax.xlane.f32.xlu0 %v2361_v59 }
 0x654   : > { %2550 = vrot.lane.b32.xlu1 %v4998_v12, %s4667_s28  ;;  %v2364_v12 = vsel %vm515_vm0, %v5552_v19, -inf }
 0x658   : > { %2597 = vrot.lane.b32.xlu1 %v5016_v1, %s4667_s28 }
 0x65c   : > { %2644 = vrot.lane.b32.xlu1 %v5014_v20, %s4667_s28 }
 0x65f   : > { %2503 = vrot.lane.b32.xlu0 %v5000_v15, %s4667_s28 }
 0x663   : > { %2691 = vrot.lane.b32.xlu0 %v5032_v28, %s4667_s28 }
 0x67a   : > { %v2321_v42 = vpop.xlane.xlu0 %2320 }
 0x67b   : > { %v2367_v37 = vsub.f32 %v5459_v53, %v2321_v42 }
 0x67c   : > { %v2324_v20 = vpop.xlane.xlu1 %2323 }
 0x67d   : > { %v2383_v40 = vmul.f32 1.442695, %v2367_v37  ;;  %v2368_v28 = vsub.f32 %v5462_v48, %v2324_v20 }
 0x67f   : > { %4509 = vpow2.f32 %v2383_v40  ;;  %v2385_v10 = vmul.f32 1.442695, %v2368_v28 }
 0x680   : > { %2365 = vmax.xlane.f32.xlu1 %v2364_v12 }
 0x681   : > { %4511 = vpow2.f32 %v2385_v10 }
 0x689   : > { %v5557_v1 = vpop.eup %4509 }
 0x68a   : > { %v2415_v15 = vsel %vm515_vm0, %v5557_v1, 0.0 }
 0x68b   : > { %2416 = vadd.xlane.f32.xlu0 %v2415_v15  ;;  %v5564_v53 = vpop.eup %4511 }
 0x68c   : > { %v2418_v29 = vsel %vm515_vm0, %v5564_v53, 0.0 }
 0x691   : > { %2738 = vrot.lane.b32.xlu1 %v5030_v23, %s4667_s28 }
 0x6b1   : > { %v2336_v16 = vpop.xlane.xlu1 %2335 }
 0x6b2   : > { %v2372_v9 = vsub.f32 %v5473_v22, %v2336_v16 }
 0x6b4   : > { %v2393_v48 = vmul.f32 1.442695, %v2372_v9 }
 0x6b5   : > { %2419 = vadd.xlane.f32.xlu1 %v2418_v29 }
 0x6ba   : > { %v2327_v6 = vpop.xlane.xlu0 %2326 }
 0x6bb   : > { %v2369_v61 = vsub.f32 %v5482_v11, %v2327_v6 }
 0x6bd   : > { %v2387_v14 = vmul.f32 1.442695, %v2369_v61 }
 0x6be   : > { %v2330_v26 = vpop.xlane.xlu0 %2329 }
 0x6bf   : > { %4513 = vpow2.f32 %v2387_v14  ;;  %v2370_v23 = vsub.f32 %v5485_v34, %v2330_v26 }
 0x6c1   : > { %v2389_v36 = vmul.f32 1.442695, %v2370_v23 }
 0x6c2   : > { %v2333_v43 = vpop.xlane.xlu0 %2332 }
 0x6c3   : > { %4515 = vpow2.f32 %v2389_v36  ;;  %v2371_v49 = vsub.f32 %v5490_v4, %v2333_v43 }
 0x6c4   : > { %v2342_v62 = vpop.xlane.xlu1 %2341  ;;  %4517 = vpow2.f32 %v2393_v48 }
 0x6c5   : > { %v2391_v50 = vmul.f32 1.442695, %v2371_v49  ;;  %v2374_v44 = vsub.f32 %v5498_v5, %v2342_v62 }
 0x6c6   : > { %v2339_v30 = vpop.xlane.xlu0 %2338 }
 0x6c7   : > { %4519 = vpow2.f32 %v2391_v50  ;;  %v2397_v11 = vmul.f32 1.442695, %v2374_v44  ;;  %v2373_v22 = vsub.f32 %v5495_v25, %v2339_v30 }
 0x6c8   : > { %v2348_v33 = vpop.xlane.xlu1 %2347 }
 0x6c9   : > { %v5574_v46 = vpop.eup %4513  ;;  %4521 = vpow2.f32 %v2397_v11  ;;  %v2395_v34 = vmul.f32 1.442695, %v2373_v22  ;;  %v2376_v17 = vsub.f32 %v5503_v45, %v2348_v33 }
 0x6ca   : > { %v2345_v63 = vpop.xlane.xlu0 %2344  ;;  %v2421_v4 = vsel %vm515_vm0, %v5574_v46, 0.0 }
 0x6cb   : > { %4523 = vpow2.f32 %v2395_v34  ;;  %v2401_v59 = vmul.f32 1.442695, %v2376_v17  ;;  %v2375_v5 = vsub.f32 %v5508_v13, %v2345_v63  ;;  %2422 = vadd.xlane.f32.xlu0 %v2421_v4 }
 0x6cc   : > { %v2354_v42 = vpop.xlane.xlu1 %2353 }
 0x6cd   : > { %v5580_v37 = vpop.eup %4515  ;;  %4525 = vpow2.f32 %v2401_v59  ;;  %v2399_v25 = vmul.f32 1.442695, %v2375_v5  ;;  %v2378_v40 = vsub.f32 %v5518_v18, %v2354_v42 }
 0x6ce   : > { %v2351_v12 = vpop.xlane.xlu0 %2350  ;;  %v2424_v45 = vsel %vm515_vm0, %v5580_v37, 0.0  ;;  %v5585_v15 = vpop.eup %4517 }
 0x6cf   : > { %4527 = vpow2.f32 %v2399_v25  ;;  %v2405_v20 = vmul.f32 1.442695, %v2378_v40  ;;  %v2377_v28 = vsub.f32 %v5515_v54, %v2351_v12  ;;  %2425 = vadd.xlane.f32.xlu1 %v2424_v45  ;;  %v2430_v18 = vsel %vm515_vm0, %v5585_v15, 0.0 }
 0x6d0   : > { %v2360_v13 = vpop.xlane.xlu1 %2359 }
 0x6d1   : > { %v5588_v10 = vpop.eup %4519  ;;  %4529 = vpow2.f32 %v2405_v20  ;;  %v2403_v29 = vmul.f32 1.442695, %v2377_v28  ;;  %v2380_v16 = vsub.f32 %v5523_v52, %v2360_v13 }
 0x6d2   : > { %v2357_v6 = vpop.xlane.xlu0 %2356  ;;  %v2427_v61 = vsel %vm515_vm0, %v5588_v10, 0.0 }
 0x6d3   : > { %v5595_v9 = vpop.eup %4521  ;;  %4531 = vpow2.f32 %v2403_v29  ;;  %v2409_v14 = vmul.f32 1.442695, %v2380_v16  ;;  %v2379_v54 = vsub.f32 %v5528_v38, %v2357_v6  ;;  %2431 = vadd.xlane.f32.xlu1 %v2430_v18  ;;  %2428 = vadd.xlane.f32.xlu0 %v2427_v61 }
 0x6d4   : > { %v2551_v26 = vpop.permute.xlu1 %2550  ;;  %v2436_v36 = vsel %vm515_vm0, %v5595_v9, 0.0 }
 0x6d5   : > { %v5598_v23 = vpop.eup %4523  ;;  %4533 = vpow2.f32 %v2409_v14  ;;  %v2407_v52 = vmul.f32 1.442695, %v2379_v54  ;;  %4253 = vmatpush3.bf16.msra.mxu1 %v2551_v26 }
 0x6d6   : > { %v2363_v48 = vpop.xlane.xlu0 %2362  ;;  %v2433_v43 = vsel %vm515_vm0, %v5598_v23, 0.0  ;;  %4264 = vmatprep.subr.bf16.mxu1 %v4661_v3 }
 0x6d7   : > { %v5605_v49 = vpop.eup %4525  ;;  %4535 = vpow2.f32 %v2407_v52  ;;  %v2381_v38 = vsub.f32 %v5535_v8, %v2363_v48  ;;  %2437 = vadd.xlane.f32.xlu1 %v2436_v36  ;;  %2434 = vadd.xlane.f32.xlu0 %v2433_v43 }
 0x6d8   : > { %v2442_v30 = vsel %vm515_vm0, %v5605_v49, 0.0  ;;  %v2598_v25 = vpop.permute.xlu1 %2597 }
 0x6d9   : > { %v5608_v62 = vpop.eup %4527  ;;  %v2411_v50 = vmul.f32 1.442695, %v2381_v38 }
 0x6da   : > { %v2504_v44 = vpop.permute.xlu0 %2503  ;;  %v2439_v11 = vsel %vm515_vm0, %v5608_v62, 0.0 }
 0x6db   : > { %v5614_v22 = vpop.eup %4529  ;;  %4537 = vpow2.f32 %v2411_v50  ;;  %2443 = vadd.xlane.f32.xlu1 %v2442_v30  ;;  %2440 = vadd.xlane.f32.xlu0 %v2439_v11 }
 0x6dc   : > { %4247 = vmatpush3.bf16.msra.mxu0 %v2504_v44  ;;  %v2448_v8 = vsel %vm515_vm0, %v5614_v22, 0.0  ;;  %v2645_v40 = vpop.permute.xlu1 %2644 }
 0x6dd   : > { %v5616_v33 = vpop.eup %4531  ;;  %4258 = vmatprep.subr.bf16.mxu0 %v4661_v3 }
 0x6de   : > { %v2445_v34 = vsel %vm515_vm0, %v5616_v33, 0.0  ;;  %v2692_v29 = vpop.permute.xlu0 %2691 }
 0x6df   : > { %v5623_v17 = vpop.eup %4533  ;;  %2449 = vadd.xlane.f32.xlu1 %v2448_v8  ;;  %2446 = vadd.xlane.f32.xlu0 %v2445_v34 }
 0x6e0   : > { %v2454_v4 = vsel %vm515_vm0, %v5623_v17, 0.0 }
 0x6e1   : > { %v5625_v63 = vpop.eup %4535 }
 0x6e2   : > { %v2451_v59 = vsel %vm515_vm0, %v5625_v63, 0.0 }
 0x6e3   : > { %2455 = vadd.xlane.f32.xlu1 %v2454_v4  ;;  %2452 = vadd.xlane.f32.xlu0 %v2451_v59 }
 0x6e5   : > { %v5631_v5 = vpop.eup %4537 }
 0x6e6   : > { %v2457_v42 = vsel %vm515_vm0, %v5631_v5, 0.0 }
 0x6e7   : > { %2458 = vadd.xlane.f32.xlu0 %v2457_v42 }
 0x6fd   : > { %2785 = vrot.lane.b32.xlu0 %v5048_v2, %s4667_s28 }
 0x70d   : > { %v2366_v12 = vpop.xlane.xlu1 %2365 }
 0x70e   : > { %v2382_v45 = vsub.f32 %v5552_v19, %v2366_v12 }
 0x710   : > { %v2413_v20 = vmul.f32 1.442695, %v2382_v45 }
 0x711   : > { %v5644_v16 = vpop.permute.xlu1 %2738 }
 0x712   : > { %4539 = vpow2.f32 %v2413_v20 }
 0x718   : > { %v2417_v2 = vpop.xlane.xlu0 %2416 }
 0x719   : > { %4541 = vrcp.f32 %v2417_v2 }
 0x71c   : > { %v5638_v28 = vpop.eup %4539 }
 0x71d   : > { %v2460_v13 = vsel %vm515_vm0, %v5638_v28, 0.0 }
 0x71e   : > { %2461 = vadd.xlane.f32.xlu1 %v2460_v13 }
 0x723   : > { %v4542_v18 = vpop.eup %4541 }
 0x724   : > { %v2464_v61 = vmul.f32 %v4542_v18, %v5557_v1 }
 0x72f   : > { %2832 = vrot.lane.b32.xlu1 %v5046_v21, %s4667_s28 }
 0x742   : > { %v2420_v6 = vpop.xlane.xlu1 %2419 }
 0x743   : > { %4543 = vrcp.f32 %v2420_v6 }
 0x74d   : > { %v4544_v19 = vpop.eup %4543 }
 0x74e   : > { %v2466_v14 = vmul.f32 %v4544_v19, %v5564_v53 }
 0x750   : > { %v2495_v54 = vpack.c.bf16 %v2466_v14, %v2464_v61 }
 0x752   : > { %4249 = vmatmul.mubr.msk.bf16.vlgmr.msra.gmra.mrb[48].mxu0 %vm515_vm0, %v2495_v54 }
 0x753   : > { %4259 = vmatpush3.bf16.msra.mxu0 %v2598_v25  ;;  %4260 = vmatprep.mubr.msk.bf16.mxu0 %vm4662_vm1, %v4661_v3 }
 0x754   : > { %4270 = vmatprep.subr.bf16.mxu0 %v4661_v3 }
 0x758   : > { %v2423_v21 = vpop.xlane.xlu0 %2422 }
 0x759   : > { %4545 = vrcp.f32 %v2423_v21 }
 0x75c   : > { %v2426_v26 = vpop.xlane.xlu1 %2425 }
 0x75d   : > { %4547 = vrcp.f32 %v2426_v26 }
 0x760   : > { %v2432_v52 = vpop.xlane.xlu1 %2431  ;;  %v2429_v48 = vpop.xlane.xlu0 %2428 }
 0x761   : > { %4549 = vrcp.f32 %v2432_v52 }
 0x762   : > { %4551 = vrcp.f32 %v2429_v48 }
 0x763   : > { %v4546_v53 = vpop.eup %4545 }
 0x764   : > { %v2438_v1 = vpop.xlane.xlu1 %2437  ;;  %v2435_v36 = vpop.xlane.xlu0 %2434  ;;  %v2468_v38 = vmul.f32 %v4546_v53, %v5574_v46 }
 0x765   : > { %4553 = vrcp.f32 %v2438_v1 }
 0x766   : > { %4555 = vrcp.f32 %v2435_v36 }
 0x767   : > { %v4548_v43 = vpop.eup %4547 }
 0x768   : > { %v2470_v50 = vmul.f32 %v4548_v43, %v5580_v37  ;;  %v2444_v44 = vpop.xlane.xlu1 %2443  ;;  %v2441_v30 = vpop.xlane.xlu0 %2440 }
 0x769   : > { %4557 = vrcp.f32 %v2444_v44  ;;  %v4409_v44 = vld [vmem:[%s6190_s6] sm:$0xff]  }
 0x76a   : > { %4559 = vrcp.f32 %v2441_v30  ;;  %v2496_v11 = vpack.c.bf16 %v2470_v50, %v2468_v38 }
 0x76b   : > { %v4550_v8 = vpop.eup %4549 }
 0x76c   : > { %v4552_v34 = vpop.eup %4551  ;;  %v2474_v4 = vmul.f32 %v4550_v8, %v5585_v15  ;;  %v2450_v59 = vpop.xlane.xlu1 %2449  ;;  %4255 = vmatmul.mubr.msk.bf16.vlgmr.msra.gmra.mrb[64].mxu1 %vm515_vm0, %v2496_v11 }
 0x76d   : > { %v2447_v42 = vpop.xlane.xlu0 %2446  ;;  %v2472_v25 = vmul.f32 %v4552_v34, %v5588_v10  ;;  %4561 = vrcp.f32 %v2450_v59  ;;  %4265 = vmatpush3.bf16.msra.mxu1 %v2645_v40  ;;  %4266 = vmatprep.mubr.msk.bf16.mxu1 %vm4662_vm1, %v4661_v3 }
 0x76e   : > { %4563 = vrcp.f32 %v2447_v42  ;;  %4276 = vmatprep.subr.bf16.mxu1 %v4661_v3 }
 0x76f   : > { %v4554_v46 = vpop.eup %4553  ;;  %v2497_v37 = vpack.c.bf16 %v2474_v4, %v2472_v25 }
 0x770   : > { %v4556_v12 = vpop.eup %4555  ;;  %v2478_v45 = vmul.f32 %v4554_v46, %v5595_v9  ;;  %v2456_v15 = vpop.xlane.xlu1 %2455 }
 0x771   : > { %v2453_v20 = vpop.xlane.xlu0 %2452  ;;  %v2476_v13 = vmul.f32 %v4556_v12, %v5598_v23  ;;  %4565 = vrcp.f32 %v2456_v15  ;;  %4261 = vmatmul.mubr.msk.bf16.vlgmr.msra.gmra.mrb[52].mxu0 %vm515_vm0, %v2497_v37 }
 0x772   : > { %4271 = vmatpush3.bf16.msra.mxu0 %v2692_v29  ;;  %4567 = vrcp.f32 %v2453_v20  ;;  %4272 = vmatprep.mubr.msk.bf16.mxu0 %vm4662_vm1, %v4661_v3 }
 0x773   : > { %v4558_v10 = vpop.eup %4557  ;;  %v2498_v40 = vpack.c.bf16 %v2478_v45, %v2476_v13  ;;  %4282 = vmatprep.subr.bf16.mxu0 %v4661_v3 }
 0x774   : > { %v4560_v2 = vpop.eup %4559  ;;  %v2482_v6 = vmul.f32 %v4558_v10, %v5605_v49 }
 0x775   : > { %v2459_v9 = vpop.xlane.xlu0 %2458  ;;  %v2480_v18 = vmul.f32 %v4560_v2, %v5608_v62  ;;  %4267 = vmatmul.mubr.msk.bf16.vlgmr.msra.gmra.mrb[68].mxu1 %vm515_vm0, %v2498_v40 }
 0x776   : > { %4277 = vmatpush3.bf16.msra.mxu1 %v5644_v16  ;;  %4278 = vmatprep.mubr.msk.bf16.mxu1 %vm4662_vm1, %v4661_v3  ;;  %4569 = vrcp.f32 %v2459_v9 }
 0x777   : > { %v4562_v23 = vpop.eup %4561  ;;  %v2499_v29 = vpack.c.bf16 %v2482_v6, %v2480_v18  ;;  %4288 = vmatprep.subr.bf16.mxu1 %v4661_v3 }
 0x778   : > { %v4564_v19 = vpop.eup %4563  ;;  %v2486_v61 = vmul.f32 %v4562_v23, %v5614_v22 }
 0x779   : > { %v2786_v14 = vpop.permute.xlu0 %2785  ;;  %v2484_v49 = vmul.f32 %v4564_v19, %v5616_v33  ;;  %4273 = vmatmul.mubr.msk.bf16.vlgmr.msra.gmra.mrb[56].mxu0 %vm515_vm0, %v2499_v29 }
 0x77a   : > { %4283 = vmatpush3.bf16.msra.mxu0 %v2786_v14  ;;  %4284 = vmatprep.mubr.msk.bf16.mxu0 %vm4662_vm1, %v4661_v3 }
 0x77b   : > { %v4566_v62 = vpop.eup %4565  ;;  %v2500_v16 = vpack.c.bf16 %v2486_v61, %v2484_v49  ;;  %4294 = vmatprep.subr.bf16.mxu0 %v4409_v44 }
 0x77c   : > { %v4568_v54 = vpop.eup %4567  ;;  %v2490_v21 = vmul.f32 %v4566_v62, %v5623_v17 }
 0x77d   : > { %v2488_v26 = vmul.f32 %v4568_v54, %v5625_v63  ;;  %4279 = vmatmul.mubr.msk.bf16.vlgmr.msra.gmra.mrb[72].mxu1 %vm515_vm0, %v2500_v16 }
 0x77e   : > { %4290 = vmatprep.mubr.msk.bf16.mxu1 %vm4662_vm1, %v4661_v3 }
 0x77f   : > { %v2501_v22 = vpack.c.bf16 %v2490_v21, %v2488_v26 }
 0x780   : > { %v4570_v48 = vpop.eup %4569 }
 0x781   : > { %4285 = vmatmul.mubr.msk.bf16.vlgmr.msra.gmra.mrb[60].mxu0 %vm515_vm0, %v2501_v22  ;;  %v2492_v36 = vmul.f32 %v4570_v48, %v5631_v5 }
 0x782   : > { %4295 = vmatpush3.bf16.msra.mxu0 %v4409_v44 }
 0x7ab   : > { %v2462_v33 = vpop.xlane.xlu1 %2461 }
 0x7ac   : > { %4571 = vrcp.f32 %v2462_v33 }
 0x7af   : > { %v2833_v52 = vpop.permute.xlu1 %2832 }
 0x7b0   : > { %4289 = vmatpush3.bf16.msra.mxu1 %v2833_v52 }
 0x7b6   : > { %v4572_v1 = vpop.eup %4571 }
 0x7b7   : > { %v2494_v17 = vmul.f32 %v4572_v1, %v5638_v28 }
 0x7b9   : > { %v2502_v63 = vpack.c.bf16 %v2494_v17, %v2492_v36 }
 0x7bb   : > { %4291 = vmatmul.mubr.msk.bf16.vlgmr.msra.gmra.mrb[76].mxu1 %vm515_vm0, %v2502_v63 }
 0x825   : > { %v2543_v53 = vpop.f32.mrb[48].mxu0 }
 0x826   : > { %v4250_v43 = vpop.f32.mrb[49].mxu0 }
 0x827   : > { %v2546_v3 = vpop.f32.mrb[50].mxu0 }
 0x828   : > { %v4368_v38 = vpack.i.bf16 %v2546_v3, %v2543_v53  ;;  %v4251_v50 = vpop.f32.mrb[51].mxu0 }
 0x82a   : > { %4369 = vrot.lane.b32.xlu0 %v4368_v38, %s4668_s30 }
 0x83f   : > { %v2590_v5 = vpop.f32.mrb[64].mxu1 }
 0x840   : > { %v4256_v30 = vpop.f32.mrb[65].mxu1 }
 0x841   : > { %v2593_v28 = vpop.f32.mrb[66].mxu1 }
 0x842   : > { %v4373_v11 = vpack.i.bf16 %v2593_v28, %v2590_v5  ;;  %v4257_v8 = vpop.f32.mrb[67].mxu1 }
 0x844   : > { %v2637_v34 = vpop.f32.mrb[52].mxu0  ;;  %4374 = vrot.lane.b32.xlu1 %v4373_v11, %s4668_s30 }
 0x845   : > { %v4262_v4 = vpop.f32.mrb[53].mxu0 }
 0x846   : > { %v2640_v59 = vpop.f32.mrb[54].mxu0 }
 0x847   : > { %v4378_v42 = vpack.i.bf16 %v2640_v59, %v2637_v34  ;;  %v4263_v25 = vpop.f32.mrb[55].mxu0 }
 0x848   : > { %v2684_v46 = vpop.f32.mrb[68].mxu1 }
 0x849   : > { %4379 = vrot.lane.b32.xlu0 %v4378_v42, %s4668_s30  ;;  %v4268_v37 = vpop.f32.mrb[69].mxu1 }
 0x84a   : > { %v2687_v12 = vpop.f32.mrb[70].mxu1 }
 0x84b   : > { %v4383_v45 = vpack.i.bf16 %v2687_v12, %v2684_v46  ;;  %v4269_v15 = vpop.f32.mrb[71].mxu1 }
 0x84c   : > { %v2731_v20 = vpop.f32.mrb[56].mxu0 }
 0x84d   : > { %4384 = vrot.lane.b32.xlu1 %v4383_v45, %s4668_s30  ;;  %v4274_v13 = vpop.f32.mrb[57].mxu0 }
 0x84e   : > { %v2734_v10 = vpop.f32.mrb[58].mxu0 }
 0x84f   : > { %v4388_v40 = vpack.i.bf16 %v2734_v10, %v2731_v20  ;;  %v4275_v2 = vpop.f32.mrb[59].mxu0 }
 0x850   : > { %v2778_v6 = vpop.f32.mrb[72].mxu1 }
 0x851   : > { %4389 = vrot.lane.b32.xlu0 %v4388_v40, %s4668_s30  ;;  %v4280_v9 = vpop.f32.mrb[73].mxu1 }
 0x852   : > { %v2781_v18 = vpop.f32.mrb[74].mxu1 }
 0x853   : > { %v4393_v23 = vpack.i.bf16 %v2781_v18, %v2778_v6  ;;  %v4281_v29 = vpop.f32.mrb[75].mxu1 }
 0x854   : > { %v2825_v19 = vpop.f32.mrb[60].mxu0 }
 0x855   : > { %4394 = vrot.lane.b32.xlu1 %v4393_v23, %s4668_s30  ;;  %v4286_v61 = vpop.f32.mrb[61].mxu0 }
 0x856   : > { %v2828_v14 = vpop.f32.mrb[62].mxu0 }
 0x857   : > { %v4398_v49 = vpack.i.bf16 %v2828_v14, %v2825_v19  ;;  %v4287_v62 = vpop.f32.mrb[63].mxu0  ;;  %v4637_v14 = vld [vmem:[%s4760_s19] sm:$0xff] }
 0x858   : > { %v4638_v62 = vld [vmem:[%s4760_s19 + $0x10] sm:$0xff] }
 0x859   : > { %4399 = vrot.lane.b32.xlu0 %v4398_v49, %s4668_s30 }
 0x88e   : > { %v2872_v16 = vpop.f32.mrb[76].mxu1 }
 0x88f   : > { %v4292_v54 = vpop.f32.mrb[77].mxu1 }
 0x890   : > { %v2875_v21 = vpop.f32.mrb[78].mxu1 }
 0x891   : > { %v4403_v26 = vpack.i.bf16 %v2875_v21, %v2872_v16  ;;  %v4293_v22 = vpop.f32.mrb[79].mxu1  ;;  %v4639_v21 = vld [vmem:[%s4760_s19 + $0x8] sm:$0xff] }
 0x893   : > { %4404 = vrot.lane.b32.xlu1 %v4403_v26, %s4668_s30 }
 0x89c   : > { %v4370_v33 = vpop.permute.xlu0 %4369 }
 0x89d   : > { %v4372_v52 = vunpack.i.h.bf16 %v4370_v33  ;;  %v4371_v48 = vunpack.i.l.bf16 %v4370_v33 }
 0x89f   : > { %v2944_v1 = vsel %vm945_vm2, %v5426_v56, %v4372_v52  ;;  %v2943_v36 = vsel %vm945_vm2, %v5424_v58, %v4371_v48  ;;  %v4640_v48 = vld [vmem:[%s4760_s19 + $0x18] sm:$0xff] }
 0x8a0   : > { %v2959_v17 = vpack.c.bf16 %v2944_v1, %v2943_v36 }
 0x8a2   : > { %4296 = vmatprep.mubr.msk.bf16.mxu0 %vm515_vm0, %v2959_v17 }
 0x8b6   : > { %v4375_v63 = vpop.permute.xlu1 %4374 }
 0x8b7   : > { %v4377_v53 = vunpack.i.h.bf16 %v4375_v63  ;;  %v4376_v43 = vunpack.i.l.bf16 %v4375_v63 }
 0x8b9   : > { %v2946_v3 = vsel %vm945_vm2, %v5430_v0, %v4377_v53  ;;  %v2945_v38 = vsel %vm945_vm2, %v5428_v35, %v4376_v43 }
 0x8ba   : > { %v2960_v50 = vpack.c.bf16 %v2946_v3, %v2945_v38 }
 0x8bb   : > { %v4380_v44 = vpop.permute.xlu0 %4379 }
 0x8bc   : > { %v4382_v5 = vunpack.i.h.bf16 %v4380_v44  ;;  %v4381_v30 = vunpack.i.l.bf16 %v4380_v44  ;;  %4297 = vmatmul.mubr.msk.bf16.vlgmr.msra.gmra.mrb[64].mxu0 %vm515_vm0, %v2960_v50  ;;  %v4641_v44 = vld [vmem:[%s4760_s19 + $0x20] sm:$0xff] }
 0x8be   : > { %v2948_v58 = vsel %vm945_vm2, %v5434_v39, %v4382_v5  ;;  %v2947_v56 = vsel %vm945_vm2, %v5432_v57, %v4381_v30 }
 0x8bf   : > { %v2961_v28 = vpack.c.bf16 %v2948_v58, %v2947_v56  ;;  %v4385_v11 = vpop.permute.xlu1 %4384  ;;  %v4642_v58 = vld [vmem:[%s4760_s19 + $0x28] sm:$0xff] }
 0x8c0   : > { %v4387_v8 = vunpack.i.h.bf16 %v4385_v11  ;;  %v4386_v34 = vunpack.i.l.bf16 %v4385_v11 }
 0x8c1   : > { %4300 = vmatprep.mubr.msk.bf16.mxu0 %vm515_vm0, %v2961_v28  ;;  %v4643_v28 = vld [vmem:[%s4760_s19 + $0x38] sm:$0xff] }
 0x8c2   : > { %v2950_v35 = vsel %vm945_vm2, %v5438_v51, %v4387_v8  ;;  %v2949_v0 = vsel %vm945_vm2, %v5436_v32, %v4386_v34 }
 0x8c3   : > { %v2962_v4 = vpack.c.bf16 %v2950_v35, %v2949_v0  ;;  %v4390_v59 = vpop.permute.xlu0 %4389  ;;  %v4644_v35 = vld [vmem:[%s4760_s19 + $0x30] sm:$0xff] }
 0x8c4   : > { %v4392_v42 = vunpack.i.h.bf16 %v4390_v59  ;;  %v4391_v25 = vunpack.i.l.bf16 %v4390_v59 }
 0x8c5   : > { %4301 = vmatmul.mubr.msk.bf16.gmra.mrb[68].mxu0 %vm515_vm0, %v2962_v4 }
 0x8c6   : > { %v2952_v57 = vsel %vm945_vm2, %v5442_v47, %v4392_v42  ;;  %v2951_v39 = vsel %vm945_vm2, %v5440_v24, %v4391_v25 }
 0x8c7   : > { %v2963_v46 = vpack.c.bf16 %v2952_v57, %v2951_v39  ;;  %v4395_v37 = vpop.permute.xlu1 %4394 }
 0x8c8   : > { %v4397_v12 = vunpack.i.h.bf16 %v4395_v37  ;;  %v4396_v45 = vunpack.i.l.bf16 %v4395_v37 }
 0x8c9   : > { %4304 = vmatprep.mubr.msk.bf16.mxu0 %vm515_vm0, %v2963_v46 }
 0x8ca   : > { %v2954_v32 = vsel %vm945_vm2, %v5468_v7, %v4397_v12  ;;  %v2953_v51 = vsel %vm945_vm2, %v5464_v60, %v4396_v45  ;;  %v4645_v45 = vld [vmem:[%s4760_s19 + $0x40] sm:$0xff] }
 0x8cb   : > { %v2964_v15 = vpack.c.bf16 %v2954_v32, %v2953_v51  ;;  %v4400_v20 = vpop.permute.xlu0 %4399 }
 0x8cc   : > { %v4402_v13 = vunpack.i.h.bf16 %v4400_v20  ;;  %v4401_v10 = vunpack.i.l.bf16 %v4400_v20 }
 0x8cd   : > { %4305 = vmatmul.mubr.msk.bf16.gmra.mrb[72].mxu0 %vm515_vm0, %v2964_v15  ;;  %v4646_v15 = vld [vmem:[%s4760_s19 + $0x48] sm:$0xff] }
 0x8ce   : > { %v2956_v24 = vsel %vm945_vm2, %v5446_v41, %v4402_v13  ;;  %v2955_v47 = vsel %vm945_vm2, %v5444_v55, %v4401_v10  ;;  %v5741_v55 = vld [vmem:[%s6191_s7] ss:$0 sm:$0xff]  ;;  %v4647_v13 = vld [vmem:[%s4760_s19 + $0x58] sm:$0xff] }
 0x8cf   : > { %v2965_v40 = vpack.c.bf16 %v2956_v24, %v2955_v47  ;;  %v4648_v47 = vld [vmem:[%s4760_s19 + $0x50] sm:$0xff] }
 0x8d1   : > { %4308 = vmatprep.mubr.msk.bf16.mxu0 %vm515_vm0, %v2965_v40 }
 0x905   : > { %v4405_v7 = vpop.permute.xlu1 %4404 }
 0x906   : > { %v4407_v2 = vunpack.i.h.bf16 %v4405_v7  ;;  %v4406_v60 = vunpack.i.l.bf16 %v4405_v7 }
 0x908   : > { %v2958_v6 = vsel %vm945_vm2, %v5477_v31, %v4407_v2  ;;  %v2957_v9 = vsel %vm945_vm2, %v5475_v27, %v4406_v60 }
 0x909   : > { %v2966_v18 = vpack.c.bf16 %v2958_v6, %v2957_v9 }
 0x90b   : > { %4309 = vmatmul.mubr.msk.bf16.gmra.mrb[76].mxu0 %vm515_vm0, %v2966_v18 }
 0x98f   : > { %v4298_v41 = vpop.f32.mrb[64].mxu0 }
 0x990   : > { %v3037_v23 = vpop.f32.mrb[65].mxu0  ;;  %v3046_v29 = vadd.f32 %v4298_v41, %v5741_v55 }
 0x991   : > { %v3038_v19 = vadd.f32 %v5741_v55, %v3037_v23  ;;  %v4299_v31 = vpop.f32.mrb[66].mxu0 }
 0x992   : > { %v3040_v61 = vpop.f32.mrb[67].mxu0  ;;  %v5750_v16 = vadd.f32 %v4638_v62, %v3046_v29  ;;  %v3049_v54 = vadd.f32 %v4299_v31, %v5741_v55 }
 0x993   : > { %v5746_v27 = vadd.f32 %v4637_v14, %v3038_v19  ;;  %v3041_v49 = vadd.f32 %v5741_v55, %v3040_v61  ;;  %v4649_v19 = vld [vmem:[%s4760_s19 + $0x60] sm:$0xff] }
 0x994   : > { %v5761_v1 = vadd.f32 %v4640_v48, %v3049_v54  ;;  %v3122_v17 = vsel %vm515_vm0, %v5750_v16, 0.0  ;;  %v4651_v54 = vld [vmem:[%s4760_s19 + $0x68] sm:$0xff] }
 0x995   : > { %v5754_v26 = vadd.f32 %v4639_v21, %v3041_v49  ;;  %v3116_v22 = vsel %vm515_vm0, %v5746_v27, 0.0  ;;  %v4650_v49 = vld [vmem:[%s4760_s19 + $0x70] sm:$0xff] }
 0x996   : > { %3117 = vadd.xlane.f32.xlu0 %v3116_v22  ;;  %v3125_v30 = vsel %vm515_vm0, %v5761_v1, 0.0 }
 0x997   : > { %v3119_v33 = vsel %vm515_vm0, %v5754_v26, 0.0 }
 0x998   : > { %v4302_v52 = vpop.f32.mrb[68].mxu0  ;;  %3120 = vadd.xlane.f32.xlu1 %v3119_v33  ;;  %v4652_v33 = vld [vmem:[%s4760_s19 + $0x78] sm:$0xff] }
 0x999   : > { %v3053_v36 = vpop.f32.mrb[69].mxu0  ;;  %v3062_v50 = vadd.f32 %v4302_v52, %v5741_v55 }
 0x99a   : > { %v3054_v63 = vadd.f32 %v5741_v55, %v3053_v36  ;;  %v4303_v53 = vpop.f32.mrb[70].mxu0  ;;  %3123 = vadd.xlane.f32.xlu0 %v3122_v17 }
 0x99b   : > { %v3056_v43 = vpop.f32.mrb[71].mxu0  ;;  %v3065_v3 = vadd.f32 %v4303_v53, %v5741_v55  ;;  %v5783_v0 = vadd.f32 %v4644_v35, %v3062_v50 }
 0x99c   : > { %v3057_v38 = vadd.f32 %v5741_v55, %v3056_v43  ;;  %v5770_v5 = vadd.f32 %v4641_v44, %v3054_v63 }
 0x99d   : > { %v5778_v11 = vadd.f32 %v4643_v28, %v3065_v3  ;;  %v3134_v51 = vsel %vm515_vm0, %v5783_v0, 0.0 }
 0x99e   : > { %v5775_v56 = vadd.f32 %v4642_v58, %v3057_v38  ;;  %3126 = vadd.xlane.f32.xlu0 %v3125_v30  ;;  %v3128_v59 = vsel %vm515_vm0, %v5770_v5, 0.0 }
 0x99f   : > { %v3137_v37 = vsel %vm515_vm0, %v5778_v11, 0.0 }
 0x9a0   : > { %v4306_v8 = vpop.f32.mrb[72].mxu0  ;;  %v3131_v34 = vsel %vm515_vm0, %v5775_v56, 0.0 }
 0x9a1   : > { %v3069_v4 = vpop.f32.mrb[73].mxu0  ;;  %3132 = vadd.xlane.f32.xlu1 %v3131_v34  ;;  %v3078_v12 = vadd.f32 %v4306_v8, %v5741_v55 }
 0x9a2   : > { %v3070_v42 = vadd.f32 %v5741_v55, %v3069_v4  ;;  %v4307_v25 = vpop.f32.mrb[74].mxu0  ;;  %3129 = vadd.xlane.f32.xlu0 %v3128_v59 }
 0x9a3   : > { %v3072_v57 = vpop.f32.mrb[75].mxu0  ;;  %v3081_v39 = vadd.f32 %v4307_v25, %v5741_v55  ;;  %v5807_v40 = vadd.f32 %v4648_v47, %v3078_v12 }
 0x9a4   : > { %v3073_v46 = vadd.f32 %v5741_v55, %v3072_v57  ;;  %v5794_v32 = vadd.f32 %v4645_v45, %v3070_v42 }
 0x9a5   : > { %3138 = vadd.xlane.f32.xlu1 %v3137_v37  ;;  %v5802_v10 = vadd.f32 %v4647_v13, %v3081_v39  ;;  %v3146_v60 = vsel %vm515_vm0, %v5807_v40, 0.0 }
 0x9a6   : > { %v5799_v20 = vadd.f32 %v4646_v15, %v3073_v46  ;;  %3135 = vadd.xlane.f32.xlu0 %v3134_v51  ;;  %v3140_v7 = vsel %vm515_vm0, %v5794_v32, 0.0 }
 0x9a7   : > { %v3149_v2 = vsel %vm515_vm0, %v5802_v10, 0.0 }
 0x9a8   : > { %v3143_v24 = vsel %vm515_vm0, %v5799_v20, 0.0 }
 0x9a9   : > { %3144 = vadd.xlane.f32.xlu1 %v3143_v24 }
 0x9aa   : > { %3141 = vadd.xlane.f32.xlu0 %v3140_v7 }
 0x9ad   : > { %3150 = vadd.xlane.f32.xlu1 %v3149_v2 }
 0x9ae   : > { %3147 = vadd.xlane.f32.xlu0 %v3146_v60 }
 0x9de   : > { %v4310_v6 = vpop.f32.mrb[76].mxu0 }
 0x9df   : > { %v3085_v9 = vpop.f32.mrb[77].mxu0  ;;  %v3094_v18 = vadd.f32 %v4310_v6, %v5741_v55 }
 0x9e0   : > { %v3086_v41 = vadd.f32 %v5741_v55, %v3085_v9  ;;  %v4311_v23 = vpop.f32.mrb[78].mxu0 }
 0x9e1   : > { %v3088_v29 = vpop.f32.mrb[79].mxu0  ;;  %v3097_v61 = vadd.f32 %v4311_v23, %v5741_v55  ;;  %v5823_v62 = vadd.f32 %v4650_v49, %v3094_v18 }
 0x9e2   : > { %v5818_v31 = vadd.f32 %v4649_v19, %v3086_v41  ;;  %v3089_v14 = vadd.f32 %v5741_v55, %v3088_v29 }
 0x9e3   : > { %v5831_v52 = vadd.f32 %v4652_v33, %v3097_v61  ;;  %v3158_v55 = vsel %vm515_vm0, %v5823_v62, 0.0 }
 0x9e4   : > { %v5826_v21 = vadd.f32 %v4651_v54, %v3089_v14  ;;  %v3152_v22 = vsel %vm515_vm0, %v5818_v31, 0.0 }
 0x9e5   : > { %3153 = vadd.xlane.f32.xlu0 %v3152_v22  ;;  %v3161_v36 = vsel %vm515_vm0, %v5831_v52, 0.0 }
 0x9e6   : > { %v3155_v48 = vsel %vm515_vm0, %v5826_v21, 0.0 }
 0x9e7   : > { %3156 = vadd.xlane.f32.xlu1 %v3155_v48 }
 0x9e9   : > { %3159 = vadd.xlane.f32.xlu0 %v3158_v55 }
 0x9eb   : > { %3162 = vadd.xlane.f32.xlu1 %v3161_v36 }
 0xa23   : > { %v3118_v17 = vpop.xlane.xlu0 %3117 }
 0xa24   : > { %v3164_v63 = vmul.f32 0.0625, %v3118_v17 }
 0xa25   : > { %v3121_v53 = vpop.xlane.xlu1 %3120 }
 0xa26   : > { %v5840_v43 = vsub.f32 %v5746_v27, %v3164_v63  ;;  %v3165_v3 = vmul.f32 0.0625, %v3121_v53 }
 0xa27   : > { %v3124_v38 = vpop.xlane.xlu0 %3123 }
 0xa28   : > { %v5843_v50 = vsub.f32 %v5754_v26, %v3165_v3  ;;  %v3166_v44 = vmul.f32 0.0625, %v3124_v38  ;;  %v3196_v30 = vmul.f32 %v5840_v43, %v5840_v43 }
 0xa2a   : > { %v5848_v58 = vsub.f32 %v5750_v16, %v3166_v44  ;;  %v3212_v28 = vsel %vm515_vm0, %v3196_v30, 0.0  ;;  %v3197_v8 = vmul.f32 %v5843_v50, %v5843_v50 }
 0xa2b   : > { %3213 = vadd.xlane.f32.xlu0 %v3212_v28  ;;  %v3127_v34 = vpop.xlane.xlu0 %3126 }
 0xa2c   : > { %v3167_v35 = vmul.f32 0.0625, %v3127_v34  ;;  %v3215_v4 = vsel %vm515_vm0, %v3197_v8, 0.0  ;;  %v3198_v59 = vmul.f32 %v5848_v58, %v5848_v58 }
 0xa2d   : > { %3216 = vadd.xlane.f32.xlu1 %v3215_v4 }
 0xa2e   : > { %v5857_v42 = vsub.f32 %v5761_v1, %v3167_v35  ;;  %v3133_v25 = vpop.xlane.xlu1 %3132  ;;  %v3218_v57 = vsel %vm515_vm0, %v3198_v59, 0.0  ;;  %v4410_v59 = vld [vmem:[%s6194_s10] sm:$0xff]  }
 0xa2f   : > { %v3169_v39 = vmul.f32 0.0625, %v3133_v25  ;;  %3219 = vadd.xlane.f32.xlu0 %v3218_v57  ;;  %v3130_v46 = vpop.xlane.xlu0 %3129  ;;  %4312 = vmatprep.subr.bf16.mxu1 %v4410_v59 }
 0xa30   : > { %v3168_v37 = vmul.f32 0.0625, %v3130_v46  ;;  %v3199_v12 = vmul.f32 %v5857_v42, %v5857_v42  ;;  %4313 = vmatpush3.bf16.msra.mxu1 %v4410_v59 }
 0xa31   : > { %v5863_v45 = vsub.f32 %v5775_v56, %v3169_v39 }
 0xa32   : > { %v5866_v51 = vsub.f32 %v5770_v5, %v3168_v37  ;;  %v3139_v15 = vpop.xlane.xlu1 %3138  ;;  %v3221_v13 = vsel %vm515_vm0, %v3199_v12, 0.0 }
 0xa33   : > { %v3171_v24 = vmul.f32 0.0625, %v3139_v15  ;;  %3222 = vadd.xlane.f32.xlu1 %v3221_v13  ;;  %v3136_v47 = vpop.xlane.xlu0 %3135  ;;  %v3201_v7 = vmul.f32 %v5863_v45, %v5863_v45 }
 0xa34   : > { %v3170_v2 = vmul.f32 0.0625, %v3136_v47  ;;  %v3200_v60 = vmul.f32 %v5866_v51, %v5866_v51 }
 0xa35   : > { %v5874_v6 = vsub.f32 %v5778_v11, %v3171_v24  ;;  %v3227_v41 = vsel %vm515_vm0, %v3201_v7, 0.0 }
 0xa36   : > { %v5877_v9 = vsub.f32 %v5783_v0, %v3170_v2  ;;  %v3145_v18 = vpop.xlane.xlu1 %3144  ;;  %v3224_v23 = vsel %vm515_vm0, %v3200_v60, 0.0 }
 0xa37   : > { %v3173_v29 = vmul.f32 0.0625, %v3145_v18  ;;  %3228 = vadd.xlane.f32.xlu1 %v3227_v41  ;;  %3225 = vadd.xlane.f32.xlu0 %v3224_v23  ;;  %v3142_v19 = vpop.xlane.xlu0 %3141  ;;  %v3203_v61 = vmul.f32 %v5874_v6, %v5874_v6 }
 0xa38   : > { %v3172_v14 = vmul.f32 0.0625, %v3142_v19  ;;  %v3202_v49 = vmul.f32 %v5877_v9, %v5877_v9 }
 0xa39   : > { %v5886_v54 = vsub.f32 %v5799_v20, %v3173_v29  ;;  %v3233_v48 = vsel %vm515_vm0, %v3203_v61, 0.0 }
 0xa3a   : > { %v5889_v22 = vsub.f32 %v5794_v32, %v3172_v14  ;;  %v3151_v33 = vpop.xlane.xlu1 %3150  ;;  %v3230_v55 = vsel %vm515_vm0, %v3202_v49, 0.0 }
 0xa3b   : > { %v3175_v36 = vmul.f32 0.0625, %v3151_v33  ;;  %3234 = vadd.xlane.f32.xlu1 %v3233_v48  ;;  %3231 = vadd.xlane.f32.xlu0 %v3230_v55  ;;  %v3148_v17 = vpop.xlane.xlu0 %3147  ;;  %v3205_v63 = vmul.f32 %v5886_v54, %v5886_v54 }
 0xa3c   : > { %v3174_v53 = vmul.f32 0.0625, %v3148_v17  ;;  %v3204_v3 = vmul.f32 %v5889_v22, %v5889_v22 }
 0xa3d   : > { %v5898_v38 = vsub.f32 %v5802_v10, %v3175_v36  ;;  %v3239_v30 = vsel %vm515_vm0, %v3205_v63, 0.0 }
 0xa3e   : > { %v5901_v44 = vsub.f32 %v5807_v40, %v3174_v53  ;;  %v3236_v28 = vsel %vm515_vm0, %v3204_v3, 0.0 }
 0xa3f   : > { %3240 = vadd.xlane.f32.xlu1 %v3239_v30  ;;  %3237 = vadd.xlane.f32.xlu0 %v3236_v28  ;;  %v3207_v8 = vmul.f32 %v5898_v38, %v5898_v38 }
 0xa40   : > { %v3206_v34 = vmul.f32 %v5901_v44, %v5901_v44 }
 0xa41   : > { %v3245_v35 = vsel %vm515_vm0, %v3207_v8, 0.0 }
 0xa42   : > { %v3242_v4 = vsel %vm515_vm0, %v3206_v34, 0.0 }
 0xa43   : > { %3246 = vadd.xlane.f32.xlu1 %v3245_v35  ;;  %3243 = vadd.xlane.f32.xlu0 %v3242_v4 }
 0xa72   : > { %v3154_v25 = vpop.xlane.xlu0 %3153 }
 0xa73   : > { %v3176_v57 = vmul.f32 0.0625, %v3154_v25 }
 0xa74   : > { %v3157_v39 = vpop.xlane.xlu1 %3156 }
 0xa75   : > { %v5915_v46 = vsub.f32 %v5818_v31, %v3176_v57  ;;  %v3177_v37 = vmul.f32 0.0625, %v3157_v39  ;;  %v5941_v57 = vld [vmem:[%s6192_s8] ss:$0 sm:$0xff] }
 0xa76   : > { %v3160_v12 = vpop.xlane.xlu0 %3159 }
 0xa77   : > { %v5918_v15 = vsub.f32 %v5826_v21, %v3177_v37  ;;  %v3178_v13 = vmul.f32 0.0625, %v3160_v12  ;;  %v3208_v24 = vmul.f32 %v5915_v46, %v5915_v46 }
 0xa78   : > { %v3163_v47 = vpop.xlane.xlu1 %3162 }
 0xa79   : > { %v5923_v7 = vsub.f32 %v5823_v62, %v3178_v13  ;;  %v3179_v2 = vmul.f32 0.0625, %v3163_v47  ;;  %v3248_v60 = vsel %vm515_vm0, %v3208_v24, 0.0  ;;  %v3209_v18 = vmul.f32 %v5918_v15, %v5918_v15 }
 0xa7a   : > { %3249 = vadd.xlane.f32.xlu0 %v3248_v60 }
 0xa7b   : > { %v5929_v41 = vsub.f32 %v5831_v52, %v3179_v2  ;;  %v3251_v23 = vsel %vm515_vm0, %v3209_v18, 0.0  ;;  %v3210_v29 = vmul.f32 %v5923_v7, %v5923_v7 }
 0xa7c   : > { %3252 = vadd.xlane.f32.xlu1 %v3251_v23 }
 0xa7d   : > { %v3254_v19 = vsel %vm515_vm0, %v3210_v29, 0.0  ;;  %v3211_v61 = vmul.f32 %v5929_v41, %v5929_v41 }
 0xa7e   : > { %3255 = vadd.xlane.f32.xlu0 %v3254_v19 }
 0xa7f   : > { %v3257_v14 = vsel %vm515_vm0, %v3211_v61, 0.0 }
 0xa80   : > { %3258 = vadd.xlane.f32.xlu1 %v3257_v14  ;;  %v5949_v14 = vld [vmem:[%s6193_s9] ss:$0 sm:$0xff] }
 0xab8   : > { %v3214_v49 = vpop.xlane.xlu0 %3213 }
 0xab9   : > { %v3260_v33 = vmul.f32 0.0625, %v3214_v49 }
 0xaba   : > { %v3217_v48 = vpop.xlane.xlu1 %3216 }
 0xabb   : > { %v3276_v55 = vadd.f32 1e-05, %v3260_v33  ;;  %v3261_v36 = vmul.f32 0.0625, %v3217_v48 }
 0xabc   : > { %v3220_v17 = vpop.xlane.xlu0 %3219 }
 0xabd   : > { %4573 = vrsqrt.f32 %v3276_v55  ;;  %v3277_v63 = vadd.f32 1e-05, %v3261_v36  ;;  %v3262_v53 = vmul.f32 0.0625, %v3220_v17 }
 0xabf   : > { %4575 = vrsqrt.f32 %v3277_v63  ;;  %v3278_v3 = vadd.f32 1e-05, %v3262_v53 }
 0xac0   : > { %v3223_v30 = vpop.xlane.xlu1 %3222 }
 0xac1   : > { %4577 = vrsqrt.f32 %v3278_v3  ;;  %v3263_v28 = vmul.f32 0.0625, %v3223_v30 }
 0xac3   : > { %v3279_v8 = vadd.f32 1e-05, %v3263_v28 }
 0xac4   : > { %v3229_v34 = vpop.xlane.xlu1 %3228  ;;  %v3226_v35 = vpop.xlane.xlu0 %3225 }
 0xac5   : > { %4579 = vrsqrt.f32 %v3279_v8  ;;  %v3265_v4 = vmul.f32 0.0625, %v3229_v34  ;;  %v3264_v59 = vmul.f32 0.0625, %v3226_v35 }
 0xac7   : > { %v4574_v25 = vpop.eup %4573  ;;  %v3281_v39 = vadd.f32 1e-05, %v3265_v4  ;;  %v3280_v37 = vadd.f32 1e-05, %v3264_v59 }
 0xac8   : > { %v3308_v12 = vmul.f32 %v4574_v25, %v5840_v43  ;;  %v3235_v13 = vpop.xlane.xlu1 %3234  ;;  %v3232_v24 = vpop.xlane.xlu0 %3231 }
 0xac9   : > { %v4576_v47 = vpop.eup %4575  ;;  %4581 = vrsqrt.f32 %v3281_v39  ;;  %v3267_v2 = vmul.f32 0.0625, %v3235_v13  ;;  %v3266_v60 = vmul.f32 0.0625, %v3232_v24 }
 0xaca   : > { %v3309_v18 = vmul.f32 %v4576_v47, %v5843_v50  ;;  %4583 = vrsqrt.f32 %v3280_v37  ;;  %v3330_v23 = vmul.f32 %v5941_v57, %v3308_v12 }
 0xacb   : > { %v4578_v29 = vpop.eup %4577  ;;  %v3283_v19 = vadd.f32 1e-05, %v3267_v2  ;;  %v3282_v61 = vadd.f32 1e-05, %v3266_v60 }
 0xacc   : > { %v3310_v43 = vmul.f32 %v4578_v29, %v5848_v58  ;;  %v3241_v49 = vpop.xlane.xlu1 %3240  ;;  %v3238_v33 = vpop.xlane.xlu0 %3237  ;;  %v3331_v48 = vmul.f32 %v5941_v57, %v3309_v18  ;;  %v3352_v36 = vadd.f32 %v5949_v14, %v3330_v23 }
 0xacd   : > { %4585 = vrsqrt.f32 %v3283_v19  ;;  %v3269_v55 = vmul.f32 0.0625, %v3241_v49  ;;  %v3268_v50 = vmul.f32 0.0625, %v3238_v33 }
 0xace   : > { %4587 = vrsqrt.f32 %v3282_v61  ;;  %v3353_v17 = vadd.f32 %v5949_v14, %v3331_v48  ;;  %v3332_v30 = vmul.f32 %v5941_v57, %v3310_v43 }
 0xacf   : > { %v4580_v63 = vpop.eup %4579  ;;  %v3285_v53 = vadd.f32 1e-05, %v3269_v55  ;;  %v3284_v3 = vadd.f32 1e-05, %v3268_v50 }
 0xad0   : > { %v3311_v28 = vmul.f32 %v4580_v63, %v5857_v42  ;;  %v3247_v58 = vpop.xlane.xlu1 %3246  ;;  %v3244_v8 = vpop.xlane.xlu0 %3243  ;;  %v3368_v34 = vpack.c.bf16 %v3353_v17, %v3352_v36  ;;  %v3354_v24 = vadd.f32 %v5949_v14, %v3332_v30 }
 0xad1   : > { %4589 = vrsqrt.f32 %v3285_v53  ;;  %v3271_v35 = vmul.f32 0.0625, %v3247_v58  ;;  %v3270_v4 = vmul.f32 0.0625, %v3244_v8 }
 0xad2   : > { %v3333_v59 = vmul.f32 %v5941_v57, %v3311_v28  ;;  %4591 = vrsqrt.f32 %v3284_v3  ;;  %4314 = vmatprep.mubr.msk.bf16.mxu1 %vm515_vm0, %v3368_v34 }
 0xad3   : > { %v4582_v25 = vpop.eup %4581  ;;  %v3287_v39 = vadd.f32 1e-05, %v3271_v35  ;;  %v3286_v37 = vadd.f32 1e-05, %v3270_v4 }
 0xad4   : > { %v4584_v12 = vpop.eup %4583  ;;  %v3313_v13 = vmul.f32 %v4582_v25, %v5863_v45  ;;  %v3355_v42 = vadd.f32 %v5949_v14, %v3333_v59 }
 0xad5   : > { %v3312_v47 = vmul.f32 %v4584_v12, %v5866_v51  ;;  %4593 = vrsqrt.f32 %v3287_v39 }
 0xad6   : > { %4595 = vrsqrt.f32 %v3286_v37  ;;  %v3369_v2 = vpack.c.bf16 %v3355_v42, %v3354_v24  ;;  %v3335_v60 = vmul.f32 %v5941_v57, %v3313_v13 }
 0xad7   : > { %v4586_v18 = vpop.eup %4585  ;;  %v3334_v23 = vmul.f32 %v5941_v57, %v3312_v47 }
 0xad8   : > { %v4588_v29 = vpop.eup %4587  ;;  %v3315_v19 = vmul.f32 %v4586_v18, %v5874_v6  ;;  %4315 = vmatmul.mubr.msk.bf16.vlgmr.msra.gmra.mrb[80].mxu1 %vm515_vm0, %v3369_v2  ;;  %v3357_v45 = vadd.f32 %v5949_v14, %v3335_v60 }
 0xad9   : > { %v3314_v61 = vmul.f32 %v4588_v29, %v5877_v9  ;;  %v3356_v43 = vadd.f32 %v5949_v14, %v3334_v23 }
 0xada   : > { %v3337_v51 = vmul.f32 %v5941_v57, %v3315_v19 }
 0xadb   : > { %v4590_v49 = vpop.eup %4589  ;;  %v3370_v33 = vpack.c.bf16 %v3357_v45, %v3356_v43  ;;  %v3336_v48 = vmul.f32 %v5941_v57, %v3314_v61 }
 0xadc   : > { %v4592_v55 = vpop.eup %4591  ;;  %v3317_v50 = vmul.f32 %v4590_v49, %v5886_v54  ;;  %v3359_v36 = vadd.f32 %v5949_v14, %v3337_v51 }
 0xadd   : > { %v3316_v6 = vmul.f32 %v4592_v55, %v5889_v22  ;;  %4318 = vmatprep.mubr.msk.bf16.mxu1 %vm515_vm0, %v3370_v33  ;;  %v3358_v17 = vadd.f32 %v5949_v14, %v3336_v48 }
 0xade   : > { %v3339_v9 = vmul.f32 %v5941_v57, %v3317_v50 }
 0xadf   : > { %v4594_v63 = vpop.eup %4593  ;;  %v3371_v53 = vpack.c.bf16 %v3359_v36, %v3358_v17  ;;  %v3338_v3 = vmul.f32 %v5941_v57, %v3316_v6 }
 0xae0   : > { %v4596_v30 = vpop.eup %4595  ;;  %v3319_v28 = vmul.f32 %v4594_v63, %v5898_v38  ;;  %v3361_v58 = vadd.f32 %v5949_v14, %v3339_v9  ;;  %v4412_v9 = vld [vmem:[%s6196_s12 + $0x8] sm:$0xff]  }
 0xae1   : > { %v3318_v54 = vmul.f32 %v4596_v30, %v5901_v44  ;;  %4319 = vmatmul.mubr.msk.bf16.gmra.mrb[84].mxu1 %vm515_vm0, %v3371_v53  ;;  %v3360_v22 = vadd.f32 %v5949_v14, %v3338_v3 }
 0xae2   : > { %v3341_v8 = vmul.f32 %v5941_v57, %v3319_v28 }
 0xae3   : > { %v3372_v34 = vpack.c.bf16 %v3361_v58, %v3360_v22  ;;  %v3340_v35 = vmul.f32 %v5941_v57, %v3318_v54 }
 0xae4   : > { %v3363_v4 = vadd.f32 %v5949_v14, %v3341_v8 }
 0xae5   : > { %4322 = vmatprep.mubr.msk.bf16.mxu1 %vm515_vm0, %v3372_v34  ;;  %v3362_v59 = vadd.f32 %v5949_v14, %v3340_v35 }
 0xae7   : > { %v3373_v38 = vpack.c.bf16 %v3363_v4, %v3362_v59 }
 0xae9   : > { %4323 = vmatmul.mubr.msk.bf16.gmra.mrb[88].mxu1 %vm515_vm0, %v3373_v38 }
 0xb07   : > { %v3250_v25 = vpop.xlane.xlu0 %3249 }
 0xb08   : > { %v3272_v44 = vmul.f32 0.0625, %v3250_v25 }
 0xb09   : > { %v3253_v39 = vpop.xlane.xlu1 %3252 }
 0xb0a   : > { %v3288_v37 = vadd.f32 1e-05, %v3272_v44  ;;  %v3273_v12 = vmul.f32 0.0625, %v3253_v39 }
 0xb0b   : > { %v3256_v13 = vpop.xlane.xlu0 %3255 }
 0xb0c   : > { %4597 = vrsqrt.f32 %v3288_v37  ;;  %v3289_v24 = vadd.f32 1e-05, %v3273_v12  ;;  %v3274_v42 = vmul.f32 0.0625, %v3256_v13 }
 0xb0d   : > { %v3259_v47 = vpop.xlane.xlu1 %3258 }
 0xb0e   : > { %4599 = vrsqrt.f32 %v3289_v24  ;;  %v3290_v2 = vadd.f32 1e-05, %v3274_v42  ;;  %v3275_v60 = vmul.f32 0.0625, %v3259_v47 }
 0xb10   : > { %4601 = vrsqrt.f32 %v3290_v2  ;;  %v3291_v18 = vadd.f32 1e-05, %v3275_v60 }
 0xb12   : > { %4603 = vrsqrt.f32 %v3291_v18 }
 0xb16   : > { %v4598_v23 = vpop.eup %4597 }
 0xb17   : > { %v3320_v29 = vmul.f32 %v4598_v23, %v5915_v46 }
 0xb18   : > { %v4600_v19 = vpop.eup %4599 }
 0xb19   : > { %v3321_v45 = vmul.f32 %v4600_v19, %v5918_v15  ;;  %v3342_v61 = vmul.f32 %v5941_v57, %v3320_v29 }
 0xb1a   : > { %v4602_v43 = vpop.eup %4601 }
 0xb1b   : > { %v3322_v51 = vmul.f32 %v4602_v43, %v5923_v7  ;;  %v3343_v49 = vmul.f32 %v5941_v57, %v3321_v45  ;;  %v3364_v55 = vadd.f32 %v5949_v14, %v3342_v61 }
 0xb1c   : > { %v4604_v33 = vpop.eup %4603 }
 0xb1d   : > { %v3323_v48 = vmul.f32 %v4604_v33, %v5929_v41  ;;  %v3365_v50 = vadd.f32 %v5949_v14, %v3343_v49  ;;  %v3344_v36 = vmul.f32 %v5941_v57, %v3322_v51  ;;  %v4411_v41 = vld [vmem:[%s6196_s12] sm:$0xff]  }
 0xb1e   : > { %4330 = vmatprep.subr.bf16.mxu0 %v4411_v41 }
 0xb1f   : > { %v3374_v46 = vpack.c.bf16 %v3365_v50, %v3364_v55  ;;  %v3345_v6 = vmul.f32 %v5941_v57, %v3323_v48  ;;  %v3366_v15 = vadd.f32 %v5949_v14, %v3344_v36  ;;  %4331 = vmatpush3.bf16.msra.mxu0 %v4411_v41  ;;  %v6013_v57 = vld [vmem:[%s6195_s11] ss:$0 sm:$0xff] }
 0xb20   : > { %4332 = vmatprep.subr.bf16.mxu0 %v4412_v9 }
 0xb21   : > { %4326 = vmatprep.mubr.msk.bf16.mxu1 %vm515_vm0, %v3374_v46  ;;  %v3367_v7 = vadd.f32 %v5949_v14, %v3345_v6 }
 0xb23   : > { %v3375_v17 = vpack.c.bf16 %v3367_v7, %v3366_v15  ;;  %4333 = vmatpush3.bf16.msra.mxu0 %v4412_v9 }
 0xb25   : > { %4327 = vmatmul.mubr.msk.bf16.gmra.mrb[92].mxu1 %vm515_vm0, %v3375_v17 }
 0xbab   : > { %v4316_v14 = vpop.f32.mrb[80].mxu1 }
 0xbac   : > { %v6016_v63 = vadd.f32 %v4316_v14, %v6013_v57  ;;  %v3446_v53 = vpop.f32.mrb[81].mxu1 }
 0xbad   : > { %v6019_v3 = vadd.f32 %v6013_v57, %v3446_v53  ;;  %v4317_v30 = vpop.f32.mrb[82].mxu1 }
 0xbae   : > { %v3511_v28 = vmul.f32 %v6016_v63, %v6016_v63  ;;  %v6024_v58 = vadd.f32 %v4317_v30, %v6013_v57  ;;  %v3449_v54 = vpop.f32.mrb[83].mxu1 }
 0xbaf   : > { %v3509_v22 = vmul.f32 %v6019_v3, %v6019_v3  ;;  %v6029_v8 = vadd.f32 %v6013_v57, %v3449_v54 }
 0xbb0   : > { %v3527_v34 = vmul.f32 %v3511_v28, %v6016_v63  ;;  %v3512_v35 = vmul.f32 %v6024_v58, %v6024_v58 }
 0xbb1   : > { %v3525_v4 = vmul.f32 %v3509_v22, %v6019_v3  ;;  %v3510_v59 = vmul.f32 %v6029_v8, %v6029_v8 }
 0xbb2   : > { %v3543_v38 = vmul.f32 0.044715, %v3527_v34  ;;  %v3528_v25 = vmul.f32 %v3512_v35, %v6024_v58 }
 0xbb3   : > { %v3541_v44 = vmul.f32 0.044715, %v3525_v4  ;;  %v3526_v39 = vmul.f32 %v3510_v59, %v6029_v8 }
 0xbb4   : > { %v3559_v37 = vadd.f32 %v3543_v38, %v6016_v63  ;;  %v3544_v12 = vmul.f32 0.044715, %v3528_v25  ;;  %v4320_v13 = vpop.f32.mrb[84].mxu1 }
 0xbb5   : > { %v3557_v24 = vadd.f32 %v3541_v44, %v6019_v3  ;;  %v3542_v42 = vmul.f32 0.044715, %v3526_v39  ;;  %v6042_v47 = vadd.f32 %v4320_v13, %v6013_v57  ;;  %v3462_v2 = vpop.f32.mrb[85].mxu1 }
 0xbb6   : > { %v3575_v60 = vmul.f32 0.7978846, %v3559_v37  ;;  %v3560_v18 = vadd.f32 %v3544_v12, %v6024_v58  ;;  %v6046_v23 = vadd.f32 %v6013_v57, %v3462_v2  ;;  %v4321_v29 = vpop.f32.mrb[86].mxu1 }
 0xbb7   : > { %v3573_v19 = vmul.f32 0.7978846, %v3557_v24  ;;  %v3558_v45 = vadd.f32 %v3542_v42, %v6029_v8  ;;  %v3515_v61 = vmul.f32 %v6042_v47, %v6042_v47  ;;  %v6052_v43 = vadd.f32 %v4321_v29, %v6013_v57  ;;  %v3465_v51 = vpop.f32.mrb[87].mxu1 }
 0xbb8   : > { %4605 = vtanh.f32 %v3575_v60  ;;  %v3576_v49 = vmul.f32 0.7978846, %v3560_v18  ;;  %v3513_v33 = vmul.f32 %v6046_v23, %v6046_v23  ;;  %v6057_v48 = vadd.f32 %v6013_v57, %v3465_v51 }
 0xbb9   : > { %4607 = vtanh.f32 %v3573_v19  ;;  %v3574_v55 = vmul.f32 0.7978846, %v3558_v45  ;;  %v3531_v50 = vmul.f32 %v3515_v61, %v6042_v47  ;;  %v3516_v36 = vmul.f32 %v6052_v43, %v6052_v43 }
 0xbba   : > { %4609 = vtanh.f32 %v3576_v49  ;;  %v3529_v46 = vmul.f32 %v3513_v33, %v6046_v23  ;;  %v3514_v6 = vmul.f32 %v6057_v48, %v6057_v48 }
 0xbbb   : > { %4611 = vtanh.f32 %v3574_v55  ;;  %v3547_v15 = vmul.f32 0.044715, %v3531_v50  ;;  %v3532_v7 = vmul.f32 %v3516_v36, %v6052_v43 }
 0xbbc   : > { %v3545_v17 = vmul.f32 0.044715, %v3529_v46  ;;  %v3530_v41 = vmul.f32 %v3514_v6, %v6057_v48  ;;  %v4324_v9 = vpop.f32.mrb[88].mxu1 }
 0xbbd   : > { %v3563_v14 = vadd.f32 %v3547_v15, %v6042_v47  ;;  %v3548_v53 = vmul.f32 0.044715, %v3532_v7  ;;  %v6069_v30 = vadd.f32 %v4324_v9, %v6013_v57  ;;  %v3478_v28 = vpop.f32.mrb[89].mxu1 }
 0xbbe   : > { %v3561_v54 = vadd.f32 %v3545_v17, %v6046_v23  ;;  %v3546_v22 = vmul.f32 0.044715, %v3530_v41  ;;  %v6073_v34 = vadd.f32 %v6013_v57, %v3478_v28  ;;  %v4325_v35 = vpop.f32.mrb[90].mxu1 }
 0xbbf   : > { %v3579_v4 = vmul.f32 0.7978846, %v3563_v14  ;;  %v3564_v59 = vadd.f32 %v3548_v53, %v6052_v43  ;;  %v3519_v38 = vmul.f32 %v6069_v30, %v6069_v30  ;;  %v6079_v25 = vadd.f32 %v4325_v35, %v6013_v57  ;;  %v3481_v44 = vpop.f32.mrb[91].mxu1 }
 0xbc0   : > { %v3577_v39 = vmul.f32 0.7978846, %v3561_v54  ;;  %v3562_v37 = vadd.f32 %v3546_v22, %v6057_v48  ;;  %v3517_v12 = vmul.f32 %v6073_v34, %v6073_v34  ;;  %v6085_v13 = vadd.f32 %v6013_v57, %v3481_v44 }
 0xbc1   : > { %4613 = vtanh.f32 %v3579_v4  ;;  %v3580_v24 = vmul.f32 0.7978846, %v3564_v59  ;;  %v3535_v42 = vmul.f32 %v3519_v38, %v6069_v30  ;;  %v3520_v2 = vmul.f32 %v6079_v25, %v6079_v25 }
 0xbc2   : > { %v4606_v60 = vpop.eup %4605  ;;  %4615 = vtanh.f32 %v3577_v39  ;;  %v3578_v18 = vmul.f32 0.7978846, %v3562_v37  ;;  %v3533_v29 = vmul.f32 %v3517_v12, %v6073_v34  ;;  %v3518_v19 = vmul.f32 %v6085_v13, %v6085_v13 }
 0xbc3   : > { %v4608_v45 = vpop.eup %4607  ;;  %v3607_v61 = vadd.f32 1.0, %v4606_v60  ;;  %4617 = vtanh.f32 %v3580_v24  ;;  %v3551_v51 = vmul.f32 0.044715, %v3535_v42  ;;  %v3536_v49 = vmul.f32 %v3520_v2, %v6079_v25 }
 0xbc4   : > { %v4610_v33 = vpop.eup %4609  ;;  %v3605_v55 = vadd.f32 1.0, %v4608_v45  ;;  %4619 = vtanh.f32 %v3578_v18  ;;  %v3549_v50 = vmul.f32 0.044715, %v3533_v29  ;;  %v3534_v36 = vmul.f32 %v3518_v19, %v6085_v13 }
 0xbc5   : > { %v4612_v46 = vpop.eup %4611  ;;  %v3623_v6 = vmul.f32 0.5, %v3607_v61  ;;  %v3608_v15 = vadd.f32 1.0, %v4610_v33  ;;  %v3567_v7 = vadd.f32 %v3551_v51, %v6069_v30  ;;  %v3552_v17 = vmul.f32 0.044715, %v3536_v49 }
 0xbc6   : > { %v3621_v41 = vmul.f32 0.5, %v3605_v55  ;;  %v3606_v9 = vadd.f32 1.0, %v4612_v46  ;;  %v3565_v14 = vadd.f32 %v3549_v50, %v6073_v34  ;;  %v3550_v53 = vmul.f32 0.044715, %v3534_v36 }
 0xbc7   : > { %v3624_v28 = vmul.f32 0.5, %v3608_v15  ;;  %v3583_v54 = vmul.f32 0.7978846, %v3567_v7  ;;  %v3568_v22 = vadd.f32 %v3552_v17, %v6079_v25  ;;  %v3639_v38 = vmul.f32 %v3623_v6, %v6016_v63 }
 0xbc8   : > { %v3622_v35 = vmul.f32 0.5, %v3606_v9  ;;  %v3581_v4 = vmul.f32 0.7978846, %v3565_v14  ;;  %v3566_v59 = vadd.f32 %v3550_v53, %v6085_v13  ;;  %v3637_v37 = vmul.f32 %v3621_v41, %v6019_v3 }
 0xbc9   : > { %v3640_v44 = vmul.f32 %v3624_v28, %v6024_v58  ;;  %4621 = vtanh.f32 %v3583_v54  ;;  %v3584_v39 = vmul.f32 0.7978846, %v3568_v22 }
 0xbca   : > { %v3638_v12 = vmul.f32 %v3622_v35, %v6029_v8  ;;  %4623 = vtanh.f32 %v3581_v4  ;;  %v3582_v24 = vmul.f32 0.7978846, %v3566_v59 }
 0xbcb   : > { %v4614_v42 = vpop.eup %4613  ;;  %v3654_v2 = vpack.c.bf16 %v3640_v44, %v3639_v38  ;;  %4625 = vtanh.f32 %v3584_v39 }
 0xbcc   : > { %v4616_v60 = vpop.eup %4615  ;;  %v3611_v18 = vadd.f32 1.0, %v4614_v42  ;;  %4627 = vtanh.f32 %v3582_v24  ;;  %v3653_v29 = vpack.c.bf16 %v3638_v12, %v3637_v37 }
 0xbcd   : > { %v4618_v19 = vpop.eup %4617  ;;  %v3609_v63 = vadd.f32 1.0, %v4616_v60 }
 0xbce   : > { %v4620_v45 = vpop.eup %4619  ;;  %v3627_v58 = vmul.f32 0.5, %v3611_v18  ;;  %v3612_v61 = vadd.f32 1.0, %v4618_v19  ;;  %4334 = vmatprep.mubr.msk.bf16.mxu0 %vm3679_vm3, %v3653_v29 }
 0xbcf   : > { %v3625_v3 = vmul.f32 0.5, %v3609_v63  ;;  %v3610_v51 = vadd.f32 1.0, %v4620_v45  ;;  %4335 = vmatmul.mubr.msk.bf16.vlgmr.msra.gmra.mrb[80].mxu0 %vm3679_vm3, %v3654_v2 }
 0xbd0   : > { %v3628_v8 = vmul.f32 0.5, %v3612_v61  ;;  %v3643_v33 = vmul.f32 %v3627_v58, %v6042_v47 }
 0xbd1   : > { %v3626_v49 = vmul.f32 0.5, %v3610_v51  ;;  %v3641_v36 = vmul.f32 %v3625_v3, %v6046_v23 }
 0xbd2   : > { %v3644_v55 = vmul.f32 %v3628_v8, %v6052_v43 }
 0xbd3   : > { %v4622_v50 = vpop.eup %4621  ;;  %v3642_v46 = vmul.f32 %v3626_v49, %v6057_v48 }
 0xbd4   : > { %v4624_v6 = vpop.eup %4623  ;;  %v3615_v15 = vadd.f32 1.0, %v4622_v50  ;;  %v3656_v7 = vpack.c.bf16 %v3644_v55, %v3643_v33 }
 0xbd5   : > { %v4626_v17 = vpop.eup %4625  ;;  %v3613_v41 = vadd.f32 1.0, %v4624_v6  ;;  %v3655_v9 = vpack.c.bf16 %v3642_v46, %v3641_v36 }
 0xbd6   : > { %v4628_v14 = vpop.eup %4627  ;;  %v3631_v53 = vmul.f32 0.5, %v3615_v15  ;;  %v3616_v28 = vadd.f32 1.0, %v4626_v17 }
 0xbd7   : > { %v3629_v54 = vmul.f32 0.5, %v3613_v41  ;;  %v3614_v22 = vadd.f32 1.0, %v4628_v14  ;;  %4338 = vmatprep.mubr.msk.bf16.mxu0 %vm3679_vm3, %v3655_v9 }
 0xbd8   : > { %v3632_v47 = vmul.f32 0.5, %v3616_v28  ;;  %4339 = vmatmul.mubr.msk.bf16.gmra.mrb[84].mxu0 %vm3679_vm3, %v3656_v7  ;;  %v3647_v23 = vmul.f32 %v3631_v53, %v6069_v30 }
 0xbd9   : > { %v3630_v43 = vmul.f32 0.5, %v3614_v22  ;;  %v3645_v35 = vmul.f32 %v3629_v54, %v6073_v34 }
 0xbda   : > { %v3648_v48 = vmul.f32 %v3632_v47, %v6079_v25 }
 0xbdb   : > { %v3646_v4 = vmul.f32 %v3630_v43, %v6085_v13 }
 0xbdc   : > { %v3658_v59 = vpack.c.bf16 %v3648_v48, %v3647_v23 }
 0xbdd   : > { %v3657_v38 = vpack.c.bf16 %v3646_v4, %v3645_v35 }
 0xbdf   : > { %4342 = vmatprep.mubr.msk.bf16.mxu0 %vm3679_vm3, %v3657_v38 }
 0xbe0   : > { %4343 = vmatmul.mubr.msk.bf16.gmra.mrb[88].mxu0 %vm3679_vm3, %v3658_v59  ;;  %v3968_v59 = vld [vmem:[%s6197_s13] ss:$0 sm:$0xff] }
 0xbf8   : > { %v4328_v44 = vpop.f32.mrb[92].mxu1 }
 0xbf9   : > { %v3503_v39 = vadd.f32 %v4328_v44, %v6013_v57  ;;  %v3494_v37 = vpop.f32.mrb[93].mxu1 }
 0xbfa   : > { %v3495_v12 = vadd.f32 %v6013_v57, %v3494_v37  ;;  %v4329_v24 = vpop.f32.mrb[94].mxu1 }
 0xbfb   : > { %v3523_v30 = vmul.f32 %v3503_v39, %v3503_v39  ;;  %v3506_v25 = vadd.f32 %v4329_v24, %v6013_v57  ;;  %v3497_v42 = vpop.f32.mrb[95].mxu1 }
 0xbfc   : > { %v3521_v34 = vmul.f32 %v3495_v12, %v3495_v12  ;;  %v3498_v13 = vadd.f32 %v6013_v57, %v3497_v42 }
 0xbfd   : > { %v3539_v2 = vmul.f32 %v3523_v30, %v3503_v39  ;;  %v3524_v60 = vmul.f32 %v3506_v25, %v3506_v25 }
 0xbfe   : > { %v3537_v18 = vmul.f32 %v3521_v34, %v3495_v12  ;;  %v3522_v29 = vmul.f32 %v3498_v13, %v3498_v13 }
 0xbff   : > { %v3555_v19 = vmul.f32 0.044715, %v3539_v2  ;;  %v3540_v63 = vmul.f32 %v3524_v60, %v3506_v25 }
 0xc00   : > { %v3553_v45 = vmul.f32 0.044715, %v3537_v18  ;;  %v3538_v58 = vmul.f32 %v3522_v29, %v3498_v13 }
 0xc01   : > { %v3571_v61 = vadd.f32 %v3555_v19, %v3503_v39  ;;  %v3556_v3 = vmul.f32 0.044715, %v3540_v63 }
 0xc02   : > { %v3569_v51 = vadd.f32 %v3553_v45, %v3495_v12  ;;  %v3554_v8 = vmul.f32 0.044715, %v3538_v58 }
 0xc03   : > { %v3587_v49 = vmul.f32 0.7978846, %v3571_v61  ;;  %v3572_v33 = vadd.f32 %v3556_v3, %v3506_v25 }
 0xc04   : > { %v3585_v55 = vmul.f32 0.7978846, %v3569_v51  ;;  %v3570_v50 = vadd.f32 %v3554_v8, %v3498_v13 }
 0xc05   : > { %4629 = vtanh.f32 %v3587_v49  ;;  %v3588_v36 = vmul.f32 0.7978846, %v3572_v33 }
 0xc06   : > { %4631 = vtanh.f32 %v3585_v55  ;;  %v3586_v57 = vmul.f32 0.7978846, %v3570_v50 }
 0xc07   : > { %4633 = vtanh.f32 %v3588_v36 }
 0xc08   : > { %4635 = vtanh.f32 %v3586_v57 }
 0xc0f   : > { %v4630_v46 = vpop.eup %4629 }
 0xc10   : > { %v4632_v6 = vpop.eup %4631  ;;  %v3619_v15 = vadd.f32 1.0, %v4630_v46 }
 0xc11   : > { %v4634_v7 = vpop.eup %4633  ;;  %v3617_v17 = vadd.f32 1.0, %v4632_v6 }
 0xc12   : > { %v4636_v41 = vpop.eup %4635  ;;  %v3635_v9 = vmul.f32 0.5, %v3619_v15  ;;  %v3620_v14 = vadd.f32 1.0, %v4634_v7 }
 0xc13   : > { %v3633_v53 = vmul.f32 0.5, %v3617_v17  ;;  %v3618_v28 = vadd.f32 1.0, %v4636_v41 }
 0xc14   : > { %v3636_v54 = vmul.f32 0.5, %v3620_v14  ;;  %v3651_v47 = vmul.f32 %v3635_v9, %v3503_v39 }
 0xc15   : > { %v3634_v22 = vmul.f32 0.5, %v3618_v28  ;;  %v3649_v23 = vmul.f32 %v3633_v53, %v3495_v12 }
 0xc16   : > { %v3652_v43 = vmul.f32 %v3636_v54, %v3506_v25 }
 0xc17   : > { %v3650_v48 = vmul.f32 %v3634_v22, %v3498_v13 }
 0xc18   : > { %v3660_v35 = vpack.c.bf16 %v3652_v43, %v3651_v47 }
 0xc19   : > { %v3659_v4 = vpack.c.bf16 %v3650_v48, %v3649_v23 }
 0xc1b   : > { %4346 = vmatprep.mubr.msk.bf16.mxu0 %vm3679_vm3, %v3659_v4 }
 0xc1c   : > { %4347 = vmatmul.mubr.msk.bf16.gmra.mrb[92].mxu0 %vm3679_vm3, %v3660_v35 }
 0xca2   : > { %v4336_v38 = vpop.f32.mrb[80].mxu0 }
 0xca3   : > { %v3747_v44 = vadd.f32 %v4336_v38, %v3968_v59  ;;  %v3738_v37 = vpop.f32.mrb[81].mxu0 }
 0xca4   : > { %v3739_v39 = vadd.f32 %v3968_v59, %v3738_v37  ;;  %v4337_v12 = vpop.f32.mrb[82].mxu0 }
 0xca5   : > { %v3803_v24 = vadd.f32 %v3747_v44, %v5750_v16  ;;  %v3750_v30 = vadd.f32 %v4337_v12, %v3968_v59  ;;  %v3741_v25 = vpop.f32.mrb[83].mxu0 }
 0xca6   : > { %v3801_v42 = vadd.f32 %v3739_v39, %v5746_v27  ;;  %v3742_v34 = vadd.f32 %v3968_v59, %v3741_v25 }
 0xca7   : > { %3819 = vst.msk [vmem:[%s6131_s24 + $0x10] sm:$0xff] %vm515_vm0, %v3803_v24  ;;  %v3804_v13 = vadd.f32 %v3750_v30, %v5761_v1 }
 0xca8   : > { %3817 = vst.msk [vmem:[%s6131_s24] sm:$0xff] %vm515_vm0, %v3801_v42  ;;  %v3802_v2 = vadd.f32 %v3742_v34, %v5754_v26 }
 0xca9   : > { %3820 = vst.msk [vmem:[%s6131_s24 + $0x18] sm:$0xff] %vm515_vm0, %v3804_v13 }
 0xcaa   : > { %3818 = vst.msk [vmem:[%s6131_s24 + $0x8] sm:$0xff] %vm515_vm0, %v3802_v2 }
 0xcab   : > { %v4340_v16 = vpop.f32.mrb[84].mxu0 }
 0xcac   : > { %v3763_v60 = vadd.f32 %v4340_v16, %v3968_v59  ;;  %v3754_v27 = vpop.f32.mrb[85].mxu0 }
 0xcad   : > { %v3755_v18 = vadd.f32 %v3968_v59, %v3754_v27  ;;  %v4341_v29 = vpop.f32.mrb[86].mxu0 }
 0xcae   : > { %v3807_v19 = vadd.f32 %v3763_v60, %v5783_v0  ;;  %v3766_v63 = vadd.f32 %v4341_v29, %v3968_v59  ;;  %v3757_v1 = vpop.f32.mrb[87].mxu0 }
 0xcaf   : > { %v3805_v45 = vadd.f32 %v3755_v18, %v5770_v5  ;;  %v3758_v58 = vadd.f32 %v3968_v59, %v3757_v1 }
 0xcb0   : > { %3823 = vst.msk [vmem:[%s6131_s24 + $0x30] sm:$0xff] %vm515_vm0, %v3807_v19  ;;  %v3808_v26 = vadd.f32 %v3766_v63, %v5778_v11 }
 0xcb1   : > { %3821 = vst.msk [vmem:[%s6131_s24 + $0x20] sm:$0xff] %vm515_vm0, %v3805_v45  ;;  %v3806_v61 = vadd.f32 %v3758_v58, %v5775_v56 }
 0xcb2   : > { %3824 = vst.msk [vmem:[%s6131_s24 + $0x38] sm:$0xff] %vm515_vm0, %v3808_v26 }
 0xcb3   : > { %3822 = vst.msk [vmem:[%s6131_s24 + $0x28] sm:$0xff] %vm515_vm0, %v3806_v61  ;;  %v4344_v0 = vpop.f32.mrb[88].mxu0 }
 0xcb4   : > { %v3779_v3 = vadd.f32 %v4344_v0, %v3968_v59  ;;  %v3770_v5 = vpop.f32.mrb[89].mxu0 }
 0xcb5   : > { %v3771_v51 = vadd.f32 %v3968_v59, %v3770_v5  ;;  %v4345_v8 = vpop.f32.mrb[90].mxu0 }
 0xcb6   : > { %v3811_v49 = vadd.f32 %v3779_v3, %v5807_v40  ;;  %v3782_v33 = vadd.f32 %v4345_v8, %v3968_v59  ;;  %v3773_v11 = vpop.f32.mrb[91].mxu0 }
 0xcb7   : > { %v3809_v55 = vadd.f32 %v3771_v51, %v5794_v32  ;;  %v3774_v50 = vadd.f32 %v3968_v59, %v3773_v11 }
 0xcb8   : > { %3827 = vst.msk [vmem:[%s6131_s24 + $0x50] sm:$0xff] %vm515_vm0, %v3811_v49  ;;  %v3812_v56 = vadd.f32 %v3782_v33, %v5802_v10 }
 0xcb9   : > { %3825 = vst.msk [vmem:[%s6131_s24 + $0x40] sm:$0xff] %vm515_vm0, %v3809_v55  ;;  %v3810_v36 = vadd.f32 %v3774_v50, %v5799_v20 }
 0xcba   : > { %3828 = vst.msk [vmem:[%s6131_s24 + $0x58] sm:$0xff] %vm515_vm0, %v3812_v56 }
 0xcbb   : > { %3826 = vst.msk [vmem:[%s6131_s24 + $0x48] sm:$0xff] %vm515_vm0, %v3810_v36 }
 0xcef   : > { %v4348_v40 = vpop.f32.mrb[92].mxu0 }
 0xcf0   : > { %v3795_v57 = vadd.f32 %v4348_v40, %v3968_v59  ;;  %v3786_v32 = vpop.f32.mrb[93].mxu0 }
 0xcf1   : > { %v3787_v46 = vadd.f32 %v3968_v59, %v3786_v32  ;;  %v4349_v6 = vpop.f32.mrb[94].mxu0 }
 0xcf2   : > { %v3815_v15 = vadd.f32 %v3795_v57, %v5823_v62  ;;  %v3798_v7 = vadd.f32 %v4349_v6, %v3968_v59  ;;  %v3789_v10 = vpop.f32.mrb[95].mxu0 }
 0xcf3   : > { %v3813_v17 = vadd.f32 %v3787_v46, %v5818_v31  ;;  %v3790_v41 = vadd.f32 %v3968_v59, %v3789_v10 }
 0xcf4   : > { %3831 = vst.msk [vmem:[%s6131_s24 + $0x70] sm:$0xff] %vm515_vm0, %v3815_v15  ;;  %v3816_v20 = vadd.f32 %v3798_v7, %v5831_v52 }
 0xcf5   : > { %3829 = vst.msk [vmem:[%s6131_s24 + $0x60] sm:$0xff] %vm515_vm0, %v3813_v17  ;;  %v3814_v9 = vadd.f32 %v3790_v41, %v5826_v21 }
 0xcf6   : > { %3832 = vst.msk [vmem:[%s6131_s24 + $0x78] sm:$0xff] %vm515_vm0, %v3816_v20 }
 0xcf7   : > { %3830 = vst.msk [vmem:[%s6131_s24 + $0x68] sm:$0xff] %vm515_vm0, %v3814_v9 }
 0xcf8 PF: > { %s24_s29 = sadd.s32 1, %s4659_s29  }
 0xcf9   : > { %p21_p4 = scmp.ge.s32.totalorder %s24_s29, 6  }
 0xcfb   :  { %23 = sbr.rel (!%p21_p4) target bundleno = 1 (0x1), region = 106 }

</bundles_post_ra>
